<compile_context>
chip_gen: v7x
topology: tpu7x:2x2x1
jax: 0.10.0
libtpu: 0.0.40
codegen_flags: <defaults>
</compile_context>

<pallas_src>
import functools

import numpy as np
import jax
import jax.numpy as jnp
from jax.experimental import pallas as pl
from jax.experimental.pallas import tpu as pltpu

NEG_SLOPE = 0.2      # F.leaky_relu(..., negative_slope=0.2)
PN_EPS = 1e-8        # pn(): x / sqrt(mean(x*x, dim=channel) + 1e-8)
NEG_BIG = -1e30      # stands in for the -inf padding of max-pool windows

_OFF5 = tuple((dy - 2, dx - 2) for dy in range(5) for dx in range(5))
_OFF3 = tuple((dy - 1, dx - 1) for dy in range(3) for dx in range(3))
_PAIRS = ((0, 1), (0, 2), (0, 3), (1, 2), (1, 3), (2, 3))


def _conn_table(code):
    """Connection table c[source][node], exactly as in the PyTorch Layer.forward."""
    c = [[[] for _ in range(4)] for _ in range(5)]
    for i in range(4):
        tmp = [code[4 * i] % 5, code[4 * i + 1] % (i + 2),
               code[4 * i + 2] % 5, code[4 * i + 3] % (i + 2)]
        if tmp[1] == tmp[3] and tmp[0] == tmp[2]:
            tmp[3] = (code[4 * i + 3] + 1) % (i + 2)
        c[tmp[1]][i].append(tmp[0])
        c[tmp[3]][i].append(tmp[2])
    return c


# ----------------------------------------------------------------------------
# Host-side constant tables (built once, tiny)
# ----------------------------------------------------------------------------
def _shift_matrices(H, W):
    """S[t] (HW,HW) with dot(x, S[t])[:, m] = x[:, m + off_t] (0 outside the image)."""
    HW = H * W
    S = np.zeros((25, HW, HW), np.float32)
    for t, (oy, ox) in enumerate(_OFF5):
        for y in range(H):
            for x in range(W):
                yy, xx = y + oy, x + ox
                if 0 <= yy < H and 0 <= xx < W:
                    S[t, yy * W + xx, y * W + x] = 1.0
    return jnp.asarray(S)


def _pool_masks(H, W):
    """mask[t, m] = 1 if the 3x3 tap t at pixel m stays inside the image."""
    HW = H * W
    mk = np.zeros((9, HW), np.float32)
    for t, (oy, ox) in enumerate(_OFF3):
        for y in range(H):
            for x in range(W):
                if 0 <= y + oy < H and 0 <= x + ox < W:
                    mk[t, y * W + x] = 1.0
    return jnp.asarray(mk)


# ----------------------------------------------------------------------------
# The fused Block kernel (one grid step == one image)
# ----------------------------------------------------------------------------
def _block_kernel(h1_ref, h2_ref, shift_ref, mask3_ref, adj_ref, w3_ref, w5_ref,
                  o1_ref, o2_ref, cat_ref, *, code, num_layers, C, HW):
    C4 = C // 4
    c_tab = _conn_table(code)
    ones_row = jnp.ones((1, C4), jnp.float32)        # channel sum via MXU
    mask3 = mask3_ref[...]                           # (9, HW) in-bounds masks

    def leaky(x):                                    # leaky_relu(x, 0.2)
        return jnp.maximum(x, NEG_SLOPE * x)

    def pixel_norm(x):                               # x: (C4, HW), norm over channels
        ss = jnp.dot(ones_row, x * x,
                     preferred_element_type=jnp.float32) * (1.0 / C4)
        return x * jax.lax.rsqrt(ss + PN_EPS)        # (1,HW) broadcasts over sublanes

    def conv1x1(x, w):                               # x: (Cin, HW), w: (C4, Cin)
        return pixel_norm(leaky(jnp.dot(w, x, preferred_element_type=jnp.float32)))

    cur1 = h1_ref[0]                                 # (C, HW)
    cur2 = h2_ref[0]

    for l in range(num_layers):
        # Factorized_adjustment (prev_in_ch == in_ch -> no resize branch).
        h = [conv1x1(cur1, adj_ref[l, 0]), conv1x1(cur2, adj_ref[l, 1])]
        s = [jnp.zeros((C4, HW), jnp.float32) for _ in range(4)]

        # Lazily built per-layer cache of shifted source images, shared between
        # conv3 / conv5 / pool edges that read the same source (amortizes the
        # on-chip "im2col" across edges).
        tap_cache = {}

        def tap(x, off):
            key = (id(x), off)
            hit = tap_cache.get(key)
            if hit is None or hit[0] is not x:
                t = (off[0] + 2) * 5 + (off[1] + 2)
                hit = (x, jnp.dot(x, shift_ref[t],
                                  preferred_element_type=jnp.float32))
                tap_cache[key] = hit
            return hit[1]

        def conv_edge(x, w_ref, idx, K):             # KxK conv -> leaky -> pn
            offs = _OFF3 if K == 3 else _OFF5
            acc = jnp.zeros((C4, HW), jnp.float32)
            for t, off in enumerate(offs):
                acc = acc + jnp.dot(w_ref[l, idx, t], tap(x, off),
                                    preferred_element_type=jnp.float32)
            return pixel_norm(leaky(acc))

        def avg_pool(x):                             # 3x3/s1/p1, count_include_pad
            acc = jnp.zeros((C4, HW), jnp.float32)
            for off in _OFF3:
                acc = acc + tap(x, off)
            return leaky(acc * (1.0 / 9.0))

        def max_pool(x):                             # 3x3/s1/p1, pad acts as -inf
            acc = x                                  # centre tap, always valid
            for t3, off in enumerate(_OFF3):
                if off == (0, 0):
                    continue
                valid = mask3[t3:t3 + 1, :]          # (1, HW)
                acc = jnp.maximum(acc,
                                  jnp.where(valid > 0.5, tap(x, off), NEG_BIG))
            return leaky(acc)

        # --- edges from the two adjusted inputs -----------------------------
        for i in range(2):
            for j in range(4):
                for k in c_tab[i][j]:
                    if k == 0:
                        s[j] = s[j] + conv_edge(h[i], w3_ref, 4 * i + j, 3)
                    elif k == 1:
                        s[j] = s[j] + conv_edge(h[i], w5_ref, 4 * i + j, 5)
                    elif k == 2:
                        s[j] = s[j] + avg_pool(h[i])
                    elif k == 3:
                        s[j] = s[j] + max_pool(h[i])
                    elif k == 4:
                        s[j] = s[j] + h[i]

        # --- edges between intermediate nodes (faithful index quirk of the
        #     reference: the pairs loop re-reads c[j][k] with j in 0..2) ------
        for idx, (j, k) in enumerate(_PAIRS):
            for op in c_tab[j][k]:
                if op == 0:
                    s[k] = s[k] + conv_edge(s[j], w3_ref, 8 + idx, 3)
                if op == 1:
                    s[k] = s[k] + conv_edge(s[j], w5_ref, 8 + idx, 5)
                if op == 2:
                    s[k] = s[k] + avg_pool(s[j])
                if op == 3:
                    s[k] = s[k] + max_pool(s[j])
                if op == 4:
                    s[k] = s[k] + s[j]

        # --- channel concat (torch.cat(sum, dim=1)) via VMEM scratch --------
        for j in range(4):
            cat_ref[pl.ds(j * C4, C4), :] = s[j]
        nxt = cat_ref[...]
        cur2 = cur1
        cur1 = nxt

    o1_ref[0] = cur1
    o2_ref[0] = cur2


# ----------------------------------------------------------------------------
# Python wrapper: Block.forward (NCHW in / NCHW out) + faithful param count
# ----------------------------------------------------------------------------
def block_forward(h1_nchw, h2_nchw, code, weights, *, num_layers):
    B, C, H, W = h1_nchw.shape
    HW = H * W
    C4 = C // 4
    L = num_layers

    # NCHW -> channel-major (B, C, H*W): channels ride the sublanes, pixels the
    # lanes.  Pure reshape, no host transpose.
    h1 = h1_nchw.reshape(B, C, HW).astype(jnp.float32)
    h2 = h2_nchw.reshape(B, C, HW).astype(jnp.float32)

    shift = _shift_matrices(H, W)          # (25, HW, HW)
    mask3 = _pool_masks(H, W)              # (9, HW)

    kernel = functools.partial(_block_kernel,
                               code=tuple(int(x) for x in code),
                               num_layers=L, C=C, HW=HW)

    grid_spec = pltpu.PrefetchScalarGridSpec(
        num_scalar_prefetch=0,
        grid=(B,),                                         # one image per step
        in_specs=[
            pl.BlockSpec((1, C, HW), lambda b: (b, 0, 0)),
            pl.BlockSpec((1, C, HW), lambda b: (b, 0, 0)),
            # constant index maps -> DMA'd once, not per grid step
            pl.BlockSpec((25, HW, HW), lambda b: (0, 0, 0)),
            pl.BlockSpec((9, HW), lambda b: (0, 0)),
            pl.BlockSpec((L, 2, C4, C), lambda b: (0, 0, 0, 0)),
            pl.BlockSpec((L, 14, 9, C4, C4), lambda b: (0, 0, 0, 0, 0)),
            pl.BlockSpec((L, 14, 25, C4, C4), lambda b: (0, 0, 0, 0, 0)),
        ],
        out_specs=[
            pl.BlockSpec((1, C, HW), lambda b: (b, 0, 0)),
            pl.BlockSpec((1, C, HW), lambda b: (b, 0, 0)),
        ],
        scratch_shapes=[pltpu.VMEM((C, HW), jnp.float32)],   # channel-concat slab
    )

    o1, o2 = pl.pallas_call(
        kernel,
        out_shape=(jax.ShapeDtypeStruct((B, C, HW), jnp.float32),
                   jax.ShapeDtypeStruct((B, C, HW), jnp.float32)),
        grid_spec=grid_spec,
        compiler_params=pltpu.CompilerParams(
            dimension_semantics=("parallel",),   # v7x: one image per TensorCore
            vmem_limit_bytes=32 * 1024 * 1024,   # headroom; safe on v5e/v6e/v7x
        ),
    )(h1, h2, shift, mask3, weights["adj"], weights["w3"], weights["w5"])

    params = _count_params(code, C, num_layers)
    return o1.reshape(B, C, H, W), o2.reshape(B, C, H, W), params


def _count_params(code, C, num_layers):
    """Python-side replica of the reference parameter bookkeeping (including
    the reference's quirk of unconditional `params +=` lines in the pairs
    loop).  Pure Python ints; not part of the kernel."""
    c = _conn_table(code)
    out_ch = in_ch = prev_in_ch = C
    per_layer = prev_in_ch * out_ch // 4 + in_ch * out_ch // 4    # adjustment
    for i in range(2):
        for j in range(4):
            for k in c[i][j]:
                if k == 0:
                    per_layer += out_ch * out_ch // 16
                elif k == 1:
                    per_layer += 3 * 3 * out_ch * out_ch // 16
    for j, k in _PAIRS:
        for _ in c[j][k]:
            per_layer += out_ch * out_ch // 16            # faithful quirk
            per_layer += 3 * 3 * out_ch * out_ch // 16    # faithful quirk
    return num_layers * per_layer


def init_block_weights(key, num_layers, C):
    """Random weights in the layouts the fused kernel consumes.

    adj : (L, 2, C4, C)        1x1 adjust convs, stored as W^T (Cout, Cin)
    w3  : (L, 14, 9,  C4, C4)  3x3 convs, per-tap W^T (Cout, Cin)
    w5  : (L, 14, 25, C4, C4)  5x5 convs, per-tap W^T (Cout, Cin)

    The reference's weight-scale trick (conv(x, w/s) * s) is folded away since
    it is mathematically a no-op (rounding-level difference only).
    """
    C4 = C // 4
    ka, k3, k5 = jax.random.split(key, 3)
    return {
        "adj": 0.1 * jax.random.normal(ka, (num_layers, 2, C4, C), jnp.float32),
        "w3": 0.1 * jax.random.normal(k3, (num_layers, 14, 9, C4, C4), jnp.float32),
        "w5": 0.1 * jax.random.normal(k5, (num_layers, 14, 25, C4, C4), jnp.float32),
    }


if __name__ == "__main__":
    B, C, H, W = 2, 16, 8, 8          # in_ch = prev_in_ch = out_ch = 16
    layers_per_block = 2

    key = jax.random.PRNGKey(0)
    k1, k2, kw = jax.random.split(key, 3)
    h1 = jax.random.normal(k1, (B, C, H, W), jnp.float32)   # NCHW input
    h2 = jax.random.normal(k2, (B, C, H, W), jnp.float32)   # NCHW input
    # architecture code (16 ints) -- exercises conv3, conv5, avg/max pool,
    # identity and node->node edges.
    code = [0, 0, 1, 1, 2, 1, 4, 0, 0, 2, 3, 1, 1, 3, 2, 0]

    weights = init_block_weights(kw, layers_per_block, C)
    out1, out2, n_params = block_forward(h1, h2, code, weights,
                                         num_layers=layers_per_block)
    jax.block_until_ready(out1)
    jax.block_until_ready(out2)

    assert out1.shape == (B, C, H, W) and out2.shape == (B, C, H, W)
    assert bool(jnp.all(jnp.isfinite(out1))) and bool(jnp.all(jnp.isfinite(out2)))
    assert n_params > 0
    print("KERNEL_OK")
</pallas_src>

<mosaic_0001>
module attributes {stable_mosaic.version = 11 : i64} {
  func.func @_block_kernel(%arg0: i32, %arg1: memref<1x16x64xf32, #tpu.memory_space<vmem>>, %arg2: memref<1x16x64xf32, #tpu.memory_space<vmem>>, %arg3: memref<25x64x64xf32, #tpu.memory_space<vmem>>, %arg4: memref<9x64xf32, #tpu.memory_space<vmem>>, %arg5: memref<2x2x4x16xf32, #tpu.memory_space<vmem>>, %arg6: memref<2x14x9x4x4xf32, #tpu.memory_space<vmem>>, %arg7: memref<2x14x25x4x4xf32, #tpu.memory_space<vmem>>, %arg8: memref<1x16x64xf32, #tpu.memory_space<vmem>>, %arg9: memref<1x16x64xf32, #tpu.memory_space<vmem>>, %arg10: memref<16x64xf32, #tpu.memory_space<vmem>>) attributes {dimension_semantics = [#tpu.dimension_semantics<parallel>], iteration_bounds = array<i64: 2>, scalar_prefetch = 0 : i64, scratch_operands = 1 : i64, tpu.core_type = #tpu.core_type<tc>, window_params = [{transform_indices = @transform_0, window_bounds = array<i64: 1, 16, 64>}, {transform_indices = @transform_1, window_bounds = array<i64: 1, 16, 64>}, {pipeline_mode = #tpu.pipeline_mode<synchronous>, transform_indices = @transform_2, window_bounds = array<i64: 25, 64, 64>}, {pipeline_mode = #tpu.pipeline_mode<synchronous>, transform_indices = @transform_3, window_bounds = array<i64: 9, 64>}, {pipeline_mode = #tpu.pipeline_mode<synchronous>, transform_indices = @transform_4, window_bounds = array<i64: 2, 2, 4, 16>}, {pipeline_mode = #tpu.pipeline_mode<synchronous>, transform_indices = @transform_5, window_bounds = array<i64: 2, 14, 9, 4, 4>}, {pipeline_mode = #tpu.pipeline_mode<synchronous>, transform_indices = @transform_6, window_bounds = array<i64: 2, 14, 25, 4, 4>}, {transform_indices = @transform_7, window_bounds = array<i64: 1, 16, 64>}, {transform_indices = @transform_8, window_bounds = array<i64: 1, 16, 64>}]} {
    %cst = arith.constant 1.000000e+00 : f32
    %0 = vector.broadcast %cst : f32 to vector<1x4xf32>
    %c0 = arith.constant 0 : index
    %c0_0 = arith.constant 0 : index
    %1 = vector.load %arg4[%c0, %c0_0] : memref<9x64xf32, #tpu.memory_space<vmem>>, vector<9x64xf32>
    %c0_1 = arith.constant 0 : index
    %c0_2 = arith.constant 0 : index
    %c0_3 = arith.constant 0 : index
    %2 = vector.load %arg1[%c0_1, %c0_2, %c0_3] : memref<1x16x64xf32, #tpu.memory_space<vmem>>, vector<1x16x64xf32>
    %3 = vector.shape_cast %2 : vector<1x16x64xf32> to vector<16x64xf32>
    %c0_4 = arith.constant 0 : index
    %c0_5 = arith.constant 0 : index
    %c0_6 = arith.constant 0 : index
    %4 = vector.load %arg2[%c0_4, %c0_5, %c0_6] : memref<1x16x64xf32, #tpu.memory_space<vmem>>, vector<1x16x64xf32>
    %5 = vector.shape_cast %4 : vector<1x16x64xf32> to vector<16x64xf32>
    %c0_7 = arith.constant 0 : index
    %c0_8 = arith.constant 0 : index
    %c0_9 = arith.constant 0 : index
    %c0_10 = arith.constant 0 : index
    %6 = vector.load %arg5[%c0_7, %c0_8, %c0_9, %c0_10] : memref<2x2x4x16xf32, #tpu.memory_space<vmem>>, vector<1x1x4x16xf32>
    %7 = vector.shape_cast %6 : vector<1x1x4x16xf32> to vector<4x16xf32>
    %cst_11 = arith.constant dense<0.000000e+00> : vector<4x64xf32>
    %8 = tpu.matmul %7, %3, %cst_11 {dimension_numbers = #tpu.dot_dimension_numbers<[1], [0], [0], [1], [0, 0, 1, 1], [], []>} : vector<4x16xf32>, vector<16x64xf32>, vector<4x64xf32> -> vector<4x64xf32>
    %cst_12 = arith.constant 2.000000e-01 : f32
    %9 = vector.broadcast %cst_12 : f32 to vector<4x64xf32>
    %10 = arith.mulf %9, %8 : vector<4x64xf32>
    %11 = arith.maximumf %8, %10 : vector<4x64xf32>
    %12 = arith.mulf %11, %11 : vector<4x64xf32>
    %cst_13 = arith.constant dense<0.000000e+00> : vector<1x64xf32>
    %13 = tpu.matmul %0, %12, %cst_13 {dimension_numbers = #tpu.dot_dimension_numbers<[1], [0], [0], [1], [0, 0, 1, 1], [], []>} : vector<1x4xf32>, vector<4x64xf32>, vector<1x64xf32> -> vector<1x64xf32>
    %cst_14 = arith.constant 2.500000e-01 : f32
    %14 = vector.broadcast %cst_14 : f32 to vector<1x64xf32>
    %15 = arith.mulf %13, %14 : vector<1x64xf32>
    %cst_15 = arith.constant 9.99999993E-9 : f32
    %16 = vector.broadcast %cst_15 : f32 to vector<1x64xf32>
    %17 = arith.addf %15, %16 : vector<1x64xf32>
    %18 = math.rsqrt %17 : vector<1x64xf32>
    %19 = vector.broadcast %18 : vector<1x64xf32> to vector<4x64xf32>
    %20 = arith.mulf %11, %19 : vector<4x64xf32>
    %c0_16 = arith.constant 0 : index
    %c1 = arith.constant 1 : index
    %c0_17 = arith.constant 0 : index
    %c0_18 = arith.constant 0 : index
    %21 = vector.load %arg5[%c0_16, %c1, %c0_17, %c0_18] : memref<2x2x4x16xf32, #tpu.memory_space<vmem>>, vector<1x1x4x16xf32>
    %22 = vector.shape_cast %21 : vector<1x1x4x16xf32> to vector<4x16xf32>
    %cst_19 = arith.constant dense<0.000000e+00> : vector<4x64xf32>
    %23 = tpu.matmul %22, %5, %cst_19 {dimension_numbers = #tpu.dot_dimension_numbers<[1], [0], [0], [1], [0, 0, 1, 1], [], []>} : vector<4x16xf32>, vector<16x64xf32>, vector<4x64xf32> -> vector<4x64xf32>
    %cst_20 = arith.constant 2.000000e-01 : f32
    %24 = vector.broadcast %cst_20 : f32 to vector<4x64xf32>
    %25 = arith.mulf %24, %23 : vector<4x64xf32>
    %26 = arith.maximumf %23, %25 : vector<4x64xf32>
    %27 = arith.mulf %26, %26 : vector<4x64xf32>
    %cst_21 = arith.constant dense<0.000000e+00> : vector<1x64xf32>
    %28 = tpu.matmul %0, %27, %cst_21 {dimension_numbers = #tpu.dot_dimension_numbers<[1], [0], [0], [1], [0, 0, 1, 1], [], []>} : vector<1x4xf32>, vector<4x64xf32>, vector<1x64xf32> -> vector<1x64xf32>
    %cst_22 = arith.constant 2.500000e-01 : f32
    %29 = vector.broadcast %cst_22 : f32 to vector<1x64xf32>
    %30 = arith.mulf %28, %29 : vector<1x64xf32>
    %cst_23 = arith.constant 9.99999993E-9 : f32
    %31 = vector.broadcast %cst_23 : f32 to vector<1x64xf32>
    %32 = arith.addf %30, %31 : vector<1x64xf32>
    %33 = math.rsqrt %32 : vector<1x64xf32>
    %34 = vector.broadcast %33 : vector<1x64xf32> to vector<4x64xf32>
    %35 = arith.mulf %26, %34 : vector<4x64xf32>
    %cst_24 = arith.constant 0.000000e+00 : f32
    %36 = vector.broadcast %cst_24 : f32 to vector<4x64xf32>
    %cst_25 = arith.constant 0.000000e+00 : f32
    %37 = vector.broadcast %cst_25 : f32 to vector<4x64xf32>
    %cst_26 = arith.constant 0.000000e+00 : f32
    %38 = vector.broadcast %cst_26 : f32 to vector<4x64xf32>
    %cst_27 = arith.constant 0.000000e+00 : f32
    %39 = vector.broadcast %cst_27 : f32 to vector<4x64xf32>
    %cst_28 = arith.constant 0.000000e+00 : f32
    %40 = vector.broadcast %cst_28 : f32 to vector<4x64xf32>
    %c0_29 = arith.constant 0 : index
    %c0_30 = arith.constant 0 : index
    %c0_31 = arith.constant 0 : index
    %c0_32 = arith.constant 0 : index
    %c0_33 = arith.constant 0 : index
    %41 = vector.load %arg6[%c0_29, %c0_30, %c0_31, %c0_32, %c0_33] : memref<2x14x9x4x4xf32, #tpu.memory_space<vmem>>, vector<1x1x1x4x4xf32>
    %42 = vector.shape_cast %41 : vector<1x1x1x4x4xf32> to vector<4x4xf32>
    %c6 = arith.constant 6 : index
    %c0_34 = arith.constant 0 : index
    %c0_35 = arith.constant 0 : index
    %43 = vector.load %arg3[%c6, %c0_34, %c0_35] : memref<25x64x64xf32, #tpu.memory_space<vmem>>, vector<1x64x64xf32>
    %44 = vector.shape_cast %43 : vector<1x64x64xf32> to vector<64x64xf32>
    %cst_36 = arith.constant dense<0.000000e+00> : vector<4x64xf32>
    %45 = tpu.matmul %20, %44, %cst_36 {dimension_numbers = #tpu.dot_dimension_numbers<[1], [0], [0], [1], [0, 0, 1, 1], [], []>} : vector<4x64xf32>, vector<64x64xf32>, vector<4x64xf32> -> vector<4x64xf32>
    %cst_37 = arith.constant dense<0.000000e+00> : vector<4x64xf32>
    %46 = tpu.matmul %42, %45, %cst_37 {dimension_numbers = #tpu.dot_dimension_numbers<[1], [0], [0], [1], [0, 0, 1, 1], [], []>} : vector<4x4xf32>, vector<4x64xf32>, vector<4x64xf32> -> vector<4x64xf32>
    %47 = arith.addf %40, %46 : vector<4x64xf32>
    %c0_38 = arith.constant 0 : index
    %c0_39 = arith.constant 0 : index
    %c1_40 = arith.constant 1 : index
    %c0_41 = arith.constant 0 : index
    %c0_42 = arith.constant 0 : index
    %48 = vector.load %arg6[%c0_38, %c0_39, %c1_40, %c0_41, %c0_42] : memref<2x14x9x4x4xf32, #tpu.memory_space<vmem>>, vector<1x1x1x4x4xf32>
    %49 = vector.shape_cast %48 : vector<1x1x1x4x4xf32> to vector<4x4xf32>
    %c7 = arith.constant 7 : index
    %c0_43 = arith.constant 0 : index
    %c0_44 = arith.constant 0 : index
    %50 = vector.load %arg3[%c7, %c0_43, %c0_44] : memref<25x64x64xf32, #tpu.memory_space<vmem>>, vector<1x64x64xf32>
    %51 = vector.shape_cast %50 : vector<1x64x64xf32> to vector<64x64xf32>
    %cst_45 = arith.constant dense<0.000000e+00> : vector<4x64xf32>
    %52 = tpu.matmul %20, %51, %cst_45 {dimension_numbers = #tpu.dot_dimension_numbers<[1], [0], [0], [1], [0, 0, 1, 1], [], []>} : vector<4x64xf32>, vector<64x64xf32>, vector<4x64xf32> -> vector<4x64xf32>
    %cst_46 = arith.constant dense<0.000000e+00> : vector<4x64xf32>
    %53 = tpu.matmul %49, %52, %cst_46 {dimension_numbers = #tpu.dot_dimension_numbers<[1], [0], [0], [1], [0, 0, 1, 1], [], []>} : vector<4x4xf32>, vector<4x64xf32>, vector<4x64xf32> -> vector<4x64xf32>
    %54 = arith.addf %47, %53 : vector<4x64xf32>
    %c0_47 = arith.constant 0 : index
    %c0_48 = arith.constant 0 : index
    %c2 = arith.constant 2 : index
    %c0_49 = arith.constant 0 : index
    %c0_50 = arith.constant 0 : index
    %55 = vector.load %arg6[%c0_47, %c0_48, %c2, %c0_49, %c0_50] : memref<2x14x9x4x4xf32, #tpu.memory_space<vmem>>, vector<1x1x1x4x4xf32>
    %56 = vector.shape_cast %55 : vector<1x1x1x4x4xf32> to vector<4x4xf32>
    %c8 = arith.constant 8 : index
    %c0_51 = arith.constant 0 : index
    %c0_52 = arith.constant 0 : index
    %57 = vector.load %arg3[%c8, %c0_51, %c0_52] : memref<25x64x64xf32, #tpu.memory_space<vmem>>, vector<1x64x64xf32>
    %58 = vector.shape_cast %57 : vector<1x64x64xf32> to vector<64x64xf32>
    %cst_53 = arith.constant dense<0.000000e+00> : vector<4x64xf32>
    %59 = tpu.matmul %20, %58, %cst_53 {dimension_numbers = #tpu.dot_dimension_numbers<[1], [0], [0], [1], [0, 0, 1, 1], [], []>} : vector<4x64xf32>, vector<64x64xf32>, vector<4x64xf32> -> vector<4x64xf32>
    %cst_54 = arith.constant dense<0.000000e+00> : vector<4x64xf32>
    %60 = tpu.matmul %56, %59, %cst_54 {dimension_numbers = #tpu.dot_dimension_numbers<[1], [0], [0], [1], [0, 0, 1, 1], [], []>} : vector<4x4xf32>, vector<4x64xf32>, vector<4x64xf32> -> vector<4x64xf32>
    %61 = arith.addf %54, %60 : vector<4x64xf32>
    %c0_55 = arith.constant 0 : index
    %c0_56 = arith.constant 0 : index
    %c3 = arith.constant 3 : index
    %c0_57 = arith.constant 0 : index
    %c0_58 = arith.constant 0 : index
    %62 = vector.load %arg6[%c0_55, %c0_56, %c3, %c0_57, %c0_58] : memref<2x14x9x4x4xf32, #tpu.memory_space<vmem>>, vector<1x1x1x4x4xf32>
    %63 = vector.shape_cast %62 : vector<1x1x1x4x4xf32> to vector<4x4xf32>
    %c11 = arith.constant 11 : index
    %c0_59 = arith.constant 0 : index
    %c0_60 = arith.constant 0 : index
    %64 = vector.load %arg3[%c11, %c0_59, %c0_60] : memref<25x64x64xf32, #tpu.memory_space<vmem>>, vector<1x64x64xf32>
    %65 = vector.shape_cast %64 : vector<1x64x64xf32> to vector<64x64xf32>
    %cst_61 = arith.constant dense<0.000000e+00> : vector<4x64xf32>
    %66 = tpu.matmul %20, %65, %cst_61 {dimension_numbers = #tpu.dot_dimension_numbers<[1], [0], [0], [1], [0, 0, 1, 1], [], []>} : vector<4x64xf32>, vector<64x64xf32>, vector<4x64xf32> -> vector<4x64xf32>
    %cst_62 = arith.constant dense<0.000000e+00> : vector<4x64xf32>
    %67 = tpu.matmul %63, %66, %cst_62 {dimension_numbers = #tpu.dot_dimension_numbers<[1], [0], [0], [1], [0, 0, 1, 1], [], []>} : vector<4x4xf32>, vector<4x64xf32>, vector<4x64xf32> -> vector<4x64xf32>
    %68 = arith.addf %61, %67 : vector<4x64xf32>
    %c0_63 = arith.constant 0 : index
    %c0_64 = arith.constant 0 : index
    %c4 = arith.constant 4 : index
    %c0_65 = arith.constant 0 : index
    %c0_66 = arith.constant 0 : index
    %69 = vector.load %arg6[%c0_63, %c0_64, %c4, %c0_65, %c0_66] : memref<2x14x9x4x4xf32, #tpu.memory_space<vmem>>, vector<1x1x1x4x4xf32>
    %70 = vector.shape_cast %69 : vector<1x1x1x4x4xf32> to vector<4x4xf32>
    %c12 = arith.constant 12 : index
    %c0_67 = arith.constant 0 : index
    %c0_68 = arith.constant 0 : index
    %71 = vector.load %arg3[%c12, %c0_67, %c0_68] : memref<25x64x64xf32, #tpu.memory_space<vmem>>, vector<1x64x64xf32>
    %72 = vector.shape_cast %71 : vector<1x64x64xf32> to vector<64x64xf32>
    %cst_69 = arith.constant dense<0.000000e+00> : vector<4x64xf32>
    %73 = tpu.matmul %20, %72, %cst_69 {dimension_numbers = #tpu.dot_dimension_numbers<[1], [0], [0], [1], [0, 0, 1, 1], [], []>} : vector<4x64xf32>, vector<64x64xf32>, vector<4x64xf32> -> vector<4x64xf32>
    %cst_70 = arith.constant dense<0.000000e+00> : vector<4x64xf32>
    %74 = tpu.matmul %70, %73, %cst_70 {dimension_numbers = #tpu.dot_dimension_numbers<[1], [0], [0], [1], [0, 0, 1, 1], [], []>} : vector<4x4xf32>, vector<4x64xf32>, vector<4x64xf32> -> vector<4x64xf32>
    %75 = arith.addf %68, %74 : vector<4x64xf32>
    %c0_71 = arith.constant 0 : index
    %c0_72 = arith.constant 0 : index
    %c5 = arith.constant 5 : index
    %c0_73 = arith.constant 0 : index
    %c0_74 = arith.constant 0 : index
    %76 = vector.load %arg6[%c0_71, %c0_72, %c5, %c0_73, %c0_74] : memref<2x14x9x4x4xf32, #tpu.memory_space<vmem>>, vector<1x1x1x4x4xf32>
    %77 = vector.shape_cast %76 : vector<1x1x1x4x4xf32> to vector<4x4xf32>
    %c13 = arith.constant 13 : index
    %c0_75 = arith.constant 0 : index
    %c0_76 = arith.constant 0 : index
    %78 = vector.load %arg3[%c13, %c0_75, %c0_76] : memref<25x64x64xf32, #tpu.memory_space<vmem>>, vector<1x64x64xf32>
    %79 = vector.shape_cast %78 : vector<1x64x64xf32> to vector<64x64xf32>
    %cst_77 = arith.constant dense<0.000000e+00> : vector<4x64xf32>
    %80 = tpu.matmul %20, %79, %cst_77 {dimension_numbers = #tpu.dot_dimension_numbers<[1], [0], [0], [1], [0, 0, 1, 1], [], []>} : vector<4x64xf32>, vector<64x64xf32>, vector<4x64xf32> -> vector<4x64xf32>
    %cst_78 = arith.constant dense<0.000000e+00> : vector<4x64xf32>
    %81 = tpu.matmul %77, %80, %cst_78 {dimension_numbers = #tpu.dot_dimension_numbers<[1], [0], [0], [1], [0, 0, 1, 1], [], []>} : vector<4x4xf32>, vector<4x64xf32>, vector<4x64xf32> -> vector<4x64xf32>
    %82 = arith.addf %75, %81 : vector<4x64xf32>
    %c0_79 = arith.constant 0 : index
    %c0_80 = arith.constant 0 : index
    %c6_81 = arith.constant 6 : index
    %c0_82 = arith.constant 0 : index
    %c0_83 = arith.constant 0 : index
    %83 = vector.load %arg6[%c0_79, %c0_80, %c6_81, %c0_82, %c0_83] : memref<2x14x9x4x4xf32, #tpu.memory_space<vmem>>, vector<1x1x1x4x4xf32>
    %84 = vector.shape_cast %83 : vector<1x1x1x4x4xf32> to vector<4x4xf32>
    %c16 = arith.constant 16 : index
    %c0_84 = arith.constant 0 : index
    %c0_85 = arith.constant 0 : index
    %85 = vector.load %arg3[%c16, %c0_84, %c0_85] : memref<25x64x64xf32, #tpu.memory_space<vmem>>, vector<1x64x64xf32>
    %86 = vector.shape_cast %85 : vector<1x64x64xf32> to vector<64x64xf32>
    %cst_86 = arith.constant dense<0.000000e+00> : vector<4x64xf32>
    %87 = tpu.matmul %20, %86, %cst_86 {dimension_numbers = #tpu.dot_dimension_numbers<[1], [0], [0], [1], [0, 0, 1, 1], [], []>} : vector<4x64xf32>, vector<64x64xf32>, vector<4x64xf32> -> vector<4x64xf32>
    %cst_87 = arith.constant dense<0.000000e+00> : vector<4x64xf32>
    %88 = tpu.matmul %84, %87, %cst_87 {dimension_numbers = #tpu.dot_dimension_numbers<[1], [0], [0], [1], [0, 0, 1, 1], [], []>} : vector<4x4xf32>, vector<4x64xf32>, vector<4x64xf32> -> vector<4x64xf32>
    %89 = arith.addf %82, %88 : vector<4x64xf32>
    %c0_88 = arith.constant 0 : index
    %c0_89 = arith.constant 0 : index
    %c7_90 = arith.constant 7 : index
    %c0_91 = arith.constant 0 : index
    %c0_92 = arith.constant 0 : index
    %90 = vector.load %arg6[%c0_88, %c0_89, %c7_90, %c0_91, %c0_92] : memref<2x14x9x4x4xf32, #tpu.memory_space<vmem>>, vector<1x1x1x4x4xf32>
    %91 = vector.shape_cast %90 : vector<1x1x1x4x4xf32> to vector<4x4xf32>
    %c17 = arith.constant 17 : index
    %c0_93 = arith.constant 0 : index
    %c0_94 = arith.constant 0 : index
    %92 = vector.load %arg3[%c17, %c0_93, %c0_94] : memref<25x64x64xf32, #tpu.memory_space<vmem>>, vector<1x64x64xf32>
    %93 = vector.shape_cast %92 : vector<1x64x64xf32> to vector<64x64xf32>
    %cst_95 = arith.constant dense<0.000000e+00> : vector<4x64xf32>
    %94 = tpu.matmul %20, %93, %cst_95 {dimension_numbers = #tpu.dot_dimension_numbers<[1], [0], [0], [1], [0, 0, 1, 1], [], []>} : vector<4x64xf32>, vector<64x64xf32>, vector<4x64xf32> -> vector<4x64xf32>
    %cst_96 = arith.constant dense<0.000000e+00> : vector<4x64xf32>
    %95 = tpu.matmul %91, %94, %cst_96 {dimension_numbers = #tpu.dot_dimension_numbers<[1], [0], [0], [1], [0, 0, 1, 1], [], []>} : vector<4x4xf32>, vector<4x64xf32>, vector<4x64xf32> -> vector<4x64xf32>
    %96 = arith.addf %89, %95 : vector<4x64xf32>
    %c0_97 = arith.constant 0 : index
    %c0_98 = arith.constant 0 : index
    %c8_99 = arith.constant 8 : index
    %c0_100 = arith.constant 0 : index
    %c0_101 = arith.constant 0 : index
    %97 = vector.load %arg6[%c0_97, %c0_98, %c8_99, %c0_100, %c0_101] : memref<2x14x9x4x4xf32, #tpu.memory_space<vmem>>, vector<1x1x1x4x4xf32>
    %98 = vector.shape_cast %97 : vector<1x1x1x4x4xf32> to vector<4x4xf32>
    %c18 = arith.constant 18 : index
    %c0_102 = arith.constant 0 : index
    %c0_103 = arith.constant 0 : index
    %99 = vector.load %arg3[%c18, %c0_102, %c0_103] : memref<25x64x64xf32, #tpu.memory_space<vmem>>, vector<1x64x64xf32>
    %100 = vector.shape_cast %99 : vector<1x64x64xf32> to vector<64x64xf32>
    %cst_104 = arith.constant dense<0.000000e+00> : vector<4x64xf32>
    %101 = tpu.matmul %20, %100, %cst_104 {dimension_numbers = #tpu.dot_dimension_numbers<[1], [0], [0], [1], [0, 0, 1, 1], [], []>} : vector<4x64xf32>, vector<64x64xf32>, vector<4x64xf32> -> vector<4x64xf32>
    %cst_105 = arith.constant dense<0.000000e+00> : vector<4x64xf32>
    %102 = tpu.matmul %98, %101, %cst_105 {dimension_numbers = #tpu.dot_dimension_numbers<[1], [0], [0], [1], [0, 0, 1, 1], [], []>} : vector<4x4xf32>, vector<4x64xf32>, vector<4x64xf32> -> vector<4x64xf32>
    %103 = arith.addf %96, %102 : vector<4x64xf32>
    %cst_106 = arith.constant 2.000000e-01 : f32
    %104 = vector.broadcast %cst_106 : f32 to vector<4x64xf32>
    %105 = arith.mulf %104, %103 : vector<4x64xf32>
    %106 = arith.maximumf %103, %105 : vector<4x64xf32>
    %107 = arith.mulf %106, %106 : vector<4x64xf32>
    %cst_107 = arith.constant dense<0.000000e+00> : vector<1x64xf32>
    %108 = tpu.matmul %0, %107, %cst_107 {dimension_numbers = #tpu.dot_dimension_numbers<[1], [0], [0], [1], [0, 0, 1, 1], [], []>} : vector<1x4xf32>, vector<4x64xf32>, vector<1x64xf32> -> vector<1x64xf32>
    %cst_108 = arith.constant 2.500000e-01 : f32
    %109 = vector.broadcast %cst_108 : f32 to vector<1x64xf32>
    %110 = arith.mulf %108, %109 : vector<1x64xf32>
    %cst_109 = arith.constant 9.99999993E-9 : f32
    %111 = vector.broadcast %cst_109 : f32 to vector<1x64xf32>
    %112 = arith.addf %110, %111 : vector<1x64xf32>
    %113 = math.rsqrt %112 : vector<1x64xf32>
    %114 = vector.broadcast %113 : vector<1x64xf32> to vector<4x64xf32>
    %115 = arith.mulf %106, %114 : vector<4x64xf32>
    %116 = arith.addf %36, %115 : vector<4x64xf32>
    %117 = arith.addf %37, %20 : vector<4x64xf32>
    %cst_110 = arith.constant 0.000000e+00 : f32
    %118 = vector.broadcast %cst_110 : f32 to vector<4x64xf32>
    %119 = arith.addf %118, %45 : vector<4x64xf32>
    %120 = arith.addf %119, %52 : vector<4x64xf32>
    %121 = arith.addf %120, %59 : vector<4x64xf32>
    %122 = arith.addf %121, %66 : vector<4x64xf32>
    %123 = arith.addf %122, %73 : vector<4x64xf32>
    %124 = arith.addf %123, %80 : vector<4x64xf32>
    %125 = arith.addf %124, %87 : vector<4x64xf32>
    %126 = arith.addf %125, %94 : vector<4x64xf32>
    %127 = arith.addf %126, %101 : vector<4x64xf32>
    %cst_111 = arith.constant 0.111111112 : f32
    %128 = vector.broadcast %cst_111 : f32 to vector<4x64xf32>
    %129 = arith.mulf %127, %128 : vector<4x64xf32>
    %cst_112 = arith.constant 2.000000e-01 : f32
    %130 = vector.broadcast %cst_112 : f32 to vector<4x64xf32>
    %131 = arith.mulf %130, %129 : vector<4x64xf32>
    %132 = arith.maximumf %129, %131 : vector<4x64xf32>
    %133 = arith.addf %39, %132 : vector<4x64xf32>
    %cst_113 = arith.constant 0.000000e+00 : f32
    %134 = vector.broadcast %cst_113 : f32 to vector<4x64xf32>
    %c0_114 = arith.constant 0 : index
    %c4_115 = arith.constant 4 : index
    %c0_116 = arith.constant 0 : index
    %c0_117 = arith.constant 0 : index
    %c0_118 = arith.constant 0 : index
    %135 = vector.load %arg7[%c0_114, %c4_115, %c0_116, %c0_117, %c0_118] : memref<2x14x25x4x4xf32, #tpu.memory_space<vmem>>, vector<1x1x1x4x4xf32>
    %136 = vector.shape_cast %135 : vector<1x1x1x4x4xf32> to vector<4x4xf32>
    %c0_119 = arith.constant 0 : index
    %c0_120 = arith.constant 0 : index
    %c0_121 = arith.constant 0 : index
    %137 = vector.load %arg3[%c0_119, %c0_120, %c0_121] : memref<25x64x64xf32, #tpu.memory_space<vmem>>, vector<1x64x64xf32>
    %138 = vector.shape_cast %137 : vector<1x64x64xf32> to vector<64x64xf32>
    %cst_122 = arith.constant dense<0.000000e+00> : vector<4x64xf32>
    %139 = tpu.matmul %35, %138, %cst_122 {dimension_numbers = #tpu.dot_dimension_numbers<[1], [0], [0], [1], [0, 0, 1, 1], [], []>} : vector<4x64xf32>, vector<64x64xf32>, vector<4x64xf32> -> vector<4x64xf32>
    %cst_123 = arith.constant dense<0.000000e+00> : vector<4x64xf32>
    %140 = tpu.matmul %136, %139, %cst_123 {dimension_numbers = #tpu.dot_dimension_numbers<[1], [0], [0], [1], [0, 0, 1, 1], [], []>} : vector<4x4xf32>, vector<4x64xf32>, vector<4x64xf32> -> vector<4x64xf32>
    %141 = arith.addf %134, %140 : vector<4x64xf32>
    %c0_124 = arith.constant 0 : index
    %c4_125 = arith.constant 4 : index
    %c1_126 = arith.constant 1 : index
    %c0_127 = arith.constant 0 : index
    %c0_128 = arith.constant 0 : index
    %142 = vector.load %arg7[%c0_124, %c4_125, %c1_126, %c0_127, %c0_128] : memref<2x14x25x4x4xf32, #tpu.memory_space<vmem>>, vector<1x1x1x4x4xf32>
    %143 = vector.shape_cast %142 : vector<1x1x1x4x4xf32> to vector<4x4xf32>
    %c1_129 = arith.constant 1 : index
    %c0_130 = arith.constant 0 : index
    %c0_131 = arith.constant 0 : index
    %144 = vector.load %arg3[%c1_129, %c0_130, %c0_131] : memref<25x64x64xf32, #tpu.memory_space<vmem>>, vector<1x64x64xf32>
    %145 = vector.shape_cast %144 : vector<1x64x64xf32> to vector<64x64xf32>
    %cst_132 = arith.constant dense<0.000000e+00> : vector<4x64xf32>
    %146 = tpu.matmul %35, %145, %cst_132 {dimension_numbers = #tpu.dot_dimension_numbers<[1], [0], [0], [1], [0, 0, 1, 1], [], []>} : vector<4x64xf32>, vector<64x64xf32>, vector<4x64xf32> -> vector<4x64xf32>
    %cst_133 = arith.constant dense<0.000000e+00> : vector<4x64xf32>
    %147 = tpu.matmul %143, %146, %cst_133 {dimension_numbers = #tpu.dot_dimension_numbers<[1], [0], [0], [1], [0, 0, 1, 1], [], []>} : vector<4x4xf32>, vector<4x64xf32>, vector<4x64xf32> -> vector<4x64xf32>
    %148 = arith.addf %141, %147 : vector<4x64xf32>
    %c0_134 = arith.constant 0 : index
    %c4_135 = arith.constant 4 : index
    %c2_136 = arith.constant 2 : index
    %c0_137 = arith.constant 0 : index
    %c0_138 = arith.constant 0 : index
    %149 = vector.load %arg7[%c0_134, %c4_135, %c2_136, %c0_137, %c0_138] : memref<2x14x25x4x4xf32, #tpu.memory_space<vmem>>, vector<1x1x1x4x4xf32>
    %150 = vector.shape_cast %149 : vector<1x1x1x4x4xf32> to vector<4x4xf32>
    %c2_139 = arith.constant 2 : index
    %c0_140 = arith.constant 0 : index
    %c0_141 = arith.constant 0 : index
    %151 = vector.load %arg3[%c2_139, %c0_140, %c0_141] : memref<25x64x64xf32, #tpu.memory_space<vmem>>, vector<1x64x64xf32>
    %152 = vector.shape_cast %151 : vector<1x64x64xf32> to vector<64x64xf32>
    %cst_142 = arith.constant dense<0.000000e+00> : vector<4x64xf32>
    %153 = tpu.matmul %35, %152, %cst_142 {dimension_numbers = #tpu.dot_dimension_numbers<[1], [0], [0], [1], [0, 0, 1, 1], [], []>} : vector<4x64xf32>, vector<64x64xf32>, vector<4x64xf32> -> vector<4x64xf32>
    %cst_143 = arith.constant dense<0.000000e+00> : vector<4x64xf32>
    %154 = tpu.matmul %150, %153, %cst_143 {dimension_numbers = #tpu.dot_dimension_numbers<[1], [0], [0], [1], [0, 0, 1, 1], [], []>} : vector<4x4xf32>, vector<4x64xf32>, vector<4x64xf32> -> vector<4x64xf32>
    %155 = arith.addf %148, %154 : vector<4x64xf32>
    %c0_144 = arith.constant 0 : index
    %c4_145 = arith.constant 4 : index
    %c3_146 = arith.constant 3 : index
    %c0_147 = arith.constant 0 : index
    %c0_148 = arith.constant 0 : index
    %156 = vector.load %arg7[%c0_144, %c4_145, %c3_146, %c0_147, %c0_148] : memref<2x14x25x4x4xf32, #tpu.memory_space<vmem>>, vector<1x1x1x4x4xf32>
    %157 = vector.shape_cast %156 : vector<1x1x1x4x4xf32> to vector<4x4xf32>
    %c3_149 = arith.constant 3 : index
    %c0_150 = arith.constant 0 : index
    %c0_151 = arith.constant 0 : index
    %158 = vector.load %arg3[%c3_149, %c0_150, %c0_151] : memref<25x64x64xf32, #tpu.memory_space<vmem>>, vector<1x64x64xf32>
    %159 = vector.shape_cast %158 : vector<1x64x64xf32> to vector<64x64xf32>
    %cst_152 = arith.constant dense<0.000000e+00> : vector<4x64xf32>
    %160 = tpu.matmul %35, %159, %cst_152 {dimension_numbers = #tpu.dot_dimension_numbers<[1], [0], [0], [1], [0, 0, 1, 1], [], []>} : vector<4x64xf32>, vector<64x64xf32>, vector<4x64xf32> -> vector<4x64xf32>
    %cst_153 = arith.constant dense<0.000000e+00> : vector<4x64xf32>
    %161 = tpu.matmul %157, %160, %cst_153 {dimension_numbers = #tpu.dot_dimension_numbers<[1], [0], [0], [1], [0, 0, 1, 1], [], []>} : vector<4x4xf32>, vector<4x64xf32>, vector<4x64xf32> -> vector<4x64xf32>
    %162 = arith.addf %155, %161 : vector<4x64xf32>
    %c0_154 = arith.constant 0 : index
    %c4_155 = arith.constant 4 : index
    %c4_156 = arith.constant 4 : index
    %c0_157 = arith.constant 0 : index
    %c0_158 = arith.constant 0 : index
    %163 = vector.load %arg7[%c0_154, %c4_155, %c4_156, %c0_157, %c0_158] : memref<2x14x25x4x4xf32, #tpu.memory_space<vmem>>, vector<1x1x1x4x4xf32>
    %164 = vector.shape_cast %163 : vector<1x1x1x4x4xf32> to vector<4x4xf32>
    %c4_159 = arith.constant 4 : index
    %c0_160 = arith.constant 0 : index
    %c0_161 = arith.constant 0 : index
    %165 = vector.load %arg3[%c4_159, %c0_160, %c0_161] : memref<25x64x64xf32, #tpu.memory_space<vmem>>, vector<1x64x64xf32>
    %166 = vector.shape_cast %165 : vector<1x64x64xf32> to vector<64x64xf32>
    %cst_162 = arith.constant dense<0.000000e+00> : vector<4x64xf32>
    %167 = tpu.matmul %35, %166, %cst_162 {dimension_numbers = #tpu.dot_dimension_numbers<[1], [0], [0], [1], [0, 0, 1, 1], [], []>} : vector<4x64xf32>, vector<64x64xf32>, vector<4x64xf32> -> vector<4x64xf32>
    %cst_163 = arith.constant dense<0.000000e+00> : vector<4x64xf32>
    %168 = tpu.matmul %164, %167, %cst_163 {dimension_numbers = #tpu.dot_dimension_numbers<[1], [0], [0], [1], [0, 0, 1, 1], [], []>} : vector<4x4xf32>, vector<4x64xf32>, vector<4x64xf32> -> vector<4x64xf32>
    %169 = arith.addf %162, %168 : vector<4x64xf32>
    %c0_164 = arith.constant 0 : index
    %c4_165 = arith.constant 4 : index
    %c5_166 = arith.constant 5 : index
    %c0_167 = arith.constant 0 : index
    %c0_168 = arith.constant 0 : index
    %170 = vector.load %arg7[%c0_164, %c4_165, %c5_166, %c0_167, %c0_168] : memref<2x14x25x4x4xf32, #tpu.memory_space<vmem>>, vector<1x1x1x4x4xf32>
    %171 = vector.shape_cast %170 : vector<1x1x1x4x4xf32> to vector<4x4xf32>
    %c5_169 = arith.constant 5 : index
    %c0_170 = arith.constant 0 : index
    %c0_171 = arith.constant 0 : index
    %172 = vector.load %arg3[%c5_169, %c0_170, %c0_171] : memref<25x64x64xf32, #tpu.memory_space<vmem>>, vector<1x64x64xf32>
    %173 = vector.shape_cast %172 : vector<1x64x64xf32> to vector<64x64xf32>
    %cst_172 = arith.constant dense<0.000000e+00> : vector<4x64xf32>
    %174 = tpu.matmul %35, %173, %cst_172 {dimension_numbers = #tpu.dot_dimension_numbers<[1], [0], [0], [1], [0, 0, 1, 1], [], []>} : vector<4x64xf32>, vector<64x64xf32>, vector<4x64xf32> -> vector<4x64xf32>
    %cst_173 = arith.constant dense<0.000000e+00> : vector<4x64xf32>
    %175 = tpu.matmul %171, %174, %cst_173 {dimension_numbers = #tpu.dot_dimension_numbers<[1], [0], [0], [1], [0, 0, 1, 1], [], []>} : vector<4x4xf32>, vector<4x64xf32>, vector<4x64xf32> -> vector<4x64xf32>
    %176 = arith.addf %169, %175 : vector<4x64xf32>
    %c0_174 = arith.constant 0 : index
    %c4_175 = arith.constant 4 : index
    %c6_176 = arith.constant 6 : index
    %c0_177 = arith.constant 0 : index
    %c0_178 = arith.constant 0 : index
    %177 = vector.load %arg7[%c0_174, %c4_175, %c6_176, %c0_177, %c0_178] : memref<2x14x25x4x4xf32, #tpu.memory_space<vmem>>, vector<1x1x1x4x4xf32>
    %178 = vector.shape_cast %177 : vector<1x1x1x4x4xf32> to vector<4x4xf32>
    %c6_179 = arith.constant 6 : index
    %c0_180 = arith.constant 0 : index
    %c0_181 = arith.constant 0 : index
    %179 = vector.load %arg3[%c6_179, %c0_180, %c0_181] : memref<25x64x64xf32, #tpu.memory_space<vmem>>, vector<1x64x64xf32>
    %180 = vector.shape_cast %179 : vector<1x64x64xf32> to vector<64x64xf32>
    %cst_182 = arith.constant dense<0.000000e+00> : vector<4x64xf32>
    %181 = tpu.matmul %35, %180, %cst_182 {dimension_numbers = #tpu.dot_dimension_numbers<[1], [0], [0], [1], [0, 0, 1, 1], [], []>} : vector<4x64xf32>, vector<64x64xf32>, vector<4x64xf32> -> vector<4x64xf32>
    %cst_183 = arith.constant dense<0.000000e+00> : vector<4x64xf32>
    %182 = tpu.matmul %178, %181, %cst_183 {dimension_numbers = #tpu.dot_dimension_numbers<[1], [0], [0], [1], [0, 0, 1, 1], [], []>} : vector<4x4xf32>, vector<4x64xf32>, vector<4x64xf32> -> vector<4x64xf32>
    %183 = arith.addf %176, %182 : vector<4x64xf32>
    %c0_184 = arith.constant 0 : index
    %c4_185 = arith.constant 4 : index
    %c7_186 = arith.constant 7 : index
    %c0_187 = arith.constant 0 : index
    %c0_188 = arith.constant 0 : index
    %184 = vector.load %arg7[%c0_184, %c4_185, %c7_186, %c0_187, %c0_188] : memref<2x14x25x4x4xf32, #tpu.memory_space<vmem>>, vector<1x1x1x4x4xf32>
    %185 = vector.shape_cast %184 : vector<1x1x1x4x4xf32> to vector<4x4xf32>
    %c7_189 = arith.constant 7 : index
    %c0_190 = arith.constant 0 : index
    %c0_191 = arith.constant 0 : index
    %186 = vector.load %arg3[%c7_189, %c0_190, %c0_191] : memref<25x64x64xf32, #tpu.memory_space<vmem>>, vector<1x64x64xf32>
    %187 = vector.shape_cast %186 : vector<1x64x64xf32> to vector<64x64xf32>
    %cst_192 = arith.constant dense<0.000000e+00> : vector<4x64xf32>
    %188 = tpu.matmul %35, %187, %cst_192 {dimension_numbers = #tpu.dot_dimension_numbers<[1], [0], [0], [1], [0, 0, 1, 1], [], []>} : vector<4x64xf32>, vector<64x64xf32>, vector<4x64xf32> -> vector<4x64xf32>
    %cst_193 = arith.constant dense<0.000000e+00> : vector<4x64xf32>
    %189 = tpu.matmul %185, %188, %cst_193 {dimension_numbers = #tpu.dot_dimension_numbers<[1], [0], [0], [1], [0, 0, 1, 1], [], []>} : vector<4x4xf32>, vector<4x64xf32>, vector<4x64xf32> -> vector<4x64xf32>
    %190 = arith.addf %183, %189 : vector<4x64xf32>
    %c0_194 = arith.constant 0 : index
    %c4_195 = arith.constant 4 : index
    %c8_196 = arith.constant 8 : index
    %c0_197 = arith.constant 0 : index
    %c0_198 = arith.constant 0 : index
    %191 = vector.load %arg7[%c0_194, %c4_195, %c8_196, %c0_197, %c0_198] : memref<2x14x25x4x4xf32, #tpu.memory_space<vmem>>, vector<1x1x1x4x4xf32>
    %192 = vector.shape_cast %191 : vector<1x1x1x4x4xf32> to vector<4x4xf32>
    %c8_199 = arith.constant 8 : index
    %c0_200 = arith.constant 0 : index
    %c0_201 = arith.constant 0 : index
    %193 = vector.load %arg3[%c8_199, %c0_200, %c0_201] : memref<25x64x64xf32, #tpu.memory_space<vmem>>, vector<1x64x64xf32>
    %194 = vector.shape_cast %193 : vector<1x64x64xf32> to vector<64x64xf32>
    %cst_202 = arith.constant dense<0.000000e+00> : vector<4x64xf32>
    %195 = tpu.matmul %35, %194, %cst_202 {dimension_numbers = #tpu.dot_dimension_numbers<[1], [0], [0], [1], [0, 0, 1, 1], [], []>} : vector<4x64xf32>, vector<64x64xf32>, vector<4x64xf32> -> vector<4x64xf32>
    %cst_203 = arith.constant dense<0.000000e+00> : vector<4x64xf32>
    %196 = tpu.matmul %192, %195, %cst_203 {dimension_numbers = #tpu.dot_dimension_numbers<[1], [0], [0], [1], [0, 0, 1, 1], [], []>} : vector<4x4xf32>, vector<4x64xf32>, vector<4x64xf32> -> vector<4x64xf32>
    %197 = arith.addf %190, %196 : vector<4x64xf32>
    %c0_204 = arith.constant 0 : index
    %c4_205 = arith.constant 4 : index
    %c9 = arith.constant 9 : index
    %c0_206 = arith.constant 0 : index
    %c0_207 = arith.constant 0 : index
    %198 = vector.load %arg7[%c0_204, %c4_205, %c9, %c0_206, %c0_207] : memref<2x14x25x4x4xf32, #tpu.memory_space<vmem>>, vector<1x1x1x4x4xf32>
    %199 = vector.shape_cast %198 : vector<1x1x1x4x4xf32> to vector<4x4xf32>
    %c9_208 = arith.constant 9 : index
    %c0_209 = arith.constant 0 : index
    %c0_210 = arith.constant 0 : index
    %200 = vector.load %arg3[%c9_208, %c0_209, %c0_210] : memref<25x64x64xf32, #tpu.memory_space<vmem>>, vector<1x64x64xf32>
    %201 = vector.shape_cast %200 : vector<1x64x64xf32> to vector<64x64xf32>
    %cst_211 = arith.constant dense<0.000000e+00> : vector<4x64xf32>
    %202 = tpu.matmul %35, %201, %cst_211 {dimension_numbers = #tpu.dot_dimension_numbers<[1], [0], [0], [1], [0, 0, 1, 1], [], []>} : vector<4x64xf32>, vector<64x64xf32>, vector<4x64xf32> -> vector<4x64xf32>
    %cst_212 = arith.constant dense<0.000000e+00> : vector<4x64xf32>
    %203 = tpu.matmul %199, %202, %cst_212 {dimension_numbers = #tpu.dot_dimension_numbers<[1], [0], [0], [1], [0, 0, 1, 1], [], []>} : vector<4x4xf32>, vector<4x64xf32>, vector<4x64xf32> -> vector<4x64xf32>
    %204 = arith.addf %197, %203 : vector<4x64xf32>
    %c0_213 = arith.constant 0 : index
    %c4_214 = arith.constant 4 : index
    %c10 = arith.constant 10 : index
    %c0_215 = arith.constant 0 : index
    %c0_216 = arith.constant 0 : index
    %205 = vector.load %arg7[%c0_213, %c4_214, %c10, %c0_215, %c0_216] : memref<2x14x25x4x4xf32, #tpu.memory_space<vmem>>, vector<1x1x1x4x4xf32>
    %206 = vector.shape_cast %205 : vector<1x1x1x4x4xf32> to vector<4x4xf32>
    %c10_217 = arith.constant 10 : index
    %c0_218 = arith.constant 0 : index
    %c0_219 = arith.constant 0 : index
    %207 = vector.load %arg3[%c10_217, %c0_218, %c0_219] : memref<25x64x64xf32, #tpu.memory_space<vmem>>, vector<1x64x64xf32>
    %208 = vector.shape_cast %207 : vector<1x64x64xf32> to vector<64x64xf32>
    %cst_220 = arith.constant dense<0.000000e+00> : vector<4x64xf32>
    %209 = tpu.matmul %35, %208, %cst_220 {dimension_numbers = #tpu.dot_dimension_numbers<[1], [0], [0], [1], [0, 0, 1, 1], [], []>} : vector<4x64xf32>, vector<64x64xf32>, vector<4x64xf32> -> vector<4x64xf32>
    %cst_221 = arith.constant dense<0.000000e+00> : vector<4x64xf32>
    %210 = tpu.matmul %206, %209, %cst_221 {dimension_numbers = #tpu.dot_dimension_numbers<[1], [0], [0], [1], [0, 0, 1, 1], [], []>} : vector<4x4xf32>, vector<4x64xf32>, vector<4x64xf32> -> vector<4x64xf32>
    %211 = arith.addf %204, %210 : vector<4x64xf32>
    %c0_222 = arith.constant 0 : index
    %c4_223 = arith.constant 4 : index
    %c11_224 = arith.constant 11 : index
    %c0_225 = arith.constant 0 : index
    %c0_226 = arith.constant 0 : index
    %212 = vector.load %arg7[%c0_222, %c4_223, %c11_224, %c0_225, %c0_226] : memref<2x14x25x4x4xf32, #tpu.memory_space<vmem>>, vector<1x1x1x4x4xf32>
    %213 = vector.shape_cast %212 : vector<1x1x1x4x4xf32> to vector<4x4xf32>
    %c11_227 = arith.constant 11 : index
    %c0_228 = arith.constant 0 : index
    %c0_229 = arith.constant 0 : index
    %214 = vector.load %arg3[%c11_227, %c0_228, %c0_229] : memref<25x64x64xf32, #tpu.memory_space<vmem>>, vector<1x64x64xf32>
    %215 = vector.shape_cast %214 : vector<1x64x64xf32> to vector<64x64xf32>
    %cst_230 = arith.constant dense<0.000000e+00> : vector<4x64xf32>
    %216 = tpu.matmul %35, %215, %cst_230 {dimension_numbers = #tpu.dot_dimension_numbers<[1], [0], [0], [1], [0, 0, 1, 1], [], []>} : vector<4x64xf32>, vector<64x64xf32>, vector<4x64xf32> -> vector<4x64xf32>
    %cst_231 = arith.constant dense<0.000000e+00> : vector<4x64xf32>
    %217 = tpu.matmul %213, %216, %cst_231 {dimension_numbers = #tpu.dot_dimension_numbers<[1], [0], [0], [1], [0, 0, 1, 1], [], []>} : vector<4x4xf32>, vector<4x64xf32>, vector<4x64xf32> -> vector<4x64xf32>
    %218 = arith.addf %211, %217 : vector<4x64xf32>
    %c0_232 = arith.constant 0 : index
    %c4_233 = arith.constant 4 : index
    %c12_234 = arith.constant 12 : index
    %c0_235 = arith.constant 0 : index
    %c0_236 = arith.constant 0 : index
    %219 = vector.load %arg7[%c0_232, %c4_233, %c12_234, %c0_235, %c0_236] : memref<2x14x25x4x4xf32, #tpu.memory_space<vmem>>, vector<1x1x1x4x4xf32>
    %220 = vector.shape_cast %219 : vector<1x1x1x4x4xf32> to vector<4x4xf32>
    %c12_237 = arith.constant 12 : index
    %c0_238 = arith.constant 0 : index
    %c0_239 = arith.constant 0 : index
    %221 = vector.load %arg3[%c12_237, %c0_238, %c0_239] : memref<25x64x64xf32, #tpu.memory_space<vmem>>, vector<1x64x64xf32>
    %222 = vector.shape_cast %221 : vector<1x64x64xf32> to vector<64x64xf32>
    %cst_240 = arith.constant dense<0.000000e+00> : vector<4x64xf32>
    %223 = tpu.matmul %35, %222, %cst_240 {dimension_numbers = #tpu.dot_dimension_numbers<[1], [0], [0], [1], [0, 0, 1, 1], [], []>} : vector<4x64xf32>, vector<64x64xf32>, vector<4x64xf32> -> vector<4x64xf32>
    %cst_241 = arith.constant dense<0.000000e+00> : vector<4x64xf32>
    %224 = tpu.matmul %220, %223, %cst_241 {dimension_numbers = #tpu.dot_dimension_numbers<[1], [0], [0], [1], [0, 0, 1, 1], [], []>} : vector<4x4xf32>, vector<4x64xf32>, vector<4x64xf32> -> vector<4x64xf32>
    %225 = arith.addf %218, %224 : vector<4x64xf32>
    %c0_242 = arith.constant 0 : index
    %c4_243 = arith.constant 4 : index
    %c13_244 = arith.constant 13 : index
    %c0_245 = arith.constant 0 : index
    %c0_246 = arith.constant 0 : index
    %226 = vector.load %arg7[%c0_242, %c4_243, %c13_244, %c0_245, %c0_246] : memref<2x14x25x4x4xf32, #tpu.memory_space<vmem>>, vector<1x1x1x4x4xf32>
    %227 = vector.shape_cast %226 : vector<1x1x1x4x4xf32> to vector<4x4xf32>
    %c13_247 = arith.constant 13 : index
    %c0_248 = arith.constant 0 : index
    %c0_249 = arith.constant 0 : index
    %228 = vector.load %arg3[%c13_247, %c0_248, %c0_249] : memref<25x64x64xf32, #tpu.memory_space<vmem>>, vector<1x64x64xf32>
    %229 = vector.shape_cast %228 : vector<1x64x64xf32> to vector<64x64xf32>
    %cst_250 = arith.constant dense<0.000000e+00> : vector<4x64xf32>
    %230 = tpu.matmul %35, %229, %cst_250 {dimension_numbers = #tpu.dot_dimension_numbers<[1], [0], [0], [1], [0, 0, 1, 1], [], []>} : vector<4x64xf32>, vector<64x64xf32>, vector<4x64xf32> -> vector<4x64xf32>
    %cst_251 = arith.constant dense<0.000000e+00> : vector<4x64xf32>
    %231 = tpu.matmul %227, %230, %cst_251 {dimension_numbers = #tpu.dot_dimension_numbers<[1], [0], [0], [1], [0, 0, 1, 1], [], []>} : vector<4x4xf32>, vector<4x64xf32>, vector<4x64xf32> -> vector<4x64xf32>
    %232 = arith.addf %225, %231 : vector<4x64xf32>
    %c0_252 = arith.constant 0 : index
    %c4_253 = arith.constant 4 : index
    %c14 = arith.constant 14 : index
    %c0_254 = arith.constant 0 : index
    %c0_255 = arith.constant 0 : index
    %233 = vector.load %arg7[%c0_252, %c4_253, %c14, %c0_254, %c0_255] : memref<2x14x25x4x4xf32, #tpu.memory_space<vmem>>, vector<1x1x1x4x4xf32>
    %234 = vector.shape_cast %233 : vector<1x1x1x4x4xf32> to vector<4x4xf32>
    %c14_256 = arith.constant 14 : index
    %c0_257 = arith.constant 0 : index
    %c0_258 = arith.constant 0 : index
    %235 = vector.load %arg3[%c14_256, %c0_257, %c0_258] : memref<25x64x64xf32, #tpu.memory_space<vmem>>, vector<1x64x64xf32>
    %236 = vector.shape_cast %235 : vector<1x64x64xf32> to vector<64x64xf32>
    %cst_259 = arith.constant dense<0.000000e+00> : vector<4x64xf32>
    %237 = tpu.matmul %35, %236, %cst_259 {dimension_numbers = #tpu.dot_dimension_numbers<[1], [0], [0], [1], [0, 0, 1, 1], [], []>} : vector<4x64xf32>, vector<64x64xf32>, vector<4x64xf32> -> vector<4x64xf32>
    %cst_260 = arith.constant dense<0.000000e+00> : vector<4x64xf32>
    %238 = tpu.matmul %234, %237, %cst_260 {dimension_numbers = #tpu.dot_dimension_numbers<[1], [0], [0], [1], [0, 0, 1, 1], [], []>} : vector<4x4xf32>, vector<4x64xf32>, vector<4x64xf32> -> vector<4x64xf32>
    %239 = arith.addf %232, %238 : vector<4x64xf32>
    %c0_261 = arith.constant 0 : index
    %c4_262 = arith.constant 4 : index
    %c15 = arith.constant 15 : index
    %c0_263 = arith.constant 0 : index
    %c0_264 = arith.constant 0 : index
    %240 = vector.load %arg7[%c0_261, %c4_262, %c15, %c0_263, %c0_264] : memref<2x14x25x4x4xf32, #tpu.memory_space<vmem>>, vector<1x1x1x4x4xf32>
    %241 = vector.shape_cast %240 : vector<1x1x1x4x4xf32> to vector<4x4xf32>
    %c15_265 = arith.constant 15 : index
    %c0_266 = arith.constant 0 : index
    %c0_267 = arith.constant 0 : index
    %242 = vector.load %arg3[%c15_265, %c0_266, %c0_267] : memref<25x64x64xf32, #tpu.memory_space<vmem>>, vector<1x64x64xf32>
    %243 = vector.shape_cast %242 : vector<1x64x64xf32> to vector<64x64xf32>
    %cst_268 = arith.constant dense<0.000000e+00> : vector<4x64xf32>
    %244 = tpu.matmul %35, %243, %cst_268 {dimension_numbers = #tpu.dot_dimension_numbers<[1], [0], [0], [1], [0, 0, 1, 1], [], []>} : vector<4x64xf32>, vector<64x64xf32>, vector<4x64xf32> -> vector<4x64xf32>
    %cst_269 = arith.constant dense<0.000000e+00> : vector<4x64xf32>
    %245 = tpu.matmul %241, %244, %cst_269 {dimension_numbers = #tpu.dot_dimension_numbers<[1], [0], [0], [1], [0, 0, 1, 1], [], []>} : vector<4x4xf32>, vector<4x64xf32>, vector<4x64xf32> -> vector<4x64xf32>
    %246 = arith.addf %239, %245 : vector<4x64xf32>
    %c0_270 = arith.constant 0 : index
    %c4_271 = arith.constant 4 : index
    %c16_272 = arith.constant 16 : index
    %c0_273 = arith.constant 0 : index
    %c0_274 = arith.constant 0 : index
    %247 = vector.load %arg7[%c0_270, %c4_271, %c16_272, %c0_273, %c0_274] : memref<2x14x25x4x4xf32, #tpu.memory_space<vmem>>, vector<1x1x1x4x4xf32>
    %248 = vector.shape_cast %247 : vector<1x1x1x4x4xf32> to vector<4x4xf32>
    %c16_275 = arith.constant 16 : index
    %c0_276 = arith.constant 0 : index
    %c0_277 = arith.constant 0 : index
    %249 = vector.load %arg3[%c16_275, %c0_276, %c0_277] : memref<25x64x64xf32, #tpu.memory_space<vmem>>, vector<1x64x64xf32>
    %250 = vector.shape_cast %249 : vector<1x64x64xf32> to vector<64x64xf32>
    %cst_278 = arith.constant dense<0.000000e+00> : vector<4x64xf32>
    %251 = tpu.matmul %35, %250, %cst_278 {dimension_numbers = #tpu.dot_dimension_numbers<[1], [0], [0], [1], [0, 0, 1, 1], [], []>} : vector<4x64xf32>, vector<64x64xf32>, vector<4x64xf32> -> vector<4x64xf32>
    %cst_279 = arith.constant dense<0.000000e+00> : vector<4x64xf32>
    %252 = tpu.matmul %248, %251, %cst_279 {dimension_numbers = #tpu.dot_dimension_numbers<[1], [0], [0], [1], [0, 0, 1, 1], [], []>} : vector<4x4xf32>, vector<4x64xf32>, vector<4x64xf32> -> vector<4x64xf32>
    %253 = arith.addf %246, %252 : vector<4x64xf32>
    %c0_280 = arith.constant 0 : index
    %c4_281 = arith.constant 4 : index
    %c17_282 = arith.constant 17 : index
    %c0_283 = arith.constant 0 : index
    %c0_284 = arith.constant 0 : index
    %254 = vector.load %arg7[%c0_280, %c4_281, %c17_282, %c0_283, %c0_284] : memref<2x14x25x4x4xf32, #tpu.memory_space<vmem>>, vector<1x1x1x4x4xf32>
    %255 = vector.shape_cast %254 : vector<1x1x1x4x4xf32> to vector<4x4xf32>
    %c17_285 = arith.constant 17 : index
    %c0_286 = arith.constant 0 : index
    %c0_287 = arith.constant 0 : index
    %256 = vector.load %arg3[%c17_285, %c0_286, %c0_287] : memref<25x64x64xf32, #tpu.memory_space<vmem>>, vector<1x64x64xf32>
    %257 = vector.shape_cast %256 : vector<1x64x64xf32> to vector<64x64xf32>
    %cst_288 = arith.constant dense<0.000000e+00> : vector<4x64xf32>
    %258 = tpu.matmul %35, %257, %cst_288 {dimension_numbers = #tpu.dot_dimension_numbers<[1], [0], [0], [1], [0, 0, 1, 1], [], []>} : vector<4x64xf32>, vector<64x64xf32>, vector<4x64xf32> -> vector<4x64xf32>
    %cst_289 = arith.constant dense<0.000000e+00> : vector<4x64xf32>
    %259 = tpu.matmul %255, %258, %cst_289 {dimension_numbers = #tpu.dot_dimension_numbers<[1], [0], [0], [1], [0, 0, 1, 1], [], []>} : vector<4x4xf32>, vector<4x64xf32>, vector<4x64xf32> -> vector<4x64xf32>
    %260 = arith.addf %253, %259 : vector<4x64xf32>
    %c0_290 = arith.constant 0 : index
    %c4_291 = arith.constant 4 : index
    %c18_292 = arith.constant 18 : index
    %c0_293 = arith.constant 0 : index
    %c0_294 = arith.constant 0 : index
    %261 = vector.load %arg7[%c0_290, %c4_291, %c18_292, %c0_293, %c0_294] : memref<2x14x25x4x4xf32, #tpu.memory_space<vmem>>, vector<1x1x1x4x4xf32>
    %262 = vector.shape_cast %261 : vector<1x1x1x4x4xf32> to vector<4x4xf32>
    %c18_295 = arith.constant 18 : index
    %c0_296 = arith.constant 0 : index
    %c0_297 = arith.constant 0 : index
    %263 = vector.load %arg3[%c18_295, %c0_296, %c0_297] : memref<25x64x64xf32, #tpu.memory_space<vmem>>, vector<1x64x64xf32>
    %264 = vector.shape_cast %263 : vector<1x64x64xf32> to vector<64x64xf32>
    %cst_298 = arith.constant dense<0.000000e+00> : vector<4x64xf32>
    %265 = tpu.matmul %35, %264, %cst_298 {dimension_numbers = #tpu.dot_dimension_numbers<[1], [0], [0], [1], [0, 0, 1, 1], [], []>} : vector<4x64xf32>, vector<64x64xf32>, vector<4x64xf32> -> vector<4x64xf32>
    %cst_299 = arith.constant dense<0.000000e+00> : vector<4x64xf32>
    %266 = tpu.matmul %262, %265, %cst_299 {dimension_numbers = #tpu.dot_dimension_numbers<[1], [0], [0], [1], [0, 0, 1, 1], [], []>} : vector<4x4xf32>, vector<4x64xf32>, vector<4x64xf32> -> vector<4x64xf32>
    %267 = arith.addf %260, %266 : vector<4x64xf32>
    %c0_300 = arith.constant 0 : index
    %c4_301 = arith.constant 4 : index
    %c19 = arith.constant 19 : index
    %c0_302 = arith.constant 0 : index
    %c0_303 = arith.constant 0 : index
    %268 = vector.load %arg7[%c0_300, %c4_301, %c19, %c0_302, %c0_303] : memref<2x14x25x4x4xf32, #tpu.memory_space<vmem>>, vector<1x1x1x4x4xf32>
    %269 = vector.shape_cast %268 : vector<1x1x1x4x4xf32> to vector<4x4xf32>
    %c19_304 = arith.constant 19 : index
    %c0_305 = arith.constant 0 : index
    %c0_306 = arith.constant 0 : index
    %270 = vector.load %arg3[%c19_304, %c0_305, %c0_306] : memref<25x64x64xf32, #tpu.memory_space<vmem>>, vector<1x64x64xf32>
    %271 = vector.shape_cast %270 : vector<1x64x64xf32> to vector<64x64xf32>
    %cst_307 = arith.constant dense<0.000000e+00> : vector<4x64xf32>
    %272 = tpu.matmul %35, %271, %cst_307 {dimension_numbers = #tpu.dot_dimension_numbers<[1], [0], [0], [1], [0, 0, 1, 1], [], []>} : vector<4x64xf32>, vector<64x64xf32>, vector<4x64xf32> -> vector<4x64xf32>
    %cst_308 = arith.constant dense<0.000000e+00> : vector<4x64xf32>
    %273 = tpu.matmul %269, %272, %cst_308 {dimension_numbers = #tpu.dot_dimension_numbers<[1], [0], [0], [1], [0, 0, 1, 1], [], []>} : vector<4x4xf32>, vector<4x64xf32>, vector<4x64xf32> -> vector<4x64xf32>
    %274 = arith.addf %267, %273 : vector<4x64xf32>
    %c0_309 = arith.constant 0 : index
    %c4_310 = arith.constant 4 : index
    %c20 = arith.constant 20 : index
    %c0_311 = arith.constant 0 : index
    %c0_312 = arith.constant 0 : index
    %275 = vector.load %arg7[%c0_309, %c4_310, %c20, %c0_311, %c0_312] : memref<2x14x25x4x4xf32, #tpu.memory_space<vmem>>, vector<1x1x1x4x4xf32>
    %276 = vector.shape_cast %275 : vector<1x1x1x4x4xf32> to vector<4x4xf32>
    %c20_313 = arith.constant 20 : index
    %c0_314 = arith.constant 0 : index
    %c0_315 = arith.constant 0 : index
    %277 = vector.load %arg3[%c20_313, %c0_314, %c0_315] : memref<25x64x64xf32, #tpu.memory_space<vmem>>, vector<1x64x64xf32>
    %278 = vector.shape_cast %277 : vector<1x64x64xf32> to vector<64x64xf32>
    %cst_316 = arith.constant dense<0.000000e+00> : vector<4x64xf32>
    %279 = tpu.matmul %35, %278, %cst_316 {dimension_numbers = #tpu.dot_dimension_numbers<[1], [0], [0], [1], [0, 0, 1, 1], [], []>} : vector<4x64xf32>, vector<64x64xf32>, vector<4x64xf32> -> vector<4x64xf32>
    %cst_317 = arith.constant dense<0.000000e+00> : vector<4x64xf32>
    %280 = tpu.matmul %276, %279, %cst_317 {dimension_numbers = #tpu.dot_dimension_numbers<[1], [0], [0], [1], [0, 0, 1, 1], [], []>} : vector<4x4xf32>, vector<4x64xf32>, vector<4x64xf32> -> vector<4x64xf32>
    %281 = arith.addf %274, %280 : vector<4x64xf32>
    %c0_318 = arith.constant 0 : index
    %c4_319 = arith.constant 4 : index
    %c21 = arith.constant 21 : index
    %c0_320 = arith.constant 0 : index
    %c0_321 = arith.constant 0 : index
    %282 = vector.load %arg7[%c0_318, %c4_319, %c21, %c0_320, %c0_321] : memref<2x14x25x4x4xf32, #tpu.memory_space<vmem>>, vector<1x1x1x4x4xf32>
    %283 = vector.shape_cast %282 : vector<1x1x1x4x4xf32> to vector<4x4xf32>
    %c21_322 = arith.constant 21 : index
    %c0_323 = arith.constant 0 : index
    %c0_324 = arith.constant 0 : index
    %284 = vector.load %arg3[%c21_322, %c0_323, %c0_324] : memref<25x64x64xf32, #tpu.memory_space<vmem>>, vector<1x64x64xf32>
    %285 = vector.shape_cast %284 : vector<1x64x64xf32> to vector<64x64xf32>
    %cst_325 = arith.constant dense<0.000000e+00> : vector<4x64xf32>
    %286 = tpu.matmul %35, %285, %cst_325 {dimension_numbers = #tpu.dot_dimension_numbers<[1], [0], [0], [1], [0, 0, 1, 1], [], []>} : vector<4x64xf32>, vector<64x64xf32>, vector<4x64xf32> -> vector<4x64xf32>
    %cst_326 = arith.constant dense<0.000000e+00> : vector<4x64xf32>
    %287 = tpu.matmul %283, %286, %cst_326 {dimension_numbers = #tpu.dot_dimension_numbers<[1], [0], [0], [1], [0, 0, 1, 1], [], []>} : vector<4x4xf32>, vector<4x64xf32>, vector<4x64xf32> -> vector<4x64xf32>
    %288 = arith.addf %281, %287 : vector<4x64xf32>
    %c0_327 = arith.constant 0 : index
    %c4_328 = arith.constant 4 : index
    %c22 = arith.constant 22 : index
    %c0_329 = arith.constant 0 : index
    %c0_330 = arith.constant 0 : index
    %289 = vector.load %arg7[%c0_327, %c4_328, %c22, %c0_329, %c0_330] : memref<2x14x25x4x4xf32, #tpu.memory_space<vmem>>, vector<1x1x1x4x4xf32>
    %290 = vector.shape_cast %289 : vector<1x1x1x4x4xf32> to vector<4x4xf32>
    %c22_331 = arith.constant 22 : index
    %c0_332 = arith.constant 0 : index
    %c0_333 = arith.constant 0 : index
    %291 = vector.load %arg3[%c22_331, %c0_332, %c0_333] : memref<25x64x64xf32, #tpu.memory_space<vmem>>, vector<1x64x64xf32>
    %292 = vector.shape_cast %291 : vector<1x64x64xf32> to vector<64x64xf32>
    %cst_334 = arith.constant dense<0.000000e+00> : vector<4x64xf32>
    %293 = tpu.matmul %35, %292, %cst_334 {dimension_numbers = #tpu.dot_dimension_numbers<[1], [0], [0], [1], [0, 0, 1, 1], [], []>} : vector<4x64xf32>, vector<64x64xf32>, vector<4x64xf32> -> vector<4x64xf32>
    %cst_335 = arith.constant dense<0.000000e+00> : vector<4x64xf32>
    %294 = tpu.matmul %290, %293, %cst_335 {dimension_numbers = #tpu.dot_dimension_numbers<[1], [0], [0], [1], [0, 0, 1, 1], [], []>} : vector<4x4xf32>, vector<4x64xf32>, vector<4x64xf32> -> vector<4x64xf32>
    %295 = arith.addf %288, %294 : vector<4x64xf32>
    %c0_336 = arith.constant 0 : index
    %c4_337 = arith.constant 4 : index
    %c23 = arith.constant 23 : index
    %c0_338 = arith.constant 0 : index
    %c0_339 = arith.constant 0 : index
    %296 = vector.load %arg7[%c0_336, %c4_337, %c23, %c0_338, %c0_339] : memref<2x14x25x4x4xf32, #tpu.memory_space<vmem>>, vector<1x1x1x4x4xf32>
    %297 = vector.shape_cast %296 : vector<1x1x1x4x4xf32> to vector<4x4xf32>
    %c23_340 = arith.constant 23 : index
    %c0_341 = arith.constant 0 : index
    %c0_342 = arith.constant 0 : index
    %298 = vector.load %arg3[%c23_340, %c0_341, %c0_342] : memref<25x64x64xf32, #tpu.memory_space<vmem>>, vector<1x64x64xf32>
    %299 = vector.shape_cast %298 : vector<1x64x64xf32> to vector<64x64xf32>
    %cst_343 = arith.constant dense<0.000000e+00> : vector<4x64xf32>
    %300 = tpu.matmul %35, %299, %cst_343 {dimension_numbers = #tpu.dot_dimension_numbers<[1], [0], [0], [1], [0, 0, 1, 1], [], []>} : vector<4x64xf32>, vector<64x64xf32>, vector<4x64xf32> -> vector<4x64xf32>
    %cst_344 = arith.constant dense<0.000000e+00> : vector<4x64xf32>
    %301 = tpu.matmul %297, %300, %cst_344 {dimension_numbers = #tpu.dot_dimension_numbers<[1], [0], [0], [1], [0, 0, 1, 1], [], []>} : vector<4x4xf32>, vector<4x64xf32>, vector<4x64xf32> -> vector<4x64xf32>
    %302 = arith.addf %295, %301 : vector<4x64xf32>
    %c0_345 = arith.constant 0 : index
    %c4_346 = arith.constant 4 : index
    %c24 = arith.constant 24 : index
    %c0_347 = arith.constant 0 : index
    %c0_348 = arith.constant 0 : index
    %303 = vector.load %arg7[%c0_345, %c4_346, %c24, %c0_347, %c0_348] : memref<2x14x25x4x4xf32, #tpu.memory_space<vmem>>, vector<1x1x1x4x4xf32>
    %304 = vector.shape_cast %303 : vector<1x1x1x4x4xf32> to vector<4x4xf32>
    %c24_349 = arith.constant 24 : index
    %c0_350 = arith.constant 0 : index
    %c0_351 = arith.constant 0 : index
    %305 = vector.load %arg3[%c24_349, %c0_350, %c0_351] : memref<25x64x64xf32, #tpu.memory_space<vmem>>, vector<1x64x64xf32>
    %306 = vector.shape_cast %305 : vector<1x64x64xf32> to vector<64x64xf32>
    %cst_352 = arith.constant dense<0.000000e+00> : vector<4x64xf32>
    %307 = tpu.matmul %35, %306, %cst_352 {dimension_numbers = #tpu.dot_dimension_numbers<[1], [0], [0], [1], [0, 0, 1, 1], [], []>} : vector<4x64xf32>, vector<64x64xf32>, vector<4x64xf32> -> vector<4x64xf32>
    %cst_353 = arith.constant dense<0.000000e+00> : vector<4x64xf32>
    %308 = tpu.matmul %304, %307, %cst_353 {dimension_numbers = #tpu.dot_dimension_numbers<[1], [0], [0], [1], [0, 0, 1, 1], [], []>} : vector<4x4xf32>, vector<4x64xf32>, vector<4x64xf32> -> vector<4x64xf32>
    %309 = arith.addf %302, %308 : vector<4x64xf32>
    %cst_354 = arith.constant 2.000000e-01 : f32
    %310 = vector.broadcast %cst_354 : f32 to vector<4x64xf32>
    %311 = arith.mulf %310, %309 : vector<4x64xf32>
    %312 = arith.maximumf %309, %311 : vector<4x64xf32>
    %313 = arith.mulf %312, %312 : vector<4x64xf32>
    %cst_355 = arith.constant dense<0.000000e+00> : vector<1x64xf32>
    %314 = tpu.matmul %0, %313, %cst_355 {dimension_numbers = #tpu.dot_dimension_numbers<[1], [0], [0], [1], [0, 0, 1, 1], [], []>} : vector<1x4xf32>, vector<4x64xf32>, vector<1x64xf32> -> vector<1x64xf32>
    %cst_356 = arith.constant 2.500000e-01 : f32
    %315 = vector.broadcast %cst_356 : f32 to vector<1x64xf32>
    %316 = arith.mulf %314, %315 : vector<1x64xf32>
    %cst_357 = arith.constant 9.99999993E-9 : f32
    %317 = vector.broadcast %cst_357 : f32 to vector<1x64xf32>
    %318 = arith.addf %316, %317 : vector<1x64xf32>
    %319 = math.rsqrt %318 : vector<1x64xf32>
    %320 = vector.broadcast %319 : vector<1x64xf32> to vector<4x64xf32>
    %321 = arith.mulf %312, %320 : vector<4x64xf32>
    %322 = arith.addf %116, %321 : vector<4x64xf32>
    %cst_358 = arith.constant 0.000000e+00 : f32
    %323 = vector.broadcast %cst_358 : f32 to vector<4x64xf32>
    %324 = arith.addf %323, %181 : vector<4x64xf32>
    %325 = arith.addf %324, %188 : vector<4x64xf32>
    %326 = arith.addf %325, %195 : vector<4x64xf32>
    %327 = arith.addf %326, %216 : vector<4x64xf32>
    %328 = arith.addf %327, %223 : vector<4x64xf32>
    %329 = arith.addf %328, %230 : vector<4x64xf32>
    %330 = arith.addf %329, %251 : vector<4x64xf32>
    %331 = arith.addf %330, %258 : vector<4x64xf32>
    %332 = arith.addf %331, %265 : vector<4x64xf32>
    %cst_359 = arith.constant 0.111111112 : f32
    %333 = vector.broadcast %cst_359 : f32 to vector<4x64xf32>
    %334 = arith.mulf %332, %333 : vector<4x64xf32>
    %cst_360 = arith.constant 2.000000e-01 : f32
    %335 = vector.broadcast %cst_360 : f32 to vector<4x64xf32>
    %336 = arith.mulf %335, %334 : vector<4x64xf32>
    %337 = arith.maximumf %334, %336 : vector<4x64xf32>
    %338 = arith.addf %117, %337 : vector<4x64xf32>
    %339 = vector.extract_strided_slice %1 {offsets = [0, 0], sizes = [1, 64], strides = [1, 1]} : vector<9x64xf32> to vector<1x64xf32>
    %cst_361 = arith.constant 5.000000e-01 : f32
    %340 = vector.broadcast %cst_361 : f32 to vector<1x64xf32>
    %341 = arith.cmpf ogt, %339, %340 : vector<1x64xf32>
    %cst_362 = arith.constant -1.000000e+30 : f32
    %342 = vector.shape_cast %341 : vector<1x64xi1> to vector<1x64xi1>
    %343 = vector.broadcast %342 : vector<1x64xi1> to vector<4x64xi1>
    %344 = vector.broadcast %cst_362 : f32 to vector<4x64xf32>
    %345 = arith.select %343, %181, %344 : vector<4x64xi1>, vector<4x64xf32>
    %346 = arith.maximumf %35, %345 : vector<4x64xf32>
    %347 = vector.extract_strided_slice %1 {offsets = [1, 0], sizes = [1, 64], strides = [1, 1]} : vector<9x64xf32> to vector<1x64xf32>
    %cst_363 = arith.constant 5.000000e-01 : f32
    %348 = vector.broadcast %cst_363 : f32 to vector<1x64xf32>
    %349 = arith.cmpf ogt, %347, %348 : vector<1x64xf32>
    %cst_364 = arith.constant -1.000000e+30 : f32
    %350 = vector.shape_cast %349 : vector<1x64xi1> to vector<1x64xi1>
    %351 = vector.broadcast %350 : vector<1x64xi1> to vector<4x64xi1>
    %352 = vector.broadcast %cst_364 : f32 to vector<4x64xf32>
    %353 = arith.select %351, %188, %352 : vector<4x64xi1>, vector<4x64xf32>
    %354 = arith.maximumf %346, %353 : vector<4x64xf32>
    %355 = vector.extract_strided_slice %1 {offsets = [2, 0], sizes = [1, 64], strides = [1, 1]} : vector<9x64xf32> to vector<1x64xf32>
    %cst_365 = arith.constant 5.000000e-01 : f32
    %356 = vector.broadcast %cst_365 : f32 to vector<1x64xf32>
    %357 = arith.cmpf ogt, %355, %356 : vector<1x64xf32>
    %cst_366 = arith.constant -1.000000e+30 : f32
    %358 = vector.shape_cast %357 : vector<1x64xi1> to vector<1x64xi1>
    %359 = vector.broadcast %358 : vector<1x64xi1> to vector<4x64xi1>
    %360 = vector.broadcast %cst_366 : f32 to vector<4x64xf32>
    %361 = arith.select %359, %195, %360 : vector<4x64xi1>, vector<4x64xf32>
    %362 = arith.maximumf %354, %361 : vector<4x64xf32>
    %363 = vector.extract_strided_slice %1 {offsets = [3, 0], sizes = [1, 64], strides = [1, 1]} : vector<9x64xf32> to vector<1x64xf32>
    %cst_367 = arith.constant 5.000000e-01 : f32
    %364 = vector.broadcast %cst_367 : f32 to vector<1x64xf32>
    %365 = arith.cmpf ogt, %363, %364 : vector<1x64xf32>
    %cst_368 = arith.constant -1.000000e+30 : f32
    %366 = vector.shape_cast %365 : vector<1x64xi1> to vector<1x64xi1>
    %367 = vector.broadcast %366 : vector<1x64xi1> to vector<4x64xi1>
    %368 = vector.broadcast %cst_368 : f32 to vector<4x64xf32>
    %369 = arith.select %367, %216, %368 : vector<4x64xi1>, vector<4x64xf32>
    %370 = arith.maximumf %362, %369 : vector<4x64xf32>
    %371 = vector.extract_strided_slice %1 {offsets = [5, 0], sizes = [1, 64], strides = [1, 1]} : vector<9x64xf32> to vector<1x64xf32>
    %cst_369 = arith.constant 5.000000e-01 : f32
    %372 = vector.broadcast %cst_369 : f32 to vector<1x64xf32>
    %373 = arith.cmpf ogt, %371, %372 : vector<1x64xf32>
    %cst_370 = arith.constant -1.000000e+30 : f32
    %374 = vector.shape_cast %373 : vector<1x64xi1> to vector<1x64xi1>
    %375 = vector.broadcast %374 : vector<1x64xi1> to vector<4x64xi1>
    %376 = vector.broadcast %cst_370 : f32 to vector<4x64xf32>
    %377 = arith.select %375, %230, %376 : vector<4x64xi1>, vector<4x64xf32>
    %378 = arith.maximumf %370, %377 : vector<4x64xf32>
    %379 = vector.extract_strided_slice %1 {offsets = [6, 0], sizes = [1, 64], strides = [1, 1]} : vector<9x64xf32> to vector<1x64xf32>
    %cst_371 = arith.constant 5.000000e-01 : f32
    %380 = vector.broadcast %cst_371 : f32 to vector<1x64xf32>
    %381 = arith.cmpf ogt, %379, %380 : vector<1x64xf32>
    %cst_372 = arith.constant -1.000000e+30 : f32
    %382 = vector.shape_cast %381 : vector<1x64xi1> to vector<1x64xi1>
    %383 = vector.broadcast %382 : vector<1x64xi1> to vector<4x64xi1>
    %384 = vector.broadcast %cst_372 : f32 to vector<4x64xf32>
    %385 = arith.select %383, %251, %384 : vector<4x64xi1>, vector<4x64xf32>
    %386 = arith.maximumf %378, %385 : vector<4x64xf32>
    %387 = vector.extract_strided_slice %1 {offsets = [7, 0], sizes = [1, 64], strides = [1, 1]} : vector<9x64xf32> to vector<1x64xf32>
    %cst_373 = arith.constant 5.000000e-01 : f32
    %388 = vector.broadcast %cst_373 : f32 to vector<1x64xf32>
    %389 = arith.cmpf ogt, %387, %388 : vector<1x64xf32>
    %cst_374 = arith.constant -1.000000e+30 : f32
    %390 = vector.shape_cast %389 : vector<1x64xi1> to vector<1x64xi1>
    %391 = vector.broadcast %390 : vector<1x64xi1> to vector<4x64xi1>
    %392 = vector.broadcast %cst_374 : f32 to vector<4x64xf32>
    %393 = arith.select %391, %258, %392 : vector<4x64xi1>, vector<4x64xf32>
    %394 = arith.maximumf %386, %393 : vector<4x64xf32>
    %395 = vector.extract_strided_slice %1 {offsets = [8, 0], sizes = [1, 64], strides = [1, 1]} : vector<9x64xf32> to vector<1x64xf32>
    %cst_375 = arith.constant 5.000000e-01 : f32
    %396 = vector.broadcast %cst_375 : f32 to vector<1x64xf32>
    %397 = arith.cmpf ogt, %395, %396 : vector<1x64xf32>
    %cst_376 = arith.constant -1.000000e+30 : f32
    %398 = vector.shape_cast %397 : vector<1x64xi1> to vector<1x64xi1>
    %399 = vector.broadcast %398 : vector<1x64xi1> to vector<4x64xi1>
    %400 = vector.broadcast %cst_376 : f32 to vector<4x64xf32>
    %401 = arith.select %399, %265, %400 : vector<4x64xi1>, vector<4x64xf32>
    %402 = arith.maximumf %394, %401 : vector<4x64xf32>
    %cst_377 = arith.constant 2.000000e-01 : f32
    %403 = vector.broadcast %cst_377 : f32 to vector<4x64xf32>
    %404 = arith.mulf %403, %402 : vector<4x64xf32>
    %405 = arith.maximumf %402, %404 : vector<4x64xf32>
    %406 = arith.addf %38, %405 : vector<4x64xf32>
    %407 = arith.addf %338, %322 : vector<4x64xf32>
    %cst_378 = arith.constant 0.000000e+00 : f32
    %408 = vector.broadcast %cst_378 : f32 to vector<4x64xf32>
    %c6_379 = arith.constant 6 : index
    %c0_380 = arith.constant 0 : index
    %c0_381 = arith.constant 0 : index
    %409 = vector.load %arg3[%c6_379, %c0_380, %c0_381] : memref<25x64x64xf32, #tpu.memory_space<vmem>>, vector<1x64x64xf32>
    %410 = vector.shape_cast %409 : vector<1x64x64xf32> to vector<64x64xf32>
    %cst_382 = arith.constant dense<0.000000e+00> : vector<4x64xf32>
    %411 = tpu.matmul %322, %410, %cst_382 {dimension_numbers = #tpu.dot_dimension_numbers<[1], [0], [0], [1], [0, 0, 1, 1], [], []>} : vector<4x64xf32>, vector<64x64xf32>, vector<4x64xf32> -> vector<4x64xf32>
    %412 = arith.addf %408, %411 : vector<4x64xf32>
    %c7_383 = arith.constant 7 : index
    %c0_384 = arith.constant 0 : index
    %c0_385 = arith.constant 0 : index
    %413 = vector.load %arg3[%c7_383, %c0_384, %c0_385] : memref<25x64x64xf32, #tpu.memory_space<vmem>>, vector<1x64x64xf32>
    %414 = vector.shape_cast %413 : vector<1x64x64xf32> to vector<64x64xf32>
    %cst_386 = arith.constant dense<0.000000e+00> : vector<4x64xf32>
    %415 = tpu.matmul %322, %414, %cst_386 {dimension_numbers = #tpu.dot_dimension_numbers<[1], [0], [0], [1], [0, 0, 1, 1], [], []>} : vector<4x64xf32>, vector<64x64xf32>, vector<4x64xf32> -> vector<4x64xf32>
    %416 = arith.addf %412, %415 : vector<4x64xf32>
    %c8_387 = arith.constant 8 : index
    %c0_388 = arith.constant 0 : index
    %c0_389 = arith.constant 0 : index
    %417 = vector.load %arg3[%c8_387, %c0_388, %c0_389] : memref<25x64x64xf32, #tpu.memory_space<vmem>>, vector<1x64x64xf32>
    %418 = vector.shape_cast %417 : vector<1x64x64xf32> to vector<64x64xf32>
    %cst_390 = arith.constant dense<0.000000e+00> : vector<4x64xf32>
    %419 = tpu.matmul %322, %418, %cst_390 {dimension_numbers = #tpu.dot_dimension_numbers<[1], [0], [0], [1], [0, 0, 1, 1], [], []>} : vector<4x64xf32>, vector<64x64xf32>, vector<4x64xf32> -> vector<4x64xf32>
    %420 = arith.addf %416, %419 : vector<4x64xf32>
    %c11_391 = arith.constant 11 : index
    %c0_392 = arith.constant 0 : index
    %c0_393 = arith.constant 0 : index
    %421 = vector.load %arg3[%c11_391, %c0_392, %c0_393] : memref<25x64x64xf32, #tpu.memory_space<vmem>>, vector<1x64x64xf32>
    %422 = vector.shape_cast %421 : vector<1x64x64xf32> to vector<64x64xf32>
    %cst_394 = arith.constant dense<0.000000e+00> : vector<4x64xf32>
    %423 = tpu.matmul %322, %422, %cst_394 {dimension_numbers = #tpu.dot_dimension_numbers<[1], [0], [0], [1], [0, 0, 1, 1], [], []>} : vector<4x64xf32>, vector<64x64xf32>, vector<4x64xf32> -> vector<4x64xf32>
    %424 = arith.addf %420, %423 : vector<4x64xf32>
    %c12_395 = arith.constant 12 : index
    %c0_396 = arith.constant 0 : index
    %c0_397 = arith.constant 0 : index
    %425 = vector.load %arg3[%c12_395, %c0_396, %c0_397] : memref<25x64x64xf32, #tpu.memory_space<vmem>>, vector<1x64x64xf32>
    %426 = vector.shape_cast %425 : vector<1x64x64xf32> to vector<64x64xf32>
    %cst_398 = arith.constant dense<0.000000e+00> : vector<4x64xf32>
    %427 = tpu.matmul %322, %426, %cst_398 {dimension_numbers = #tpu.dot_dimension_numbers<[1], [0], [0], [1], [0, 0, 1, 1], [], []>} : vector<4x64xf32>, vector<64x64xf32>, vector<4x64xf32> -> vector<4x64xf32>
    %428 = arith.addf %424, %427 : vector<4x64xf32>
    %c13_399 = arith.constant 13 : index
    %c0_400 = arith.constant 0 : index
    %c0_401 = arith.constant 0 : index
    %429 = vector.load %arg3[%c13_399, %c0_400, %c0_401] : memref<25x64x64xf32, #tpu.memory_space<vmem>>, vector<1x64x64xf32>
    %430 = vector.shape_cast %429 : vector<1x64x64xf32> to vector<64x64xf32>
    %cst_402 = arith.constant dense<0.000000e+00> : vector<4x64xf32>
    %431 = tpu.matmul %322, %430, %cst_402 {dimension_numbers = #tpu.dot_dimension_numbers<[1], [0], [0], [1], [0, 0, 1, 1], [], []>} : vector<4x64xf32>, vector<64x64xf32>, vector<4x64xf32> -> vector<4x64xf32>
    %432 = arith.addf %428, %431 : vector<4x64xf32>
    %c16_403 = arith.constant 16 : index
    %c0_404 = arith.constant 0 : index
    %c0_405 = arith.constant 0 : index
    %433 = vector.load %arg3[%c16_403, %c0_404, %c0_405] : memref<25x64x64xf32, #tpu.memory_space<vmem>>, vector<1x64x64xf32>
    %434 = vector.shape_cast %433 : vector<1x64x64xf32> to vector<64x64xf32>
    %cst_406 = arith.constant dense<0.000000e+00> : vector<4x64xf32>
    %435 = tpu.matmul %322, %434, %cst_406 {dimension_numbers = #tpu.dot_dimension_numbers<[1], [0], [0], [1], [0, 0, 1, 1], [], []>} : vector<4x64xf32>, vector<64x64xf32>, vector<4x64xf32> -> vector<4x64xf32>
    %436 = arith.addf %432, %435 : vector<4x64xf32>
    %c17_407 = arith.constant 17 : index
    %c0_408 = arith.constant 0 : index
    %c0_409 = arith.constant 0 : index
    %437 = vector.load %arg3[%c17_407, %c0_408, %c0_409] : memref<25x64x64xf32, #tpu.memory_space<vmem>>, vector<1x64x64xf32>
    %438 = vector.shape_cast %437 : vector<1x64x64xf32> to vector<64x64xf32>
    %cst_410 = arith.constant dense<0.000000e+00> : vector<4x64xf32>
    %439 = tpu.matmul %322, %438, %cst_410 {dimension_numbers = #tpu.dot_dimension_numbers<[1], [0], [0], [1], [0, 0, 1, 1], [], []>} : vector<4x64xf32>, vector<64x64xf32>, vector<4x64xf32> -> vector<4x64xf32>
    %440 = arith.addf %436, %439 : vector<4x64xf32>
    %c18_411 = arith.constant 18 : index
    %c0_412 = arith.constant 0 : index
    %c0_413 = arith.constant 0 : index
    %441 = vector.load %arg3[%c18_411, %c0_412, %c0_413] : memref<25x64x64xf32, #tpu.memory_space<vmem>>, vector<1x64x64xf32>
    %442 = vector.shape_cast %441 : vector<1x64x64xf32> to vector<64x64xf32>
    %cst_414 = arith.constant dense<0.000000e+00> : vector<4x64xf32>
    %443 = tpu.matmul %322, %442, %cst_414 {dimension_numbers = #tpu.dot_dimension_numbers<[1], [0], [0], [1], [0, 0, 1, 1], [], []>} : vector<4x64xf32>, vector<64x64xf32>, vector<4x64xf32> -> vector<4x64xf32>
    %444 = arith.addf %440, %443 : vector<4x64xf32>
    %cst_415 = arith.constant 0.111111112 : f32
    %445 = vector.broadcast %cst_415 : f32 to vector<4x64xf32>
    %446 = arith.mulf %444, %445 : vector<4x64xf32>
    %cst_416 = arith.constant 2.000000e-01 : f32
    %447 = vector.broadcast %cst_416 : f32 to vector<4x64xf32>
    %448 = arith.mulf %447, %446 : vector<4x64xf32>
    %449 = arith.maximumf %446, %448 : vector<4x64xf32>
    %450 = arith.addf %133, %449 : vector<4x64xf32>
    %451 = vector.extract_strided_slice %1 {offsets = [0, 0], sizes = [1, 64], strides = [1, 1]} : vector<9x64xf32> to vector<1x64xf32>
    %cst_417 = arith.constant 5.000000e-01 : f32
    %452 = vector.broadcast %cst_417 : f32 to vector<1x64xf32>
    %453 = arith.cmpf ogt, %451, %452 : vector<1x64xf32>
    %c6_418 = arith.constant 6 : index
    %c0_419 = arith.constant 0 : index
    %c0_420 = arith.constant 0 : index
    %454 = vector.load %arg3[%c6_418, %c0_419, %c0_420] : memref<25x64x64xf32, #tpu.memory_space<vmem>>, vector<1x64x64xf32>
    %455 = vector.shape_cast %454 : vector<1x64x64xf32> to vector<64x64xf32>
    %cst_421 = arith.constant dense<0.000000e+00> : vector<4x64xf32>
    %456 = tpu.matmul %407, %455, %cst_421 {dimension_numbers = #tpu.dot_dimension_numbers<[1], [0], [0], [1], [0, 0, 1, 1], [], []>} : vector<4x64xf32>, vector<64x64xf32>, vector<4x64xf32> -> vector<4x64xf32>
    %cst_422 = arith.constant -1.000000e+30 : f32
    %457 = vector.shape_cast %453 : vector<1x64xi1> to vector<1x64xi1>
    %458 = vector.broadcast %457 : vector<1x64xi1> to vector<4x64xi1>
    %459 = vector.broadcast %cst_422 : f32 to vector<4x64xf32>
    %460 = arith.select %458, %456, %459 : vector<4x64xi1>, vector<4x64xf32>
    %461 = arith.maximumf %407, %460 : vector<4x64xf32>
    %462 = vector.extract_strided_slice %1 {offsets = [1, 0], sizes = [1, 64], strides = [1, 1]} : vector<9x64xf32> to vector<1x64xf32>
    %cst_423 = arith.constant 5.000000e-01 : f32
    %463 = vector.broadcast %cst_423 : f32 to vector<1x64xf32>
    %464 = arith.cmpf ogt, %462, %463 : vector<1x64xf32>
    %c7_424 = arith.constant 7 : index
    %c0_425 = arith.constant 0 : index
    %c0_426 = arith.constant 0 : index
    %465 = vector.load %arg3[%c7_424, %c0_425, %c0_426] : memref<25x64x64xf32, #tpu.memory_space<vmem>>, vector<1x64x64xf32>
    %466 = vector.shape_cast %465 : vector<1x64x64xf32> to vector<64x64xf32>
    %cst_427 = arith.constant dense<0.000000e+00> : vector<4x64xf32>
    %467 = tpu.matmul %407, %466, %cst_427 {dimension_numbers = #tpu.dot_dimension_numbers<[1], [0], [0], [1], [0, 0, 1, 1], [], []>} : vector<4x64xf32>, vector<64x64xf32>, vector<4x64xf32> -> vector<4x64xf32>
    %cst_428 = arith.constant -1.000000e+30 : f32
    %468 = vector.shape_cast %464 : vector<1x64xi1> to vector<1x64xi1>
    %469 = vector.broadcast %468 : vector<1x64xi1> to vector<4x64xi1>
    %470 = vector.broadcast %cst_428 : f32 to vector<4x64xf32>
    %471 = arith.select %469, %467, %470 : vector<4x64xi1>, vector<4x64xf32>
    %472 = arith.maximumf %461, %471 : vector<4x64xf32>
    %473 = vector.extract_strided_slice %1 {offsets = [2, 0], sizes = [1, 64], strides = [1, 1]} : vector<9x64xf32> to vector<1x64xf32>
    %cst_429 = arith.constant 5.000000e-01 : f32
    %474 = vector.broadcast %cst_429 : f32 to vector<1x64xf32>
    %475 = arith.cmpf ogt, %473, %474 : vector<1x64xf32>
    %c8_430 = arith.constant 8 : index
    %c0_431 = arith.constant 0 : index
    %c0_432 = arith.constant 0 : index
    %476 = vector.load %arg3[%c8_430, %c0_431, %c0_432] : memref<25x64x64xf32, #tpu.memory_space<vmem>>, vector<1x64x64xf32>
    %477 = vector.shape_cast %476 : vector<1x64x64xf32> to vector<64x64xf32>
    %cst_433 = arith.constant dense<0.000000e+00> : vector<4x64xf32>
    %478 = tpu.matmul %407, %477, %cst_433 {dimension_numbers = #tpu.dot_dimension_numbers<[1], [0], [0], [1], [0, 0, 1, 1], [], []>} : vector<4x64xf32>, vector<64x64xf32>, vector<4x64xf32> -> vector<4x64xf32>
    %cst_434 = arith.constant -1.000000e+30 : f32
    %479 = vector.shape_cast %475 : vector<1x64xi1> to vector<1x64xi1>
    %480 = vector.broadcast %479 : vector<1x64xi1> to vector<4x64xi1>
    %481 = vector.broadcast %cst_434 : f32 to vector<4x64xf32>
    %482 = arith.select %480, %478, %481 : vector<4x64xi1>, vector<4x64xf32>
    %483 = arith.maximumf %472, %482 : vector<4x64xf32>
    %484 = vector.extract_strided_slice %1 {offsets = [3, 0], sizes = [1, 64], strides = [1, 1]} : vector<9x64xf32> to vector<1x64xf32>
    %cst_435 = arith.constant 5.000000e-01 : f32
    %485 = vector.broadcast %cst_435 : f32 to vector<1x64xf32>
    %486 = arith.cmpf ogt, %484, %485 : vector<1x64xf32>
    %c11_436 = arith.constant 11 : index
    %c0_437 = arith.constant 0 : index
    %c0_438 = arith.constant 0 : index
    %487 = vector.load %arg3[%c11_436, %c0_437, %c0_438] : memref<25x64x64xf32, #tpu.memory_space<vmem>>, vector<1x64x64xf32>
    %488 = vector.shape_cast %487 : vector<1x64x64xf32> to vector<64x64xf32>
    %cst_439 = arith.constant dense<0.000000e+00> : vector<4x64xf32>
    %489 = tpu.matmul %407, %488, %cst_439 {dimension_numbers = #tpu.dot_dimension_numbers<[1], [0], [0], [1], [0, 0, 1, 1], [], []>} : vector<4x64xf32>, vector<64x64xf32>, vector<4x64xf32> -> vector<4x64xf32>
    %cst_440 = arith.constant -1.000000e+30 : f32
    %490 = vector.shape_cast %486 : vector<1x64xi1> to vector<1x64xi1>
    %491 = vector.broadcast %490 : vector<1x64xi1> to vector<4x64xi1>
    %492 = vector.broadcast %cst_440 : f32 to vector<4x64xf32>
    %493 = arith.select %491, %489, %492 : vector<4x64xi1>, vector<4x64xf32>
    %494 = arith.maximumf %483, %493 : vector<4x64xf32>
    %495 = vector.extract_strided_slice %1 {offsets = [5, 0], sizes = [1, 64], strides = [1, 1]} : vector<9x64xf32> to vector<1x64xf32>
    %cst_441 = arith.constant 5.000000e-01 : f32
    %496 = vector.broadcast %cst_441 : f32 to vector<1x64xf32>
    %497 = arith.cmpf ogt, %495, %496 : vector<1x64xf32>
    %c13_442 = arith.constant 13 : index
    %c0_443 = arith.constant 0 : index
    %c0_444 = arith.constant 0 : index
    %498 = vector.load %arg3[%c13_442, %c0_443, %c0_444] : memref<25x64x64xf32, #tpu.memory_space<vmem>>, vector<1x64x64xf32>
    %499 = vector.shape_cast %498 : vector<1x64x64xf32> to vector<64x64xf32>
    %cst_445 = arith.constant dense<0.000000e+00> : vector<4x64xf32>
    %500 = tpu.matmul %407, %499, %cst_445 {dimension_numbers = #tpu.dot_dimension_numbers<[1], [0], [0], [1], [0, 0, 1, 1], [], []>} : vector<4x64xf32>, vector<64x64xf32>, vector<4x64xf32> -> vector<4x64xf32>
    %cst_446 = arith.constant -1.000000e+30 : f32
    %501 = vector.shape_cast %497 : vector<1x64xi1> to vector<1x64xi1>
    %502 = vector.broadcast %501 : vector<1x64xi1> to vector<4x64xi1>
    %503 = vector.broadcast %cst_446 : f32 to vector<4x64xf32>
    %504 = arith.select %502, %500, %503 : vector<4x64xi1>, vector<4x64xf32>
    %505 = arith.maximumf %494, %504 : vector<4x64xf32>
    %506 = vector.extract_strided_slice %1 {offsets = [6, 0], sizes = [1, 64], strides = [1, 1]} : vector<9x64xf32> to vector<1x64xf32>
    %cst_447 = arith.constant 5.000000e-01 : f32
    %507 = vector.broadcast %cst_447 : f32 to vector<1x64xf32>
    %508 = arith.cmpf ogt, %506, %507 : vector<1x64xf32>
    %c16_448 = arith.constant 16 : index
    %c0_449 = arith.constant 0 : index
    %c0_450 = arith.constant 0 : index
    %509 = vector.load %arg3[%c16_448, %c0_449, %c0_450] : memref<25x64x64xf32, #tpu.memory_space<vmem>>, vector<1x64x64xf32>
    %510 = vector.shape_cast %509 : vector<1x64x64xf32> to vector<64x64xf32>
    %cst_451 = arith.constant dense<0.000000e+00> : vector<4x64xf32>
    %511 = tpu.matmul %407, %510, %cst_451 {dimension_numbers = #tpu.dot_dimension_numbers<[1], [0], [0], [1], [0, 0, 1, 1], [], []>} : vector<4x64xf32>, vector<64x64xf32>, vector<4x64xf32> -> vector<4x64xf32>
    %cst_452 = arith.constant -1.000000e+30 : f32
    %512 = vector.shape_cast %508 : vector<1x64xi1> to vector<1x64xi1>
    %513 = vector.broadcast %512 : vector<1x64xi1> to vector<4x64xi1>
    %514 = vector.broadcast %cst_452 : f32 to vector<4x64xf32>
    %515 = arith.select %513, %511, %514 : vector<4x64xi1>, vector<4x64xf32>
    %516 = arith.maximumf %505, %515 : vector<4x64xf32>
    %517 = vector.extract_strided_slice %1 {offsets = [7, 0], sizes = [1, 64], strides = [1, 1]} : vector<9x64xf32> to vector<1x64xf32>
    %cst_453 = arith.constant 5.000000e-01 : f32
    %518 = vector.broadcast %cst_453 : f32 to vector<1x64xf32>
    %519 = arith.cmpf ogt, %517, %518 : vector<1x64xf32>
    %c17_454 = arith.constant 17 : index
    %c0_455 = arith.constant 0 : index
    %c0_456 = arith.constant 0 : index
    %520 = vector.load %arg3[%c17_454, %c0_455, %c0_456] : memref<25x64x64xf32, #tpu.memory_space<vmem>>, vector<1x64x64xf32>
    %521 = vector.shape_cast %520 : vector<1x64x64xf32> to vector<64x64xf32>
    %cst_457 = arith.constant dense<0.000000e+00> : vector<4x64xf32>
    %522 = tpu.matmul %407, %521, %cst_457 {dimension_numbers = #tpu.dot_dimension_numbers<[1], [0], [0], [1], [0, 0, 1, 1], [], []>} : vector<4x64xf32>, vector<64x64xf32>, vector<4x64xf32> -> vector<4x64xf32>
    %cst_458 = arith.constant -1.000000e+30 : f32
    %523 = vector.shape_cast %519 : vector<1x64xi1> to vector<1x64xi1>
    %524 = vector.broadcast %523 : vector<1x64xi1> to vector<4x64xi1>
    %525 = vector.broadcast %cst_458 : f32 to vector<4x64xf32>
    %526 = arith.select %524, %522, %525 : vector<4x64xi1>, vector<4x64xf32>
    %527 = arith.maximumf %516, %526 : vector<4x64xf32>
    %528 = vector.extract_strided_slice %1 {offsets = [8, 0], sizes = [1, 64], strides = [1, 1]} : vector<9x64xf32> to vector<1x64xf32>
    %cst_459 = arith.constant 5.000000e-01 : f32
    %529 = vector.broadcast %cst_459 : f32 to vector<1x64xf32>
    %530 = arith.cmpf ogt, %528, %529 : vector<1x64xf32>
    %c18_460 = arith.constant 18 : index
    %c0_461 = arith.constant 0 : index
    %c0_462 = arith.constant 0 : index
    %531 = vector.load %arg3[%c18_460, %c0_461, %c0_462] : memref<25x64x64xf32, #tpu.memory_space<vmem>>, vector<1x64x64xf32>
    %532 = vector.shape_cast %531 : vector<1x64x64xf32> to vector<64x64xf32>
    %cst_463 = arith.constant dense<0.000000e+00> : vector<4x64xf32>
    %533 = tpu.matmul %407, %532, %cst_463 {dimension_numbers = #tpu.dot_dimension_numbers<[1], [0], [0], [1], [0, 0, 1, 1], [], []>} : vector<4x64xf32>, vector<64x64xf32>, vector<4x64xf32> -> vector<4x64xf32>
    %cst_464 = arith.constant -1.000000e+30 : f32
    %534 = vector.shape_cast %530 : vector<1x64xi1> to vector<1x64xi1>
    %535 = vector.broadcast %534 : vector<1x64xi1> to vector<4x64xi1>
    %536 = vector.broadcast %cst_464 : f32 to vector<4x64xf32>
    %537 = arith.select %535, %533, %536 : vector<4x64xi1>, vector<4x64xf32>
    %538 = arith.maximumf %527, %537 : vector<4x64xf32>
    %cst_465 = arith.constant 2.000000e-01 : f32
    %539 = vector.broadcast %cst_465 : f32 to vector<4x64xf32>
    %540 = arith.mulf %539, %538 : vector<4x64xf32>
    %541 = arith.maximumf %538, %540 : vector<4x64xf32>
    %542 = arith.addf %406, %541 : vector<4x64xf32>
    %c0_466 = arith.constant 0 : index
    %c0_467 = arith.constant 0 : index
    %543 = vector.load %arg10[%c0_466, %c0_467] : memref<16x64xf32, #tpu.memory_space<vmem>>, vector<4x64xf32>
    tpu.vector_store %arg10[%c0_466, %c0_467], %322 {strides = array<i32>} : memref<16x64xf32, #tpu.memory_space<vmem>>, vector<4x64xf32>,
    %c4_468 = arith.constant 4 : index
    %c0_469 = arith.constant 0 : index
    %544 = vector.load %arg10[%c4_468, %c0_469] : memref<16x64xf32, #tpu.memory_space<vmem>>, vector<4x64xf32>
    tpu.vector_store %arg10[%c4_468, %c0_469], %407 {strides = array<i32>} : memref<16x64xf32, #tpu.memory_space<vmem>>, vector<4x64xf32>,
    %c8_470 = arith.constant 8 : index
    %c0_471 = arith.constant 0 : index
    %545 = vector.load %arg10[%c8_470, %c0_471] : memref<16x64xf32, #tpu.memory_space<vmem>>, vector<4x64xf32>
    tpu.vector_store %arg10[%c8_470, %c0_471], %542 {strides = array<i32>} : memref<16x64xf32, #tpu.memory_space<vmem>>, vector<4x64xf32>,
    %c12_472 = arith.constant 12 : index
    %c0_473 = arith.constant 0 : index
    %546 = vector.load %arg10[%c12_472, %c0_473] : memref<16x64xf32, #tpu.memory_space<vmem>>, vector<4x64xf32>
    tpu.vector_store %arg10[%c12_472, %c0_473], %450 {strides = array<i32>} : memref<16x64xf32, #tpu.memory_space<vmem>>, vector<4x64xf32>,
    %c0_474 = arith.constant 0 : index
    %c0_475 = arith.constant 0 : index
    %547 = vector.load %arg10[%c0_474, %c0_475] : memref<16x64xf32, #tpu.memory_space<vmem>>, vector<16x64xf32>
    %c1_476 = arith.constant 1 : index
    %c0_477 = arith.constant 0 : index
    %c0_478 = arith.constant 0 : index
    %c0_479 = arith.constant 0 : index
    %548 = vector.load %arg5[%c1_476, %c0_477, %c0_478, %c0_479] : memref<2x2x4x16xf32, #tpu.memory_space<vmem>>, vector<1x1x4x16xf32>
    %549 = vector.shape_cast %548 : vector<1x1x4x16xf32> to vector<4x16xf32>
    %cst_480 = arith.constant dense<0.000000e+00> : vector<4x64xf32>
    %550 = tpu.matmul %549, %547, %cst_480 {dimension_numbers = #tpu.dot_dimension_numbers<[1], [0], [0], [1], [0, 0, 1, 1], [], []>} : vector<4x16xf32>, vector<16x64xf32>, vector<4x64xf32> -> vector<4x64xf32>
    %cst_481 = arith.constant 2.000000e-01 : f32
    %551 = vector.broadcast %cst_481 : f32 to vector<4x64xf32>
    %552 = arith.mulf %551, %550 : vector<4x64xf32>
    %553 = arith.maximumf %550, %552 : vector<4x64xf32>
    %554 = arith.mulf %553, %553 : vector<4x64xf32>
    %cst_482 = arith.constant dense<0.000000e+00> : vector<1x64xf32>
    %555 = tpu.matmul %0, %554, %cst_482 {dimension_numbers = #tpu.dot_dimension_numbers<[1], [0], [0], [1], [0, 0, 1, 1], [], []>} : vector<1x4xf32>, vector<4x64xf32>, vector<1x64xf32> -> vector<1x64xf32>
    %cst_483 = arith.constant 2.500000e-01 : f32
    %556 = vector.broadcast %cst_483 : f32 to vector<1x64xf32>
    %557 = arith.mulf %555, %556 : vector<1x64xf32>
    %cst_484 = arith.constant 9.99999993E-9 : f32
    %558 = vector.broadcast %cst_484 : f32 to vector<1x64xf32>
    %559 = arith.addf %557, %558 : vector<1x64xf32>
    %560 = math.rsqrt %559 : vector<1x64xf32>
    %561 = vector.broadcast %560 : vector<1x64xf32> to vector<4x64xf32>
    %562 = arith.mulf %553, %561 : vector<4x64xf32>
    %c1_485 = arith.constant 1 : index
    %c1_486 = arith.constant 1 : index
    %c0_487 = arith.constant 0 : index
    %c0_488 = arith.constant 0 : index
    %563 = vector.load %arg5[%c1_485, %c1_486, %c0_487, %c0_488] : memref<2x2x4x16xf32, #tpu.memory_space<vmem>>, vector<1x1x4x16xf32>
    %564 = vector.shape_cast %563 : vector<1x1x4x16xf32> to vector<4x16xf32>
    %cst_489 = arith.constant dense<0.000000e+00> : vector<4x64xf32>
    %565 = tpu.matmul %564, %3, %cst_489 {dimension_numbers = #tpu.dot_dimension_numbers<[1], [0], [0], [1], [0, 0, 1, 1], [], []>} : vector<4x16xf32>, vector<16x64xf32>, vector<4x64xf32> -> vector<4x64xf32>
    %cst_490 = arith.constant 2.000000e-01 : f32
    %566 = vector.broadcast %cst_490 : f32 to vector<4x64xf32>
    %567 = arith.mulf %566, %565 : vector<4x64xf32>
    %568 = arith.maximumf %565, %567 : vector<4x64xf32>
    %569 = arith.mulf %568, %568 : vector<4x64xf32>
    %cst_491 = arith.constant dense<0.000000e+00> : vector<1x64xf32>
    %570 = tpu.matmul %0, %569, %cst_491 {dimension_numbers = #tpu.dot_dimension_numbers<[1], [0], [0], [1], [0, 0, 1, 1], [], []>} : vector<1x4xf32>, vector<4x64xf32>, vector<1x64xf32> -> vector<1x64xf32>
    %cst_492 = arith.constant 2.500000e-01 : f32
    %571 = vector.broadcast %cst_492 : f32 to vector<1x64xf32>
    %572 = arith.mulf %570, %571 : vector<1x64xf32>
    %cst_493 = arith.constant 9.99999993E-9 : f32
    %573 = vector.broadcast %cst_493 : f32 to vector<1x64xf32>
    %574 = arith.addf %572, %573 : vector<1x64xf32>
    %575 = math.rsqrt %574 : vector<1x64xf32>
    %576 = vector.broadcast %575 : vector<1x64xf32> to vector<4x64xf32>
    %577 = arith.mulf %568, %576 : vector<4x64xf32>
    %cst_494 = arith.constant 0.000000e+00 : f32
    %578 = vector.broadcast %cst_494 : f32 to vector<4x64xf32>
    %cst_495 = arith.constant 0.000000e+00 : f32
    %579 = vector.broadcast %cst_495 : f32 to vector<4x64xf32>
    %cst_496 = arith.constant 0.000000e+00 : f32
    %580 = vector.broadcast %cst_496 : f32 to vector<4x64xf32>
    %cst_497 = arith.constant 0.000000e+00 : f32
    %581 = vector.broadcast %cst_497 : f32 to vector<4x64xf32>
    %cst_498 = arith.constant 0.000000e+00 : f32
    %582 = vector.broadcast %cst_498 : f32 to vector<4x64xf32>
    %c1_499 = arith.constant 1 : index
    %c0_500 = arith.constant 0 : index
    %c0_501 = arith.constant 0 : index
    %c0_502 = arith.constant 0 : index
    %c0_503 = arith.constant 0 : index
    %583 = vector.load %arg6[%c1_499, %c0_500, %c0_501, %c0_502, %c0_503] : memref<2x14x9x4x4xf32, #tpu.memory_space<vmem>>, vector<1x1x1x4x4xf32>
    %584 = vector.shape_cast %583 : vector<1x1x1x4x4xf32> to vector<4x4xf32>
    %c6_504 = arith.constant 6 : index
    %c0_505 = arith.constant 0 : index
    %c0_506 = arith.constant 0 : index
    %585 = vector.load %arg3[%c6_504, %c0_505, %c0_506] : memref<25x64x64xf32, #tpu.memory_space<vmem>>, vector<1x64x64xf32>
    %586 = vector.shape_cast %585 : vector<1x64x64xf32> to vector<64x64xf32>
    %cst_507 = arith.constant dense<0.000000e+00> : vector<4x64xf32>
    %587 = tpu.matmul %562, %586, %cst_507 {dimension_numbers = #tpu.dot_dimension_numbers<[1], [0], [0], [1], [0, 0, 1, 1], [], []>} : vector<4x64xf32>, vector<64x64xf32>, vector<4x64xf32> -> vector<4x64xf32>
    %cst_508 = arith.constant dense<0.000000e+00> : vector<4x64xf32>
    %588 = tpu.matmul %584, %587, %cst_508 {dimension_numbers = #tpu.dot_dimension_numbers<[1], [0], [0], [1], [0, 0, 1, 1], [], []>} : vector<4x4xf32>, vector<4x64xf32>, vector<4x64xf32> -> vector<4x64xf32>
    %589 = arith.addf %582, %588 : vector<4x64xf32>
    %c1_509 = arith.constant 1 : index
    %c0_510 = arith.constant 0 : index
    %c1_511 = arith.constant 1 : index
    %c0_512 = arith.constant 0 : index
    %c0_513 = arith.constant 0 : index
    %590 = vector.load %arg6[%c1_509, %c0_510, %c1_511, %c0_512, %c0_513] : memref<2x14x9x4x4xf32, #tpu.memory_space<vmem>>, vector<1x1x1x4x4xf32>
    %591 = vector.shape_cast %590 : vector<1x1x1x4x4xf32> to vector<4x4xf32>
    %c7_514 = arith.constant 7 : index
    %c0_515 = arith.constant 0 : index
    %c0_516 = arith.constant 0 : index
    %592 = vector.load %arg3[%c7_514, %c0_515, %c0_516] : memref<25x64x64xf32, #tpu.memory_space<vmem>>, vector<1x64x64xf32>
    %593 = vector.shape_cast %592 : vector<1x64x64xf32> to vector<64x64xf32>
    %cst_517 = arith.constant dense<0.000000e+00> : vector<4x64xf32>
    %594 = tpu.matmul %562, %593, %cst_517 {dimension_numbers = #tpu.dot_dimension_numbers<[1], [0], [0], [1], [0, 0, 1, 1], [], []>} : vector<4x64xf32>, vector<64x64xf32>, vector<4x64xf32> -> vector<4x64xf32>
    %cst_518 = arith.constant dense<0.000000e+00> : vector<4x64xf32>
    %595 = tpu.matmul %591, %594, %cst_518 {dimension_numbers = #tpu.dot_dimension_numbers<[1], [0], [0], [1], [0, 0, 1, 1], [], []>} : vector<4x4xf32>, vector<4x64xf32>, vector<4x64xf32> -> vector<4x64xf32>
    %596 = arith.addf %589, %595 : vector<4x64xf32>
    %c1_519 = arith.constant 1 : index
    %c0_520 = arith.constant 0 : index
    %c2_521 = arith.constant 2 : index
    %c0_522 = arith.constant 0 : index
    %c0_523 = arith.constant 0 : index
    %597 = vector.load %arg6[%c1_519, %c0_520, %c2_521, %c0_522, %c0_523] : memref<2x14x9x4x4xf32, #tpu.memory_space<vmem>>, vector<1x1x1x4x4xf32>
    %598 = vector.shape_cast %597 : vector<1x1x1x4x4xf32> to vector<4x4xf32>
    %c8_524 = arith.constant 8 : index
    %c0_525 = arith.constant 0 : index
    %c0_526 = arith.constant 0 : index
    %599 = vector.load %arg3[%c8_524, %c0_525, %c0_526] : memref<25x64x64xf32, #tpu.memory_space<vmem>>, vector<1x64x64xf32>
    %600 = vector.shape_cast %599 : vector<1x64x64xf32> to vector<64x64xf32>
    %cst_527 = arith.constant dense<0.000000e+00> : vector<4x64xf32>
    %601 = tpu.matmul %562, %600, %cst_527 {dimension_numbers = #tpu.dot_dimension_numbers<[1], [0], [0], [1], [0, 0, 1, 1], [], []>} : vector<4x64xf32>, vector<64x64xf32>, vector<4x64xf32> -> vector<4x64xf32>
    %cst_528 = arith.constant dense<0.000000e+00> : vector<4x64xf32>
    %602 = tpu.matmul %598, %601, %cst_528 {dimension_numbers = #tpu.dot_dimension_numbers<[1], [0], [0], [1], [0, 0, 1, 1], [], []>} : vector<4x4xf32>, vector<4x64xf32>, vector<4x64xf32> -> vector<4x64xf32>
    %603 = arith.addf %596, %602 : vector<4x64xf32>
    %c1_529 = arith.constant 1 : index
    %c0_530 = arith.constant 0 : index
    %c3_531 = arith.constant 3 : index
    %c0_532 = arith.constant 0 : index
    %c0_533 = arith.constant 0 : index
    %604 = vector.load %arg6[%c1_529, %c0_530, %c3_531, %c0_532, %c0_533] : memref<2x14x9x4x4xf32, #tpu.memory_space<vmem>>, vector<1x1x1x4x4xf32>
    %605 = vector.shape_cast %604 : vector<1x1x1x4x4xf32> to vector<4x4xf32>
    %c11_534 = arith.constant 11 : index
    %c0_535 = arith.constant 0 : index
    %c0_536 = arith.constant 0 : index
    %606 = vector.load %arg3[%c11_534, %c0_535, %c0_536] : memref<25x64x64xf32, #tpu.memory_space<vmem>>, vector<1x64x64xf32>
    %607 = vector.shape_cast %606 : vector<1x64x64xf32> to vector<64x64xf32>
    %cst_537 = arith.constant dense<0.000000e+00> : vector<4x64xf32>
    %608 = tpu.matmul %562, %607, %cst_537 {dimension_numbers = #tpu.dot_dimension_numbers<[1], [0], [0], [1], [0, 0, 1, 1], [], []>} : vector<4x64xf32>, vector<64x64xf32>, vector<4x64xf32> -> vector<4x64xf32>
    %cst_538 = arith.constant dense<0.000000e+00> : vector<4x64xf32>
    %609 = tpu.matmul %605, %608, %cst_538 {dimension_numbers = #tpu.dot_dimension_numbers<[1], [0], [0], [1], [0, 0, 1, 1], [], []>} : vector<4x4xf32>, vector<4x64xf32>, vector<4x64xf32> -> vector<4x64xf32>
    %610 = arith.addf %603, %609 : vector<4x64xf32>
    %c1_539 = arith.constant 1 : index
    %c0_540 = arith.constant 0 : index
    %c4_541 = arith.constant 4 : index
    %c0_542 = arith.constant 0 : index
    %c0_543 = arith.constant 0 : index
    %611 = vector.load %arg6[%c1_539, %c0_540, %c4_541, %c0_542, %c0_543] : memref<2x14x9x4x4xf32, #tpu.memory_space<vmem>>, vector<1x1x1x4x4xf32>
    %612 = vector.shape_cast %611 : vector<1x1x1x4x4xf32> to vector<4x4xf32>
    %c12_544 = arith.constant 12 : index
    %c0_545 = arith.constant 0 : index
    %c0_546 = arith.constant 0 : index
    %613 = vector.load %arg3[%c12_544, %c0_545, %c0_546] : memref<25x64x64xf32, #tpu.memory_space<vmem>>, vector<1x64x64xf32>
    %614 = vector.shape_cast %613 : vector<1x64x64xf32> to vector<64x64xf32>
    %cst_547 = arith.constant dense<0.000000e+00> : vector<4x64xf32>
    %615 = tpu.matmul %562, %614, %cst_547 {dimension_numbers = #tpu.dot_dimension_numbers<[1], [0], [0], [1], [0, 0, 1, 1], [], []>} : vector<4x64xf32>, vector<64x64xf32>, vector<4x64xf32> -> vector<4x64xf32>
    %cst_548 = arith.constant dense<0.000000e+00> : vector<4x64xf32>
    %616 = tpu.matmul %612, %615, %cst_548 {dimension_numbers = #tpu.dot_dimension_numbers<[1], [0], [0], [1], [0, 0, 1, 1], [], []>} : vector<4x4xf32>, vector<4x64xf32>, vector<4x64xf32> -> vector<4x64xf32>
    %617 = arith.addf %610, %616 : vector<4x64xf32>
    %c1_549 = arith.constant 1 : index
    %c0_550 = arith.constant 0 : index
    %c5_551 = arith.constant 5 : index
    %c0_552 = arith.constant 0 : index
    %c0_553 = arith.constant 0 : index
    %618 = vector.load %arg6[%c1_549, %c0_550, %c5_551, %c0_552, %c0_553] : memref<2x14x9x4x4xf32, #tpu.memory_space<vmem>>, vector<1x1x1x4x4xf32>
    %619 = vector.shape_cast %618 : vector<1x1x1x4x4xf32> to vector<4x4xf32>
    %c13_554 = arith.constant 13 : index
    %c0_555 = arith.constant 0 : index
    %c0_556 = arith.constant 0 : index
    %620 = vector.load %arg3[%c13_554, %c0_555, %c0_556] : memref<25x64x64xf32, #tpu.memory_space<vmem>>, vector<1x64x64xf32>
    %621 = vector.shape_cast %620 : vector<1x64x64xf32> to vector<64x64xf32>
    %cst_557 = arith.constant dense<0.000000e+00> : vector<4x64xf32>
    %622 = tpu.matmul %562, %621, %cst_557 {dimension_numbers = #tpu.dot_dimension_numbers<[1], [0], [0], [1], [0, 0, 1, 1], [], []>} : vector<4x64xf32>, vector<64x64xf32>, vector<4x64xf32> -> vector<4x64xf32>
    %cst_558 = arith.constant dense<0.000000e+00> : vector<4x64xf32>
    %623 = tpu.matmul %619, %622, %cst_558 {dimension_numbers = #tpu.dot_dimension_numbers<[1], [0], [0], [1], [0, 0, 1, 1], [], []>} : vector<4x4xf32>, vector<4x64xf32>, vector<4x64xf32> -> vector<4x64xf32>
    %624 = arith.addf %617, %623 : vector<4x64xf32>
    %c1_559 = arith.constant 1 : index
    %c0_560 = arith.constant 0 : index
    %c6_561 = arith.constant 6 : index
    %c0_562 = arith.constant 0 : index
    %c0_563 = arith.constant 0 : index
    %625 = vector.load %arg6[%c1_559, %c0_560, %c6_561, %c0_562, %c0_563] : memref<2x14x9x4x4xf32, #tpu.memory_space<vmem>>, vector<1x1x1x4x4xf32>
    %626 = vector.shape_cast %625 : vector<1x1x1x4x4xf32> to vector<4x4xf32>
    %c16_564 = arith.constant 16 : index
    %c0_565 = arith.constant 0 : index
    %c0_566 = arith.constant 0 : index
    %627 = vector.load %arg3[%c16_564, %c0_565, %c0_566] : memref<25x64x64xf32, #tpu.memory_space<vmem>>, vector<1x64x64xf32>
    %628 = vector.shape_cast %627 : vector<1x64x64xf32> to vector<64x64xf32>
    %cst_567 = arith.constant dense<0.000000e+00> : vector<4x64xf32>
    %629 = tpu.matmul %562, %628, %cst_567 {dimension_numbers = #tpu.dot_dimension_numbers<[1], [0], [0], [1], [0, 0, 1, 1], [], []>} : vector<4x64xf32>, vector<64x64xf32>, vector<4x64xf32> -> vector<4x64xf32>
    %cst_568 = arith.constant dense<0.000000e+00> : vector<4x64xf32>
    %630 = tpu.matmul %626, %629, %cst_568 {dimension_numbers = #tpu.dot_dimension_numbers<[1], [0], [0], [1], [0, 0, 1, 1], [], []>} : vector<4x4xf32>, vector<4x64xf32>, vector<4x64xf32> -> vector<4x64xf32>
    %631 = arith.addf %624, %630 : vector<4x64xf32>
    %c1_569 = arith.constant 1 : index
    %c0_570 = arith.constant 0 : index
    %c7_571 = arith.constant 7 : index
    %c0_572 = arith.constant 0 : index
    %c0_573 = arith.constant 0 : index
    %632 = vector.load %arg6[%c1_569, %c0_570, %c7_571, %c0_572, %c0_573] : memref<2x14x9x4x4xf32, #tpu.memory_space<vmem>>, vector<1x1x1x4x4xf32>
    %633 = vector.shape_cast %632 : vector<1x1x1x4x4xf32> to vector<4x4xf32>
    %c17_574 = arith.constant 17 : index
    %c0_575 = arith.constant 0 : index
    %c0_576 = arith.constant 0 : index
    %634 = vector.load %arg3[%c17_574, %c0_575, %c0_576] : memref<25x64x64xf32, #tpu.memory_space<vmem>>, vector<1x64x64xf32>
    %635 = vector.shape_cast %634 : vector<1x64x64xf32> to vector<64x64xf32>
    %cst_577 = arith.constant dense<0.000000e+00> : vector<4x64xf32>
    %636 = tpu.matmul %562, %635, %cst_577 {dimension_numbers = #tpu.dot_dimension_numbers<[1], [0], [0], [1], [0, 0, 1, 1], [], []>} : vector<4x64xf32>, vector<64x64xf32>, vector<4x64xf32> -> vector<4x64xf32>
    %cst_578 = arith.constant dense<0.000000e+00> : vector<4x64xf32>
    %637 = tpu.matmul %633, %636, %cst_578 {dimension_numbers = #tpu.dot_dimension_numbers<[1], [0], [0], [1], [0, 0, 1, 1], [], []>} : vector<4x4xf32>, vector<4x64xf32>, vector<4x64xf32> -> vector<4x64xf32>
    %638 = arith.addf %631, %637 : vector<4x64xf32>
    %c1_579 = arith.constant 1 : index
    %c0_580 = arith.constant 0 : index
    %c8_581 = arith.constant 8 : index
    %c0_582 = arith.constant 0 : index
    %c0_583 = arith.constant 0 : index
    %639 = vector.load %arg6[%c1_579, %c0_580, %c8_581, %c0_582, %c0_583] : memref<2x14x9x4x4xf32, #tpu.memory_space<vmem>>, vector<1x1x1x4x4xf32>
    %640 = vector.shape_cast %639 : vector<1x1x1x4x4xf32> to vector<4x4xf32>
    %c18_584 = arith.constant 18 : index
    %c0_585 = arith.constant 0 : index
    %c0_586 = arith.constant 0 : index
    %641 = vector.load %arg3[%c18_584, %c0_585, %c0_586] : memref<25x64x64xf32, #tpu.memory_space<vmem>>, vector<1x64x64xf32>
    %642 = vector.shape_cast %641 : vector<1x64x64xf32> to vector<64x64xf32>
    %cst_587 = arith.constant dense<0.000000e+00> : vector<4x64xf32>
    %643 = tpu.matmul %562, %642, %cst_587 {dimension_numbers = #tpu.dot_dimension_numbers<[1], [0], [0], [1], [0, 0, 1, 1], [], []>} : vector<4x64xf32>, vector<64x64xf32>, vector<4x64xf32> -> vector<4x64xf32>
    %cst_588 = arith.constant dense<0.000000e+00> : vector<4x64xf32>
    %644 = tpu.matmul %640, %643, %cst_588 {dimension_numbers = #tpu.dot_dimension_numbers<[1], [0], [0], [1], [0, 0, 1, 1], [], []>} : vector<4x4xf32>, vector<4x64xf32>, vector<4x64xf32> -> vector<4x64xf32>
    %645 = arith.addf %638, %644 : vector<4x64xf32>
    %cst_589 = arith.constant 2.000000e-01 : f32
    %646 = vector.broadcast %cst_589 : f32 to vector<4x64xf32>
    %647 = arith.mulf %646, %645 : vector<4x64xf32>
    %648 = arith.maximumf %645, %647 : vector<4x64xf32>
    %649 = arith.mulf %648, %648 : vector<4x64xf32>
    %cst_590 = arith.constant dense<0.000000e+00> : vector<1x64xf32>
    %650 = tpu.matmul %0, %649, %cst_590 {dimension_numbers = #tpu.dot_dimension_numbers<[1], [0], [0], [1], [0, 0, 1, 1], [], []>} : vector<1x4xf32>, vector<4x64xf32>, vector<1x64xf32> -> vector<1x64xf32>
    %cst_591 = arith.constant 2.500000e-01 : f32
    %651 = vector.broadcast %cst_591 : f32 to vector<1x64xf32>
    %652 = arith.mulf %650, %651 : vector<1x64xf32>
    %cst_592 = arith.constant 9.99999993E-9 : f32
    %653 = vector.broadcast %cst_592 : f32 to vector<1x64xf32>
    %654 = arith.addf %652, %653 : vector<1x64xf32>
    %655 = math.rsqrt %654 : vector<1x64xf32>
    %656 = vector.broadcast %655 : vector<1x64xf32> to vector<4x64xf32>
    %657 = arith.mulf %648, %656 : vector<4x64xf32>
    %658 = arith.addf %578, %657 : vector<4x64xf32>
    %659 = arith.addf %579, %562 : vector<4x64xf32>
    %cst_593 = arith.constant 0.000000e+00 : f32
    %660 = vector.broadcast %cst_593 : f32 to vector<4x64xf32>
    %661 = arith.addf %660, %587 : vector<4x64xf32>
    %662 = arith.addf %661, %594 : vector<4x64xf32>
    %663 = arith.addf %662, %601 : vector<4x64xf32>
    %664 = arith.addf %663, %608 : vector<4x64xf32>
    %665 = arith.addf %664, %615 : vector<4x64xf32>
    %666 = arith.addf %665, %622 : vector<4x64xf32>
    %667 = arith.addf %666, %629 : vector<4x64xf32>
    %668 = arith.addf %667, %636 : vector<4x64xf32>
    %669 = arith.addf %668, %643 : vector<4x64xf32>
    %cst_594 = arith.constant 0.111111112 : f32
    %670 = vector.broadcast %cst_594 : f32 to vector<4x64xf32>
    %671 = arith.mulf %669, %670 : vector<4x64xf32>
    %cst_595 = arith.constant 2.000000e-01 : f32
    %672 = vector.broadcast %cst_595 : f32 to vector<4x64xf32>
    %673 = arith.mulf %672, %671 : vector<4x64xf32>
    %674 = arith.maximumf %671, %673 : vector<4x64xf32>
    %675 = arith.addf %581, %674 : vector<4x64xf32>
    %cst_596 = arith.constant 0.000000e+00 : f32
    %676 = vector.broadcast %cst_596 : f32 to vector<4x64xf32>
    %c1_597 = arith.constant 1 : index
    %c4_598 = arith.constant 4 : index
    %c0_599 = arith.constant 0 : index
    %c0_600 = arith.constant 0 : index
    %c0_601 = arith.constant 0 : index
    %677 = vector.load %arg7[%c1_597, %c4_598, %c0_599, %c0_600, %c0_601] : memref<2x14x25x4x4xf32, #tpu.memory_space<vmem>>, vector<1x1x1x4x4xf32>
    %678 = vector.shape_cast %677 : vector<1x1x1x4x4xf32> to vector<4x4xf32>
    %c0_602 = arith.constant 0 : index
    %c0_603 = arith.constant 0 : index
    %c0_604 = arith.constant 0 : index
    %679 = vector.load %arg3[%c0_602, %c0_603, %c0_604] : memref<25x64x64xf32, #tpu.memory_space<vmem>>, vector<1x64x64xf32>
    %680 = vector.shape_cast %679 : vector<1x64x64xf32> to vector<64x64xf32>
    %cst_605 = arith.constant dense<0.000000e+00> : vector<4x64xf32>
    %681 = tpu.matmul %577, %680, %cst_605 {dimension_numbers = #tpu.dot_dimension_numbers<[1], [0], [0], [1], [0, 0, 1, 1], [], []>} : vector<4x64xf32>, vector<64x64xf32>, vector<4x64xf32> -> vector<4x64xf32>
    %cst_606 = arith.constant dense<0.000000e+00> : vector<4x64xf32>
    %682 = tpu.matmul %678, %681, %cst_606 {dimension_numbers = #tpu.dot_dimension_numbers<[1], [0], [0], [1], [0, 0, 1, 1], [], []>} : vector<4x4xf32>, vector<4x64xf32>, vector<4x64xf32> -> vector<4x64xf32>
    %683 = arith.addf %676, %682 : vector<4x64xf32>
    %c1_607 = arith.constant 1 : index
    %c4_608 = arith.constant 4 : index
    %c1_609 = arith.constant 1 : index
    %c0_610 = arith.constant 0 : index
    %c0_611 = arith.constant 0 : index
    %684 = vector.load %arg7[%c1_607, %c4_608, %c1_609, %c0_610, %c0_611] : memref<2x14x25x4x4xf32, #tpu.memory_space<vmem>>, vector<1x1x1x4x4xf32>
    %685 = vector.shape_cast %684 : vector<1x1x1x4x4xf32> to vector<4x4xf32>
    %c1_612 = arith.constant 1 : index
    %c0_613 = arith.constant 0 : index
    %c0_614 = arith.constant 0 : index
    %686 = vector.load %arg3[%c1_612, %c0_613, %c0_614] : memref<25x64x64xf32, #tpu.memory_space<vmem>>, vector<1x64x64xf32>
    %687 = vector.shape_cast %686 : vector<1x64x64xf32> to vector<64x64xf32>
    %cst_615 = arith.constant dense<0.000000e+00> : vector<4x64xf32>
    %688 = tpu.matmul %577, %687, %cst_615 {dimension_numbers = #tpu.dot_dimension_numbers<[1], [0], [0], [1], [0, 0, 1, 1], [], []>} : vector<4x64xf32>, vector<64x64xf32>, vector<4x64xf32> -> vector<4x64xf32>
    %cst_616 = arith.constant dense<0.000000e+00> : vector<4x64xf32>
    %689 = tpu.matmul %685, %688, %cst_616 {dimension_numbers = #tpu.dot_dimension_numbers<[1], [0], [0], [1], [0, 0, 1, 1], [], []>} : vector<4x4xf32>, vector<4x64xf32>, vector<4x64xf32> -> vector<4x64xf32>
    %690 = arith.addf %683, %689 : vector<4x64xf32>
    %c1_617 = arith.constant 1 : index
    %c4_618 = arith.constant 4 : index
    %c2_619 = arith.constant 2 : index
    %c0_620 = arith.constant 0 : index
    %c0_621 = arith.constant 0 : index
    %691 = vector.load %arg7[%c1_617, %c4_618, %c2_619, %c0_620, %c0_621] : memref<2x14x25x4x4xf32, #tpu.memory_space<vmem>>, vector<1x1x1x4x4xf32>
    %692 = vector.shape_cast %691 : vector<1x1x1x4x4xf32> to vector<4x4xf32>
    %c2_622 = arith.constant 2 : index
    %c0_623 = arith.constant 0 : index
    %c0_624 = arith.constant 0 : index
    %693 = vector.load %arg3[%c2_622, %c0_623, %c0_624] : memref<25x64x64xf32, #tpu.memory_space<vmem>>, vector<1x64x64xf32>
    %694 = vector.shape_cast %693 : vector<1x64x64xf32> to vector<64x64xf32>
    %cst_625 = arith.constant dense<0.000000e+00> : vector<4x64xf32>
    %695 = tpu.matmul %577, %694, %cst_625 {dimension_numbers = #tpu.dot_dimension_numbers<[1], [0], [0], [1], [0, 0, 1, 1], [], []>} : vector<4x64xf32>, vector<64x64xf32>, vector<4x64xf32> -> vector<4x64xf32>
    %cst_626 = arith.constant dense<0.000000e+00> : vector<4x64xf32>
    %696 = tpu.matmul %692, %695, %cst_626 {dimension_numbers = #tpu.dot_dimension_numbers<[1], [0], [0], [1], [0, 0, 1, 1], [], []>} : vector<4x4xf32>, vector<4x64xf32>, vector<4x64xf32> -> vector<4x64xf32>
    %697 = arith.addf %690, %696 : vector<4x64xf32>
    %c1_627 = arith.constant 1 : index
    %c4_628 = arith.constant 4 : index
    %c3_629 = arith.constant 3 : index
    %c0_630 = arith.constant 0 : index
    %c0_631 = arith.constant 0 : index
    %698 = vector.load %arg7[%c1_627, %c4_628, %c3_629, %c0_630, %c0_631] : memref<2x14x25x4x4xf32, #tpu.memory_space<vmem>>, vector<1x1x1x4x4xf32>
    %699 = vector.shape_cast %698 : vector<1x1x1x4x4xf32> to vector<4x4xf32>
    %c3_632 = arith.constant 3 : index
    %c0_633 = arith.constant 0 : index
    %c0_634 = arith.constant 0 : index
    %700 = vector.load %arg3[%c3_632, %c0_633, %c0_634] : memref<25x64x64xf32, #tpu.memory_space<vmem>>, vector<1x64x64xf32>
    %701 = vector.shape_cast %700 : vector<1x64x64xf32> to vector<64x64xf32>
    %cst_635 = arith.constant dense<0.000000e+00> : vector<4x64xf32>
    %702 = tpu.matmul %577, %701, %cst_635 {dimension_numbers = #tpu.dot_dimension_numbers<[1], [0], [0], [1], [0, 0, 1, 1], [], []>} : vector<4x64xf32>, vector<64x64xf32>, vector<4x64xf32> -> vector<4x64xf32>
    %cst_636 = arith.constant dense<0.000000e+00> : vector<4x64xf32>
    %703 = tpu.matmul %699, %702, %cst_636 {dimension_numbers = #tpu.dot_dimension_numbers<[1], [0], [0], [1], [0, 0, 1, 1], [], []>} : vector<4x4xf32>, vector<4x64xf32>, vector<4x64xf32> -> vector<4x64xf32>
    %704 = arith.addf %697, %703 : vector<4x64xf32>
    %c1_637 = arith.constant 1 : index
    %c4_638 = arith.constant 4 : index
    %c4_639 = arith.constant 4 : index
    %c0_640 = arith.constant 0 : index
    %c0_641 = arith.constant 0 : index
    %705 = vector.load %arg7[%c1_637, %c4_638, %c4_639, %c0_640, %c0_641] : memref<2x14x25x4x4xf32, #tpu.memory_space<vmem>>, vector<1x1x1x4x4xf32>
    %706 = vector.shape_cast %705 : vector<1x1x1x4x4xf32> to vector<4x4xf32>
    %c4_642 = arith.constant 4 : index
    %c0_643 = arith.constant 0 : index
    %c0_644 = arith.constant 0 : index
    %707 = vector.load %arg3[%c4_642, %c0_643, %c0_644] : memref<25x64x64xf32, #tpu.memory_space<vmem>>, vector<1x64x64xf32>
    %708 = vector.shape_cast %707 : vector<1x64x64xf32> to vector<64x64xf32>
    %cst_645 = arith.constant dense<0.000000e+00> : vector<4x64xf32>
    %709 = tpu.matmul %577, %708, %cst_645 {dimension_numbers = #tpu.dot_dimension_numbers<[1], [0], [0], [1], [0, 0, 1, 1], [], []>} : vector<4x64xf32>, vector<64x64xf32>, vector<4x64xf32> -> vector<4x64xf32>
    %cst_646 = arith.constant dense<0.000000e+00> : vector<4x64xf32>
    %710 = tpu.matmul %706, %709, %cst_646 {dimension_numbers = #tpu.dot_dimension_numbers<[1], [0], [0], [1], [0, 0, 1, 1], [], []>} : vector<4x4xf32>, vector<4x64xf32>, vector<4x64xf32> -> vector<4x64xf32>
    %711 = arith.addf %704, %710 : vector<4x64xf32>
    %c1_647 = arith.constant 1 : index
    %c4_648 = arith.constant 4 : index
    %c5_649 = arith.constant 5 : index
    %c0_650 = arith.constant 0 : index
    %c0_651 = arith.constant 0 : index
    %712 = vector.load %arg7[%c1_647, %c4_648, %c5_649, %c0_650, %c0_651] : memref<2x14x25x4x4xf32, #tpu.memory_space<vmem>>, vector<1x1x1x4x4xf32>
    %713 = vector.shape_cast %712 : vector<1x1x1x4x4xf32> to vector<4x4xf32>
    %c5_652 = arith.constant 5 : index
    %c0_653 = arith.constant 0 : index
    %c0_654 = arith.constant 0 : index
    %714 = vector.load %arg3[%c5_652, %c0_653, %c0_654] : memref<25x64x64xf32, #tpu.memory_space<vmem>>, vector<1x64x64xf32>
    %715 = vector.shape_cast %714 : vector<1x64x64xf32> to vector<64x64xf32>
    %cst_655 = arith.constant dense<0.000000e+00> : vector<4x64xf32>
    %716 = tpu.matmul %577, %715, %cst_655 {dimension_numbers = #tpu.dot_dimension_numbers<[1], [0], [0], [1], [0, 0, 1, 1], [], []>} : vector<4x64xf32>, vector<64x64xf32>, vector<4x64xf32> -> vector<4x64xf32>
    %cst_656 = arith.constant dense<0.000000e+00> : vector<4x64xf32>
    %717 = tpu.matmul %713, %716, %cst_656 {dimension_numbers = #tpu.dot_dimension_numbers<[1], [0], [0], [1], [0, 0, 1, 1], [], []>} : vector<4x4xf32>, vector<4x64xf32>, vector<4x64xf32> -> vector<4x64xf32>
    %718 = arith.addf %711, %717 : vector<4x64xf32>
    %c1_657 = arith.constant 1 : index
    %c4_658 = arith.constant 4 : index
    %c6_659 = arith.constant 6 : index
    %c0_660 = arith.constant 0 : index
    %c0_661 = arith.constant 0 : index
    %719 = vector.load %arg7[%c1_657, %c4_658, %c6_659, %c0_660, %c0_661] : memref<2x14x25x4x4xf32, #tpu.memory_space<vmem>>, vector<1x1x1x4x4xf32>
    %720 = vector.shape_cast %719 : vector<1x1x1x4x4xf32> to vector<4x4xf32>
    %c6_662 = arith.constant 6 : index
    %c0_663 = arith.constant 0 : index
    %c0_664 = arith.constant 0 : index
    %721 = vector.load %arg3[%c6_662, %c0_663, %c0_664] : memref<25x64x64xf32, #tpu.memory_space<vmem>>, vector<1x64x64xf32>
    %722 = vector.shape_cast %721 : vector<1x64x64xf32> to vector<64x64xf32>
    %cst_665 = arith.constant dense<0.000000e+00> : vector<4x64xf32>
    %723 = tpu.matmul %577, %722, %cst_665 {dimension_numbers = #tpu.dot_dimension_numbers<[1], [0], [0], [1], [0, 0, 1, 1], [], []>} : vector<4x64xf32>, vector<64x64xf32>, vector<4x64xf32> -> vector<4x64xf32>
    %cst_666 = arith.constant dense<0.000000e+00> : vector<4x64xf32>
    %724 = tpu.matmul %720, %723, %cst_666 {dimension_numbers = #tpu.dot_dimension_numbers<[1], [0], [0], [1], [0, 0, 1, 1], [], []>} : vector<4x4xf32>, vector<4x64xf32>, vector<4x64xf32> -> vector<4x64xf32>
    %725 = arith.addf %718, %724 : vector<4x64xf32>
    %c1_667 = arith.constant 1 : index
    %c4_668 = arith.constant 4 : index
    %c7_669 = arith.constant 7 : index
    %c0_670 = arith.constant 0 : index
    %c0_671 = arith.constant 0 : index
    %726 = vector.load %arg7[%c1_667, %c4_668, %c7_669, %c0_670, %c0_671] : memref<2x14x25x4x4xf32, #tpu.memory_space<vmem>>, vector<1x1x1x4x4xf32>
    %727 = vector.shape_cast %726 : vector<1x1x1x4x4xf32> to vector<4x4xf32>
    %c7_672 = arith.constant 7 : index
    %c0_673 = arith.constant 0 : index
    %c0_674 = arith.constant 0 : index
    %728 = vector.load %arg3[%c7_672, %c0_673, %c0_674] : memref<25x64x64xf32, #tpu.memory_space<vmem>>, vector<1x64x64xf32>
    %729 = vector.shape_cast %728 : vector<1x64x64xf32> to vector<64x64xf32>
    %cst_675 = arith.constant dense<0.000000e+00> : vector<4x64xf32>
    %730 = tpu.matmul %577, %729, %cst_675 {dimension_numbers = #tpu.dot_dimension_numbers<[1], [0], [0], [1], [0, 0, 1, 1], [], []>} : vector<4x64xf32>, vector<64x64xf32>, vector<4x64xf32> -> vector<4x64xf32>
    %cst_676 = arith.constant dense<0.000000e+00> : vector<4x64xf32>
    %731 = tpu.matmul %727, %730, %cst_676 {dimension_numbers = #tpu.dot_dimension_numbers<[1], [0], [0], [1], [0, 0, 1, 1], [], []>} : vector<4x4xf32>, vector<4x64xf32>, vector<4x64xf32> -> vector<4x64xf32>
    %732 = arith.addf %725, %731 : vector<4x64xf32>
    %c1_677 = arith.constant 1 : index
    %c4_678 = arith.constant 4 : index
    %c8_679 = arith.constant 8 : index
    %c0_680 = arith.constant 0 : index
    %c0_681 = arith.constant 0 : index
    %733 = vector.load %arg7[%c1_677, %c4_678, %c8_679, %c0_680, %c0_681] : memref<2x14x25x4x4xf32, #tpu.memory_space<vmem>>, vector<1x1x1x4x4xf32>
    %734 = vector.shape_cast %733 : vector<1x1x1x4x4xf32> to vector<4x4xf32>
    %c8_682 = arith.constant 8 : index
    %c0_683 = arith.constant 0 : index
    %c0_684 = arith.constant 0 : index
    %735 = vector.load %arg3[%c8_682, %c0_683, %c0_684] : memref<25x64x64xf32, #tpu.memory_space<vmem>>, vector<1x64x64xf32>
    %736 = vector.shape_cast %735 : vector<1x64x64xf32> to vector<64x64xf32>
    %cst_685 = arith.constant dense<0.000000e+00> : vector<4x64xf32>
    %737 = tpu.matmul %577, %736, %cst_685 {dimension_numbers = #tpu.dot_dimension_numbers<[1], [0], [0], [1], [0, 0, 1, 1], [], []>} : vector<4x64xf32>, vector<64x64xf32>, vector<4x64xf32> -> vector<4x64xf32>
    %cst_686 = arith.constant dense<0.000000e+00> : vector<4x64xf32>
    %738 = tpu.matmul %734, %737, %cst_686 {dimension_numbers = #tpu.dot_dimension_numbers<[1], [0], [0], [1], [0, 0, 1, 1], [], []>} : vector<4x4xf32>, vector<4x64xf32>, vector<4x64xf32> -> vector<4x64xf32>
    %739 = arith.addf %732, %738 : vector<4x64xf32>
    %c1_687 = arith.constant 1 : index
    %c4_688 = arith.constant 4 : index
    %c9_689 = arith.constant 9 : index
    %c0_690 = arith.constant 0 : index
    %c0_691 = arith.constant 0 : index
    %740 = vector.load %arg7[%c1_687, %c4_688, %c9_689, %c0_690, %c0_691] : memref<2x14x25x4x4xf32, #tpu.memory_space<vmem>>, vector<1x1x1x4x4xf32>
    %741 = vector.shape_cast %740 : vector<1x1x1x4x4xf32> to vector<4x4xf32>
    %c9_692 = arith.constant 9 : index
    %c0_693 = arith.constant 0 : index
    %c0_694 = arith.constant 0 : index
    %742 = vector.load %arg3[%c9_692, %c0_693, %c0_694] : memref<25x64x64xf32, #tpu.memory_space<vmem>>, vector<1x64x64xf32>
    %743 = vector.shape_cast %742 : vector<1x64x64xf32> to vector<64x64xf32>
    %cst_695 = arith.constant dense<0.000000e+00> : vector<4x64xf32>
    %744 = tpu.matmul %577, %743, %cst_695 {dimension_numbers = #tpu.dot_dimension_numbers<[1], [0], [0], [1], [0, 0, 1, 1], [], []>} : vector<4x64xf32>, vector<64x64xf32>, vector<4x64xf32> -> vector<4x64xf32>
    %cst_696 = arith.constant dense<0.000000e+00> : vector<4x64xf32>
    %745 = tpu.matmul %741, %744, %cst_696 {dimension_numbers = #tpu.dot_dimension_numbers<[1], [0], [0], [1], [0, 0, 1, 1], [], []>} : vector<4x4xf32>, vector<4x64xf32>, vector<4x64xf32> -> vector<4x64xf32>
    %746 = arith.addf %739, %745 : vector<4x64xf32>
    %c1_697 = arith.constant 1 : index
    %c4_698 = arith.constant 4 : index
    %c10_699 = arith.constant 10 : index
    %c0_700 = arith.constant 0 : index
    %c0_701 = arith.constant 0 : index
    %747 = vector.load %arg7[%c1_697, %c4_698, %c10_699, %c0_700, %c0_701] : memref<2x14x25x4x4xf32, #tpu.memory_space<vmem>>, vector<1x1x1x4x4xf32>
    %748 = vector.shape_cast %747 : vector<1x1x1x4x4xf32> to vector<4x4xf32>
    %c10_702 = arith.constant 10 : index
    %c0_703 = arith.constant 0 : index
    %c0_704 = arith.constant 0 : index
    %749 = vector.load %arg3[%c10_702, %c0_703, %c0_704] : memref<25x64x64xf32, #tpu.memory_space<vmem>>, vector<1x64x64xf32>
    %750 = vector.shape_cast %749 : vector<1x64x64xf32> to vector<64x64xf32>
    %cst_705 = arith.constant dense<0.000000e+00> : vector<4x64xf32>
    %751 = tpu.matmul %577, %750, %cst_705 {dimension_numbers = #tpu.dot_dimension_numbers<[1], [0], [0], [1], [0, 0, 1, 1], [], []>} : vector<4x64xf32>, vector<64x64xf32>, vector<4x64xf32> -> vector<4x64xf32>
    %cst_706 = arith.constant dense<0.000000e+00> : vector<4x64xf32>
    %752 = tpu.matmul %748, %751, %cst_706 {dimension_numbers = #tpu.dot_dimension_numbers<[1], [0], [0], [1], [0, 0, 1, 1], [], []>} : vector<4x4xf32>, vector<4x64xf32>, vector<4x64xf32> -> vector<4x64xf32>
    %753 = arith.addf %746, %752 : vector<4x64xf32>
    %c1_707 = arith.constant 1 : index
    %c4_708 = arith.constant 4 : index
    %c11_709 = arith.constant 11 : index
    %c0_710 = arith.constant 0 : index
    %c0_711 = arith.constant 0 : index
    %754 = vector.load %arg7[%c1_707, %c4_708, %c11_709, %c0_710, %c0_711] : memref<2x14x25x4x4xf32, #tpu.memory_space<vmem>>, vector<1x1x1x4x4xf32>
    %755 = vector.shape_cast %754 : vector<1x1x1x4x4xf32> to vector<4x4xf32>
    %c11_712 = arith.constant 11 : index
    %c0_713 = arith.constant 0 : index
    %c0_714 = arith.constant 0 : index
    %756 = vector.load %arg3[%c11_712, %c0_713, %c0_714] : memref<25x64x64xf32, #tpu.memory_space<vmem>>, vector<1x64x64xf32>
    %757 = vector.shape_cast %756 : vector<1x64x64xf32> to vector<64x64xf32>
    %cst_715 = arith.constant dense<0.000000e+00> : vector<4x64xf32>
    %758 = tpu.matmul %577, %757, %cst_715 {dimension_numbers = #tpu.dot_dimension_numbers<[1], [0], [0], [1], [0, 0, 1, 1], [], []>} : vector<4x64xf32>, vector<64x64xf32>, vector<4x64xf32> -> vector<4x64xf32>
    %cst_716 = arith.constant dense<0.000000e+00> : vector<4x64xf32>
    %759 = tpu.matmul %755, %758, %cst_716 {dimension_numbers = #tpu.dot_dimension_numbers<[1], [0], [0], [1], [0, 0, 1, 1], [], []>} : vector<4x4xf32>, vector<4x64xf32>, vector<4x64xf32> -> vector<4x64xf32>
    %760 = arith.addf %753, %759 : vector<4x64xf32>
    %c1_717 = arith.constant 1 : index
    %c4_718 = arith.constant 4 : index
    %c12_719 = arith.constant 12 : index
    %c0_720 = arith.constant 0 : index
    %c0_721 = arith.constant 0 : index
    %761 = vector.load %arg7[%c1_717, %c4_718, %c12_719, %c0_720, %c0_721] : memref<2x14x25x4x4xf32, #tpu.memory_space<vmem>>, vector<1x1x1x4x4xf32>
    %762 = vector.shape_cast %761 : vector<1x1x1x4x4xf32> to vector<4x4xf32>
    %c12_722 = arith.constant 12 : index
    %c0_723 = arith.constant 0 : index
    %c0_724 = arith.constant 0 : index
    %763 = vector.load %arg3[%c12_722, %c0_723, %c0_724] : memref<25x64x64xf32, #tpu.memory_space<vmem>>, vector<1x64x64xf32>
    %764 = vector.shape_cast %763 : vector<1x64x64xf32> to vector<64x64xf32>
    %cst_725 = arith.constant dense<0.000000e+00> : vector<4x64xf32>
    %765 = tpu.matmul %577, %764, %cst_725 {dimension_numbers = #tpu.dot_dimension_numbers<[1], [0], [0], [1], [0, 0, 1, 1], [], []>} : vector<4x64xf32>, vector<64x64xf32>, vector<4x64xf32> -> vector<4x64xf32>
    %cst_726 = arith.constant dense<0.000000e+00> : vector<4x64xf32>
    %766 = tpu.matmul %762, %765, %cst_726 {dimension_numbers = #tpu.dot_dimension_numbers<[1], [0], [0], [1], [0, 0, 1, 1], [], []>} : vector<4x4xf32>, vector<4x64xf32>, vector<4x64xf32> -> vector<4x64xf32>
    %767 = arith.addf %760, %766 : vector<4x64xf32>
    %c1_727 = arith.constant 1 : index
    %c4_728 = arith.constant 4 : index
    %c13_729 = arith.constant 13 : index
    %c0_730 = arith.constant 0 : index
    %c0_731 = arith.constant 0 : index
    %768 = vector.load %arg7[%c1_727, %c4_728, %c13_729, %c0_730, %c0_731] : memref<2x14x25x4x4xf32, #tpu.memory_space<vmem>>, vector<1x1x1x4x4xf32>
    %769 = vector.shape_cast %768 : vector<1x1x1x4x4xf32> to vector<4x4xf32>
    %c13_732 = arith.constant 13 : index
    %c0_733 = arith.constant 0 : index
    %c0_734 = arith.constant 0 : index
    %770 = vector.load %arg3[%c13_732, %c0_733, %c0_734] : memref<25x64x64xf32, #tpu.memory_space<vmem>>, vector<1x64x64xf32>
    %771 = vector.shape_cast %770 : vector<1x64x64xf32> to vector<64x64xf32>
    %cst_735 = arith.constant dense<0.000000e+00> : vector<4x64xf32>
    %772 = tpu.matmul %577, %771, %cst_735 {dimension_numbers = #tpu.dot_dimension_numbers<[1], [0], [0], [1], [0, 0, 1, 1], [], []>} : vector<4x64xf32>, vector<64x64xf32>, vector<4x64xf32> -> vector<4x64xf32>
    %cst_736 = arith.constant dense<0.000000e+00> : vector<4x64xf32>
    %773 = tpu.matmul %769, %772, %cst_736 {dimension_numbers = #tpu.dot_dimension_numbers<[1], [0], [0], [1], [0, 0, 1, 1], [], []>} : vector<4x4xf32>, vector<4x64xf32>, vector<4x64xf32> -> vector<4x64xf32>
    %774 = arith.addf %767, %773 : vector<4x64xf32>
    %c1_737 = arith.constant 1 : index
    %c4_738 = arith.constant 4 : index
    %c14_739 = arith.constant 14 : index
    %c0_740 = arith.constant 0 : index
    %c0_741 = arith.constant 0 : index
    %775 = vector.load %arg7[%c1_737, %c4_738, %c14_739, %c0_740, %c0_741] : memref<2x14x25x4x4xf32, #tpu.memory_space<vmem>>, vector<1x1x1x4x4xf32>
    %776 = vector.shape_cast %775 : vector<1x1x1x4x4xf32> to vector<4x4xf32>
    %c14_742 = arith.constant 14 : index
    %c0_743 = arith.constant 0 : index
    %c0_744 = arith.constant 0 : index
    %777 = vector.load %arg3[%c14_742, %c0_743, %c0_744] : memref<25x64x64xf32, #tpu.memory_space<vmem>>, vector<1x64x64xf32>
    %778 = vector.shape_cast %777 : vector<1x64x64xf32> to vector<64x64xf32>
    %cst_745 = arith.constant dense<0.000000e+00> : vector<4x64xf32>
    %779 = tpu.matmul %577, %778, %cst_745 {dimension_numbers = #tpu.dot_dimension_numbers<[1], [0], [0], [1], [0, 0, 1, 1], [], []>} : vector<4x64xf32>, vector<64x64xf32>, vector<4x64xf32> -> vector<4x64xf32>
    %cst_746 = arith.constant dense<0.000000e+00> : vector<4x64xf32>
    %780 = tpu.matmul %776, %779, %cst_746 {dimension_numbers = #tpu.dot_dimension_numbers<[1], [0], [0], [1], [0, 0, 1, 1], [], []>} : vector<4x4xf32>, vector<4x64xf32>, vector<4x64xf32> -> vector<4x64xf32>
    %781 = arith.addf %774, %780 : vector<4x64xf32>
    %c1_747 = arith.constant 1 : index
    %c4_748 = arith.constant 4 : index
    %c15_749 = arith.constant 15 : index
    %c0_750 = arith.constant 0 : index
    %c0_751 = arith.constant 0 : index
    %782 = vector.load %arg7[%c1_747, %c4_748, %c15_749, %c0_750, %c0_751] : memref<2x14x25x4x4xf32, #tpu.memory_space<vmem>>, vector<1x1x1x4x4xf32>
    %783 = vector.shape_cast %782 : vector<1x1x1x4x4xf32> to vector<4x4xf32>
    %c15_752 = arith.constant 15 : index
    %c0_753 = arith.constant 0 : index
    %c0_754 = arith.constant 0 : index
    %784 = vector.load %arg3[%c15_752, %c0_753, %c0_754] : memref<25x64x64xf32, #tpu.memory_space<vmem>>, vector<1x64x64xf32>
    %785 = vector.shape_cast %784 : vector<1x64x64xf32> to vector<64x64xf32>
    %cst_755 = arith.constant dense<0.000000e+00> : vector<4x64xf32>
    %786 = tpu.matmul %577, %785, %cst_755 {dimension_numbers = #tpu.dot_dimension_numbers<[1], [0], [0], [1], [0, 0, 1, 1], [], []>} : vector<4x64xf32>, vector<64x64xf32>, vector<4x64xf32> -> vector<4x64xf32>
    %cst_756 = arith.constant dense<0.000000e+00> : vector<4x64xf32>
    %787 = tpu.matmul %783, %786, %cst_756 {dimension_numbers = #tpu.dot_dimension_numbers<[1], [0], [0], [1], [0, 0, 1, 1], [], []>} : vector<4x4xf32>, vector<4x64xf32>, vector<4x64xf32> -> vector<4x64xf32>
    %788 = arith.addf %781, %787 : vector<4x64xf32>
    %c1_757 = arith.constant 1 : index
    %c4_758 = arith.constant 4 : index
    %c16_759 = arith.constant 16 : index
    %c0_760 = arith.constant 0 : index
    %c0_761 = arith.constant 0 : index
    %789 = vector.load %arg7[%c1_757, %c4_758, %c16_759, %c0_760, %c0_761] : memref<2x14x25x4x4xf32, #tpu.memory_space<vmem>>, vector<1x1x1x4x4xf32>
    %790 = vector.shape_cast %789 : vector<1x1x1x4x4xf32> to vector<4x4xf32>
    %c16_762 = arith.constant 16 : index
    %c0_763 = arith.constant 0 : index
    %c0_764 = arith.constant 0 : index
    %791 = vector.load %arg3[%c16_762, %c0_763, %c0_764] : memref<25x64x64xf32, #tpu.memory_space<vmem>>, vector<1x64x64xf32>
    %792 = vector.shape_cast %791 : vector<1x64x64xf32> to vector<64x64xf32>
    %cst_765 = arith.constant dense<0.000000e+00> : vector<4x64xf32>
    %793 = tpu.matmul %577, %792, %cst_765 {dimension_numbers = #tpu.dot_dimension_numbers<[1], [0], [0], [1], [0, 0, 1, 1], [], []>} : vector<4x64xf32>, vector<64x64xf32>, vector<4x64xf32> -> vector<4x64xf32>
    %cst_766 = arith.constant dense<0.000000e+00> : vector<4x64xf32>
    %794 = tpu.matmul %790, %793, %cst_766 {dimension_numbers = #tpu.dot_dimension_numbers<[1], [0], [0], [1], [0, 0, 1, 1], [], []>} : vector<4x4xf32>, vector<4x64xf32>, vector<4x64xf32> -> vector<4x64xf32>
    %795 = arith.addf %788, %794 : vector<4x64xf32>
    %c1_767 = arith.constant 1 : index
    %c4_768 = arith.constant 4 : index
    %c17_769 = arith.constant 17 : index
    %c0_770 = arith.constant 0 : index
    %c0_771 = arith.constant 0 : index
    %796 = vector.load %arg7[%c1_767, %c4_768, %c17_769, %c0_770, %c0_771] : memref<2x14x25x4x4xf32, #tpu.memory_space<vmem>>, vector<1x1x1x4x4xf32>
    %797 = vector.shape_cast %796 : vector<1x1x1x4x4xf32> to vector<4x4xf32>
    %c17_772 = arith.constant 17 : index
    %c0_773 = arith.constant 0 : index
    %c0_774 = arith.constant 0 : index
    %798 = vector.load %arg3[%c17_772, %c0_773, %c0_774] : memref<25x64x64xf32, #tpu.memory_space<vmem>>, vector<1x64x64xf32>
    %799 = vector.shape_cast %798 : vector<1x64x64xf32> to vector<64x64xf32>
    %cst_775 = arith.constant dense<0.000000e+00> : vector<4x64xf32>
    %800 = tpu.matmul %577, %799, %cst_775 {dimension_numbers = #tpu.dot_dimension_numbers<[1], [0], [0], [1], [0, 0, 1, 1], [], []>} : vector<4x64xf32>, vector<64x64xf32>, vector<4x64xf32> -> vector<4x64xf32>
    %cst_776 = arith.constant dense<0.000000e+00> : vector<4x64xf32>
    %801 = tpu.matmul %797, %800, %cst_776 {dimension_numbers = #tpu.dot_dimension_numbers<[1], [0], [0], [1], [0, 0, 1, 1], [], []>} : vector<4x4xf32>, vector<4x64xf32>, vector<4x64xf32> -> vector<4x64xf32>
    %802 = arith.addf %795, %801 : vector<4x64xf32>
    %c1_777 = arith.constant 1 : index
    %c4_778 = arith.constant 4 : index
    %c18_779 = arith.constant 18 : index
    %c0_780 = arith.constant 0 : index
    %c0_781 = arith.constant 0 : index
    %803 = vector.load %arg7[%c1_777, %c4_778, %c18_779, %c0_780, %c0_781] : memref<2x14x25x4x4xf32, #tpu.memory_space<vmem>>, vector<1x1x1x4x4xf32>
    %804 = vector.shape_cast %803 : vector<1x1x1x4x4xf32> to vector<4x4xf32>
    %c18_782 = arith.constant 18 : index
    %c0_783 = arith.constant 0 : index
    %c0_784 = arith.constant 0 : index
    %805 = vector.load %arg3[%c18_782, %c0_783, %c0_784] : memref<25x64x64xf32, #tpu.memory_space<vmem>>, vector<1x64x64xf32>
    %806 = vector.shape_cast %805 : vector<1x64x64xf32> to vector<64x64xf32>
    %cst_785 = arith.constant dense<0.000000e+00> : vector<4x64xf32>
    %807 = tpu.matmul %577, %806, %cst_785 {dimension_numbers = #tpu.dot_dimension_numbers<[1], [0], [0], [1], [0, 0, 1, 1], [], []>} : vector<4x64xf32>, vector<64x64xf32>, vector<4x64xf32> -> vector<4x64xf32>
    %cst_786 = arith.constant dense<0.000000e+00> : vector<4x64xf32>
    %808 = tpu.matmul %804, %807, %cst_786 {dimension_numbers = #tpu.dot_dimension_numbers<[1], [0], [0], [1], [0, 0, 1, 1], [], []>} : vector<4x4xf32>, vector<4x64xf32>, vector<4x64xf32> -> vector<4x64xf32>
    %809 = arith.addf %802, %808 : vector<4x64xf32>
    %c1_787 = arith.constant 1 : index
    %c4_788 = arith.constant 4 : index
    %c19_789 = arith.constant 19 : index
    %c0_790 = arith.constant 0 : index
    %c0_791 = arith.constant 0 : index
    %810 = vector.load %arg7[%c1_787, %c4_788, %c19_789, %c0_790, %c0_791] : memref<2x14x25x4x4xf32, #tpu.memory_space<vmem>>, vector<1x1x1x4x4xf32>
    %811 = vector.shape_cast %810 : vector<1x1x1x4x4xf32> to vector<4x4xf32>
    %c19_792 = arith.constant 19 : index
    %c0_793 = arith.constant 0 : index
    %c0_794 = arith.constant 0 : index
    %812 = vector.load %arg3[%c19_792, %c0_793, %c0_794] : memref<25x64x64xf32, #tpu.memory_space<vmem>>, vector<1x64x64xf32>
    %813 = vector.shape_cast %812 : vector<1x64x64xf32> to vector<64x64xf32>
    %cst_795 = arith.constant dense<0.000000e+00> : vector<4x64xf32>
    %814 = tpu.matmul %577, %813, %cst_795 {dimension_numbers = #tpu.dot_dimension_numbers<[1], [0], [0], [1], [0, 0, 1, 1], [], []>} : vector<4x64xf32>, vector<64x64xf32>, vector<4x64xf32> -> vector<4x64xf32>
    %cst_796 = arith.constant dense<0.000000e+00> : vector<4x64xf32>
    %815 = tpu.matmul %811, %814, %cst_796 {dimension_numbers = #tpu.dot_dimension_numbers<[1], [0], [0], [1], [0, 0, 1, 1], [], []>} : vector<4x4xf32>, vector<4x64xf32>, vector<4x64xf32> -> vector<4x64xf32>
    %816 = arith.addf %809, %815 : vector<4x64xf32>
    %c1_797 = arith.constant 1 : index
    %c4_798 = arith.constant 4 : index
    %c20_799 = arith.constant 20 : index
    %c0_800 = arith.constant 0 : index
    %c0_801 = arith.constant 0 : index
    %817 = vector.load %arg7[%c1_797, %c4_798, %c20_799, %c0_800, %c0_801] : memref<2x14x25x4x4xf32, #tpu.memory_space<vmem>>, vector<1x1x1x4x4xf32>
    %818 = vector.shape_cast %817 : vector<1x1x1x4x4xf32> to vector<4x4xf32>
    %c20_802 = arith.constant 20 : index
    %c0_803 = arith.constant 0 : index
    %c0_804 = arith.constant 0 : index
    %819 = vector.load %arg3[%c20_802, %c0_803, %c0_804] : memref<25x64x64xf32, #tpu.memory_space<vmem>>, vector<1x64x64xf32>
    %820 = vector.shape_cast %819 : vector<1x64x64xf32> to vector<64x64xf32>
    %cst_805 = arith.constant dense<0.000000e+00> : vector<4x64xf32>
    %821 = tpu.matmul %577, %820, %cst_805 {dimension_numbers = #tpu.dot_dimension_numbers<[1], [0], [0], [1], [0, 0, 1, 1], [], []>} : vector<4x64xf32>, vector<64x64xf32>, vector<4x64xf32> -> vector<4x64xf32>
    %cst_806 = arith.constant dense<0.000000e+00> : vector<4x64xf32>
    %822 = tpu.matmul %818, %821, %cst_806 {dimension_numbers = #tpu.dot_dimension_numbers<[1], [0], [0], [1], [0, 0, 1, 1], [], []>} : vector<4x4xf32>, vector<4x64xf32>, vector<4x64xf32> -> vector<4x64xf32>
    %823 = arith.addf %816, %822 : vector<4x64xf32>
    %c1_807 = arith.constant 1 : index
    %c4_808 = arith.constant 4 : index
    %c21_809 = arith.constant 21 : index
    %c0_810 = arith.constant 0 : index
    %c0_811 = arith.constant 0 : index
    %824 = vector.load %arg7[%c1_807, %c4_808, %c21_809, %c0_810, %c0_811] : memref<2x14x25x4x4xf32, #tpu.memory_space<vmem>>, vector<1x1x1x4x4xf32>
    %825 = vector.shape_cast %824 : vector<1x1x1x4x4xf32> to vector<4x4xf32>
    %c21_812 = arith.constant 21 : index
    %c0_813 = arith.constant 0 : index
    %c0_814 = arith.constant 0 : index
    %826 = vector.load %arg3[%c21_812, %c0_813, %c0_814] : memref<25x64x64xf32, #tpu.memory_space<vmem>>, vector<1x64x64xf32>
    %827 = vector.shape_cast %826 : vector<1x64x64xf32> to vector<64x64xf32>
    %cst_815 = arith.constant dense<0.000000e+00> : vector<4x64xf32>
    %828 = tpu.matmul %577, %827, %cst_815 {dimension_numbers = #tpu.dot_dimension_numbers<[1], [0], [0], [1], [0, 0, 1, 1], [], []>} : vector<4x64xf32>, vector<64x64xf32>, vector<4x64xf32> -> vector<4x64xf32>
    %cst_816 = arith.constant dense<0.000000e+00> : vector<4x64xf32>
    %829 = tpu.matmul %825, %828, %cst_816 {dimension_numbers = #tpu.dot_dimension_numbers<[1], [0], [0], [1], [0, 0, 1, 1], [], []>} : vector<4x4xf32>, vector<4x64xf32>, vector<4x64xf32> -> vector<4x64xf32>
    %830 = arith.addf %823, %829 : vector<4x64xf32>
    %c1_817 = arith.constant 1 : index
    %c4_818 = arith.constant 4 : index
    %c22_819 = arith.constant 22 : index
    %c0_820 = arith.constant 0 : index
    %c0_821 = arith.constant 0 : index
    %831 = vector.load %arg7[%c1_817, %c4_818, %c22_819, %c0_820, %c0_821] : memref<2x14x25x4x4xf32, #tpu.memory_space<vmem>>, vector<1x1x1x4x4xf32>
    %832 = vector.shape_cast %831 : vector<1x1x1x4x4xf32> to vector<4x4xf32>
    %c22_822 = arith.constant 22 : index
    %c0_823 = arith.constant 0 : index
    %c0_824 = arith.constant 0 : index
    %833 = vector.load %arg3[%c22_822, %c0_823, %c0_824] : memref<25x64x64xf32, #tpu.memory_space<vmem>>, vector<1x64x64xf32>
    %834 = vector.shape_cast %833 : vector<1x64x64xf32> to vector<64x64xf32>
    %cst_825 = arith.constant dense<0.000000e+00> : vector<4x64xf32>
    %835 = tpu.matmul %577, %834, %cst_825 {dimension_numbers = #tpu.dot_dimension_numbers<[1], [0], [0], [1], [0, 0, 1, 1], [], []>} : vector<4x64xf32>, vector<64x64xf32>, vector<4x64xf32> -> vector<4x64xf32>
    %cst_826 = arith.constant dense<0.000000e+00> : vector<4x64xf32>
    %836 = tpu.matmul %832, %835, %cst_826 {dimension_numbers = #tpu.dot_dimension_numbers<[1], [0], [0], [1], [0, 0, 1, 1], [], []>} : vector<4x4xf32>, vector<4x64xf32>, vector<4x64xf32> -> vector<4x64xf32>
    %837 = arith.addf %830, %836 : vector<4x64xf32>
    %c1_827 = arith.constant 1 : index
    %c4_828 = arith.constant 4 : index
    %c23_829 = arith.constant 23 : index
    %c0_830 = arith.constant 0 : index
    %c0_831 = arith.constant 0 : index
    %838 = vector.load %arg7[%c1_827, %c4_828, %c23_829, %c0_830, %c0_831] : memref<2x14x25x4x4xf32, #tpu.memory_space<vmem>>, vector<1x1x1x4x4xf32>
    %839 = vector.shape_cast %838 : vector<1x1x1x4x4xf32> to vector<4x4xf32>
    %c23_832 = arith.constant 23 : index
    %c0_833 = arith.constant 0 : index
    %c0_834 = arith.constant 0 : index
    %840 = vector.load %arg3[%c23_832, %c0_833, %c0_834] : memref<25x64x64xf32, #tpu.memory_space<vmem>>, vector<1x64x64xf32>
    %841 = vector.shape_cast %840 : vector<1x64x64xf32> to vector<64x64xf32>
    %cst_835 = arith.constant dense<0.000000e+00> : vector<4x64xf32>
    %842 = tpu.matmul %577, %841, %cst_835 {dimension_numbers = #tpu.dot_dimension_numbers<[1], [0], [0], [1], [0, 0, 1, 1], [], []>} : vector<4x64xf32>, vector<64x64xf32>, vector<4x64xf32> -> vector<4x64xf32>
    %cst_836 = arith.constant dense<0.000000e+00> : vector<4x64xf32>
    %843 = tpu.matmul %839, %842, %cst_836 {dimension_numbers = #tpu.dot_dimension_numbers<[1], [0], [0], [1], [0, 0, 1, 1], [], []>} : vector<4x4xf32>, vector<4x64xf32>, vector<4x64xf32> -> vector<4x64xf32>
    %844 = arith.addf %837, %843 : vector<4x64xf32>
    %c1_837 = arith.constant 1 : index
    %c4_838 = arith.constant 4 : index
    %c24_839 = arith.constant 24 : index
    %c0_840 = arith.constant 0 : index
    %c0_841 = arith.constant 0 : index
    %845 = vector.load %arg7[%c1_837, %c4_838, %c24_839, %c0_840, %c0_841] : memref<2x14x25x4x4xf32, #tpu.memory_space<vmem>>, vector<1x1x1x4x4xf32>
    %846 = vector.shape_cast %845 : vector<1x1x1x4x4xf32> to vector<4x4xf32>
    %c24_842 = arith.constant 24 : index
    %c0_843 = arith.constant 0 : index
    %c0_844 = arith.constant 0 : index
    %847 = vector.load %arg3[%c24_842, %c0_843, %c0_844] : memref<25x64x64xf32, #tpu.memory_space<vmem>>, vector<1x64x64xf32>
    %848 = vector.shape_cast %847 : vector<1x64x64xf32> to vector<64x64xf32>
    %cst_845 = arith.constant dense<0.000000e+00> : vector<4x64xf32>
    %849 = tpu.matmul %577, %848, %cst_845 {dimension_numbers = #tpu.dot_dimension_numbers<[1], [0], [0], [1], [0, 0, 1, 1], [], []>} : vector<4x64xf32>, vector<64x64xf32>, vector<4x64xf32> -> vector<4x64xf32>
    %cst_846 = arith.constant dense<0.000000e+00> : vector<4x64xf32>
    %850 = tpu.matmul %846, %849, %cst_846 {dimension_numbers = #tpu.dot_dimension_numbers<[1], [0], [0], [1], [0, 0, 1, 1], [], []>} : vector<4x4xf32>, vector<4x64xf32>, vector<4x64xf32> -> vector<4x64xf32>
    %851 = arith.addf %844, %850 : vector<4x64xf32>
    %cst_847 = arith.constant 2.000000e-01 : f32
    %852 = vector.broadcast %cst_847 : f32 to vector<4x64xf32>
    %853 = arith.mulf %852, %851 : vector<4x64xf32>
    %854 = arith.maximumf %851, %853 : vector<4x64xf32>
    %855 = arith.mulf %854, %854 : vector<4x64xf32>
    %cst_848 = arith.constant dense<0.000000e+00> : vector<1x64xf32>
    %856 = tpu.matmul %0, %855, %cst_848 {dimension_numbers = #tpu.dot_dimension_numbers<[1], [0], [0], [1], [0, 0, 1, 1], [], []>} : vector<1x4xf32>, vector<4x64xf32>, vector<1x64xf32> -> vector<1x64xf32>
    %cst_849 = arith.constant 2.500000e-01 : f32
    %857 = vector.broadcast %cst_849 : f32 to vector<1x64xf32>
    %858 = arith.mulf %856, %857 : vector<1x64xf32>
    %cst_850 = arith.constant 9.99999993E-9 : f32
    %859 = vector.broadcast %cst_850 : f32 to vector<1x64xf32>
    %860 = arith.addf %858, %859 : vector<1x64xf32>
    %861 = math.rsqrt %860 : vector<1x64xf32>
    %862 = vector.broadcast %861 : vector<1x64xf32> to vector<4x64xf32>
    %863 = arith.mulf %854, %862 : vector<4x64xf32>
    %864 = arith.addf %658, %863 : vector<4x64xf32>
    %cst_851 = arith.constant 0.000000e+00 : f32
    %865 = vector.broadcast %cst_851 : f32 to vector<4x64xf32>
    %866 = arith.addf %865, %723 : vector<4x64xf32>
    %867 = arith.addf %866, %730 : vector<4x64xf32>
    %868 = arith.addf %867, %737 : vector<4x64xf32>
    %869 = arith.addf %868, %758 : vector<4x64xf32>
    %870 = arith.addf %869, %765 : vector<4x64xf32>
    %871 = arith.addf %870, %772 : vector<4x64xf32>
    %872 = arith.addf %871, %793 : vector<4x64xf32>
    %873 = arith.addf %872, %800 : vector<4x64xf32>
    %874 = arith.addf %873, %807 : vector<4x64xf32>
    %cst_852 = arith.constant 0.111111112 : f32
    %875 = vector.broadcast %cst_852 : f32 to vector<4x64xf32>
    %876 = arith.mulf %874, %875 : vector<4x64xf32>
    %cst_853 = arith.constant 2.000000e-01 : f32
    %877 = vector.broadcast %cst_853 : f32 to vector<4x64xf32>
    %878 = arith.mulf %877, %876 : vector<4x64xf32>
    %879 = arith.maximumf %876, %878 : vector<4x64xf32>
    %880 = arith.addf %659, %879 : vector<4x64xf32>
    %881 = vector.extract_strided_slice %1 {offsets = [0, 0], sizes = [1, 64], strides = [1, 1]} : vector<9x64xf32> to vector<1x64xf32>
    %cst_854 = arith.constant 5.000000e-01 : f32
    %882 = vector.broadcast %cst_854 : f32 to vector<1x64xf32>
    %883 = arith.cmpf ogt, %881, %882 : vector<1x64xf32>
    %cst_855 = arith.constant -1.000000e+30 : f32
    %884 = vector.shape_cast %883 : vector<1x64xi1> to vector<1x64xi1>
    %885 = vector.broadcast %884 : vector<1x64xi1> to vector<4x64xi1>
    %886 = vector.broadcast %cst_855 : f32 to vector<4x64xf32>
    %887 = arith.select %885, %723, %886 : vector<4x64xi1>, vector<4x64xf32>
    %888 = arith.maximumf %577, %887 : vector<4x64xf32>
    %889 = vector.extract_strided_slice %1 {offsets = [1, 0], sizes = [1, 64], strides = [1, 1]} : vector<9x64xf32> to vector<1x64xf32>
    %cst_856 = arith.constant 5.000000e-01 : f32
    %890 = vector.broadcast %cst_856 : f32 to vector<1x64xf32>
    %891 = arith.cmpf ogt, %889, %890 : vector<1x64xf32>
    %cst_857 = arith.constant -1.000000e+30 : f32
    %892 = vector.shape_cast %891 : vector<1x64xi1> to vector<1x64xi1>
    %893 = vector.broadcast %892 : vector<1x64xi1> to vector<4x64xi1>
    %894 = vector.broadcast %cst_857 : f32 to vector<4x64xf32>
    %895 = arith.select %893, %730, %894 : vector<4x64xi1>, vector<4x64xf32>
    %896 = arith.maximumf %888, %895 : vector<4x64xf32>
    %897 = vector.extract_strided_slice %1 {offsets = [2, 0], sizes = [1, 64], strides = [1, 1]} : vector<9x64xf32> to vector<1x64xf32>
    %cst_858 = arith.constant 5.000000e-01 : f32
    %898 = vector.broadcast %cst_858 : f32 to vector<1x64xf32>
    %899 = arith.cmpf ogt, %897, %898 : vector<1x64xf32>
    %cst_859 = arith.constant -1.000000e+30 : f32
    %900 = vector.shape_cast %899 : vector<1x64xi1> to vector<1x64xi1>
    %901 = vector.broadcast %900 : vector<1x64xi1> to vector<4x64xi1>
    %902 = vector.broadcast %cst_859 : f32 to vector<4x64xf32>
    %903 = arith.select %901, %737, %902 : vector<4x64xi1>, vector<4x64xf32>
    %904 = arith.maximumf %896, %903 : vector<4x64xf32>
    %905 = vector.extract_strided_slice %1 {offsets = [3, 0], sizes = [1, 64], strides = [1, 1]} : vector<9x64xf32> to vector<1x64xf32>
    %cst_860 = arith.constant 5.000000e-01 : f32
    %906 = vector.broadcast %cst_860 : f32 to vector<1x64xf32>
    %907 = arith.cmpf ogt, %905, %906 : vector<1x64xf32>
    %cst_861 = arith.constant -1.000000e+30 : f32
    %908 = vector.shape_cast %907 : vector<1x64xi1> to vector<1x64xi1>
    %909 = vector.broadcast %908 : vector<1x64xi1> to vector<4x64xi1>
    %910 = vector.broadcast %cst_861 : f32 to vector<4x64xf32>
    %911 = arith.select %909, %758, %910 : vector<4x64xi1>, vector<4x64xf32>
    %912 = arith.maximumf %904, %911 : vector<4x64xf32>
    %913 = vector.extract_strided_slice %1 {offsets = [5, 0], sizes = [1, 64], strides = [1, 1]} : vector<9x64xf32> to vector<1x64xf32>
    %cst_862 = arith.constant 5.000000e-01 : f32
    %914 = vector.broadcast %cst_862 : f32 to vector<1x64xf32>
    %915 = arith.cmpf ogt, %913, %914 : vector<1x64xf32>
    %cst_863 = arith.constant -1.000000e+30 : f32
    %916 = vector.shape_cast %915 : vector<1x64xi1> to vector<1x64xi1>
    %917 = vector.broadcast %916 : vector<1x64xi1> to vector<4x64xi1>
    %918 = vector.broadcast %cst_863 : f32 to vector<4x64xf32>
    %919 = arith.select %917, %772, %918 : vector<4x64xi1>, vector<4x64xf32>
    %920 = arith.maximumf %912, %919 : vector<4x64xf32>
    %921 = vector.extract_strided_slice %1 {offsets = [6, 0], sizes = [1, 64], strides = [1, 1]} : vector<9x64xf32> to vector<1x64xf32>
    %cst_864 = arith.constant 5.000000e-01 : f32
    %922 = vector.broadcast %cst_864 : f32 to vector<1x64xf32>
    %923 = arith.cmpf ogt, %921, %922 : vector<1x64xf32>
    %cst_865 = arith.constant -1.000000e+30 : f32
    %924 = vector.shape_cast %923 : vector<1x64xi1> to vector<1x64xi1>
    %925 = vector.broadcast %924 : vector<1x64xi1> to vector<4x64xi1>
    %926 = vector.broadcast %cst_865 : f32 to vector<4x64xf32>
    %927 = arith.select %925, %793, %926 : vector<4x64xi1>, vector<4x64xf32>
    %928 = arith.maximumf %920, %927 : vector<4x64xf32>
    %929 = vector.extract_strided_slice %1 {offsets = [7, 0], sizes = [1, 64], strides = [1, 1]} : vector<9x64xf32> to vector<1x64xf32>
    %cst_866 = arith.constant 5.000000e-01 : f32
    %930 = vector.broadcast %cst_866 : f32 to vector<1x64xf32>
    %931 = arith.cmpf ogt, %929, %930 : vector<1x64xf32>
    %cst_867 = arith.constant -1.000000e+30 : f32
    %932 = vector.shape_cast %931 : vector<1x64xi1> to vector<1x64xi1>
    %933 = vector.broadcast %932 : vector<1x64xi1> to vector<4x64xi1>
    %934 = vector.broadcast %cst_867 : f32 to vector<4x64xf32>
    %935 = arith.select %933, %800, %934 : vector<4x64xi1>, vector<4x64xf32>
    %936 = arith.maximumf %928, %935 : vector<4x64xf32>
    %937 = vector.extract_strided_slice %1 {offsets = [8, 0], sizes = [1, 64], strides = [1, 1]} : vector<9x64xf32> to vector<1x64xf32>
    %cst_868 = arith.constant 5.000000e-01 : f32
    %938 = vector.broadcast %cst_868 : f32 to vector<1x64xf32>
    %939 = arith.cmpf ogt, %937, %938 : vector<1x64xf32>
    %cst_869 = arith.constant -1.000000e+30 : f32
    %940 = vector.shape_cast %939 : vector<1x64xi1> to vector<1x64xi1>
    %941 = vector.broadcast %940 : vector<1x64xi1> to vector<4x64xi1>
    %942 = vector.broadcast %cst_869 : f32 to vector<4x64xf32>
    %943 = arith.select %941, %807, %942 : vector<4x64xi1>, vector<4x64xf32>
    %944 = arith.maximumf %936, %943 : vector<4x64xf32>
    %cst_870 = arith.constant 2.000000e-01 : f32
    %945 = vector.broadcast %cst_870 : f32 to vector<4x64xf32>
    %946 = arith.mulf %945, %944 : vector<4x64xf32>
    %947 = arith.maximumf %944, %946 : vector<4x64xf32>
    %948 = arith.addf %580, %947 : vector<4x64xf32>
    %949 = arith.addf %880, %864 : vector<4x64xf32>
    %cst_871 = arith.constant 0.000000e+00 : f32
    %950 = vector.broadcast %cst_871 : f32 to vector<4x64xf32>
    %c6_872 = arith.constant 6 : index
    %c0_873 = arith.constant 0 : index
    %c0_874 = arith.constant 0 : index
    %951 = vector.load %arg3[%c6_872, %c0_873, %c0_874] : memref<25x64x64xf32, #tpu.memory_space<vmem>>, vector<1x64x64xf32>
    %952 = vector.shape_cast %951 : vector<1x64x64xf32> to vector<64x64xf32>
    %cst_875 = arith.constant dense<0.000000e+00> : vector<4x64xf32>
    %953 = tpu.matmul %864, %952, %cst_875 {dimension_numbers = #tpu.dot_dimension_numbers<[1], [0], [0], [1], [0, 0, 1, 1], [], []>} : vector<4x64xf32>, vector<64x64xf32>, vector<4x64xf32> -> vector<4x64xf32>
    %954 = arith.addf %950, %953 : vector<4x64xf32>
    %c7_876 = arith.constant 7 : index
    %c0_877 = arith.constant 0 : index
    %c0_878 = arith.constant 0 : index
    %955 = vector.load %arg3[%c7_876, %c0_877, %c0_878] : memref<25x64x64xf32, #tpu.memory_space<vmem>>, vector<1x64x64xf32>
    %956 = vector.shape_cast %955 : vector<1x64x64xf32> to vector<64x64xf32>
    %cst_879 = arith.constant dense<0.000000e+00> : vector<4x64xf32>
    %957 = tpu.matmul %864, %956, %cst_879 {dimension_numbers = #tpu.dot_dimension_numbers<[1], [0], [0], [1], [0, 0, 1, 1], [], []>} : vector<4x64xf32>, vector<64x64xf32>, vector<4x64xf32> -> vector<4x64xf32>
    %958 = arith.addf %954, %957 : vector<4x64xf32>
    %c8_880 = arith.constant 8 : index
    %c0_881 = arith.constant 0 : index
    %c0_882 = arith.constant 0 : index
    %959 = vector.load %arg3[%c8_880, %c0_881, %c0_882] : memref<25x64x64xf32, #tpu.memory_space<vmem>>, vector<1x64x64xf32>
    %960 = vector.shape_cast %959 : vector<1x64x64xf32> to vector<64x64xf32>
    %cst_883 = arith.constant dense<0.000000e+00> : vector<4x64xf32>
    %961 = tpu.matmul %864, %960, %cst_883 {dimension_numbers = #tpu.dot_dimension_numbers<[1], [0], [0], [1], [0, 0, 1, 1], [], []>} : vector<4x64xf32>, vector<64x64xf32>, vector<4x64xf32> -> vector<4x64xf32>
    %962 = arith.addf %958, %961 : vector<4x64xf32>
    %c11_884 = arith.constant 11 : index
    %c0_885 = arith.constant 0 : index
    %c0_886 = arith.constant 0 : index
    %963 = vector.load %arg3[%c11_884, %c0_885, %c0_886] : memref<25x64x64xf32, #tpu.memory_space<vmem>>, vector<1x64x64xf32>
    %964 = vector.shape_cast %963 : vector<1x64x64xf32> to vector<64x64xf32>
    %cst_887 = arith.constant dense<0.000000e+00> : vector<4x64xf32>
    %965 = tpu.matmul %864, %964, %cst_887 {dimension_numbers = #tpu.dot_dimension_numbers<[1], [0], [0], [1], [0, 0, 1, 1], [], []>} : vector<4x64xf32>, vector<64x64xf32>, vector<4x64xf32> -> vector<4x64xf32>
    %966 = arith.addf %962, %965 : vector<4x64xf32>
    %c12_888 = arith.constant 12 : index
    %c0_889 = arith.constant 0 : index
    %c0_890 = arith.constant 0 : index
    %967 = vector.load %arg3[%c12_888, %c0_889, %c0_890] : memref<25x64x64xf32, #tpu.memory_space<vmem>>, vector<1x64x64xf32>
    %968 = vector.shape_cast %967 : vector<1x64x64xf32> to vector<64x64xf32>
    %cst_891 = arith.constant dense<0.000000e+00> : vector<4x64xf32>
    %969 = tpu.matmul %864, %968, %cst_891 {dimension_numbers = #tpu.dot_dimension_numbers<[1], [0], [0], [1], [0, 0, 1, 1], [], []>} : vector<4x64xf32>, vector<64x64xf32>, vector<4x64xf32> -> vector<4x64xf32>
    %970 = arith.addf %966, %969 : vector<4x64xf32>
    %c13_892 = arith.constant 13 : index
    %c0_893 = arith.constant 0 : index
    %c0_894 = arith.constant 0 : index
    %971 = vector.load %arg3[%c13_892, %c0_893, %c0_894] : memref<25x64x64xf32, #tpu.memory_space<vmem>>, vector<1x64x64xf32>
    %972 = vector.shape_cast %971 : vector<1x64x64xf32> to vector<64x64xf32>
    %cst_895 = arith.constant dense<0.000000e+00> : vector<4x64xf32>
    %973 = tpu.matmul %864, %972, %cst_895 {dimension_numbers = #tpu.dot_dimension_numbers<[1], [0], [0], [1], [0, 0, 1, 1], [], []>} : vector<4x64xf32>, vector<64x64xf32>, vector<4x64xf32> -> vector<4x64xf32>
    %974 = arith.addf %970, %973 : vector<4x64xf32>
    %c16_896 = arith.constant 16 : index
    %c0_897 = arith.constant 0 : index
    %c0_898 = arith.constant 0 : index
    %975 = vector.load %arg3[%c16_896, %c0_897, %c0_898] : memref<25x64x64xf32, #tpu.memory_space<vmem>>, vector<1x64x64xf32>
    %976 = vector.shape_cast %975 : vector<1x64x64xf32> to vector<64x64xf32>
    %cst_899 = arith.constant dense<0.000000e+00> : vector<4x64xf32>
    %977 = tpu.matmul %864, %976, %cst_899 {dimension_numbers = #tpu.dot_dimension_numbers<[1], [0], [0], [1], [0, 0, 1, 1], [], []>} : vector<4x64xf32>, vector<64x64xf32>, vector<4x64xf32> -> vector<4x64xf32>
    %978 = arith.addf %974, %977 : vector<4x64xf32>
    %c17_900 = arith.constant 17 : index
    %c0_901 = arith.constant 0 : index
    %c0_902 = arith.constant 0 : index
    %979 = vector.load %arg3[%c17_900, %c0_901, %c0_902] : memref<25x64x64xf32, #tpu.memory_space<vmem>>, vector<1x64x64xf32>
    %980 = vector.shape_cast %979 : vector<1x64x64xf32> to vector<64x64xf32>
    %cst_903 = arith.constant dense<0.000000e+00> : vector<4x64xf32>
    %981 = tpu.matmul %864, %980, %cst_903 {dimension_numbers = #tpu.dot_dimension_numbers<[1], [0], [0], [1], [0, 0, 1, 1], [], []>} : vector<4x64xf32>, vector<64x64xf32>, vector<4x64xf32> -> vector<4x64xf32>
    %982 = arith.addf %978, %981 : vector<4x64xf32>
    %c18_904 = arith.constant 18 : index
    %c0_905 = arith.constant 0 : index
    %c0_906 = arith.constant 0 : index
    %983 = vector.load %arg3[%c18_904, %c0_905, %c0_906] : memref<25x64x64xf32, #tpu.memory_space<vmem>>, vector<1x64x64xf32>
    %984 = vector.shape_cast %983 : vector<1x64x64xf32> to vector<64x64xf32>
    %cst_907 = arith.constant dense<0.000000e+00> : vector<4x64xf32>
    %985 = tpu.matmul %864, %984, %cst_907 {dimension_numbers = #tpu.dot_dimension_numbers<[1], [0], [0], [1], [0, 0, 1, 1], [], []>} : vector<4x64xf32>, vector<64x64xf32>, vector<4x64xf32> -> vector<4x64xf32>
    %986 = arith.addf %982, %985 : vector<4x64xf32>
    %cst_908 = arith.constant 0.111111112 : f32
    %987 = vector.broadcast %cst_908 : f32 to vector<4x64xf32>
    %988 = arith.mulf %986, %987 : vector<4x64xf32>
    %cst_909 = arith.constant 2.000000e-01 : f32
    %989 = vector.broadcast %cst_909 : f32 to vector<4x64xf32>
    %990 = arith.mulf %989, %988 : vector<4x64xf32>
    %991 = arith.maximumf %988, %990 : vector<4x64xf32>
    %992 = arith.addf %675, %991 : vector<4x64xf32>
    %993 = vector.extract_strided_slice %1 {offsets = [0, 0], sizes = [1, 64], strides = [1, 1]} : vector<9x64xf32> to vector<1x64xf32>
    %cst_910 = arith.constant 5.000000e-01 : f32
    %994 = vector.broadcast %cst_910 : f32 to vector<1x64xf32>
    %995 = arith.cmpf ogt, %993, %994 : vector<1x64xf32>
    %c6_911 = arith.constant 6 : index
    %c0_912 = arith.constant 0 : index
    %c0_913 = arith.constant 0 : index
    %996 = vector.load %arg3[%c6_911, %c0_912, %c0_913] : memref<25x64x64xf32, #tpu.memory_space<vmem>>, vector<1x64x64xf32>
    %997 = vector.shape_cast %996 : vector<1x64x64xf32> to vector<64x64xf32>
    %cst_914 = arith.constant dense<0.000000e+00> : vector<4x64xf32>
    %998 = tpu.matmul %949, %997, %cst_914 {dimension_numbers = #tpu.dot_dimension_numbers<[1], [0], [0], [1], [0, 0, 1, 1], [], []>} : vector<4x64xf32>, vector<64x64xf32>, vector<4x64xf32> -> vector<4x64xf32>
    %cst_915 = arith.constant -1.000000e+30 : f32
    %999 = vector.shape_cast %995 : vector<1x64xi1> to vector<1x64xi1>
    %1000 = vector.broadcast %999 : vector<1x64xi1> to vector<4x64xi1>
    %1001 = vector.broadcast %cst_915 : f32 to vector<4x64xf32>
    %1002 = arith.select %1000, %998, %1001 : vector<4x64xi1>, vector<4x64xf32>
    %1003 = arith.maximumf %949, %1002 : vector<4x64xf32>
    %1004 = vector.extract_strided_slice %1 {offsets = [1, 0], sizes = [1, 64], strides = [1, 1]} : vector<9x64xf32> to vector<1x64xf32>
    %cst_916 = arith.constant 5.000000e-01 : f32
    %1005 = vector.broadcast %cst_916 : f32 to vector<1x64xf32>
    %1006 = arith.cmpf ogt, %1004, %1005 : vector<1x64xf32>
    %c7_917 = arith.constant 7 : index
    %c0_918 = arith.constant 0 : index
    %c0_919 = arith.constant 0 : index
    %1007 = vector.load %arg3[%c7_917, %c0_918, %c0_919] : memref<25x64x64xf32, #tpu.memory_space<vmem>>, vector<1x64x64xf32>
    %1008 = vector.shape_cast %1007 : vector<1x64x64xf32> to vector<64x64xf32>
    %cst_920 = arith.constant dense<0.000000e+00> : vector<4x64xf32>
    %1009 = tpu.matmul %949, %1008, %cst_920 {dimension_numbers = #tpu.dot_dimension_numbers<[1], [0], [0], [1], [0, 0, 1, 1], [], []>} : vector<4x64xf32>, vector<64x64xf32>, vector<4x64xf32> -> vector<4x64xf32>
    %cst_921 = arith.constant -1.000000e+30 : f32
    %1010 = vector.shape_cast %1006 : vector<1x64xi1> to vector<1x64xi1>
    %1011 = vector.broadcast %1010 : vector<1x64xi1> to vector<4x64xi1>
    %1012 = vector.broadcast %cst_921 : f32 to vector<4x64xf32>
    %1013 = arith.select %1011, %1009, %1012 : vector<4x64xi1>, vector<4x64xf32>
    %1014 = arith.maximumf %1003, %1013 : vector<4x64xf32>
    %1015 = vector.extract_strided_slice %1 {offsets = [2, 0], sizes = [1, 64], strides = [1, 1]} : vector<9x64xf32> to vector<1x64xf32>
    %cst_922 = arith.constant 5.000000e-01 : f32
    %1016 = vector.broadcast %cst_922 : f32 to vector<1x64xf32>
    %1017 = arith.cmpf ogt, %1015, %1016 : vector<1x64xf32>
    %c8_923 = arith.constant 8 : index
    %c0_924 = arith.constant 0 : index
    %c0_925 = arith.constant 0 : index
    %1018 = vector.load %arg3[%c8_923, %c0_924, %c0_925] : memref<25x64x64xf32, #tpu.memory_space<vmem>>, vector<1x64x64xf32>
    %1019 = vector.shape_cast %1018 : vector<1x64x64xf32> to vector<64x64xf32>
    %cst_926 = arith.constant dense<0.000000e+00> : vector<4x64xf32>
    %1020 = tpu.matmul %949, %1019, %cst_926 {dimension_numbers = #tpu.dot_dimension_numbers<[1], [0], [0], [1], [0, 0, 1, 1], [], []>} : vector<4x64xf32>, vector<64x64xf32>, vector<4x64xf32> -> vector<4x64xf32>
    %cst_927 = arith.constant -1.000000e+30 : f32
    %1021 = vector.shape_cast %1017 : vector<1x64xi1> to vector<1x64xi1>
    %1022 = vector.broadcast %1021 : vector<1x64xi1> to vector<4x64xi1>
    %1023 = vector.broadcast %cst_927 : f32 to vector<4x64xf32>
    %1024 = arith.select %1022, %1020, %1023 : vector<4x64xi1>, vector<4x64xf32>
    %1025 = arith.maximumf %1014, %1024 : vector<4x64xf32>
    %1026 = vector.extract_strided_slice %1 {offsets = [3, 0], sizes = [1, 64], strides = [1, 1]} : vector<9x64xf32> to vector<1x64xf32>
    %cst_928 = arith.constant 5.000000e-01 : f32
    %1027 = vector.broadcast %cst_928 : f32 to vector<1x64xf32>
    %1028 = arith.cmpf ogt, %1026, %1027 : vector<1x64xf32>
    %c11_929 = arith.constant 11 : index
    %c0_930 = arith.constant 0 : index
    %c0_931 = arith.constant 0 : index
    %1029 = vector.load %arg3[%c11_929, %c0_930, %c0_931] : memref<25x64x64xf32, #tpu.memory_space<vmem>>, vector<1x64x64xf32>
    %1030 = vector.shape_cast %1029 : vector<1x64x64xf32> to vector<64x64xf32>
    %cst_932 = arith.constant dense<0.000000e+00> : vector<4x64xf32>
    %1031 = tpu.matmul %949, %1030, %cst_932 {dimension_numbers = #tpu.dot_dimension_numbers<[1], [0], [0], [1], [0, 0, 1, 1], [], []>} : vector<4x64xf32>, vector<64x64xf32>, vector<4x64xf32> -> vector<4x64xf32>
    %cst_933 = arith.constant -1.000000e+30 : f32
    %1032 = vector.shape_cast %1028 : vector<1x64xi1> to vector<1x64xi1>
    %1033 = vector.broadcast %1032 : vector<1x64xi1> to vector<4x64xi1>
    %1034 = vector.broadcast %cst_933 : f32 to vector<4x64xf32>
    %1035 = arith.select %1033, %1031, %1034 : vector<4x64xi1>, vector<4x64xf32>
    %1036 = arith.maximumf %1025, %1035 : vector<4x64xf32>
    %1037 = vector.extract_strided_slice %1 {offsets = [5, 0], sizes = [1, 64], strides = [1, 1]} : vector<9x64xf32> to vector<1x64xf32>
    %cst_934 = arith.constant 5.000000e-01 : f32
    %1038 = vector.broadcast %cst_934 : f32 to vector<1x64xf32>
    %1039 = arith.cmpf ogt, %1037, %1038 : vector<1x64xf32>
    %c13_935 = arith.constant 13 : index
    %c0_936 = arith.constant 0 : index
    %c0_937 = arith.constant 0 : index
    %1040 = vector.load %arg3[%c13_935, %c0_936, %c0_937] : memref<25x64x64xf32, #tpu.memory_space<vmem>>, vector<1x64x64xf32>
    %1041 = vector.shape_cast %1040 : vector<1x64x64xf32> to vector<64x64xf32>
    %cst_938 = arith.constant dense<0.000000e+00> : vector<4x64xf32>
    %1042 = tpu.matmul %949, %1041, %cst_938 {dimension_numbers = #tpu.dot_dimension_numbers<[1], [0], [0], [1], [0, 0, 1, 1], [], []>} : vector<4x64xf32>, vector<64x64xf32>, vector<4x64xf32> -> vector<4x64xf32>
    %cst_939 = arith.constant -1.000000e+30 : f32
    %1043 = vector.shape_cast %1039 : vector<1x64xi1> to vector<1x64xi1>
    %1044 = vector.broadcast %1043 : vector<1x64xi1> to vector<4x64xi1>
    %1045 = vector.broadcast %cst_939 : f32 to vector<4x64xf32>
    %1046 = arith.select %1044, %1042, %1045 : vector<4x64xi1>, vector<4x64xf32>
    %1047 = arith.maximumf %1036, %1046 : vector<4x64xf32>
    %1048 = vector.extract_strided_slice %1 {offsets = [6, 0], sizes = [1, 64], strides = [1, 1]} : vector<9x64xf32> to vector<1x64xf32>
    %cst_940 = arith.constant 5.000000e-01 : f32
    %1049 = vector.broadcast %cst_940 : f32 to vector<1x64xf32>
    %1050 = arith.cmpf ogt, %1048, %1049 : vector<1x64xf32>
    %c16_941 = arith.constant 16 : index
    %c0_942 = arith.constant 0 : index
    %c0_943 = arith.constant 0 : index
    %1051 = vector.load %arg3[%c16_941, %c0_942, %c0_943] : memref<25x64x64xf32, #tpu.memory_space<vmem>>, vector<1x64x64xf32>
    %1052 = vector.shape_cast %1051 : vector<1x64x64xf32> to vector<64x64xf32>
    %cst_944 = arith.constant dense<0.000000e+00> : vector<4x64xf32>
    %1053 = tpu.matmul %949, %1052, %cst_944 {dimension_numbers = #tpu.dot_dimension_numbers<[1], [0], [0], [1], [0, 0, 1, 1], [], []>} : vector<4x64xf32>, vector<64x64xf32>, vector<4x64xf32> -> vector<4x64xf32>
    %cst_945 = arith.constant -1.000000e+30 : f32
    %1054 = vector.shape_cast %1050 : vector<1x64xi1> to vector<1x64xi1>
    %1055 = vector.broadcast %1054 : vector<1x64xi1> to vector<4x64xi1>
    %1056 = vector.broadcast %cst_945 : f32 to vector<4x64xf32>
    %1057 = arith.select %1055, %1053, %1056 : vector<4x64xi1>, vector<4x64xf32>
    %1058 = arith.maximumf %1047, %1057 : vector<4x64xf32>
    %1059 = vector.extract_strided_slice %1 {offsets = [7, 0], sizes = [1, 64], strides = [1, 1]} : vector<9x64xf32> to vector<1x64xf32>
    %cst_946 = arith.constant 5.000000e-01 : f32
    %1060 = vector.broadcast %cst_946 : f32 to vector<1x64xf32>
    %1061 = arith.cmpf ogt, %1059, %1060 : vector<1x64xf32>
    %c17_947 = arith.constant 17 : index
    %c0_948 = arith.constant 0 : index
    %c0_949 = arith.constant 0 : index
    %1062 = vector.load %arg3[%c17_947, %c0_948, %c0_949] : memref<25x64x64xf32, #tpu.memory_space<vmem>>, vector<1x64x64xf32>
    %1063 = vector.shape_cast %1062 : vector<1x64x64xf32> to vector<64x64xf32>
    %cst_950 = arith.constant dense<0.000000e+00> : vector<4x64xf32>
    %1064 = tpu.matmul %949, %1063, %cst_950 {dimension_numbers = #tpu.dot_dimension_numbers<[1], [0], [0], [1], [0, 0, 1, 1], [], []>} : vector<4x64xf32>, vector<64x64xf32>, vector<4x64xf32> -> vector<4x64xf32>
    %cst_951 = arith.constant -1.000000e+30 : f32
    %1065 = vector.shape_cast %1061 : vector<1x64xi1> to vector<1x64xi1>
    %1066 = vector.broadcast %1065 : vector<1x64xi1> to vector<4x64xi1>
    %1067 = vector.broadcast %cst_951 : f32 to vector<4x64xf32>
    %1068 = arith.select %1066, %1064, %1067 : vector<4x64xi1>, vector<4x64xf32>
    %1069 = arith.maximumf %1058, %1068 : vector<4x64xf32>
    %1070 = vector.extract_strided_slice %1 {offsets = [8, 0], sizes = [1, 64], strides = [1, 1]} : vector<9x64xf32> to vector<1x64xf32>
    %cst_952 = arith.constant 5.000000e-01 : f32
    %1071 = vector.broadcast %cst_952 : f32 to vector<1x64xf32>
    %1072 = arith.cmpf ogt, %1070, %1071 : vector<1x64xf32>
    %c18_953 = arith.constant 18 : index
    %c0_954 = arith.constant 0 : index
    %c0_955 = arith.constant 0 : index
    %1073 = vector.load %arg3[%c18_953, %c0_954, %c0_955] : memref<25x64x64xf32, #tpu.memory_space<vmem>>, vector<1x64x64xf32>
    %1074 = vector.shape_cast %1073 : vector<1x64x64xf32> to vector<64x64xf32>
    %cst_956 = arith.constant dense<0.000000e+00> : vector<4x64xf32>
    %1075 = tpu.matmul %949, %1074, %cst_956 {dimension_numbers = #tpu.dot_dimension_numbers<[1], [0], [0], [1], [0, 0, 1, 1], [], []>} : vector<4x64xf32>, vector<64x64xf32>, vector<4x64xf32> -> vector<4x64xf32>
    %cst_957 = arith.constant -1.000000e+30 : f32
    %1076 = vector.shape_cast %1072 : vector<1x64xi1> to vector<1x64xi1>
    %1077 = vector.broadcast %1076 : vector<1x64xi1> to vector<4x64xi1>
    %1078 = vector.broadcast %cst_957 : f32 to vector<4x64xf32>
    %1079 = arith.select %1077, %1075, %1078 : vector<4x64xi1>, vector<4x64xf32>
    %1080 = arith.maximumf %1069, %1079 : vector<4x64xf32>
    %cst_958 = arith.constant 2.000000e-01 : f32
    %1081 = vector.broadcast %cst_958 : f32 to vector<4x64xf32>
    %1082 = arith.mulf %1081, %1080 : vector<4x64xf32>
    %1083 = arith.maximumf %1080, %1082 : vector<4x64xf32>
    %1084 = arith.addf %948, %1083 : vector<4x64xf32>
    %c0_959 = arith.constant 0 : index
    %c0_960 = arith.constant 0 : index
    %1085 = vector.load %arg10[%c0_959, %c0_960] : memref<16x64xf32, #tpu.memory_space<vmem>>, vector<4x64xf32>
    tpu.vector_store %arg10[%c0_959, %c0_960], %864 {strides = array<i32>} : memref<16x64xf32, #tpu.memory_space<vmem>>, vector<4x64xf32>,
    %c4_961 = arith.constant 4 : index
    %c0_962 = arith.constant 0 : index
    %1086 = vector.load %arg10[%c4_961, %c0_962] : memref<16x64xf32, #tpu.memory_space<vmem>>, vector<4x64xf32>
    tpu.vector_store %arg10[%c4_961, %c0_962], %949 {strides = array<i32>} : memref<16x64xf32, #tpu.memory_space<vmem>>, vector<4x64xf32>,
    %c8_963 = arith.constant 8 : index
    %c0_964 = arith.constant 0 : index
    %1087 = vector.load %arg10[%c8_963, %c0_964] : memref<16x64xf32, #tpu.memory_space<vmem>>, vector<4x64xf32>
    tpu.vector_store %arg10[%c8_963, %c0_964], %1084 {strides = array<i32>} : memref<16x64xf32, #tpu.memory_space<vmem>>, vector<4x64xf32>,
    %c12_965 = arith.constant 12 : index
    %c0_966 = arith.constant 0 : index
    %1088 = vector.load %arg10[%c12_965, %c0_966] : memref<16x64xf32, #tpu.memory_space<vmem>>, vector<4x64xf32>
    tpu.vector_store %arg10[%c12_965, %c0_966], %992 {strides = array<i32>} : memref<16x64xf32, #tpu.memory_space<vmem>>, vector<4x64xf32>,
    %c0_967 = arith.constant 0 : index
    %c0_968 = arith.constant 0 : index
    %1089 = vector.load %arg10[%c0_967, %c0_968] : memref<16x64xf32, #tpu.memory_space<vmem>>, vector<16x64xf32>
    %c0_969 = arith.constant 0 : index
    %c0_970 = arith.constant 0 : index
    %c0_971 = arith.constant 0 : index
    %1090 = vector.load %arg8[%c0_969, %c0_970, %c0_971] : memref<1x16x64xf32, #tpu.memory_space<vmem>>, vector<1x16x64xf32>
    %1091 = vector.shape_cast %1090 : vector<1x16x64xf32> to vector<16x64xf32>
    %1092 = vector.shape_cast %1089 : vector<16x64xf32> to vector<1x16x64xf32>
    tpu.vector_store %arg8[%c0_969, %c0_970, %c0_971], %1092 {strides = array<i32>} : memref<1x16x64xf32, #tpu.memory_space<vmem>>, vector<1x16x64xf32>,
    %c0_972 = arith.constant 0 : index
    %c0_973 = arith.constant 0 : index
    %c0_974 = arith.constant 0 : index
    %1093 = vector.load %arg9[%c0_972, %c0_973, %c0_974] : memref<1x16x64xf32, #tpu.memory_space<vmem>>, vector<1x16x64xf32>
    %1094 = vector.shape_cast %1093 : vector<1x16x64xf32> to vector<16x64xf32>
    %1095 = vector.shape_cast %547 : vector<16x64xf32> to vector<1x16x64xf32>
    tpu.vector_store %arg9[%c0_972, %c0_973, %c0_974], %1095 {strides = array<i32>} : memref<1x16x64xf32, #tpu.memory_space<vmem>>, vector<1x16x64xf32>,
    return
  }
  func.func @transform_0(%arg0: i32) -> (i32, i32, i32) {
    %c0_i32 = arith.constant 0 : i32
    %c0_i32_0 = arith.constant 0 : i32
    %c0_i32_1 = arith.constant 0 : i32
    return %arg0, %c0_i32, %c0_i32_0 : i32, i32, i32
  }
  func.func @transform_1(%arg0: i32) -> (i32, i32, i32) {
    %c0_i32 = arith.constant 0 : i32
    %c0_i32_0 = arith.constant 0 : i32
    %c0_i32_1 = arith.constant 0 : i32
    return %arg0, %c0_i32, %c0_i32_0 : i32, i32, i32
  }
  func.func @transform_2(%arg0: i32) -> (i32, i32, i32) {
    %c0_i32 = arith.constant 0 : i32
    %c0_i32_0 = arith.constant 0 : i32
    %c0_i32_1 = arith.constant 0 : i32
    %c0_i32_2 = arith.constant 0 : i32
    return %c0_i32, %c0_i32_0, %c0_i32_1 : i32, i32, i32
  }
  func.func @transform_3(%arg0: i32) -> (i32, i32) {
    %c0_i32 = arith.constant 0 : i32
    %c0_i32_0 = arith.constant 0 : i32
    %c0_i32_1 = arith.constant 0 : i32
    return %c0_i32, %c0_i32_0 : i32, i32
  }
  func.func @transform_4(%arg0: i32) -> (i32, i32, i32, i32) {
    %c0_i32 = arith.constant 0 : i32
    %c0_i32_0 = arith.constant 0 : i32
    %c0_i32_1 = arith.constant 0 : i32
    %c0_i32_2 = arith.constant 0 : i32
    %c0_i32_3 = arith.constant 0 : i32
    return %c0_i32, %c0_i32_0, %c0_i32_1, %c0_i32_2 : i32, i32, i32, i32
  }
  func.func @transform_5(%arg0: i32) -> (i32, i32, i32, i32, i32) {
    %c0_i32 = arith.constant 0 : i32
    %c0_i32_0 = arith.constant 0 : i32
    %c0_i32_1 = arith.constant 0 : i32
    %c0_i32_2 = arith.constant 0 : i32
    %c0_i32_3 = arith.constant 0 : i32
    %c0_i32_4 = arith.constant 0 : i32
    return %c0_i32, %c0_i32_0, %c0_i32_1, %c0_i32_2, %c0_i32_3 : i32, i32, i32, i32, i32
  }
  func.func @transform_6(%arg0: i32) -> (i32, i32, i32, i32, i32) {
    %c0_i32 = arith.constant 0 : i32
    %c0_i32_0 = arith.constant 0 : i32
    %c0_i32_1 = arith.constant 0 : i32
    %c0_i32_2 = arith.constant 0 : i32
    %c0_i32_3 = arith.constant 0 : i32
    %c0_i32_4 = arith.constant 0 : i32
    return %c0_i32, %c0_i32_0, %c0_i32_1, %c0_i32_2, %c0_i32_3 : i32, i32, i32, i32, i32
  }
  func.func @transform_7(%arg0: i32) -> (i32, i32, i32) {
    %c0_i32 = arith.constant 0 : i32
    %c0_i32_0 = arith.constant 0 : i32
    %c0_i32_1 = arith.constant 0 : i32
    return %arg0, %c0_i32, %c0_i32_0 : i32, i32, i32
  }
  func.func @transform_8(%arg0: i32) -> (i32, i32, i32) {
    %c0_i32 = arith.constant 0 : i32
    %c0_i32_0 = arith.constant 0 : i32
    %c0_i32_1 = arith.constant 0 : i32
    return %arg0, %c0_i32, %c0_i32_0 : i32, i32, i32
  }
}

</mosaic_0001>

<bundles_post_ra>
// kernel: tpu_custom_call.1
= control target key start
LH: loop header
LB: loop body
LE: loop exit
PB: predicated region body
PF: predicated region fallthrough
CT: control target
= control target key end

     0   :  { %14 = vsyncpa [#allocation4], 0  ;;  %s23989_s0 = inlined_call_operand.vmem [shape: f32[2,16,64], index: 0, kind: input, shape index: {}]   ;;  %s23990_s1 = inlined_call_operand.vmem [shape: f32[2,16,64], index: 1, kind: input, shape index: {}]   ;;  %s23991_s2 = inlined_call_operand.vmem [shape: f32[25,64,64], index: 2, kind: input, shape index: {}]   ;;  %s23992_s3 = inlined_call_operand.vmem [shape: f32[9,64], index: 3, kind: input, shape index: {}]   ;;  %s23993_s4 = inlined_call_operand.vmem [shape: f32[2,2,4,16], index: 4, kind: input, shape index: {}]   ;;  %s23994_s5 = inlined_call_operand.vmem [shape: f32[2,14,9,4,4], index: 5, kind: input, shape index: {}]   ;;  %s23995_s6 = inlined_call_operand.vmem [shape: f32[2,14,25,4,4], index: 6, kind: input, shape index: {}]   ;;  %s23996_s7 = inlined_call_operand.hbm [shape: f32[2,16,64], index: 7, kind: output, shape index: {0}]   ;;  %s23997_s8 = inlined_call_operand.hbm [shape: f32[2,16,64], index: 8, kind: output, shape index: {1}]  }
   0x1   :  { %16 = vsyncpa [#allocation4 + $0x1], 0 }
   0x2   :  { %17 = vsyncpa [#allocation6], 0 }
   0x3   :  { %19 = vsyncpa [#allocation6 + $0x1], 0  ;;  %s20405_s27 = smov 0   ;;  %s20407_s28 = smov 0  }
   0x4   :  { %s20409_s29 = smov 0   ;;  %s20411_s30 = smov 0  }
   0x5 LB: > { %s20426_s9 = sadd.s32 4294967295, %s20349_s30   ;;  %s14630_s10 = sadd.s32 4294967294, %s20349_s30   ;;  %s20349_s30 = sphi %s20411_s30, %s24089_s30   ;;  %s20345_s29 = sphi %s20409_s29, %s24088_s29   ;;  %s20341_s28 = sphi %s20407_s28, %s24087_s28   ;;  %s20337_s27 = sphi %s20405_s27, %s24086_s27  }
   0x6   : > { %s20430_s11 = sadd.s32 1, %s20349_s30   ;;  %s189_s12 = sadd.s32 1, %s20345_s29 }
   0x7   : > { %s186_s13 = ssub.s32 %s20349_s30, %s20430_s11  ;;  %p199_p0 = scmp.ne.s32.totalorder %s20345_s29, %s20341_s28 }
   0x8   : > { %p187_p1 = scmp.eq.s32.totalorder %s186_s13, 0  ;;  %p200_p2 = scmp.eq.s32.totalorder %s20426_s9, 1 }
   0x9   : > { %p205_p3 = scmp.ne.s32.totalorder %s20341_s28, %s20337_s27  ;;  %p206_p4 = scmp.eq.s32.totalorder %s14630_s10, 1 }
   0xa   : > { %s20441_s14 = scalar_select %p187_p1, %s20345_s29, %s189_s12  }
   0xb   : > { %p20443_p5 = por %p200_p2, %p199_p0  ;;  %p20447_p6 = por %p206_p4, %p205_p3 }
   0xc   : > { %p14633_p7 = scmp.ge.s32.totalorder %s20349_s30, 1  ;;  %p281_p8 = scmp.lt.s32.totalorder %s20349_s30, 3 }
   0xe   : > { %p282_p9 = pnand %p14633_p7, %p281_p8 }
  0x10   : > { %285 = sbr.rel (%p282_p9) target bundleno = 9708 (0x25ec), region = 48 }
  0x17   : > { %p325_p10 = scmp.lt.s32.totalorder %s20426_s9, 1  ;;  %v24002_v0 = vmov 0.0|0.0   ;;  %vm20352_vm0 = vmmov 0   ;;  %v24000_v1 = vmov 0.0   ;;  %v341_v5 = vld [vmem:[%s23993_s4] sm:$0xf]  ;;  %v500_v32 = vlaneseq }
  0x18   : > { %18792 = vmatprep.subr.bf16.mxu0 %v24002_v0  ;;  %16450 = vmatprep.mubr.msk.f32.mxu0 %vm20352_vm0, %v24000_v1  ;;  %vm342_vm1 = vcmask 130048   ;;  %vm423_vm2 = vcmask 1043456   ;;  %vm419_vm3 = vcmask 31744   ;;  %v23998_v14 = vmov 1.0   ;;  %v14643_v15 = vld [vmem:[%s23993_s4 + $0x4] sm:$0xf] }
  0x19   : > { %s326_s17 = scalar_select %p325_p10, %s20426_s9, 1  ;;  %18798 = vmatprep.subr.bf16.mxu1 %v24002_v0  ;;  %16486 = vmatprep.mubr.msk.f32.mxu1 %vm20352_vm0, %v24000_v1  ;;  %v14647_v16 = vld [vmem:[%s23991_s2 + $0x180] sm:$0xff]  ;;  %v14648_v17 = vld [vmem:[%s23991_s2 + $0x188] sm:$0xff]  ;;  %v14649_v19 = vld [vmem:[%s23991_s2 + $0x190] sm:$0xff]  ;;  %v20542_v39 = vshrl.u32 %v500_v32, 7  ;;  %vm674_vm4 = vcmask 523264  }
  0x1a   : > { %v20500_v18 = vpack.c.bf16 %v14648_v17, %v14647_v16  ;;  %v14650_v20 = vld [vmem:[%s23991_s2 + $0x198] sm:$0xff]  ;;  %v14651_v22 = vld [vmem:[%s23991_s2 + $0x1a0] sm:$0xff]  ;;  %v14652_v23 = vld [vmem:[%s23991_s2 + $0x1a8] sm:$0xff]  ;;  %vm7443_vm15 = vcmask 519168   ;;  %s22000_s20 = sand.u32 1, %s20341_s28   ;;  %s20356_s19 = smov [#allocation5]  }
  0x1b   : > { %s15360_s18 = sshll.u32 %s326_s17, 4  ;;  %v20510_v21 = vpack.c.bf16 %v14650_v20, %v14649_v19  ;;  %v20520_v24 = vpack.c.bf16 %v14652_v23, %v14651_v22  ;;  %v14653_v25 = vld [vmem:[%s23991_s2 + $0x1b0] sm:$0xff]  ;;  %v14654_v26 = vld [vmem:[%s23991_s2 + $0x1b8] sm:$0xff]  ;;  %v14657_v36 = vld [vmem:[%s23991_s2 + $0x1c0] sm:$0xff]  ;;  %v20556_v44 = vsub.s32 0, %v20542_v39  ;;  %s14495_s17 = scalar_lea.sflag [#allocation6], %s22000_s20 }
  0x1c   : > { %s329_s21 = scalar_lea.vmem %s23989_s0, %s15360_s18  ;;  %s334_s26 = scalar_lea.vmem %s23990_s1, %s15360_s18  ;;  %18800 = vmatpush3.bf16.msra.mxu1 %v20500_v18  ;;  %v20530_v27 = vpack.c.bf16 %v14654_v26, %v14653_v25  ;;  %v14658_v37 = vld [vmem:[%s23991_s2 + $0x1c8] sm:$0xff]  ;;  %v14659_v42 = vld [vmem:[%s23991_s2 + $0x1d0] sm:$0xff]  ;;  %v14660_v43 = vld [vmem:[%s23991_s2 + $0x1d8] sm:$0xff] }
  0x1d   : > { %v337_v2 = vld [vmem:[%s329_s21] sm:$0xff]  ;;  %v338_v3 = vld [vmem:[%s329_s21 + $0x8] sm:$0xff]  ;;  %18801 = vmatprep.subr.bf16.mxu1 %v24002_v0  ;;  %v20546_v41 = vpack.c.bf16 %v14658_v37, %v14657_v36  ;;  %v20562_v45 = vpack.c.bf16 %v14660_v43, %v14659_v42  ;;  %v14663_v52 = vld [vmem:[%s23991_s2 + $0x1f0] sm:$0xff]  ;;  %s14634_s21 = sshll.u32 %s22000_s20, 4  ;;  %s20259_s23 = sshll.u32 %s20356_s19, 4  ;;  %s20260_s23 = int_to_ptr.vmem [resolvable:$false] %s20259_s23 }
  0x1e   : > { %v20464_v4 = vpack.c.bf16 %v338_v3, %v337_v2  ;;  %v339_v9 = vld [vmem:[%s334_s26] sm:$0xff]  ;;  %v340_v10 = vld [vmem:[%s334_s26 + $0x8] sm:$0xff]  ;;  %v14664_v53 = vld [vmem:[%s23991_s2 + $0x1f8] sm:$0xff]  ;;  %s22022_s22 = scalar_lea.vmem [#allocation5], %s14634_s21  ;;  %s23705_s25 = scalar_lea.vmem [#allocation3], %s14634_s21 }
  0x1f   : > { %v18796_v13 = vpack.c.bf16 %v340_v10, %v339_v9  ;;  %v14661_v46 = vld [vmem:[%s23991_s2 + $0x1e0] sm:$0xff]  ;;  %v14662_v47 = vld [vmem:[%s23991_s2 + $0x1e8] sm:$0xff]  ;;  %v20590_v54 = vpack.c.bf16 %v14664_v53, %v14663_v52  ;;  %v14673_v58 = vld [vmem:[%s23991_s2 + $0x210] sm:$0xff]  ;;  %s24036_s21 = sshll.u32 %s20426_s9, 8  ;;  %s14524_s13 = sshll.u32 %s22022_s22, 4  ;;  %s23887_s13 = int_to_ptr.vmem [resolvable:$true] %s14524_s13 }
  0x20   : > { %24039 = vst [vmem:[#allocation9_spill] sm:$0xff] %v20464_v4  ;;  %18794 = vmatpush3.bf16.msra.mxu0 %v20464_v4  ;;  %18803 = vmatpush3.bf16.msra.mxu1 %v20510_v21  ;;  %v20575_v50 = vpack.c.bf16 %v14662_v47, %v14661_v46  ;;  %v14671_v55 = vld [vmem:[%s23991_s2 + $0x200] sm:$0xff]  ;;  %v14672_v56 = vld [vmem:[%s23991_s2 + $0x208] sm:$0xff]  ;;  %v14674_v59 = vld [vmem:[%s23991_s2 + $0x218] sm:$0xff]  ;;  %s23884_s12 = scalar_lea.hbm %s23997_s8, %s24036_s21  ;;  %s20255_s18 = scalar_lea.vmem %s23887_s13, 256 }
  0x21   : > { %16453 = vmatprep.subr.mxu0 %v24000_v1  ;;  %18804 = vmatprep.subr.bf16.mxu1 %v24002_v0  ;;  %v20602_v57 = vpack.c.bf16 %v14672_v56, %v14671_v55  ;;  %v20614_v60 = vpack.c.bf16 %v14674_v59, %v14673_v58  ;;  %v14675_v61 = vld [vmem:[%s23991_s2 + $0x220] sm:$0xff]  ;;  %v14676_v62 = vld [vmem:[%s23991_s2 + $0x228] sm:$0xff]  ;;  %v14677_v2 = vld [vmem:[%s23991_s2 + $0x230] sm:$0xff]  ;;  %p20256_p11 = scmp.ne.s32.totalorder %s23887_s13, %s20255_s18  ;;  %s20261_s24 = scalar_lea.vmem %s20260_s23, 512 }
  0x22   : > { %v20626_v63 = vpack.c.bf16 %v14676_v62, %v14675_v61  ;;  %v14678_v3 = vld [vmem:[%s23991_s2 + $0x238] sm:$0xff]  ;;  %v14697_v9 = vld [vmem:[%s23991_s2 + $0x310] sm:$0xff]  ;;  %v14707_v20 = vld [vmem:[%s23991_s2 + $0x340] sm:$0xff]  ;;  %p20262_p0 = scmp.lt.s32.totalorder %s23887_s13, %s20260_s23  ;;  %p20263_p1 = scmp.lt.s32.totalorder %s20261_s24, %s20255_s18 }
  0x23   : > { %16451 = vmatmul.mubr.msk.f32.vlgmr.msra.gmra.mrb[0].mxu0 %vm342_vm1, %v341_v5  ;;  %v20636_v5 = vpack.c.bf16 %v14678_v3, %v14677_v2  ;;  %v14698_v10 = vld [vmem:[%s23991_s2 + $0x318] sm:$0xff]  ;;  %v14701_v16 = vld [vmem:[%s23991_s2 + $0x330] sm:$0xff]  ;;  %v14708_v22 = vld [vmem:[%s23991_s2 + $0x348] sm:$0xff]  ;;  %p20257_p12 = pnand %p20256_p11, %p20443_p5 }
  0x24   : > { %16455 = vmatprep.mubr.msk.f32.mxu0 %vm20352_vm0, %v24000_v1  ;;  %18806 = vmatpush3.bf16.msra.mxu1 %v20520_v24  ;;  %v14702_v17 = vld [vmem:[%s23991_s2 + $0x338] sm:$0xff]  ;;  %v20690_v23 = vpack.c.bf16 %v14708_v22, %v14707_v20  ;;  %v14709_v25 = vld [vmem:[%s23991_s2 + $0x350] sm:$0xff]  ;;  %v14732_v36 = vld [vmem:[%s23991_s2 + $0x448] sm:$0xff]  ;;  %p20264_p2 = por %p20263_p1, %p20262_p0 }
  0x25   : > { %18807 = vmatprep.subr.bf16.mxu1 %v24002_v0  ;;  %v20680_v19 = vpack.c.bf16 %v14702_v17, %v14701_v16  ;;  %v14710_v26 = vld [vmem:[%s23991_s2 + $0x358] sm:$0xff]  ;;  %v14713_v32 = vld [vmem:[%s23991_s2 + $0x370] sm:$0xff]  ;;  %v14735_v46 = vld [vmem:[%s23991_s2 + $0x460] sm:$0xff]  ;;  %p20258_p13 = pneg %p20257_p12 }
  0x26   : > { %v14734_v42 = vld [vmem:[%s23991_s2 + $0x458] sm:$0xff]  ;;  %v14736_v47 = vld [vmem:[%s23991_s2 + $0x468] sm:$0xff]  ;;  %v14656_v61 = vld [vmem:[%s23994_s5 + $0x4] sm:$0xf] }
  0x27   : > { %v14738_v52 = vld [vmem:[%s23991_s2 + $0x478] sm:$0xff]  ;;  %v14685_v16 = vld [vmem:[%s23991_s2 + $0x2d0] sm:$0xff]  ;;  %p20265_p3 = pnand %p20264_p2, %p20258_p13 }
  0x28   : > { %18809 = vmatpush3.bf16.msra.mxu1 %v20530_v27  ;;  %v14686_v17 = vld [vmem:[%s23991_s2 + $0x2d8] sm:$0xff] }
  0x29   : > { %16508 = vmatprep.subr.mxu1 %v24000_v1 }
  0xf6   : > { %v412_v6 = vpop.f32.mrb[0].mxu0 }
  0xf7   : > { %v416_v7 = vmul.f32 0.2, %v412_v6  ;;  %v16452_v8 = vpop.f32.mrb[1].mxu0 }
  0xf9   : > { %v20477_v11 = vmax.f32 %v412_v6, %v416_v7  ;;  %v14695_v6 = vld [vmem:[%s23991_s2 + $0x300] sm:$0xff]  ;;  %v14696_v7 = vld [vmem:[%s23991_s2 + $0x308] sm:$0xff] }
  0xfa   : > { %v20646_v8 = vpack.c.bf16 %v14696_v7, %v14695_v6  ;;  %v664_v6 = vld [vmem:[%s23994_s5] sm:$0xf] }
  0xfb   : > { %v418_v12 = vmul.f32 %v20477_v11, %v20477_v11  ;;  %v14683_v7 = vld [vmem:[%s23991_s2 + $0x2c0] sm:$0xff] }
  0xfd   : > { %16454 = vmatpush3.msk.msra.mxu0 %vm423_vm2, %v418_v12  ;;  %v14699_v12 = vld [vmem:[%s23991_s2 + $0x320] sm:$0xff] }
  0xfe   : > { %16456 = vmatmul.mubr.msk.f32.vlgmr.msra.gmra.mrb[2].mxu0 %vm419_vm3, %v23998_v14  ;;  %18795 = vmatprep.subr.bf16.mxu0 %v24002_v0 }
  0xff   : > { %18797 = vmatpush3.bf16.msra.mxu0 %v18796_v13  ;;  %16462 = vmatprep.mubr.msk.f32.mxu0 %vm20352_vm0, %v24000_v1  ;;  %v14700_v13 = vld [vmem:[%s23991_s2 + $0x328] sm:$0xff] }
 0x100   : > { %16465 = vmatprep.subr.mxu0 %v24000_v1 }
 0x102   : > { %16463 = vmatmul.mubr.msk.f32.vlgmr.msra.gmra.mrb[4].mxu0 %vm342_vm1, %v14643_v15  ;;  %v20670_v15 = vpack.c.bf16 %v14700_v13, %v14699_v12 }
 0x103   : > { %16467 = vmatprep.mubr.msk.f32.mxu0 %vm20352_vm0, %v24000_v1 }
 0x1d1   : > { %v493_v28 = vpop.f32.mrb[2].mxu0 }
 0x1d2   : > { %v497_v29 = vmul.f32 0.25, %v493_v28  ;;  %v16457_v30 = vpop.f32.mrb[3].mxu0  ;;  %v20702_v28 = vpack.c.bf16 %v14710_v26, %v14709_v25  ;;  %v20816_v25 = vpack.c.bf16 %v14686_v17, %v14685_v16  ;;  %v14687_v26 = vld [vmem:[%s23991_s2 + $0x2e0] sm:$0xff] }
 0x1d3   : > { %v14712_v30 = vld [vmem:[%s23991_s2 + $0x368] sm:$0xff]  ;;  %v14723_v17 = vld [vmem:[%s23991_s2 + $0x420] sm:$0xff] }
 0x1d4   : > { %v498_v31 = vadd.f32 1e-08, %v497_v29  ;;  %v14711_v29 = vld [vmem:[%s23991_s2 + $0x360] sm:$0xff] }
 0x1d5   : > { %v576_v33 = vpop.f32.mrb[4].mxu0 }
 0x1d6   : > { %20239 = vrsqrt.f32 %v498_v31  ;;  %v580_v34 = vmul.f32 0.2, %v576_v33  ;;  %v16464_v35 = vpop.f32.mrb[5].mxu0  ;;  %v20714_v31 = vpack.c.bf16 %v14712_v30, %v14711_v29  ;;  %v14688_v29 = vld [vmem:[%s23991_s2 + $0x2e8] sm:$0xff] }
 0x1d7   : > { %v14731_v35 = vld [vmem:[%s23991_s2 + $0x440] sm:$0xff]  ;;  %v20828_v30 = vpack.c.bf16 %v14688_v29, %v14687_v26  ;;  %v14725_v26 = vld [vmem:[%s23991_s2 + $0x430] sm:$0xff]  ;;  %v14726_v29 = vld [vmem:[%s23991_s2 + $0x438] sm:$0xff] }
 0x1d8   : > { %v20540_v38 = vmax.f32 %v576_v33, %v580_v34  ;;  %v14714_v33 = vld [vmem:[%s23991_s2 + $0x378] sm:$0xff]  ;;  %v20734_v37 = vpack.c.bf16 %v14732_v36, %v14731_v35 }
 0x1d9   : > { %v20724_v34 = vpack.c.bf16 %v14714_v33, %v14713_v32  ;;  %v14689_v32 = vld [vmem:[%s23991_s2 + $0x2f0] sm:$0xff]  ;;  %v14690_v33 = vld [vmem:[%s23991_s2 + $0x2f8] sm:$0xff] }
 0x1da   : > { %v582_v40 = vmul.f32 %v20540_v38, %v20540_v38  ;;  %24040 = vst [vmem:[#allocation10_spill] sm:$0xff] %v20734_v37  ;;  %v20838_v35 = vpack.c.bf16 %v14690_v33, %v14689_v32  ;;  %v20906_v32 = vpack.c.bf16 %v14726_v29, %v14725_v26  ;;  %v14718_v33 = vld [vmem:[%s23994_s5 + $0x18] sm:$0xf]  ;;  %v14760_v26 = vld [vmem:[%s23991_s2 + $0x48] sm:$0xff]  ;;  %v14742_v29 = vld [vmem:[%s23994_s5 + $0x20] sm:$0xf] }
 0x1dc   : > { %16466 = vmatpush3.msk.msra.mxu0 %vm423_vm2, %v582_v40  ;;  %v14733_v40 = vld [vmem:[%s23991_s2 + $0x450] sm:$0xff]  ;;  %24044 = vst [vmem:[#allocation14_spill] sm:$0xff] %v20906_v32 }
 0x1dd   : > { %16468 = vmatmul.mubr.msk.f32.vlgmr.msra.gmra.mrb[6].mxu0 %vm419_vm3, %v23998_v14  ;;  %18810 = vmatprep.subr.bf16.mxu0 %v24002_v0  ;;  %v20746_v43 = vpack.c.bf16 %v14734_v42, %v14733_v40 }
 0x1de   : > { %18812 = vmatpush3.bf16.msra.mxu0 %v20546_v41  ;;  %16505 = vmatprep.mubr.msk.f32.mxu0 %vm20352_vm0, %v24000_v1 }
 0x1df   : > { %18813 = vmatprep.subr.bf16.mxu0 %v24002_v0  ;;  %24041 = vst [vmem:[#allocation11_spill] sm:$0xff] %v20746_v43 }
 0x1e0   : > { %v20240_v48 = vpop.eup %20239 }
 0x1e1   : > { %v503_v49 = vrot.slane %v20240_v48, %v20556_v44  ;;  %v20758_v48 = vpack.c.bf16 %v14736_v47, %v14735_v46 }
 0x1e2   : > { %18815 = vmatpush3.bf16.msra.mxu0 %v20562_v45 }
 0x1e3   : > { %v20578_v51 = vmul.f32 %v503_v49, %v20477_v11  ;;  %18816 = vmatprep.subr.bf16.mxu0 %v24002_v0  ;;  %v20658_v11 = vpack.c.bf16 %v14698_v10, %v14697_v9  ;;  %24042 = vst [vmem:[#allocation12_spill] sm:$0xff] %v20758_v48  ;;  %v14737_v49 = vld [vmem:[%s23991_s2 + $0x470] sm:$0xff]  ;;  %v14684_v9 = vld [vmem:[%s23991_s2 + $0x2c8] sm:$0xff] }
 0x1e4   : > { %v20768_v53 = vpack.c.bf16 %v14738_v52, %v14737_v49  ;;  %v14670_v10 = vld [vmem:[%s23994_s5 + $0x8] sm:$0xf]  ;;  %v20804_v12 = vpack.c.bf16 %v14684_v9, %v14683_v7  ;;  %v14682_v52 = vld [vmem:[%s23994_s5 + $0xc] sm:$0xf]  ;;  %v14706_v7 = vld [vmem:[%s23994_s5 + $0x14] sm:$0xf] }
 0x1e5   : > { %16487 = vmatmul.mubr.msk.f32.vlgmr.msra.gmra.mrb[0].mxu1 %vm674_vm4, %v20578_v51 }
 0x1e6   : > { %18818 = vmatpush3.bf16.msra.mxu0 %v20575_v50  ;;  %16510 = vmatprep.mubr.msk.f32.mxu1 %vm20352_vm0, %v24000_v1  ;;  %24043 = vst [vmem:[#allocation13_spill] sm:$0xff] %v20768_v53 }
 0x1e7   : > { %18819 = vmatprep.subr.bf16.mxu0 %v24002_v0 }
 0x1ea   : > { %18821 = vmatpush3.bf16.msra.mxu0 %v20590_v54 }
 0x1eb   : > { %18822 = vmatprep.subr.bf16.mxu0 %v24002_v0 }
 0x1ed   : > { %16506 = vmatmul.mubr.msk.f32.vlgmr.msra.gmra.mrb[8].mxu0 %vm674_vm4, %v20578_v51 }
 0x1ee   : > { %18824 = vmatpush3.bf16.msra.mxu0 %v20602_v57  ;;  %16534 = vmatprep.mubr.msk.f32.mxu0 %vm20352_vm0, %v24000_v1 }
 0x1ef   : > { %18825 = vmatprep.subr.bf16.mxu0 %v24002_v0 }
 0x1f2   : > { %18827 = vmatpush3.bf16.msra.mxu0 %v20614_v60 }
 0x1f3   : > { %18828 = vmatprep.subr.bf16.mxu0 %v24002_v0 }
 0x1f6   : > { %18830 = vmatpush3.bf16.msra.mxu0 %v20626_v63 }
 0x1f7   : > { %18831 = vmatprep.subr.bf16.mxu0 %v24002_v0 }
 0x1fa   : > { %18833 = vmatpush3.bf16.msra.mxu0 %v20636_v5 }
 0x1fb   : > { %18846 = vmatprep.subr.bf16.mxu0 %v24002_v0 }
 0x1fd   : > { %16535 = vmatmul.mubr.msk.f32.vlgmr.msra.gmra.mrb[10].mxu0 %vm674_vm4, %v20578_v51 }
 0x1fe   : > { %18848 = vmatpush3.bf16.msra.mxu0 %v20646_v8  ;;  %16582 = vmatprep.mubr.msk.f32.mxu0 %vm20352_vm0, %v24000_v1 }
 0x1ff   : > { %18849 = vmatprep.subr.bf16.mxu0 %v24002_v0 }
 0x202   : > { %18851 = vmatpush3.bf16.msra.mxu0 %v20658_v11 }
 0x203   : > { %18852 = vmatprep.subr.bf16.mxu0 %v24002_v0 }
 0x206   : > { %18854 = vmatpush3.bf16.msra.mxu0 %v20670_v15 }
 0x207   : > { %18855 = vmatprep.subr.bf16.mxu0 %v24002_v0 }
 0x20a   : > { %18857 = vmatpush3.bf16.msra.mxu0 %v20680_v19 }
 0x20b   : > { %18858 = vmatprep.subr.bf16.mxu0 %v24002_v0 }
 0x20d   : > { %16583 = vmatmul.mubr.msk.f32.vlgmr.msra.gmra.mrb[12].mxu0 %vm674_vm4, %v20578_v51 }
 0x20e   : > { %18860 = vmatpush3.bf16.msra.mxu0 %v20690_v23  ;;  %16606 = vmatprep.mubr.msk.f32.mxu0 %vm20352_vm0, %v24000_v1 }
 0x20f   : > { %18861 = vmatprep.subr.bf16.mxu0 %v24002_v0 }
 0x212   : > { %18863 = vmatpush3.bf16.msra.mxu0 %v20702_v28 }
 0x213   : > { %18864 = vmatprep.subr.bf16.mxu0 %v24002_v0 }
 0x216   : > { %18866 = vmatpush3.bf16.msra.mxu0 %v20714_v31 }
 0x217   : > { %18867 = vmatprep.subr.bf16.mxu0 %v24002_v0 }
 0x21a   : > { %18869 = vmatpush3.bf16.msra.mxu0 %v20724_v34 }
 0x21b   : > { %18882 = vmatprep.subr.bf16.mxu0 %v24002_v0 }
 0x21d   : > { %16607 = vmatmul.mubr.msk.f32.vlgmr.msra.gmra.mrb[14].mxu0 %vm674_vm4, %v20578_v51 }
 0x21e   : > { %18884 = vmatpush3.bf16.msra.mxu0 %v20734_v37  ;;  %16654 = vmatprep.mubr.msk.f32.mxu0 %vm20352_vm0, %v24000_v1 }
 0x21f   : > { %18885 = vmatprep.subr.bf16.mxu0 %v24002_v0 }
 0x222   : > { %18887 = vmatpush3.bf16.msra.mxu0 %v20746_v43 }
 0x223   : > { %18888 = vmatprep.subr.bf16.mxu0 %v24002_v0 }
 0x226   : > { %18890 = vmatpush3.bf16.msra.mxu0 %v20758_v48 }
 0x227   : > { %18891 = vmatprep.subr.bf16.mxu0 %v24002_v0 }
 0x22a   : > { %18893 = vmatpush3.bf16.msra.mxu0 %v20768_v53 }
 0x22b   : > { %16686 = vmatprep.subr.mxu0 %v24000_v1 }
 0x22d   : > { %16655 = vmatmul.mubr.msk.f32.vlgmr.msra.gmra.mrb[16].mxu0 %vm674_vm4, %v20578_v51 }
 0x22e   : > { %16688 = vmatprep.mubr.msk.f32.mxu0 %vm20352_vm0, %v24000_v1 }
 0x2b0   : > { %v20777_v55 = vpop.f32.mrb[6].mxu0 }
 0x2b1   : > { %v16469_v56 = vpop.f32.mrb[7].mxu0 }
 0x2b8   : > { %v744_v58 = vpop.f32.mrb[0].mxu1 }
 0x2b9   : > { %v16488_v59 = vpop.f32.mrb[1].mxu1 }
 0x2c0   : > { %v825_v62 = vpop.f32.mrb[8].mxu0 }
 0x2c1   : > { %v2174_v2 = vadd.f32 %v825_v62, %v744_v58  ;;  %v16507_v3 = vpop.f32.mrb[9].mxu0  ;;  %16509 = vmatpush3.msk.msra.mxu1 %vm423_vm2, %v825_v62 }
 0x2c2   : > { %16513 = vmatprep.subr.mxu1 %v24000_v1  ;;  %16511 = vmatmul.mubr.msk.f32.vlgmr.msra.gmra.mrb[2].mxu1 %vm419_vm3, %v14656_v61  ;;  %v14719_v3 = vld [vmem:[%s23991_s2 + $0x400] sm:$0xff] }
 0x2c3   : > { %16514 = vmatpush3.msk.msra.mxu1 %vm423_vm2, %v744_v58  ;;  %16515 = vmatprep.mubr.msk.f32.mxu1 %vm20352_vm0, %v24000_v1 }
 0x2c4   : > { %16537 = vmatprep.subr.mxu1 %v24000_v1 }
 0x2ca   : > { %16516 = vmatmul.mubr.msk.f32.vlgmr.msra.gmra.mrb[2].mxu1 %vm419_vm3, %v664_v6  ;;  %v14720_v6 = vld [vmem:[%s23991_s2 + $0x408] sm:$0xff] }
 0x2cb   : > { %16539 = vmatprep.mubr.msk.f32.mxu1 %vm20352_vm0, %v24000_v1  ;;  %v20874_v9 = vpack.c.bf16 %v14720_v6, %v14719_v3  ;;  %v14749_v6 = vld [vmem:[%s23991_s2 + $0x4b0] sm:$0xff] }
 0x2d0   : > { %v1058_v13 = vpop.f32.mrb[10].mxu0 }
 0x2d1   : > { %v2175_v20 = vadd.f32 %v2174_v2, %v1058_v13  ;;  %v16536_v22 = vpop.f32.mrb[11].mxu0  ;;  %16538 = vmatpush3.msk.msra.mxu1 %vm423_vm2, %v1058_v13  ;;  %v14694_v2 = vld [vmem:[%s23994_s5 + $0x10] sm:$0xf]  ;;  %v14722_v13 = vld [vmem:[%s23991_s2 + $0x418] sm:$0xff] }
 0x2d2   : > { %18834 = vmatprep.subr.bf16.mxu1 %v24002_v0  ;;  %16540 = vmatmul.mubr.msk.f32.vlgmr.msra.gmra.mrb[2].mxu1 %vm419_vm3, %v14670_v10  ;;  %v14721_v10 = vld [vmem:[%s23991_s2 + $0x410] sm:$0xff] }
 0x2d3   : > { %18836 = vmatpush3.bf16.msra.mxu1 %v20804_v12  ;;  %16558 = vmatprep.mubr.msk.f32.mxu1 %vm20352_vm0, %v24000_v1  ;;  %v20884_v16 = vpack.c.bf16 %v14722_v13, %v14721_v10  ;;  %v656_v13 = vmul.f32 0.25, %v20777_v55  ;;  %v14761_v55 = vld [vmem:[%s23991_s2 + $0x50] sm:$0xff] }
 0x2d4   : > { %18837 = vmatprep.subr.bf16.mxu1 %v24002_v0 }
 0x2d7   : > { %18839 = vmatpush3.bf16.msra.mxu1 %v20816_v25 }
 0x2d8   : > { %18840 = vmatprep.subr.bf16.mxu1 %v24002_v0 }
 0x2db   : > { %18842 = vmatpush3.bf16.msra.mxu1 %v20828_v30 }
 0x2dc   : > { %18843 = vmatprep.subr.bf16.mxu1 %v24002_v0 }
 0x2df   : > { %18845 = vmatpush3.bf16.msra.mxu1 %v20838_v35 }
 0x2e0   : > { %v1374_v36 = vpop.f32.mrb[12].mxu0  ;;  %16561 = vmatprep.subr.mxu1 %v24000_v1 }
 0x2e1   : > { %v16584_v40 = vpop.f32.mrb[13].mxu0 }
 0x2e2   : > { %16559 = vmatmul.mubr.msk.f32.vlgmr.msra.gmra.mrb[4].mxu1 %vm674_vm4, %v20578_v51 }
 0x2e3   : > { %16563 = vmatprep.mubr.msk.f32.mxu1 %vm20352_vm0, %v24000_v1 }
 0x2f0   : > { %v1532_v42 = vpop.f32.mrb[14].mxu0 }
 0x2f1   : > { %v16608_v46 = vpop.f32.mrb[15].mxu0 }
 0x300   : > { %v1848_v47 = vpop.f32.mrb[16].mxu0 }
 0x301   : > { %v16656_v49 = vpop.f32.mrb[17].mxu0 }
 0x302   : > { %v14743_v49 = vld [vmem:[%s23991_s2 + $0x480] sm:$0xff] }
 0x3b5   : > { %v1216_v56 = vpop.f32.mrb[4].mxu1 }
 0x3b6   : > { %v2176_v58 = vadd.f32 %v2175_v20, %v1216_v56  ;;  %v16560_v59 = vpop.f32.mrb[5].mxu1  ;;  %16562 = vmatpush3.msk.msra.mxu1 %vm423_vm2, %v1216_v56  ;;  %v14724_v20 = vld [vmem:[%s23991_s2 + $0x428] sm:$0xff]  ;;  %v14730_v56 = vld [vmem:[%s23994_s5 + $0x1c] sm:$0xf] }
 0x3b7   : > { %16564 = vmatmul.mubr.msk.f32.vlgmr.msra.gmra.mrb[2].mxu1 %vm419_vm3, %v14682_v52  ;;  %16585 = vmatprep.subr.mxu1 %v24000_v1  ;;  %v20896_v22 = vpack.c.bf16 %v14724_v20, %v14723_v17  ;;  %v14744_v52 = vld [vmem:[%s23991_s2 + $0x488] sm:$0xff]  ;;  %v14746_v59 = vld [vmem:[%s23991_s2 + $0x498] sm:$0xff]  ;;  %v657_v17 = vadd.f32 1e-08, %v656_v13  ;;  %v14759_v20 = vld [vmem:[%s23991_s2 + $0x40] sm:$0xff] }
 0x3b8   : > { %v2177_v61 = vadd.f32 %v2176_v58, %v1374_v36  ;;  %16586 = vmatpush3.msk.msra.mxu1 %vm423_vm2, %v1374_v36  ;;  %16587 = vmatprep.mubr.msk.f32.mxu1 %vm20352_vm0, %v24000_v1  ;;  %v20934_v58 = vpack.c.bf16 %v14744_v52, %v14743_v49  ;;  %v14785_v13 = vld [vmem:[%s23991_s2 + $0xc0] sm:$0xff] }
 0x3b9   : > { %16609 = vmatprep.subr.mxu1 %v24000_v1  ;;  %20241 = vrsqrt.f32 %v657_v17  ;;  %v14786_v17 = vld [vmem:[%s23991_s2 + $0xc8] sm:$0xff] }
 0x3ba   : > { %v2178_v62 = vadd.f32 %v2177_v61, %v1532_v42 }
 0x3bf   : > { %16588 = vmatmul.mubr.msk.f32.vlgmr.msra.gmra.mrb[2].mxu1 %vm419_vm3, %v14694_v2  ;;  %v14748_v2 = vld [vmem:[%s23991_s2 + $0x4a8] sm:$0xff] }
 0x3c0   : > { %16610 = vmatpush3.msk.msra.mxu1 %vm423_vm2, %v1532_v42  ;;  %16611 = vmatprep.mubr.msk.f32.mxu1 %vm20352_vm0, %v24000_v1 }
 0x3c1   : > { %18870 = vmatprep.subr.bf16.mxu1 %v24002_v0 }
 0x3c7   : > { %16612 = vmatmul.mubr.msk.f32.vlgmr.msra.gmra.mrb[2].mxu1 %vm419_vm3, %v14706_v7  ;;  %v14750_v7 = vld [vmem:[%s23991_s2 + $0x4b8] sm:$0xff] }
 0x3c8   : > { %18872 = vmatpush3.bf16.msra.mxu1 %v20874_v9  ;;  %16630 = vmatprep.mubr.msk.f32.mxu1 %vm20352_vm0, %v24000_v1  ;;  %v20966_v10 = vpack.c.bf16 %v14750_v7, %v14749_v6 }
 0x3c9   : > { %18873 = vmatprep.subr.bf16.mxu1 %v24002_v0 }
 0x3cc   : > { %18875 = vmatpush3.bf16.msra.mxu1 %v20884_v16 }
 0x3cd   : > { %18876 = vmatprep.subr.bf16.mxu1 %v24002_v0 }
 0x3d0   : > { %18878 = vmatpush3.bf16.msra.mxu1 %v20896_v22 }
 0x3d1   : > { %18879 = vmatprep.subr.bf16.mxu1 %v24002_v0 }
 0x3d4   : > { %18881 = vmatpush3.bf16.msra.mxu1 %v20906_v32 }
 0x3d5   : > { %16633 = vmatprep.subr.mxu1 %v24000_v1 }
 0x3d7   : > { %16631 = vmatmul.mubr.msk.f32.vlgmr.msra.gmra.mrb[6].mxu1 %vm674_vm4, %v20578_v51 }
 0x3d8   : > { %16635 = vmatprep.mubr.msk.f32.mxu1 %vm20352_vm0, %v24000_v1 }
 0x4aa   : > { %v1690_v36 = vpop.f32.mrb[6].mxu1 }
 0x4ab   : > { %v2179_v40 = vadd.f32 %v2178_v62, %v1690_v36  ;;  %v16632_v42 = vpop.f32.mrb[7].mxu1  ;;  %16634 = vmatpush3.msk.msra.mxu1 %vm423_vm2, %v1690_v36  ;;  %v14747_v62 = vld [vmem:[%s23991_s2 + $0x4a0] sm:$0xff] }
 0x4ac   : > { %16636 = vmatmul.mubr.msk.f32.vlgmr.msra.gmra.mrb[2].mxu1 %vm419_vm3, %v14718_v33  ;;  %16657 = vmatprep.subr.mxu1 %v24000_v1  ;;  %v20956_v3 = vpack.c.bf16 %v14748_v2, %v14747_v62  ;;  %v18919_v33 = vpack.c.bf16 %v14760_v26, %v14759_v20  ;;  %v14766_v62 = vld [vmem:[%s23991_s2 + $0x78] sm:$0xff]  ;;  %v20242_v2 = vpop.eup %20241  ;;  %v18943_v20 = vpack.c.bf16 %v14786_v17, %v14785_v13  ;;  %v14802_v13 = vld [vmem:[%s23991_s2 + $0x128] sm:$0xff] }
 0x4ad   : > { %16658 = vmatpush3.msk.msra.mxu1 %vm423_vm2, %v1848_v47  ;;  %16659 = vmatprep.mubr.msk.f32.mxu1 %vm20352_vm0, %v24000_v1  ;;  %v2180_v46 = vadd.f32 %v2179_v40, %v1848_v47  ;;  %v14745_v47 = vld [vmem:[%s23991_s2 + $0x490] sm:$0xff]  ;;  %v14762_v40 = vld [vmem:[%s23991_s2 + $0x58] sm:$0xff]  ;;  %v662_v7 = vrot.slane %v20242_v2, %v20556_v44 }
 0x4ae   : > { %18894 = vmatprep.subr.bf16.mxu1 %v24002_v0  ;;  %v20944_v61 = vpack.c.bf16 %v14746_v59, %v14745_v47  ;;  %v18922_v52 = vpack.c.bf16 %v14762_v40, %v14761_v55  ;;  %v14765_v59 = vld [vmem:[%s23991_s2 + $0x70] sm:$0xff]  ;;  %v14790_v55 = vld [vmem:[%s23991_s2 + $0xe8] sm:$0xff]  ;;  %v14800_v2 = vld [vmem:[%s23991_s2 + $0x118] sm:$0xff] }
 0x4af   : > { %v18928_v6 = vpack.c.bf16 %v14766_v62, %v14765_v59  ;;  %v21021_v26 = vmul.f32 %v662_v7, %v20540_v38  ;;  %v14789_v38 = vld [vmem:[%s23991_s2 + $0xe0] sm:$0xff]  ;;  %v14799_v62 = vld [vmem:[%s23991_s2 + $0x110] sm:$0xff] }
 0x4b0   : > { %v18949_v40 = vpack.c.bf16 %v14790_v55, %v14789_v38  ;;  %v14801_v7 = vld [vmem:[%s23991_s2 + $0x120] sm:$0xff]  ;;  %v14834_v38 = vld [vmem:[%s23991_s2 + $0x248] sm:$0xff] }
 0x4b1   : > { %v18961_v17 = vpack.c.bf16 %v14802_v13, %v14801_v7  ;;  %v14870_v7 = vld [vmem:[%s23991_s2 + $0x388] sm:$0xff] }
 0x4b4   : > { %16660 = vmatmul.mubr.msk.f32.vlgmr.msra.gmra.mrb[2].mxu1 %vm419_vm3, %v14730_v56  ;;  %v14763_v56 = vld [vmem:[%s23991_s2 + $0x60] sm:$0xff] }
 0x4b5   : > { %18896 = vmatpush3.bf16.msra.mxu1 %v20934_v58  ;;  %16678 = vmatprep.mubr.msk.f32.mxu1 %vm20352_vm0, %v24000_v1 }
 0x4b6   : > { %18897 = vmatprep.subr.bf16.mxu1 %v24002_v0 }
 0x4b9   : > { %18899 = vmatpush3.bf16.msra.mxu1 %v20944_v61 }
 0x4ba   : > { %18900 = vmatprep.subr.bf16.mxu1 %v24002_v0 }
 0x4bd   : > { %18902 = vmatpush3.bf16.msra.mxu1 %v20956_v3 }
 0x4be   : > { %18903 = vmatprep.subr.bf16.mxu1 %v24002_v0 }
 0x4c1   : > { %18905 = vmatpush3.bf16.msra.mxu1 %v20966_v10 }
 0x4c2   : > { %16681 = vmatprep.subr.mxu1 %v24000_v1 }
 0x4c4   : > { %16679 = vmatmul.mubr.msk.f32.vlgmr.msra.gmra.mrb[8].mxu1 %vm674_vm4, %v20578_v51 }
 0x4c5   : > { %16683 = vmatprep.mubr.msk.f32.mxu1 %vm20352_vm0, %v24000_v1 }
 0x597   : > { %v2006_v36 = vpop.f32.mrb[8].mxu1 }
 0x598   : > { %v20991_v42 = vadd.f32 %v2180_v46, %v2006_v36  ;;  %v16680_v49 = vpop.f32.mrb[9].mxu1  ;;  %16682 = vmatpush3.msk.msra.mxu1 %vm423_vm2, %v2006_v36  ;;  %v14764_v46 = vld [vmem:[%s23991_s2 + $0x68] sm:$0xff] }
 0x599   : > { %16684 = vmatmul.mubr.msk.f32.vlgmr.msra.gmra.mrb[2].mxu1 %vm419_vm3, %v14742_v29  ;;  %18918 = vmatprep.subr.bf16.mxu1 %v24002_v0  ;;  %v18925_v47 = vpack.c.bf16 %v14764_v46, %v14763_v56  ;;  %v14787_v29 = vld [vmem:[%s23991_s2 + $0xd0] sm:$0xff]  ;;  %v14797_v46 = vld [vmem:[%s23991_s2 + $0x100] sm:$0xff] }
 0x59a   : > { %24045 = vst [vmem:[#allocation15_spill] sm:$0xff] %v20991_v42  ;;  %18920 = vmatpush3.bf16.msra.mxu1 %v18919_v33  ;;  %16726 = vmatprep.mubr.msk.f32.mxu1 %vm20352_vm0, %v24000_v1  ;;  %v14788_v33 = vld [vmem:[%s23991_s2 + $0xd8] sm:$0xff]  ;;  %v14791_v49 = vld [vmem:[%s23991_s2 + $0xf0] sm:$0xff]  ;;  %v24046_v42 = vmov 0.0|0.0  }
 0x59b   : > { %18921 = vmatprep.subr.bf16.mxu1 %v24002_v0  ;;  %v18946_v36 = vpack.c.bf16 %v14788_v33, %v14787_v29  ;;  %v14804_v29 = vld [vmem:[%s23991_s2 + $0x138] sm:$0xff] }
 0x59e   : > { %18923 = vmatpush3.bf16.msra.mxu1 %v18922_v52  ;;  %v14792_v52 = vld [vmem:[%s23991_s2 + $0xf8] sm:$0xff] }
 0x59f   : > { %18924 = vmatprep.subr.bf16.mxu1 %v24002_v0  ;;  %v18952_v56 = vpack.c.bf16 %v14792_v52, %v14791_v49  ;;  %v14836_v49 = vld [vmem:[%s23991_s2 + $0x258] sm:$0xff] }
 0x5a2   : > { %18926 = vmatpush3.bf16.msra.mxu1 %v18925_v47  ;;  %v14798_v47 = vld [vmem:[%s23991_s2 + $0x108] sm:$0xff] }
 0x5a3   : > { %18927 = vmatprep.subr.bf16.mxu1 %v24002_v0  ;;  %v18955_v59 = vpack.c.bf16 %v14798_v47, %v14797_v46  ;;  %v14838_v46 = vld [vmem:[%s23991_s2 + $0x268] sm:$0xff] }
 0x5a6   : > { %18929 = vmatpush3.bf16.msra.mxu1 %v18928_v6  ;;  %v18958_v6 = vpack.c.bf16 %v14800_v2, %v14799_v62  ;;  %v14840_v62 = vld [vmem:[%s23991_s2 + $0x278] sm:$0xff] }
 0x5a7   : > { %18942 = vmatprep.subr.bf16.mxu1 %v24002_v0 }
 0x5a9   : > { %16727 = vmatmul.mubr.msk.f32.vlgmr.msra.gmra.mrb[10].mxu1 %vm674_vm4, %v21021_v26 }
 0x5aa   : > { %18944 = vmatpush3.bf16.msra.mxu1 %v18943_v20  ;;  %16779 = vmatprep.mubr.msk.f32.mxu1 %vm20352_vm0, %v24000_v1  ;;  %v14803_v20 = vld [vmem:[%s23991_s2 + $0x130] sm:$0xff] }
 0x5ab   : > { %18945 = vmatprep.subr.bf16.mxu1 %v24002_v0  ;;  %v18964_v33 = vpack.c.bf16 %v14804_v29, %v14803_v20  ;;  %v14872_v20 = vld [vmem:[%s23991_s2 + $0x398] sm:$0xff] }
 0x5ae   : > { %18947 = vmatpush3.bf16.msra.mxu1 %v18946_v36  ;;  %v14833_v36 = vld [vmem:[%s23991_s2 + $0x240] sm:$0xff] }
 0x5af   : > { %18948 = vmatprep.subr.bf16.mxu1 %v24002_v0  ;;  %v19015_v55 = vpack.c.bf16 %v14834_v38, %v14833_v36  ;;  %v14874_v36 = vld [vmem:[%s23991_s2 + $0x3a8] sm:$0xff] }
 0x5b2   : > { %18950 = vmatpush3.bf16.msra.mxu1 %v18949_v40  ;;  %v14835_v40 = vld [vmem:[%s23991_s2 + $0x250] sm:$0xff] }
 0x5b3   : > { %18951 = vmatprep.subr.bf16.mxu1 %v24002_v0  ;;  %v19018_v52 = vpack.c.bf16 %v14836_v49, %v14835_v40  ;;  %v14876_v40 = vld [vmem:[%s23991_s2 + $0x3b8] sm:$0xff] }
 0x5b6   : > { %18953 = vmatpush3.bf16.msra.mxu1 %v18952_v56  ;;  %v14837_v56 = vld [vmem:[%s23991_s2 + $0x260] sm:$0xff] }
 0x5b7   : > { %18954 = vmatprep.subr.bf16.mxu1 %v24002_v0  ;;  %v19021_v47 = vpack.c.bf16 %v14838_v46, %v14837_v56  ;;  %v14906_v56 = vld [vmem:[%s23991_s2 + $0x4c8] sm:$0xff] }
 0x5b9   : > { %16780 = vmatmul.mubr.msk.f32.vlgmr.msra.gmra.mrb[12].mxu1 %vm674_vm4, %v21021_v26 }
 0x5ba   : > { %18956 = vmatpush3.bf16.msra.mxu1 %v18955_v59  ;;  %16803 = vmatprep.mubr.msk.f32.mxu1 %vm20352_vm0, %v24000_v1  ;;  %v14839_v59 = vld [vmem:[%s23991_s2 + $0x270] sm:$0xff] }
 0x5bb   : > { %18957 = vmatprep.subr.bf16.mxu1 %v24002_v0  ;;  %v19024_v2 = vpack.c.bf16 %v14840_v62, %v14839_v59  ;;  %v14908_v59 = vld [vmem:[%s23991_s2 + $0x4d8] sm:$0xff] }
 0x5be   : > { %18959 = vmatpush3.bf16.msra.mxu1 %v18958_v6  ;;  %v14869_v6 = vld [vmem:[%s23991_s2 + $0x380] sm:$0xff] }
 0x5bf   : > { %18960 = vmatprep.subr.bf16.mxu1 %v24002_v0  ;;  %v19075_v13 = vpack.c.bf16 %v14870_v7, %v14869_v6  ;;  %v14910_v6 = vld [vmem:[%s23991_s2 + $0x4e8] sm:$0xff] }
 0x5c2   : > { %18962 = vmatpush3.bf16.msra.mxu1 %v18961_v17  ;;  %v14871_v17 = vld [vmem:[%s23991_s2 + $0x390] sm:$0xff] }
 0x5c3   : > { %18963 = vmatprep.subr.bf16.mxu1 %v24002_v0  ;;  %v19078_v29 = vpack.c.bf16 %v14872_v20, %v14871_v17  ;;  %v14912_v17 = vld [vmem:[%s23991_s2 + $0x4f8] sm:$0xff] }
 0x5c6   : > { %18965 = vmatpush3.bf16.msra.mxu1 %v18964_v33  ;;  %v14873_v33 = vld [vmem:[%s23991_s2 + $0x3a0] sm:$0xff] }
 0x5c7   : > { %18978 = vmatprep.subr.bf16.mxu1 %v24002_v0  ;;  %v19081_v38 = vpack.c.bf16 %v14874_v36, %v14873_v33  ;;  %v14918_v33 = vld [vmem:[%s23991_s2 + $0x508] sm:$0xff] }
 0x5c9   : > { %16804 = vmatmul.mubr.msk.f32.vlgmr.msra.gmra.mrb[14].mxu1 %vm674_vm4, %v21021_v26 }
 0x5ca   : > { %18980 = vmatpush3.bf16.msra.mxu1 %v20500_v18  ;;  %16851 = vmatprep.mubr.msk.f32.mxu1 %vm20352_vm0, %v24000_v1 }
 0x5cb   : > { %18981 = vmatprep.subr.bf16.mxu1 %v24002_v0 }
 0x5ce   : > { %18983 = vmatpush3.bf16.msra.mxu1 %v20510_v21 }
 0x5cf   : > { %18984 = vmatprep.subr.bf16.mxu1 %v24002_v0 }
 0x5d2   : > { %18986 = vmatpush3.bf16.msra.mxu1 %v20520_v24 }
 0x5d3   : > { %18987 = vmatprep.subr.bf16.mxu1 %v24002_v0 }
 0x5d6   : > { %18989 = vmatpush3.bf16.msra.mxu1 %v20530_v27 }
 0x5d7   : > { %19002 = vmatprep.subr.bf16.mxu1 %v24002_v0 }
 0x5d9   : > { %16852 = vmatmul.mubr.msk.f32.vlgmr.msra.gmra.mrb[16].mxu1 %vm674_vm4, %v21021_v26 }
 0x5da   : > { %19004 = vmatpush3.bf16.msra.mxu1 %v20602_v57  ;;  %16899 = vmatprep.mubr.msk.f32.mxu1 %vm20352_vm0, %v24000_v1 }
 0x5db   : > { %19005 = vmatprep.subr.bf16.mxu1 %v24002_v0 }
 0x5de   : > { %19007 = vmatpush3.bf16.msra.mxu1 %v20614_v60 }
 0x5df   : > { %19008 = vmatprep.subr.bf16.mxu1 %v24002_v0 }
 0x5e2   : > { %19010 = vmatpush3.bf16.msra.mxu1 %v20626_v63 }
 0x5e3   : > { %19011 = vmatprep.subr.bf16.mxu1 %v24002_v0 }
 0x5e6   : > { %19013 = vmatpush3.bf16.msra.mxu1 %v20636_v5 }
 0x5e7   : > { %19014 = vmatprep.subr.bf16.mxu1 %v24002_v0 }
 0x5e9   : > { %16900 = vmatmul.mubr.msk.f32.vlgmr.msra.gmra.mrb[18].mxu1 %vm674_vm4, %v21021_v26 }
 0x5ea   : > { %19016 = vmatpush3.bf16.msra.mxu1 %v19015_v55  ;;  %16923 = vmatprep.mubr.msk.f32.mxu1 %vm20352_vm0, %v24000_v1  ;;  %v14875_v55 = vld [vmem:[%s23991_s2 + $0x3b0] sm:$0xff] }
 0x5eb   : > { %19017 = vmatprep.subr.bf16.mxu1 %v24002_v0  ;;  %v19084_v49 = vpack.c.bf16 %v14876_v40, %v14875_v55  ;;  %v14920_v55 = vld [vmem:[%s23991_s2 + $0x518] sm:$0xff] }
 0x5ee   : > { %19019 = vmatpush3.bf16.msra.mxu1 %v19018_v52  ;;  %v14905_v52 = vld [vmem:[%s23991_s2 + $0x4c0] sm:$0xff] }
 0x5ef   : > { %19020 = vmatprep.subr.bf16.mxu1 %v24002_v0  ;;  %v19135_v46 = vpack.c.bf16 %v14906_v56, %v14905_v52  ;;  %v14922_v52 = vld [vmem:[%s23991_s2 + $0x528] sm:$0xff] }
 0x5f2   : > { %19022 = vmatpush3.bf16.msra.mxu1 %v19021_v47  ;;  %v14907_v47 = vld [vmem:[%s23991_s2 + $0x4d0] sm:$0xff] }
 0x5f3   : > { %19023 = vmatprep.subr.bf16.mxu1 %v24002_v0  ;;  %v19138_v62 = vpack.c.bf16 %v14908_v59, %v14907_v47  ;;  %v14924_v47 = vld [vmem:[%s23991_s2 + $0x538] sm:$0xff] }
 0x5f6   : > { %19025 = vmatpush3.bf16.msra.mxu1 %v19024_v2  ;;  %v14909_v2 = vld [vmem:[%s23991_s2 + $0x4e0] sm:$0xff] }
 0x5f7   : > { %19038 = vmatprep.subr.bf16.mxu1 %v24002_v0  ;;  %v19141_v7 = vpack.c.bf16 %v14910_v6, %v14909_v2  ;;  %v14942_v2 = vld [vmem:[%s23991_s2 + $0x588] sm:$0xff] }
 0x5f9   : > { %16924 = vmatmul.mubr.msk.f32.vlgmr.msra.gmra.mrb[20].mxu1 %vm674_vm4, %v21021_v26 }
 0x5fa   : > { %19040 = vmatpush3.bf16.msra.mxu1 %v20804_v12  ;;  %16971 = vmatprep.mubr.msk.f32.mxu1 %vm20352_vm0, %v24000_v1 }
 0x5fb   : > { %19041 = vmatprep.subr.bf16.mxu1 %v24002_v0 }
 0x5fe   : > { %19043 = vmatpush3.bf16.msra.mxu1 %v20816_v25 }
 0x5ff   : > { %19044 = vmatprep.subr.bf16.mxu1 %v24002_v0 }
 0x602   : > { %19046 = vmatpush3.bf16.msra.mxu1 %v20828_v30 }
 0x603   : > { %19047 = vmatprep.subr.bf16.mxu1 %v24002_v0 }
 0x606   : > { %19049 = vmatpush3.bf16.msra.mxu1 %v20838_v35 }
 0x607   : > { %19050 = vmatprep.subr.bf16.mxu1 %v24002_v0 }
 0x609   : > { %16972 = vmatmul.mubr.msk.f32.vlgmr.msra.gmra.mrb[22].mxu1 %vm674_vm4, %v21021_v26 }
 0x60a   : > { %19052 = vmatpush3.bf16.msra.mxu1 %v20646_v8  ;;  %16995 = vmatprep.mubr.msk.f32.mxu1 %vm20352_vm0, %v24000_v1 }
 0x60b   : > { %19053 = vmatprep.subr.bf16.mxu1 %v24002_v0 }
 0x60e   : > { %19055 = vmatpush3.bf16.msra.mxu1 %v20658_v11 }
 0x60f   : > { %19056 = vmatprep.subr.bf16.mxu1 %v24002_v0 }
 0x612   : > { %19058 = vmatpush3.bf16.msra.mxu1 %v20670_v15 }
 0x613   : > { %19059 = vmatprep.subr.bf16.mxu1 %v24002_v0 }
 0x616   : > { %19061 = vmatpush3.bf16.msra.mxu1 %v20680_v19 }
 0x617   : > { %19074 = vmatprep.subr.bf16.mxu1 %v24002_v0 }
 0x619   : > { %16996 = vmatmul.mubr.msk.f32.vlgmr.msra.gmra.mrb[24].mxu1 %vm674_vm4, %v21021_v26 }
 0x61a   : > { %19076 = vmatpush3.bf16.msra.mxu1 %v19075_v13  ;;  %17043 = vmatprep.mubr.msk.f32.mxu1 %vm20352_vm0, %v24000_v1  ;;  %v14911_v13 = vld [vmem:[%s23991_s2 + $0x4f0] sm:$0xff] }
 0x61b   : > { %19077 = vmatprep.subr.bf16.mxu1 %v24002_v0  ;;  %v19144_v20 = vpack.c.bf16 %v14912_v17, %v14911_v13  ;;  %v14944_v13 = vld [vmem:[%s23991_s2 + $0x598] sm:$0xff] }
 0x61e   : > { %19079 = vmatpush3.bf16.msra.mxu1 %v19078_v29  ;;  %v14917_v29 = vld [vmem:[%s23991_s2 + $0x500] sm:$0xff] }
 0x61f   : > { %19080 = vmatprep.subr.bf16.mxu1 %v24002_v0  ;;  %v19147_v36 = vpack.c.bf16 %v14918_v33, %v14917_v29  ;;  %v14946_v29 = vld [vmem:[%s23991_s2 + $0x5a8] sm:$0xff] }
 0x622   : > { %19082 = vmatpush3.bf16.msra.mxu1 %v19081_v38  ;;  %v14919_v38 = vld [vmem:[%s23991_s2 + $0x510] sm:$0xff] }
 0x623   : > { %19083 = vmatprep.subr.bf16.mxu1 %v24002_v0  ;;  %v19150_v40 = vpack.c.bf16 %v14920_v55, %v14919_v38 }
 0x626   : > { %19085 = vmatpush3.bf16.msra.mxu1 %v19084_v49  ;;  %v14921_v49 = vld [vmem:[%s23991_s2 + $0x520] sm:$0xff] }
 0x627   : > { %19098 = vmatprep.subr.bf16.mxu1 %v24002_v0  ;;  %v19153_v56 = vpack.c.bf16 %v14922_v52, %v14921_v49  ;;  %v2189_v49 = vld [vmem:[%s23991_s2 + $0x8] sm:$0xff] }
 0x629   : > { %17044 = vmatmul.mubr.msk.f32.vlgmr.msra.gmra.mrb[26].mxu1 %vm674_vm4, %v21021_v26 }
 0x62a   : > { %19100 = vmatpush3.bf16.msra.mxu1 %v20874_v9  ;;  %17091 = vmatprep.mubr.msk.f32.mxu1 %vm20352_vm0, %v24000_v1 }
 0x62b   : > { %19101 = vmatprep.subr.bf16.mxu1 %v24002_v0 }
 0x62e   : > { %19103 = vmatpush3.bf16.msra.mxu1 %v20884_v16 }
 0x62f   : > { %19104 = vmatprep.subr.bf16.mxu1 %v24002_v0 }
 0x632   : > { %19106 = vmatpush3.bf16.msra.mxu1 %v20896_v22 }
 0x633   : > { %19107 = vmatprep.subr.bf16.mxu1 %v24002_v0 }
 0x636   : > { %19109 = vmatpush3.bf16.msra.mxu1 %v20906_v32 }
 0x637   : > { %19110 = vmatprep.subr.bf16.mxu1 %v24002_v0 }
 0x639   : > { %17092 = vmatmul.mubr.msk.f32.vlgmr.msra.gmra.mrb[28].mxu1 %vm674_vm4, %v21021_v26 }
 0x63a   : > { %19112 = vmatpush3.bf16.msra.mxu1 %v20734_v37  ;;  %17115 = vmatprep.mubr.msk.f32.mxu1 %vm20352_vm0, %v24000_v1 }
 0x63b   : > { %19113 = vmatprep.subr.bf16.mxu1 %v24002_v0 }
 0x63e   : > { %19115 = vmatpush3.bf16.msra.mxu1 %v20746_v43 }
 0x63f   : > { %19116 = vmatprep.subr.bf16.mxu1 %v24002_v0 }
 0x642   : > { %19118 = vmatpush3.bf16.msra.mxu1 %v20758_v48  ;;  %v24047_v48 = vmov 0.0  }
 0x643   : > { %19119 = vmatprep.subr.bf16.mxu1 %v24002_v0 }
 0x646   : > { %19121 = vmatpush3.bf16.msra.mxu1 %v20768_v53 }
 0x647   : > { %19134 = vmatprep.subr.bf16.mxu1 %v24002_v0 }
 0x649   : > { %17116 = vmatmul.mubr.msk.f32.vlgmr.msra.gmra.mrb[30].mxu1 %vm674_vm4, %v21021_v26 }
 0x64a   : > { %19136 = vmatpush3.bf16.msra.mxu1 %v19135_v46  ;;  %17163 = vmatprep.mubr.msk.f32.mxu1 %vm20352_vm0, %v24000_v1  ;;  %v14923_v46 = vld [vmem:[%s23991_s2 + $0x530] sm:$0xff] }
 0x64b   : > { %19137 = vmatprep.subr.bf16.mxu1 %v24002_v0  ;;  %v19156_v59 = vpack.c.bf16 %v14924_v47, %v14923_v46  ;;  %v14948_v46 = vld [vmem:[%s23991_s2 + $0x5b8] sm:$0xff] }
 0x64e   : > { %19139 = vmatpush3.bf16.msra.mxu1 %v19138_v62  ;;  %v14941_v62 = vld [vmem:[%s23991_s2 + $0x580] sm:$0xff] }
 0x64f   : > { %19140 = vmatprep.subr.bf16.mxu1 %v24002_v0  ;;  %v19171_v6 = vpack.c.bf16 %v14942_v2, %v14941_v62  ;;  %v2190_v2 = vld [vmem:[%s23991_s2 + $0x10] sm:$0xff] }
 0x652   : > { %19142 = vmatpush3.bf16.msra.mxu1 %v19141_v7  ;;  %v14943_v7 = vld [vmem:[%s23991_s2 + $0x590] sm:$0xff] }
 0x653   : > { %19143 = vmatprep.subr.bf16.mxu1 %v24002_v0  ;;  %v19174_v17 = vpack.c.bf16 %v14944_v13, %v14943_v7  ;;  %v14965_v7 = vld [vmem:[%s23991_s2 + $0x600] sm:$0xff]  ;;  %v14966_v13 = vld [vmem:[%s23991_s2 + $0x608] sm:$0xff] }
 0x656   : > { %19145 = vmatpush3.bf16.msra.mxu1 %v19144_v20  ;;  %v14945_v20 = vld [vmem:[%s23991_s2 + $0x5a0] sm:$0xff] }
 0x657   : > { %19146 = vmatprep.subr.bf16.mxu1 %v24002_v0  ;;  %v19177_v55 = vpack.c.bf16 %v14946_v29, %v14945_v20  ;;  %v19195_v20 = vpack.c.bf16 %v14966_v13, %v14965_v7  ;;  %v2192_v29 = vld [vmem:[%s23991_s2 + $0x20] sm:$0xff]  ;;  %v14971_v7 = vld [vmem:[%s23991_s2 + $0x630] sm:$0xff]  ;;  %v14972_v13 = vld [vmem:[%s23991_s2 + $0x638] sm:$0xff] }
 0x659   : > { %17164 = vmatmul.mubr.msk.f32.vlgmr.msra.gmra.mrb[32].mxu1 %vm674_vm4, %v21021_v26 }
 0x65a   : > { %19148 = vmatpush3.bf16.msra.mxu1 %v19147_v36  ;;  %17187 = vmatprep.mubr.msk.f32.mxu1 %vm20352_vm0, %v24000_v1 }
 0x65b   : > { %19149 = vmatprep.subr.bf16.mxu1 %v24002_v0 }
 0x65e   : > { %19151 = vmatpush3.bf16.msra.mxu1 %v19150_v40  ;;  %v2188_v40 = vld [vmem:[%s23991_s2] sm:$0xff] }
 0x65f   : > { %19152 = vmatprep.subr.bf16.mxu1 %v24002_v0 }
 0x662   : > { %19154 = vmatpush3.bf16.msra.mxu1 %v19153_v56  ;;  %v14947_v56 = vld [vmem:[%s23991_s2 + $0x5b0] sm:$0xff] }
 0x663   : > { %19155 = vmatprep.subr.bf16.mxu1 %v24002_v0  ;;  %v19180_v62 = vpack.c.bf16 %v14948_v46, %v14947_v56  ;;  %v2195_v56 = vld [vmem:[%s23991_s2 + $0x38] sm:$0xff]  ;;  %v14969_v46 = vld [vmem:[%s23991_s2 + $0x620] sm:$0xff] }
 0x666   : > { %19157 = vmatpush3.bf16.msra.mxu1 %v19156_v59  ;;  %v18907_v59 = vpack.c.bf16 %v2189_v49, %v2188_v40  ;;  %v2194_v49 = vld [vmem:[%s23991_s2 + $0x30] sm:$0xff] }
 0x667   : > { %19170 = vmatprep.subr.bf16.mxu1 %v24002_v0 }
 0x669   : > { %17188 = vmatmul.mubr.msk.f32.vlgmr.msra.gmra.mrb[34].mxu1 %vm674_vm4, %v21021_v26 }
 0x66a   : > { %19172 = vmatpush3.bf16.msra.mxu1 %v19171_v6  ;;  %17235 = vmatprep.mubr.msk.f32.mxu1 %vm20352_vm0, %v24000_v1  ;;  %v2191_v6 = vld [vmem:[%s23991_s2 + $0x18] sm:$0xff] }
 0x66b   : > { %19173 = vmatprep.subr.bf16.mxu1 %v24002_v0 }
 0x66c   : > { %v2082_v33 = vpop.f32.mrb[2].mxu1 }
 0x66d   : > { %v2087_v36 = vmul.f32 0.2, %v2082_v33  ;;  %v16685_v38 = vpop.f32.mrb[3].mxu1 }
 0x66e   : > { %19175 = vmatpush3.bf16.msra.mxu1 %v19174_v17  ;;  %v18910_v17 = vpack.c.bf16 %v2191_v6, %v2190_v2  ;;  %v14968_v38 = vld [vmem:[%s23991_s2 + $0x618] sm:$0xff]  ;;  %v18916_v2 = vpack.c.bf16 %v2195_v56, %v2194_v49 }
 0x66f   : > { %v21311_v52 = vmax.f32 %v2082_v33, %v2087_v36  ;;  %19176 = vmatprep.subr.bf16.mxu1 %v24002_v0  ;;  %v2193_v33 = vld [vmem:[%s23991_s2 + $0x28] sm:$0xff]  ;;  %v14967_v36 = vld [vmem:[%s23991_s2 + $0x610] sm:$0xff] }
 0x670   : > { %v19198_v40 = vpack.c.bf16 %v14968_v38, %v14967_v36 }
 0x671   : > { %v2089_v47 = vmul.f32 %v21311_v52, %v21311_v52 }
 0x672   : > { %19178 = vmatpush3.bf16.msra.mxu1 %v19177_v55  ;;  %v18913_v55 = vpack.c.bf16 %v2193_v33, %v2192_v29 }
 0x673   : > { %16687 = vmatpush3.msk.msra.mxu0 %vm423_vm2, %v2089_v47  ;;  %19179 = vmatprep.subr.bf16.mxu1 %v24002_v0  ;;  %v14970_v47 = vld [vmem:[%s23991_s2 + $0x628] sm:$0xff] }
 0x674   : > { %16689 = vmatmul.mubr.msk.f32.vlgmr.msra.gmra.mrb[18].mxu0 %vm419_vm3, %v23998_v14  ;;  %18906 = vmatprep.subr.bf16.mxu0 %v24002_v0  ;;  %v19201_v6 = vpack.c.bf16 %v14970_v47, %v14969_v46  ;;  %v14758_v47 = vld [vmem:[%s23995_s6 + $0x194] sm:$0xf] }
 0x675   : > { %18908 = vmatpush3.bf16.msra.mxu0 %v18907_v59  ;;  %16707 = vmatprep.mubr.msk.f32.mxu0 %vm20352_vm0, %v24000_v1 }
 0x676   : > { %19181 = vmatpush3.bf16.msra.mxu1 %v19180_v62  ;;  %18909 = vmatprep.subr.bf16.mxu0 %v24002_v0 }
 0x677   : > { %19194 = vmatprep.subr.bf16.mxu1 %v24002_v0 }
 0x679   : > { %18911 = vmatpush3.bf16.msra.mxu0 %v18910_v17  ;;  %17236 = vmatmul.mubr.msk.f32.vlgmr.msra.gmra.mrb[36].mxu1 %vm674_vm4, %v21021_v26  ;;  %v19204_v17 = vpack.c.bf16 %v14972_v13, %v14971_v7 }
 0x67a   : > { %19196 = vmatpush3.bf16.msra.mxu1 %v19195_v20  ;;  %18912 = vmatprep.subr.bf16.mxu0 %v24002_v0 }
 0x67b   : > { %19197 = vmatprep.subr.bf16.mxu1 %v24002_v0  ;;  %17283 = vmatprep.mubr.msk.f32.mxu1 %vm20352_vm0, %v24000_v1 }
 0x67c   : > { %v2346_v59 = vpop.f32.mrb[10].mxu1 }
 0x67d   : > { %18914 = vmatpush3.bf16.msra.mxu0 %v18913_v55  ;;  %v16728_v62 = vpop.f32.mrb[11].mxu1 }
 0x67e   : > { %19199 = vmatpush3.bf16.msra.mxu1 %v19198_v40  ;;  %18915 = vmatprep.subr.bf16.mxu0 %v24002_v0 }
 0x67f   : > { %19200 = vmatprep.subr.bf16.mxu1 %v24002_v0 }
 0x681   : > { %18917 = vmatpush3.bf16.msra.mxu0 %v18916_v2 }
 0x682   : > { %19202 = vmatpush3.bf16.msra.mxu1 %v19201_v6  ;;  %16729 = vmatprep.subr.mxu0 %v24000_v1 }
 0x683   : > { %19203 = vmatprep.subr.bf16.mxu1 %v24002_v0 }
 0x684   : > { %16708 = vmatmul.mubr.msk.f32.vlgmr.msra.gmra.mrb[20].mxu0 %vm674_vm4, %v21021_v26 }
 0x685   : > { %16730 = vmatpush3.msk.msra.mxu0 %vm423_vm2, %v2346_v59  ;;  %16731 = vmatprep.mubr.msk.f32.mxu0 %vm20352_vm0, %v24000_v1 }
 0x686   : > { %19205 = vmatpush3.bf16.msra.mxu1 %v19204_v17  ;;  %16734 = vmatprep.subr.mxu0 %v24000_v1 }
 0x687   : > { %17291 = vmatprep.subr.mxu1 %v24000_v1 }
 0x688   : > { %16732 = vmatmul.mubr.msk.f32.vlgmr.msra.gmra.mrb[22].mxu0 %vm419_vm3, %v14758_v47 }
 0x689   : > { %17284 = vmatmul.mubr.msk.f32.vlgmr.msra.gmra.mrb[38].mxu1 %vm674_vm4, %v21021_v26  ;;  %16736 = vmatprep.mubr.msk.f32.mxu0 %vm20352_vm0, %v24000_v1 }
 0x68a   : > { %17293 = vmatprep.mubr.msk.f32.mxu1 %vm20352_vm0, %v24000_v1 }
 0x68c   : > { %v21394_v20 = vpop.f32.mrb[12].mxu1 }
 0x68d   : > { %v16781_v29 = vpop.f32.mrb[13].mxu1 }
 0x69c   : > { %v21396_v33 = vpop.f32.mrb[14].mxu1 }
 0x69d   : > { %v16805_v36 = vpop.f32.mrb[15].mxu1 }
 0x6ac   : > { %v21398_v38 = vpop.f32.mrb[16].mxu1 }
 0x6ad   : > { %v16853_v55 = vpop.f32.mrb[17].mxu1 }
 0x6bc   : > { %v21400_v40 = vpop.f32.mrb[18].mxu1 }
 0x6bd   : > { %v16901_v49 = vpop.f32.mrb[19].mxu1 }
 0x6cc   : > { %v21402_v56 = vpop.f32.mrb[20].mxu1 }
 0x6cd   : > { %v16925_v46 = vpop.f32.mrb[21].mxu1 }
 0x6dc   : > { %v21410_v59 = vpop.f32.mrb[22].mxu1 }
 0x6dd   : > { %v16973_v62 = vpop.f32.mrb[23].mxu1 }
 0x6ec   : > { %v21412_v2 = vpop.f32.mrb[24].mxu1 }
 0x6ed   : > { %v16997_v6 = vpop.f32.mrb[25].mxu1 }
 0x6fc   : > { %v21414_v7 = vpop.f32.mrb[26].mxu1 }
 0x6fd   : > { %v17045_v13 = vpop.f32.mrb[27].mxu1 }
 0x6fe   : > { %v14773_v13 = vld [vmem:[%s23991_s2 + $0x80] sm:$0xff] }
 0x70c   : > { %v21416_v17 = vpop.f32.mrb[28].mxu1 }
 0x70d   : > { %v17093_v29 = vpop.f32.mrb[29].mxu1 }
 0x70e   : > { %v14774_v29 = vld [vmem:[%s23991_s2 + $0x88] sm:$0xff] }
 0x71c   : > { %v21418_v36 = vpop.f32.mrb[30].mxu1 }
 0x71d   : > { %v17117_v55 = vpop.f32.mrb[31].mxu1 }
 0x71e   : > { %v14756_v55 = vld [vmem:[%s23995_s6 + $0x190] sm:$0xf] }
 0x72c   : > { %v21420_v49 = vpop.f32.mrb[32].mxu1 }
 0x72d   : > { %v17165_v46 = vpop.f32.mrb[33].mxu1 }
 0x72e   : > { %v18931_v46 = vpack.c.bf16 %v14774_v29, %v14773_v13  ;;  %v14777_v13 = vld [vmem:[%s23991_s2 + $0xa0] sm:$0xff] }
 0x73c   : > { %v21422_v47 = vpop.f32.mrb[34].mxu1 }
 0x73d   : > { %v17189_v14 = vpop.f32.mrb[35].mxu1 }
 0x747   : > { %v21424_v1 = vpop.f32.mrb[18].mxu0 }
 0x748   : > { %v16690_v62 = vpop.f32.mrb[19].mxu0 }
 0x749   : > { %v14775_v62 = vld [vmem:[%s23991_s2 + $0x90] sm:$0xff] }
 0x74c   : > { %v21426_v0 = vpop.f32.mrb[36].mxu1 }
 0x74d   : > { %v17237_v6 = vpop.f32.mrb[37].mxu1 }
 0x74e   : > { %v14776_v6 = vld [vmem:[%s23991_s2 + $0x98] sm:$0xff] }
 0x74f   : > { %v18934_v53 = vpack.c.bf16 %v14776_v6, %v14775_v62  ;;  %v14780_v62 = vld [vmem:[%s23991_s2 + $0xb8] sm:$0xff] }
 0x757   : > { %v2265_v14 = vpop.f32.mrb[20].mxu0 }
 0x758   : > { %v16709_v4 = vpop.f32.mrb[21].mxu0  ;;  %16735 = vmatpush3.msk.msra.mxu0 %vm423_vm2, %v2265_v14 }
 0x759   : > { %18930 = vmatprep.subr.bf16.mxu0 %v24046_v42  ;;  %16737 = vmatmul.mubr.msk.f32.vlgmr.msra.gmra.mrb[22].mxu0 %vm419_vm3, %v14756_v55  ;;  %v14778_v4 = vld [vmem:[%s23991_s2 + $0xa8] sm:$0xff] }
 0x75a   : > { %18932 = vmatpush3.bf16.msra.mxu0 %v18931_v46  ;;  %16755 = vmatprep.mubr.msk.f32.mxu0 %vm20352_vm0, %v24047_v48  ;;  %v18937_v55 = vpack.c.bf16 %v14778_v4, %v14777_v13  ;;  %v14779_v46 = vld [vmem:[%s23991_s2 + $0xb0] sm:$0xff] }
 0x75b   : > { %18933 = vmatprep.subr.bf16.mxu0 %v24046_v42  ;;  %v18940_v6 = vpack.c.bf16 %v14780_v62, %v14779_v46  ;;  %v14796_v46 = vld [vmem:[%s23995_s6 + $0x1a0] sm:$0xf] }
 0x75c   : > { %v21455_v29 = vpop.f32.mrb[38].mxu1 }
 0x75d   : > { %v17285_v14 = vpop.f32.mrb[39].mxu1 }
 0x75e   : > { %18935 = vmatpush3.bf16.msra.mxu0 %v18934_v53  ;;  %v14772_v53 = vld [vmem:[%s23995_s6 + $0x198] sm:$0xf]  ;;  %v14784_v14 = vld [vmem:[%s23995_s6 + $0x19c] sm:$0xf] }
 0x75f   : > { %18936 = vmatprep.subr.bf16.mxu0 %v24046_v42 }
 0x762   : > { %18938 = vmatpush3.bf16.msra.mxu0 %v18937_v55  ;;  %v14810_v55 = vld [vmem:[%s23991_s2 + $0x148] sm:$0xff] }
 0x763   : > { %18939 = vmatprep.subr.bf16.mxu0 %v24046_v42 }
 0x766   : > { %18941 = vmatpush3.bf16.msra.mxu0 %v18940_v6  ;;  %v14812_v6 = vld [vmem:[%s23991_s2 + $0x158] sm:$0xff] }
 0x767   : > { %16758 = vmatprep.subr.mxu0 %v24047_v48 }
 0x769   : > { %16756 = vmatmul.mubr.msk.f32.vlgmr.msra.gmra.mrb[24].mxu0 %vm674_vm4, %v21021_v26 }
 0x76a   : > { %16760 = vmatprep.mubr.msk.f32.mxu0 %vm20352_vm0, %v24047_v48 }
 0x83c   : > { %v2579_v13 = vpop.f32.mrb[24].mxu0 }
 0x83d   : > { %v16757_v4 = vpop.f32.mrb[25].mxu0  ;;  %16759 = vmatpush3.msk.msra.mxu0 %vm423_vm2, %v2579_v13  ;;  %v14813_v13 = vld [vmem:[%s23991_s2 + $0x160] sm:$0xff] }
 0x83e   : > { %16761 = vmatmul.mubr.msk.f32.vlgmr.msra.gmra.mrb[22].mxu0 %vm419_vm3, %v14772_v53  ;;  %16782 = vmatprep.subr.mxu0 %v24047_v48  ;;  %v14814_v4 = vld [vmem:[%s23991_s2 + $0x168] sm:$0xff] }
 0x83f   : > { %16783 = vmatpush3.msk.msra.mxu0 %vm423_vm2, %v21394_v20  ;;  %16784 = vmatprep.mubr.msk.f32.mxu0 %vm20352_vm0, %v24047_v48  ;;  %v14809_v20 = vld [vmem:[%s23991_s2 + $0x140] sm:$0xff] }
 0x840   : > { %16806 = vmatprep.subr.mxu0 %v24047_v48  ;;  %v18967_v62 = vpack.c.bf16 %v14810_v55, %v14809_v20  ;;  %v14815_v20 = vld [vmem:[%s23991_s2 + $0x170] sm:$0xff]  ;;  %v14816_v55 = vld [vmem:[%s23991_s2 + $0x178] sm:$0xff] }
 0x846   : > { %16785 = vmatmul.mubr.msk.f32.vlgmr.msra.gmra.mrb[22].mxu0 %vm419_vm3, %v14784_v14  ;;  %v18973_v14 = vpack.c.bf16 %v14814_v4, %v14813_v13  ;;  %v335_v13 = vld [vmem:[%s23992_s3] sm:$0xff]  ;;  %v24009_v4 = vmov 0  }
 0x847   : > { %16807 = vmatpush3.msk.msra.mxu0 %vm423_vm2, %v21396_v33  ;;  %16808 = vmatprep.mubr.msk.f32.mxu0 %vm20352_vm0, %v24047_v48  ;;  %v14811_v33 = vld [vmem:[%s23991_s2 + $0x150] sm:$0xff]  ;;  %vm6153_vm5 = vcmp.gt.f32.partialorder %v335_v13, 0.5 }
 0x848   : > { %18966 = vmatprep.subr.bf16.mxu0 %v24046_v42  ;;  %v18970_v53 = vpack.c.bf16 %v14812_v6, %v14811_v33 }
 0x84e   : > { %16809 = vmatmul.mubr.msk.f32.vlgmr.msra.gmra.mrb[22].mxu0 %vm419_vm3, %v14796_v46  ;;  %v18976_v46 = vpack.c.bf16 %v14816_v55, %v14815_v20  ;;  %v6164_v55 = vsub.s32 1, %v20542_v39 }
 0x84f   : > { %18968 = vmatpush3.bf16.msra.mxu0 %v18967_v62  ;;  %16827 = vmatprep.mubr.msk.f32.mxu0 %vm20352_vm0, %v24047_v48  ;;  %v14808_v62 = vld [vmem:[%s23995_s6 + $0x1a4] sm:$0xf] }
 0x850   : > { %18969 = vmatprep.subr.bf16.mxu0 %v24046_v42 }
 0x853   : > { %18971 = vmatpush3.bf16.msra.mxu0 %v18970_v53  ;;  %v14820_v53 = vld [vmem:[%s23995_s6 + $0x1a8] sm:$0xf] }
 0x854   : > { %18972 = vmatprep.subr.bf16.mxu0 %v24046_v42 }
 0x857   : > { %18974 = vmatpush3.bf16.msra.mxu0 %v18973_v14  ;;  %v21561_v14 = vsel %vm6153_vm5, 1, %v24009_v4 }
 0x858   : > { %18975 = vmatprep.subr.bf16.mxu0 %v24046_v42  ;;  %v6158_v20 = vrot.slane %v21561_v14, %v20556_v44 }
 0x85a   : > { %vm21567_vm6 = vcmp.eq.s32.totalorder %v6158_v20, 1  ;;  %v14824_v20 = vld [vmem:[%s23995_s6 + $0x1ac] sm:$0xf] }
 0x85b   : > { %18977 = vmatpush3.bf16.msra.mxu0 %v18976_v46  ;;  %v6171_v46 = vsub.s32 2, %v20542_v39  ;;  %v6160_v13 = vsel %vm21567_vm6, %v21398_v38, -1e+30 }
 0x85c   : > { %16830 = vmatprep.subr.mxu0 %v24047_v48  ;;  %v6161_v43 = vmax.f32 %v21021_v26, %v6160_v13 }
 0x85e   : > { %16828 = vmatmul.mubr.msk.f32.vlgmr.msra.gmra.mrb[26].mxu0 %vm674_vm4, %v21021_v26 }
 0x85f   : > { %16832 = vmatprep.mubr.msk.f32.mxu0 %vm20352_vm0, %v24047_v48 }
 0x931   : > { %v3053_v33 = vpop.f32.mrb[26].mxu0 }
 0x932   : > { %v16829_v6 = vpop.f32.mrb[27].mxu0  ;;  %16831 = vmatpush3.msk.msra.mxu0 %vm423_vm2, %v3053_v33  ;;  %v6178_v33 = vsub.s32 3, %v20542_v39 }
 0x933   : > { %16833 = vmatmul.mubr.msk.f32.vlgmr.msra.gmra.mrb[22].mxu0 %vm419_vm3, %v14808_v62  ;;  %16854 = vmatprep.subr.mxu0 %v24047_v48  ;;  %v24048_v62 = vmov 0  ;;  %v21573_v6 = vrot.slane %v21561_v14, %v6164_v55 }
 0x934   : > { %16855 = vmatpush3.msk.msra.mxu0 %vm423_vm2, %v21398_v38  ;;  %16856 = vmatprep.mubr.msk.f32.mxu0 %vm20352_vm0, %v24047_v48  ;;  %v24049_v62 = vsel %vm21567_vm6, 4294967295, %v24048_v62  ;;  %v21582_v4 = vrot.slane %v21561_v14, %v6178_v33 }
 0x935   : > { %18990 = vmatprep.subr.bf16.mxu0 %v24046_v42  ;;  %24050 = vst [vmem:[#allocation16_spill] sm:$0xff] %v24049_v62  ;;  %vm6166_vm7 = vcmp.eq.s32.totalorder %v21573_v6, 1 }
 0x936   : > { %vm6180_vm9 = vcmp.eq.s32.totalorder %v21582_v4, 1 }
 0x93b   : > { %16857 = vmatmul.mubr.msk.f32.vlgmr.msra.gmra.mrb[22].mxu0 %vm419_vm3, %v14820_v53  ;;  %v21576_v53 = vrot.slane %v21561_v14, %v6171_v46 }
 0x93c   : > { %18992 = vmatpush3.bf16.msra.mxu0 %v20546_v41  ;;  %16875 = vmatprep.mubr.msk.f32.mxu0 %vm20352_vm0, %v24047_v48 }
 0x93d   : > { %18993 = vmatprep.subr.bf16.mxu0 %v24046_v42  ;;  %vm6173_vm8 = vcmp.eq.s32.totalorder %v21576_v53, 1 }
 0x93e   : > { %v6174_v13 = vsel %vm6173_vm8, %v21400_v40, -1e+30 }
 0x940   : > { %18995 = vmatpush3.bf16.msra.mxu0 %v20562_v45 }
 0x941   : > { %18996 = vmatprep.subr.bf16.mxu0 %v24046_v42 }
 0x944   : > { %18998 = vmatpush3.bf16.msra.mxu0 %v20575_v50 }
 0x945   : > { %18999 = vmatprep.subr.bf16.mxu0 %v24046_v42 }
 0x948   : > { %19001 = vmatpush3.bf16.msra.mxu0 %v20590_v54 }
 0x949   : > { %16878 = vmatprep.subr.mxu0 %v24047_v48 }
 0x94b   : > { %16876 = vmatmul.mubr.msk.f32.vlgmr.msra.gmra.mrb[28].mxu0 %vm674_vm4, %v21021_v26 }
 0x94c   : > { %16880 = vmatprep.mubr.msk.f32.mxu0 %vm20352_vm0, %v24047_v48 }
 0xa1e   : > { %v3351_v55 = vpop.f32.mrb[28].mxu0 }
 0xa1f   : > { %v6141_v46 = vadd.f32 %v3351_v55, %v21398_v38  ;;  %v6167_v62 = vsel %vm6166_vm7, %v3351_v55, -1e+30  ;;  %v16877_v37 = vpop.f32.mrb[29].mxu0  ;;  %16879 = vmatpush3.msk.msra.mxu0 %vm423_vm2, %v3351_v55  ;;  %v14846_v55 = vld [vmem:[%s23991_s2 + $0x288] sm:$0xff] }
 0xa20   : > { %v6168_v33 = vmax.f32 %v6161_v43, %v6167_v62  ;;  %16881 = vmatmul.mubr.msk.f32.vlgmr.msra.gmra.mrb[22].mxu0 %vm419_vm3, %v14824_v20  ;;  %16902 = vmatprep.subr.mxu0 %v24047_v48  ;;  %v21611_v43 = vsel %vm6180_vm9, %v21410_v59, -1e+30 }
 0xa21   : > { %v6142_v32 = vadd.f32 %v6141_v46, %v21400_v40  ;;  %16903 = vmatpush3.msk.msra.mxu0 %vm423_vm2, %v21400_v40  ;;  %16904 = vmatprep.mubr.msk.f32.mxu0 %vm20352_vm0, %v24047_v48  ;;  %v14828_v40 = vld [vmem:[%s23995_s6 + $0x1b0] sm:$0xf]  ;;  %v14832_v46 = vld [vmem:[%s23995_s6 + $0x1b4] sm:$0xf] }
 0xa22   : > { %v21605_v37 = vmax.f32 %v6168_v33, %v6174_v13  ;;  %16926 = vmatprep.subr.mxu0 %v24047_v48  ;;  %v14848_v13 = vld [vmem:[%s23991_s2 + $0x298] sm:$0xff] }
 0xa23   : > { %v6143_v38 = vadd.f32 %v6142_v32, %v21410_v59  ;;  %v14845_v32 = vld [vmem:[%s23991_s2 + $0x280] sm:$0xff] }
 0xa24   : > { %v6182_v62 = vmax.f32 %v21605_v37, %v21611_v43  ;;  %v19027_v33 = vpack.c.bf16 %v14846_v55, %v14845_v32  ;;  %v14850_v32 = vld [vmem:[%s23991_s2 + $0x2a8] sm:$0xff]  ;;  %v14881_v37 = vld [vmem:[%s23991_s2 + $0x3c0] sm:$0xff] }
 0xa25   : > { %v21620_v20 = vadd.f32 %v6143_v38, %v21412_v2  ;;  %v14882_v43 = vld [vmem:[%s23991_s2 + $0x3c8] sm:$0xff] }
 0xa28   : > { %16905 = vmatmul.mubr.msk.f32.vlgmr.msra.gmra.mrb[22].mxu0 %vm419_vm3, %v14828_v40  ;;  %v14849_v40 = vld [vmem:[%s23991_s2 + $0x2a0] sm:$0xff] }
 0xa29   : > { %16927 = vmatpush3.msk.msra.mxu0 %vm423_vm2, %v21402_v56  ;;  %16928 = vmatprep.mubr.msk.f32.mxu0 %vm20352_vm0, %v24047_v48  ;;  %v14847_v56 = vld [vmem:[%s23991_s2 + $0x290] sm:$0xff]  ;;  %v19033_v55 = vpack.c.bf16 %v14850_v32, %v14849_v40  ;;  %v14856_v32 = vld [vmem:[%s23995_s6 + $0x1bc] sm:$0xf] }
 0xa2a   : > { %19026 = vmatprep.subr.bf16.mxu0 %v24046_v42  ;;  %v19030_v38 = vpack.c.bf16 %v14848_v13, %v14847_v56  ;;  %v14844_v13 = vld [vmem:[%s23995_s6 + $0x1b8] sm:$0xf] }
 0xa30   : > { %16929 = vmatmul.mubr.msk.f32.vlgmr.msra.gmra.mrb[22].mxu0 %vm419_vm3, %v14832_v46  ;;  %v14851_v46 = vld [vmem:[%s23991_s2 + $0x2b0] sm:$0xff] }
 0xa31   : > { %19028 = vmatpush3.bf16.msra.mxu0 %v19027_v33  ;;  %16947 = vmatprep.mubr.msk.f32.mxu0 %vm20352_vm0, %v24047_v48  ;;  %v14852_v33 = vld [vmem:[%s23991_s2 + $0x2b8] sm:$0xff] }
 0xa32   : > { %19029 = vmatprep.subr.bf16.mxu0 %v24046_v42  ;;  %v19036_v56 = vpack.c.bf16 %v14852_v33, %v14851_v46  ;;  %v6199_v46 = vsub.s32 7, %v20542_v39 }
 0xa35   : > { %19031 = vmatpush3.bf16.msra.mxu0 %v19030_v38 }
 0xa36   : > { %19032 = vmatprep.subr.bf16.mxu0 %v24046_v42 }
 0xa39   : > { %19034 = vmatpush3.bf16.msra.mxu0 %v19033_v55  ;;  %v6192_v55 = vsub.s32 6, %v20542_v39 }
 0xa3a   : > { %19035 = vmatprep.subr.bf16.mxu0 %v24046_v42 }
 0xa3d   : > { %19037 = vmatpush3.bf16.msra.mxu0 %v19036_v56  ;;  %v21711_v56 = vrot.slane %v21561_v14, %v6192_v55 }
 0xa3e   : > { %16950 = vmatprep.subr.mxu0 %v24047_v48 }
 0xa3f   : > { %vm6194_vm11 = vcmp.eq.s32.totalorder %v21711_v56, 1 }
 0xa40   : > { %16948 = vmatmul.mubr.msk.f32.vlgmr.msra.gmra.mrb[30].mxu0 %vm674_vm4, %v21021_v26 }
 0xa41   : > { %16952 = vmatprep.mubr.msk.f32.mxu0 %vm20352_vm0, %v24047_v48 }
 0xb13   : > { %v3816_v38 = vpop.f32.mrb[30].mxu0 }
 0xb14   : > { %v16949_v40 = vpop.f32.mrb[31].mxu0  ;;  %16951 = vmatpush3.msk.msra.mxu0 %vm423_vm2, %v3816_v38  ;;  %v14864_v38 = vld [vmem:[%s23995_s6 + $0x1c4] sm:$0xf] }
 0xb15   : > { %16953 = vmatmul.mubr.msk.f32.vlgmr.msra.gmra.mrb[22].mxu0 %vm419_vm3, %v14844_v13  ;;  %16974 = vmatprep.subr.mxu0 %v24047_v48  ;;  %v21714_v13 = vrot.slane %v21561_v14, %v6199_v46 }
 0xb16   : > { %16975 = vmatpush3.msk.msra.mxu0 %vm423_vm2, %v21410_v59  ;;  %16976 = vmatprep.mubr.msk.f32.mxu0 %vm20352_vm0, %v24047_v48  ;;  %v14860_v59 = vld [vmem:[%s23995_s6 + $0x1c0] sm:$0xf] }
 0xb17   : > { %16998 = vmatprep.subr.mxu0 %v24047_v48  ;;  %vm6201_vm12 = vcmp.eq.s32.totalorder %v21714_v13, 1 }
 0xb1d   : > { %16977 = vmatmul.mubr.msk.f32.vlgmr.msra.gmra.mrb[22].mxu0 %vm419_vm3, %v14856_v32 }
 0xb1e   : > { %16999 = vmatpush3.msk.msra.mxu0 %vm423_vm2, %v21412_v2  ;;  %17000 = vmatprep.mubr.msk.f32.mxu0 %vm20352_vm0, %v24047_v48  ;;  %v6185_v2 = vsub.s32 5, %v20542_v39 }
 0xb1f   : > { %19062 = vmatprep.subr.bf16.mxu0 %v24046_v42 }
 0xb20   : > { %v21708_v33 = vrot.slane %v21561_v14, %v6185_v2 }
 0xb22   : > { %vm6187_vm10 = vcmp.eq.s32.totalorder %v21708_v33, 1 }
 0xb25   : > { %17001 = vmatmul.mubr.msk.f32.vlgmr.msra.gmra.mrb[22].mxu0 %vm419_vm3, %v14860_v59 }
 0xb26   : > { %19064 = vmatpush3.bf16.msra.mxu0 %v20690_v23  ;;  %17019 = vmatprep.mubr.msk.f32.mxu0 %vm20352_vm0, %v24047_v48 }
 0xb27   : > { %19065 = vmatprep.subr.bf16.mxu0 %v24046_v42 }
 0xb2a   : > { %19067 = vmatpush3.bf16.msra.mxu0 %v20702_v28 }
 0xb2b   : > { %19068 = vmatprep.subr.bf16.mxu0 %v24046_v42 }
 0xb2e   : > { %19070 = vmatpush3.bf16.msra.mxu0 %v20714_v31 }
 0xb2f   : > { %19071 = vmatprep.subr.bf16.mxu0 %v24046_v42 }
 0xb32   : > { %19073 = vmatpush3.bf16.msra.mxu0 %v20724_v34 }
 0xb33   : > { %17022 = vmatprep.subr.mxu0 %v24047_v48 }
 0xb35   : > { %17020 = vmatmul.mubr.msk.f32.vlgmr.msra.gmra.mrb[32].mxu0 %vm674_vm4, %v21021_v26 }
 0xb36   : > { %17024 = vmatprep.mubr.msk.f32.mxu0 %vm20352_vm0, %v24047_v48 }
 0xc08   : > { %v4263_v40 = vpop.f32.mrb[32].mxu0 }
 0xc09   : > { %v6145_v39 = vadd.f32 %v21620_v20, %v4263_v40  ;;  %v6188_v32 = vsel %vm6187_vm10, %v4263_v40, -1e+30  ;;  %v17021_v59 = vpop.f32.mrb[33].mxu0  ;;  %17023 = vmatpush3.msk.msra.mxu0 %vm423_vm2, %v4263_v40  ;;  %v6195_v20 = vsel %vm6194_vm11, %v21416_v17, -1e+30  ;;  %v19087_v40 = vpack.c.bf16 %v14882_v43, %v14881_v37  ;;  %v14888_v37 = vld [vmem:[%s23991_s2 + $0x3f8] sm:$0xff] }
 0xc0a   : > { %v6189_v14 = vmax.f32 %v6182_v62, %v6188_v32  ;;  %17025 = vmatmul.mubr.msk.f32.vlgmr.msra.gmra.mrb[22].mxu0 %vm419_vm3, %v14864_v38  ;;  %17046 = vmatprep.subr.mxu0 %v24047_v48  ;;  %v6202_v62 = vsel %vm6201_vm12, %v21418_v36, -1e+30  ;;  %v14868_v38 = vld [vmem:[%s23995_s6 + $0x1c8] sm:$0xf]  ;;  %v14884_v32 = vld [vmem:[%s23991_s2 + $0x3d8] sm:$0xff] }
 0xc0b   : > { %v6146_v2 = vadd.f32 %v6145_v39, %v21416_v17  ;;  %17047 = vmatpush3.msk.msra.mxu0 %vm423_vm2, %v21414_v7  ;;  %17048 = vmatprep.mubr.msk.f32.mxu0 %vm20352_vm0, %v24047_v48  ;;  %v14883_v39 = vld [vmem:[%s23991_s2 + $0x3d0] sm:$0xff] }
 0xc0c   : > { %v6196_v55 = vmax.f32 %v6189_v14, %v6195_v20  ;;  %19086 = vmatprep.subr.bf16.mxu0 %v24046_v42  ;;  %v19090_v59 = vpack.c.bf16 %v14884_v32, %v14883_v39  ;;  %v14885_v14 = vld [vmem:[%s23991_s2 + $0x3e0] sm:$0xff]  ;;  %v14886_v20 = vld [vmem:[%s23991_s2 + $0x3e8] sm:$0xff]  ;;  %v14892_v39 = vld [vmem:[%s23995_s6 + $0x1d0] sm:$0xf]  ;;  %v24051_v32 = vmov 0  }
 0xc0d   : > { %v6147_v7 = vadd.f32 %v6146_v2, %v21418_v36  ;;  %v19093_v2 = vpack.c.bf16 %v14886_v20, %v14885_v14 }
 0xc0e   : > { %v6203_v46 = vmax.f32 %v6196_v55, %v6202_v62  ;;  %v14887_v55 = vld [vmem:[%s23991_s2 + $0x3f0] sm:$0xff]  ;;  %v14880_v62 = vld [vmem:[%s23995_s6 + $0x1cc] sm:$0xf] }
 0xc0f   : > { %v19096_v43 = vpack.c.bf16 %v14888_v37, %v14887_v55 }
 0xc12   : > { %17049 = vmatmul.mubr.msk.f32.vlgmr.msra.gmra.mrb[22].mxu0 %vm419_vm3, %v14868_v38 }
 0xc13   : > { %19088 = vmatpush3.bf16.msra.mxu0 %v19087_v40  ;;  %17067 = vmatprep.mubr.msk.f32.mxu0 %vm20352_vm0, %v24047_v48 }
 0xc14   : > { %19089 = vmatprep.subr.bf16.mxu0 %v24046_v42 }
 0xc17   : > { %19091 = vmatpush3.bf16.msra.mxu0 %v19090_v59 }
 0xc18   : > { %19092 = vmatprep.subr.bf16.mxu0 %v24046_v42 }
 0xc1b   : > { %19094 = vmatpush3.bf16.msra.mxu0 %v19093_v2  ;;  %v14900_v2 = vld [vmem:[%s23995_s6 + $0x1d8] sm:$0xf] }
 0xc1c   : > { %19095 = vmatprep.subr.bf16.mxu0 %v24046_v42 }
 0xc1f   : > { %19097 = vmatpush3.bf16.msra.mxu0 %v19096_v43 }
 0xc20   : > { %17070 = vmatprep.subr.mxu0 %v24047_v48 }
 0xc22   : > { %17068 = vmatmul.mubr.msk.f32.vlgmr.msra.gmra.mrb[34].mxu0 %vm674_vm4, %v21021_v26 }
 0xc23   : > { %17072 = vmatprep.mubr.msk.f32.mxu0 %vm20352_vm0, %v24047_v48 }
 0xcf5   : > { %v4579_v38 = vpop.f32.mrb[34].mxu0 }
 0xcf6   : > { %v17069_v40 = vpop.f32.mrb[35].mxu0  ;;  %17071 = vmatpush3.msk.msra.mxu0 %vm423_vm2, %v4579_v38 }
 0xcf7   : > { %17073 = vmatmul.mubr.msk.f32.vlgmr.msra.gmra.mrb[22].mxu0 %vm419_vm3, %v14880_v62  ;;  %17094 = vmatprep.subr.mxu0 %v24047_v48  ;;  %v14916_v40 = vld [vmem:[%s23995_s6 + $0x1e0] sm:$0xf] }
 0xcf8   : > { %17095 = vmatpush3.msk.msra.mxu0 %vm423_vm2, %v21416_v17  ;;  %17096 = vmatprep.mubr.msk.f32.mxu0 %vm20352_vm0, %v24047_v48  ;;  %v14896_v17 = vld [vmem:[%s23995_s6 + $0x1d4] sm:$0xf] }
 0xcf9   : > { %17118 = vmatprep.subr.mxu0 %v24047_v48 }
 0xcff   : > { %17097 = vmatmul.mubr.msk.f32.vlgmr.msra.gmra.mrb[22].mxu0 %vm419_vm3, %v14892_v39 }
 0xd00   : > { %17119 = vmatpush3.msk.msra.mxu0 %vm423_vm2, %v21418_v36  ;;  %17120 = vmatprep.mubr.msk.f32.mxu0 %vm20352_vm0, %v24047_v48  ;;  %v336_v36 = vld [vmem:[%s23992_s3 + $0x8] sm:$0x1] }
 0xd01   : > { %19122 = vmatprep.subr.bf16.mxu0 %v24046_v42  ;;  %vm6204_vm13 = vcmp.gt.f32.partialorder %v336_v36, 0.5 }
 0xd02   : > { %v6205_v59 = vsel %vm6204_vm13, 1, %v24051_v32  ;;  %v14933_v32 = vld [vmem:[%s23991_s2 + $0x560] sm:$0xff] }
 0xd03   : > { %v6209_v14 = vrot.slane %v6205_v59, %v20556_v44  ;;  %v14934_v59 = vld [vmem:[%s23991_s2 + $0x568] sm:$0xff] }
 0xd05   : > { %vm21825_vm14 = vcmp.eq.s32.totalorder %v6209_v14, 1  ;;  %v19165_v14 = vpack.c.bf16 %v14934_v59, %v14933_v32  ;;  %v14957_v32 = vld [vmem:[%s23991_s2 + $0x5e0] sm:$0xff]  ;;  %v14958_v59 = vld [vmem:[%s23991_s2 + $0x5e8] sm:$0xff] }
 0xd07   : > { %17121 = vmatmul.mubr.msk.f32.vlgmr.msra.gmra.mrb[22].mxu0 %vm419_vm3, %v14896_v17  ;;  %v14932_v17 = vld [vmem:[%s23991_s2 + $0x558] sm:$0xff] }
 0xd08   : > { %19124 = vmatpush3.bf16.msra.mxu0 %v20934_v58  ;;  %17139 = vmatprep.mubr.msk.f32.mxu0 %vm20352_vm0, %v24047_v48 }
 0xd09   : > { %19125 = vmatprep.subr.bf16.mxu0 %v24046_v42 }
 0xd0c   : > { %19127 = vmatpush3.bf16.msra.mxu0 %v20944_v61 }
 0xd0d   : > { %19128 = vmatprep.subr.bf16.mxu0 %v24046_v42 }
 0xd10   : > { %19130 = vmatpush3.bf16.msra.mxu0 %v20956_v3 }
 0xd11   : > { %19131 = vmatprep.subr.bf16.mxu0 %v24046_v42 }
 0xd14   : > { %19133 = vmatpush3.bf16.msra.mxu0 %v20966_v10 }
 0xd15   : > { %17142 = vmatprep.subr.mxu0 %v24047_v48 }
 0xd17   : > { %17140 = vmatmul.mubr.msk.f32.vlgmr.msra.gmra.mrb[36].mxu0 %vm674_vm4, %v21021_v26 }
 0xd18   : > { %17144 = vmatprep.mubr.msk.f32.mxu0 %vm20352_vm0, %v24047_v48 }
 0xdea   : > { %v5026_v55 = vpop.f32.mrb[36].mxu0 }
 0xdeb   : > { %v21832_v37 = vadd.f32 %v6147_v7, %v5026_v55  ;;  %v6211_v43 = vsel %vm21825_vm14, %v5026_v55, -1e+30  ;;  %v17141_v62 = vpop.f32.mrb[37].mxu0  ;;  %17143 = vmatpush3.msk.msra.mxu0 %vm423_vm2, %v5026_v55  ;;  %v14904_v7 = vld [vmem:[%s23995_s6 + $0x1dc] sm:$0xf] }
 0xdec   : > { %v21837_v38 = vmax.f32 %v6203_v46, %v6211_v43  ;;  %17145 = vmatmul.mubr.msk.f32.vlgmr.msra.gmra.mrb[22].mxu0 %vm419_vm3, %v14900_v2  ;;  %17166 = vmatprep.subr.mxu0 %v24047_v48  ;;  %v14930_v46 = vld [vmem:[%s23991_s2 + $0x548] sm:$0xff]  ;;  %v14935_v2 = vld [vmem:[%s23991_s2 + $0x570] sm:$0xff]  ;;  %v14936_v55 = vld [vmem:[%s23991_s2 + $0x578] sm:$0xff] }
 0xded   : > { %17167 = vmatpush3.msk.msra.mxu0 %vm423_vm2, %v21420_v49  ;;  %17168 = vmatprep.mubr.msk.f32.mxu0 %vm20352_vm0, %v24047_v48  ;;  %v14929_v49 = vld [vmem:[%s23991_s2 + $0x540] sm:$0xff]  ;;  %v19168_v43 = vpack.c.bf16 %v14936_v55, %v14935_v2  ;;  %v14959_v2 = vld [vmem:[%s23991_s2 + $0x5f0] sm:$0xff]  ;;  %v14960_v55 = vld [vmem:[%s23991_s2 + $0x5f8] sm:$0xff] }
 0xdee   : > { %17190 = vmatprep.subr.mxu0 %v24047_v48  ;;  %v19159_v39 = vpack.c.bf16 %v14930_v46, %v14929_v49  ;;  %v14928_v62 = vld [vmem:[%s23995_s6 + $0x1e4] sm:$0xf] }
 0xdef   : > { %v14953_v46 = vld [vmem:[%s23991_s2 + $0x5c0] sm:$0xff] }
 0xdf4   : > { %17169 = vmatmul.mubr.msk.f32.vlgmr.msra.gmra.mrb[22].mxu0 %vm419_vm3, %v14904_v7 }
 0xdf5   : > { %17191 = vmatpush3.msk.msra.mxu0 %vm423_vm2, %v21422_v47  ;;  %17192 = vmatprep.mubr.msk.f32.mxu0 %vm20352_vm0, %v24047_v48  ;;  %v14931_v47 = vld [vmem:[%s23991_s2 + $0x550] sm:$0xff] }
 0xdf6   : > { %19158 = vmatprep.subr.bf16.mxu0 %v24046_v42  ;;  %v19162_v36 = vpack.c.bf16 %v14932_v17, %v14931_v47  ;;  %v14956_v17 = vld [vmem:[%s23991_s2 + $0x5d8] sm:$0xff] }
 0xdfc   : > { %17193 = vmatmul.mubr.msk.f32.vlgmr.msra.gmra.mrb[22].mxu0 %vm419_vm3, %v14916_v40  ;;  %v14954_v40 = vld [vmem:[%s23991_s2 + $0x5c8] sm:$0xff] }
 0xdfd   : > { %19160 = vmatpush3.bf16.msra.mxu0 %v19159_v39  ;;  %17211 = vmatprep.mubr.msk.f32.mxu0 %vm20352_vm0, %v24047_v48  ;;  %v14940_v39 = vld [vmem:[%s23995_s6 + $0x1e8] sm:$0xf]  ;;  %v19183_v47 = vpack.c.bf16 %v14954_v40, %v14953_v46 }
 0xdfe   : > { %19161 = vmatprep.subr.bf16.mxu0 %v24046_v42 }
 0xe01   : > { %19163 = vmatpush3.bf16.msra.mxu0 %v19162_v36 }
 0xe02   : > { %19164 = vmatprep.subr.bf16.mxu0 %v24046_v42 }
 0xe05   : > { %19166 = vmatpush3.bf16.msra.mxu0 %v19165_v14  ;;  %v19189_v14 = vpack.c.bf16 %v14958_v59, %v14957_v32 }
 0xe06   : > { %19167 = vmatprep.subr.bf16.mxu0 %v24046_v42 }
 0xe09   : > { %19169 = vmatpush3.bf16.msra.mxu0 %v19168_v43  ;;  %v19192_v43 = vpack.c.bf16 %v14960_v55, %v14959_v2  ;;  %v6149_v55 = vmul.f32 0.11111111, %v21832_v37 }
 0xe0a   : > { %17214 = vmatprep.subr.mxu0 %v24047_v48 }
 0xe0c   : > { %17212 = vmatmul.mubr.msk.f32.vlgmr.msra.gmra.mrb[38].mxu0 %vm674_vm4, %v21021_v26 }
 0xe0d   : > { %17216 = vmatprep.mubr.msk.f32.mxu0 %vm20352_vm0, %v24047_v48 }
 0xedf   : > { %v5500_v7 = vpop.f32.mrb[38].mxu0 }
 0xee0   : > { %v17213_v49 = vpop.f32.mrb[39].mxu0  ;;  %17215 = vmatpush3.msk.msra.mxu0 %vm423_vm2, %v5500_v7 }
 0xee1   : > { %17217 = vmatmul.mubr.msk.f32.vlgmr.msra.gmra.mrb[22].mxu0 %vm419_vm3, %v14928_v62  ;;  %17238 = vmatprep.subr.mxu0 %v24047_v48  ;;  %v14952_v62 = vld [vmem:[%s23995_s6 + $0x1ec] sm:$0xf] }
 0xee2   : > { %17239 = vmatpush3.msk.msra.mxu0 %vm423_vm2, %v21426_v0  ;;  %17240 = vmatprep.mubr.msk.f32.mxu0 %vm20352_vm0, %v24047_v48  ;;  %v14955_v0 = vld [vmem:[%s23991_s2 + $0x5d0] sm:$0xff] }
 0xee3   : > { %19182 = vmatprep.subr.bf16.mxu0 %v24046_v42  ;;  %v19186_v36 = vpack.c.bf16 %v14956_v17, %v14955_v0  ;;  %v24054_v0 = vmov 1.0   ;;  %v2163_v17 = vmul.f32 0.25, %v21424_v1 }
 0xee9   : > { %17241 = vmatmul.mubr.msk.f32.vlgmr.msra.gmra.mrb[22].mxu0 %vm419_vm3, %v14940_v39 }
 0xeea   : > { %19184 = vmatpush3.bf16.msra.mxu0 %v19183_v47  ;;  %17259 = vmatprep.mubr.msk.f32.mxu0 %vm20352_vm0, %v24047_v48 }
 0xeeb   : > { %19185 = vmatprep.subr.bf16.mxu0 %v24046_v42 }
 0xeee   : > { %19187 = vmatpush3.bf16.msra.mxu0 %v19186_v36  ;;  %v2164_v36 = vadd.f32 1e-08, %v2163_v17 }
 0xeef   : > { %19188 = vmatprep.subr.bf16.mxu0 %v24046_v42 }
 0xef0   : > { %20243 = vrsqrt.f32 %v2164_v36 }
 0xef2   : > { %19190 = vmatpush3.bf16.msra.mxu0 %v19189_v14 }
 0xef3   : > { %19191 = vmatprep.subr.bf16.mxu0 %v24046_v42 }
 0xef6   : > { %19193 = vmatpush3.bf16.msra.mxu0 %v19192_v43 }
 0xef7   : > { %17262 = vmatprep.subr.mxu0 %v24047_v48 }
 0xef9   : > { %17260 = vmatmul.mubr.msk.f32.vlgmr.msra.gmra.mrb[40].mxu0 %vm674_vm4, %v21021_v26  ;;  %v14964_v26 = vld [vmem:[%s23995_s6 + $0x1f0] sm:$0xf] }
 0xefa   : > { %17264 = vmatprep.mubr.msk.f32.mxu0 %vm20352_vm0, %v24047_v48  ;;  %v20244_v43 = vpop.eup %20243 }
 0xfcc   : > { %v5816_v7 = vpop.f32.mrb[40].mxu0 }
 0xfcd   : > { %v17261_v49 = vpop.f32.mrb[41].mxu0  ;;  %17263 = vmatpush3.msk.msra.mxu0 %vm423_vm2, %v5816_v7  ;;  %v2169_v7 = vrot.slane %v20244_v43, %v20556_v44 }
 0xfce   : > { %17265 = vmatmul.mubr.msk.f32.vlgmr.msra.gmra.mrb[22].mxu0 %vm419_vm3, %v14952_v62  ;;  %17286 = vmatprep.subr.mxu0 %v24047_v48  ;;  %v6150_v62 = vmul.f32 0.2, %v6149_v55 }
 0xfcf   : > { %17287 = vmatpush3.msk.msra.mxu0 %vm423_vm2, %v21455_v29  ;;  %17288 = vmatprep.mubr.msk.f32.mxu0 %vm20352_vm0, %v24047_v48  ;;  %v2170_v1 = vmul.f32 %v2169_v7, %v21311_v52 }
 0xfd0   : > { %19314 = vmatprep.subr.bf16.mxu0 %v24046_v42 }
 0xfd6   : > { %17289 = vmatmul.mubr.msk.f32.vlgmr.msra.gmra.mrb[22].mxu0 %vm419_vm3, %v14964_v26  ;;  %v6151_v26 = vmax.f32 %v6149_v55, %v6150_v62 }
 0xfd7   : > { %19316 = vmatpush3.bf16.msra.mxu0 %v20500_v18  ;;  %17483 = vmatprep.mubr.msk.f32.mxu0 %vm20352_vm0, %v24047_v48 }
 0xfd8   : > { %19317 = vmatprep.subr.bf16.mxu0 %v24046_v42 }
 0xfdb   : > { %19319 = vmatpush3.bf16.msra.mxu0 %v20510_v21 }
 0xfdc   : > { %19320 = vmatprep.subr.bf16.mxu0 %v24046_v42 }
 0xfdf   : > { %19322 = vmatpush3.bf16.msra.mxu0 %v20520_v24 }
 0xfe0   : > { %19323 = vmatprep.subr.bf16.mxu0 %v24046_v42 }
 0xfe3   : > { %19325 = vmatpush3.bf16.msra.mxu0 %v20530_v27 }
 0xfe4   : > { %19326 = vmatprep.subr.bf16.mxu0 %v24046_v42 }
0x10a9   : > { %v6050_v29 = vpop.f32.mrb[22].mxu0 }
0x10aa   : > { %v6055_v46 = vmul.f32 0.2, %v6050_v29  ;;  %v17290_v40 = vpop.f32.mrb[23].mxu0 }
0x10ab   : > { %v6152_v40 = vadd.f32 %v6151_v26, %v20578_v51 }
0x10ac   : > { %v6056_v39 = vmax.f32 %v6050_v29, %v6055_v46 }
0x10ae   : > { %v6057_v47 = vmul.f32 %v6056_v39, %v6056_v39 }
0x10b0   : > { %17292 = vmatpush3.msk.msra.mxu1 %vm423_vm2, %v6057_v47 }
0x10b1   : > { %17294 = vmatmul.mubr.msk.f32.vlgmr.msra.gmra.mrb[40].mxu1 %vm419_vm3, %v24054_v0  ;;  %19206 = vmatprep.subr.bf16.mxu1 %v24046_v42 }
0x10b2   : > { %19208 = vmatpush3.bf16.msra.mxu1 %v20546_v41  ;;  %17312 = vmatprep.mubr.msk.f32.mxu1 %vm20352_vm0, %v24047_v48 }
0x10b3   : > { %19209 = vmatprep.subr.bf16.mxu1 %v24046_v42 }
0x10b6   : > { %19211 = vmatpush3.bf16.msra.mxu1 %v20562_v45 }
0x10b7   : > { %19212 = vmatprep.subr.bf16.mxu1 %v24046_v42 }
0x10ba   : > { %19214 = vmatpush3.bf16.msra.mxu1 %v20575_v50 }
0x10bb   : > { %19215 = vmatprep.subr.bf16.mxu1 %v24046_v42 }
0x10be   : > { %19217 = vmatpush3.bf16.msra.mxu1 %v20590_v54 }
0x10bf   : > { %19218 = vmatprep.subr.bf16.mxu1 %v24046_v42 }
0x1184   : > { %v6127_v32 = vpop.f32.mrb[40].mxu1 }
0x1185   : > { %v6131_v59 = vmul.f32 0.25, %v6127_v32  ;;  %v17295_v14 = vpop.f32.mrb[41].mxu1 }
0x1186   : > { %v6213_v14 = vmul.f32 0.2, %v21837_v38 }
0x1187   : > { %v6132_v2 = vadd.f32 1e-08, %v6131_v59 }
0x1188   : > { %v6214_v43 = vmax.f32 %v21837_v38, %v6213_v14 }
0x1189   : > { %20245 = vrsqrt.f32 %v6132_v2 }
0x1193   : > { %v20246_v49 = vpop.eup %20245 }
0x1194   : > { %v6137_v29 = vrot.slane %v20246_v49, %v20556_v44  ;;  %v24061_v49 = vld [vmem:[#allocation15_spill] sm:$0xff] }
0x1195   : > { %v2182_v26 = vmul.f32 0.11111111, %v24061_v49 }
0x1196   : > { %v6138_v46 = vmul.f32 %v6137_v29, %v6056_v39 }
0x1198   : > { %v21987_v47 = vadd.f32 %v6138_v46, %v2170_v1  ;;  %v2183_v1 = vmul.f32 0.2, %v2182_v26 }
0x119a   : > { %17313 = vmatmul.mubr.msk.f32.vlgmr.msra.gmra.mrb[42].mxu1 %vm674_vm4, %v21987_v47  ;;  %v21992_v37 = vadd.f32 %v6152_v40, %v21987_v47  ;;  %7444 = vst.msk [vmem:[#allocation2] sm:$0xf] %vm7443_vm15, %v21987_v47 }
0x119b   : > { %19220 = vmatpush3.bf16.msra.mxu1 %v20500_v18  ;;  %17331 = vmatprep.mubr.msk.f32.mxu1 %vm20352_vm0, %v24047_v48 }
0x119c   : > { %17484 = vmatmul.mubr.msk.f32.vlgmr.msra.gmra.mrb[42].mxu0 %vm674_vm4, %v21992_v37  ;;  %19221 = vmatprep.subr.bf16.mxu1 %v24046_v42  ;;  %7445 = vst.msk [vmem:[#allocation2 + $0x4] sm:$0xf] %vm7443_vm15, %v21992_v37 }
0x119d   : > { %19328 = vmatpush3.bf16.msra.mxu0 %v20546_v41  ;;  %17502 = vmatprep.mubr.msk.f32.mxu0 %vm20352_vm0, %v24047_v48  ;;  %v24058_v41 = vld [vmem:[#allocation12_spill] sm:$0xff] }
0x119e   : > { %19329 = vmatprep.subr.bf16.mxu0 %v24046_v42 }
0x119f   : > { %19223 = vmatpush3.bf16.msra.mxu1 %v20510_v21  ;;  %v24055_v21 = vld [vmem:[#allocation14_spill] sm:$0xff] }
0x11a0   : > { %19224 = vmatprep.subr.bf16.mxu1 %v24046_v42 }
0x11a1   : > { %19331 = vmatpush3.bf16.msra.mxu0 %v20562_v45  ;;  %v24059_v45 = vld [vmem:[#allocation13_spill] sm:$0xff] }
0x11a2   : > { %19332 = vmatprep.subr.bf16.mxu0 %v24046_v42 }
0x11a3   : > { %19226 = vmatpush3.bf16.msra.mxu1 %v20520_v24  ;;  %v22017_v18 = vld [vmem:[#allocation2] sm:$0xff]  ;;  %v24056_v24 = vld [vmem:[#allocation10_spill] sm:$0xff] }
0x11a4   : > { %19227 = vmatprep.subr.bf16.mxu1 %v24046_v42  ;;  %14487 = vst.msk [vmem:[%s22022_s22] sm:$0xff] %vm674_vm4, %v22017_v18 }
0x11a5   : > { %19334 = vmatpush3.bf16.msra.mxu0 %v20575_v50 }
0x11a6   : > { %19335 = vmatprep.subr.bf16.mxu0 %v24046_v42 }
0x11a7   : > { %19229 = vmatpush3.bf16.msra.mxu1 %v20530_v27  ;;  %v24057_v27 = vld [vmem:[#allocation11_spill] sm:$0xff] }
0x11a8   : > { %19230 = vmatprep.subr.bf16.mxu1 %v24046_v42 }
0x11a9   : > { %19337 = vmatpush3.bf16.msra.mxu0 %v20590_v54 }
0x11aa   : > { %17332 = vmatmul.mubr.msk.f32.vlgmr.msra.gmra.mrb[42].mxu1 %vm674_vm4, %v21987_v47  ;;  %19338 = vmatprep.subr.bf16.mxu0 %v24046_v42 }
0x11ab   : > { %19232 = vmatpush3.bf16.msra.mxu1 %v20602_v57  ;;  %17350 = vmatprep.mubr.msk.f32.mxu1 %vm20352_vm0, %v24047_v48 }
0x11ac   : > { %17503 = vmatmul.mubr.msk.f32.vlgmr.msra.gmra.mrb[44].mxu0 %vm674_vm4, %v21992_v37  ;;  %19233 = vmatprep.subr.bf16.mxu1 %v24046_v42 }
0x11ad   : > { %19340 = vmatpush3.bf16.msra.mxu0 %v20602_v57  ;;  %17521 = vmatprep.mubr.msk.f32.mxu0 %vm20352_vm0, %v24047_v48 }
0x11ae   : > { %19341 = vmatprep.subr.bf16.mxu0 %v24046_v42 }
0x11af   : > { %19235 = vmatpush3.bf16.msra.mxu1 %v20614_v60 }
0x11b0   : > { %19236 = vmatprep.subr.bf16.mxu1 %v24046_v42 }
0x11b1   : > { %19343 = vmatpush3.bf16.msra.mxu0 %v20614_v60 }
0x11b2   : > { %19344 = vmatprep.subr.bf16.mxu0 %v24046_v42 }
0x11b3   : > { %19238 = vmatpush3.bf16.msra.mxu1 %v20626_v63 }
0x11b4   : > { %19239 = vmatprep.subr.bf16.mxu1 %v24046_v42 }
0x11b5   : > { %19346 = vmatpush3.bf16.msra.mxu0 %v20626_v63 }
0x11b6   : > { %19347 = vmatprep.subr.bf16.mxu0 %v24046_v42 }
0x11b7   : > { %19241 = vmatpush3.bf16.msra.mxu1 %v20636_v5 }
0x11b8   : > { %19242 = vmatprep.subr.bf16.mxu1 %v24046_v42 }
0x11b9   : > { %19349 = vmatpush3.bf16.msra.mxu0 %v20636_v5 }
0x11ba   : > { %17351 = vmatmul.mubr.msk.f32.vlgmr.msra.gmra.mrb[42].mxu1 %vm674_vm4, %v21987_v47  ;;  %19350 = vmatprep.subr.bf16.mxu0 %v24046_v42 }
0x11bb   : > { %19244 = vmatpush3.bf16.msra.mxu1 %v20804_v12  ;;  %17369 = vmatprep.mubr.msk.f32.mxu1 %vm20352_vm0, %v24047_v48 }
0x11bc   : > { %17522 = vmatmul.mubr.msk.f32.vlgmr.msra.gmra.mrb[46].mxu0 %vm674_vm4, %v21992_v37  ;;  %19245 = vmatprep.subr.bf16.mxu1 %v24046_v42 }
0x11bd   : > { %19352 = vmatpush3.bf16.msra.mxu0 %v20804_v12  ;;  %17540 = vmatprep.mubr.msk.f32.mxu0 %vm20352_vm0, %v24047_v48 }
0x11be   : > { %19353 = vmatprep.subr.bf16.mxu0 %v24046_v42 }
0x11bf   : > { %19247 = vmatpush3.bf16.msra.mxu1 %v20816_v25 }
0x11c0   : > { %19248 = vmatprep.subr.bf16.mxu1 %v24046_v42 }
0x11c1   : > { %19355 = vmatpush3.bf16.msra.mxu0 %v20816_v25 }
0x11c2   : > { %19356 = vmatprep.subr.bf16.mxu0 %v24046_v42 }
0x11c3   : > { %19250 = vmatpush3.bf16.msra.mxu1 %v20828_v30 }
0x11c4   : > { %19251 = vmatprep.subr.bf16.mxu1 %v24046_v42 }
0x11c5   : > { %19358 = vmatpush3.bf16.msra.mxu0 %v20828_v30 }
0x11c6   : > { %19359 = vmatprep.subr.bf16.mxu0 %v24046_v42 }
0x11c7   : > { %19253 = vmatpush3.bf16.msra.mxu1 %v20838_v35 }
0x11c8   : > { %19254 = vmatprep.subr.bf16.mxu1 %v24046_v42 }
0x11c9   : > { %19361 = vmatpush3.bf16.msra.mxu0 %v20838_v35 }
0x11ca   : > { %17370 = vmatmul.mubr.msk.f32.vlgmr.msra.gmra.mrb[42].mxu1 %vm674_vm4, %v21987_v47  ;;  %19362 = vmatprep.subr.bf16.mxu0 %v24046_v42 }
0x11cb   : > { %19256 = vmatpush3.bf16.msra.mxu1 %v20646_v8  ;;  %17388 = vmatprep.mubr.msk.f32.mxu1 %vm20352_vm0, %v24047_v48 }
0x11cc   : > { %17541 = vmatmul.mubr.msk.f32.vlgmr.msra.gmra.mrb[48].mxu0 %vm674_vm4, %v21992_v37  ;;  %19257 = vmatprep.subr.bf16.mxu1 %v24046_v42 }
0x11cd   : > { %19364 = vmatpush3.bf16.msra.mxu0 %v20690_v23  ;;  %17559 = vmatprep.mubr.msk.f32.mxu0 %vm20352_vm0, %v24047_v48 }
0x11ce   : > { %19365 = vmatprep.subr.bf16.mxu0 %v24046_v42 }
0x11cf   : > { %19259 = vmatpush3.bf16.msra.mxu1 %v20658_v11 }
0x11d0   : > { %19260 = vmatprep.subr.bf16.mxu1 %v24046_v42 }
0x11d1   : > { %19367 = vmatpush3.bf16.msra.mxu0 %v20702_v28 }
0x11d2   : > { %19368 = vmatprep.subr.bf16.mxu0 %v24046_v42 }
0x11d3   : > { %19262 = vmatpush3.bf16.msra.mxu1 %v20670_v15 }
0x11d4   : > { %19263 = vmatprep.subr.bf16.mxu1 %v24046_v42 }
0x11d5   : > { %19370 = vmatpush3.bf16.msra.mxu0 %v20714_v31 }
0x11d6   : > { %19371 = vmatprep.subr.bf16.mxu0 %v24046_v42 }
0x11d7   : > { %19265 = vmatpush3.bf16.msra.mxu1 %v20680_v19 }
0x11d8   : > { %19266 = vmatprep.subr.bf16.mxu1 %v24046_v42 }
0x11d9   : > { %19373 = vmatpush3.bf16.msra.mxu0 %v20724_v34 }
0x11da   : > { %17389 = vmatmul.mubr.msk.f32.vlgmr.msra.gmra.mrb[42].mxu1 %vm674_vm4, %v21987_v47  ;;  %19374 = vmatprep.subr.bf16.mxu0 %v24046_v42 }
0x11db   : > { %19268 = vmatpush3.bf16.msra.mxu1 %v20690_v23  ;;  %17407 = vmatprep.mubr.msk.f32.mxu1 %vm20352_vm0, %v24047_v48 }
0x11dc   : > { %17560 = vmatmul.mubr.msk.f32.vlgmr.msra.gmra.mrb[50].mxu0 %vm674_vm4, %v21992_v37  ;;  %19269 = vmatprep.subr.bf16.mxu1 %v24046_v42 }
0x11dd   : > { %19376 = vmatpush3.bf16.msra.mxu0 %v20874_v9  ;;  %17578 = vmatprep.mubr.msk.f32.mxu0 %vm20352_vm0, %v24047_v48 }
0x11de   : > { %19377 = vmatprep.subr.bf16.mxu0 %v24046_v42 }
0x11df   : > { %19271 = vmatpush3.bf16.msra.mxu1 %v20702_v28 }
0x11e0   : > { %19272 = vmatprep.subr.bf16.mxu1 %v24046_v42 }
0x11e1   : > { %19379 = vmatpush3.bf16.msra.mxu0 %v20884_v16 }
0x11e2   : > { %19380 = vmatprep.subr.bf16.mxu0 %v24046_v42 }
0x11e3   : > { %19274 = vmatpush3.bf16.msra.mxu1 %v20714_v31 }
0x11e4   : > { %19275 = vmatprep.subr.bf16.mxu1 %v24046_v42 }
0x11e5   : > { %19382 = vmatpush3.bf16.msra.mxu0 %v20896_v22 }
0x11e6   : > { %19383 = vmatprep.subr.bf16.mxu0 %v24046_v42 }
0x11e7   : > { %19277 = vmatpush3.bf16.msra.mxu1 %v20724_v34 }
0x11e8   : > { %19278 = vmatprep.subr.bf16.mxu1 %v24046_v42 }
0x11e9   : > { %19385 = vmatpush3.bf16.msra.mxu0 %v24055_v21 }
0x11ea   : > { %17408 = vmatmul.mubr.msk.f32.vlgmr.msra.gmra.mrb[42].mxu1 %vm674_vm4, %v21987_v47  ;;  %19386 = vmatprep.subr.bf16.mxu0 %v24046_v42 }
0x11eb   : > { %19280 = vmatpush3.bf16.msra.mxu1 %v20874_v9  ;;  %17426 = vmatprep.mubr.msk.f32.mxu1 %vm20352_vm0, %v24047_v48 }
0x11ec   : > { %17579 = vmatmul.mubr.msk.f32.vlgmr.msra.gmra.mrb[52].mxu0 %vm674_vm4, %v21992_v37  ;;  %19281 = vmatprep.subr.bf16.mxu1 %v24046_v42 }
0x11ed   : > { %19388 = vmatpush3.bf16.msra.mxu0 %v24056_v24  ;;  %17597 = vmatprep.mubr.msk.f32.mxu0 %vm20352_vm0, %v24047_v48 }
0x11ee   : > { %19389 = vmatprep.subr.bf16.mxu0 %v24046_v42 }
0x11ef   : > { %19283 = vmatpush3.bf16.msra.mxu1 %v20884_v16 }
0x11f0   : > { %19284 = vmatprep.subr.bf16.mxu1 %v24046_v42 }
0x11f1   : > { %19391 = vmatpush3.bf16.msra.mxu0 %v24057_v27 }
0x11f2   : > { %19392 = vmatprep.subr.bf16.mxu0 %v24046_v42 }
0x11f3   : > { %19286 = vmatpush3.bf16.msra.mxu1 %v20896_v22 }
0x11f4   : > { %19287 = vmatprep.subr.bf16.mxu1 %v24046_v42 }
0x11f5   : > { %19394 = vmatpush3.bf16.msra.mxu0 %v24058_v41 }
0x11f6   : > { %19395 = vmatprep.subr.bf16.mxu0 %v24046_v42 }
0x11f7   : > { %19289 = vmatpush3.bf16.msra.mxu1 %v24055_v21 }
0x11f8   : > { %19290 = vmatprep.subr.bf16.mxu1 %v24046_v42 }
0x11f9   : > { %19397 = vmatpush3.bf16.msra.mxu0 %v24059_v45 }
0x11fa   : > { %17427 = vmatmul.mubr.msk.f32.vlgmr.msra.gmra.mrb[42].mxu1 %vm674_vm4, %v21987_v47  ;;  %19398 = vmatprep.subr.bf16.mxu0 %v24046_v42 }
0x11fb   : > { %19292 = vmatpush3.bf16.msra.mxu1 %v24056_v24  ;;  %17445 = vmatprep.mubr.msk.f32.mxu1 %vm20352_vm0, %v24047_v48 }
0x11fc   : > { %17598 = vmatmul.mubr.msk.f32.vlgmr.msra.gmra.mrb[54].mxu0 %vm674_vm4, %v21992_v37  ;;  %19293 = vmatprep.subr.bf16.mxu1 %v24046_v42 }
0x11fd   : > { %19400 = vmatpush3.bf16.msra.mxu0 %v20934_v58  ;;  %17616 = vmatprep.mubr.msk.f32.mxu0 %vm20352_vm0, %v24047_v48 }
0x11fe   : > { %19401 = vmatprep.subr.bf16.mxu0 %v24046_v42 }
0x11ff   : > { %19295 = vmatpush3.bf16.msra.mxu1 %v24057_v27 }
0x1200   : > { %19296 = vmatprep.subr.bf16.mxu1 %v24046_v42 }
0x1201   : > { %19403 = vmatpush3.bf16.msra.mxu0 %v20944_v61 }
0x1202   : > { %19404 = vmatprep.subr.bf16.mxu0 %v24046_v42 }
0x1203   : > { %19298 = vmatpush3.bf16.msra.mxu1 %v24058_v41  ;;  %v14995_v41 = vld [vmem:[%s23993_s4 + $0x8] sm:$0xf] }
0x1204   : > { %19299 = vmatprep.subr.bf16.mxu1 %v24046_v42 }
0x1205   : > { %19406 = vmatpush3.bf16.msra.mxu0 %v20956_v3 }
0x1206   : > { %19407 = vmatprep.subr.bf16.mxu0 %v24046_v42 }
0x1207   : > { %19301 = vmatpush3.bf16.msra.mxu1 %v24059_v45 }
0x1208   : > { %19302 = vmatprep.subr.bf16.mxu1 %v24046_v42 }
0x1209   : > { %19409 = vmatpush3.bf16.msra.mxu0 %v20966_v10 }
0x120a   : > { %17446 = vmatmul.mubr.msk.f32.vlgmr.msra.gmra.mrb[42].mxu1 %vm674_vm4, %v21987_v47  ;;  %19410 = vmatprep.subr.bf16.mxu0 %v24046_v42 }
0x120b   : > { %19304 = vmatpush3.bf16.msra.mxu1 %v20934_v58  ;;  %17464 = vmatprep.mubr.msk.f32.mxu1 %vm20352_vm0, %v24047_v48 }
0x120c   : > { %17617 = vmatmul.mubr.msk.f32.vlgmr.msra.gmra.mrb[56].mxu0 %vm674_vm4, %v21992_v37  ;;  %19305 = vmatprep.subr.bf16.mxu1 %v24046_v42 }
0x120d   : > { %17623 = vmatprep.mubr.msk.f32.mxu0 %vm20352_vm0, %v24047_v48 }
0x120f   : > { %19307 = vmatpush3.bf16.msra.mxu1 %v20944_v61 }
0x1210   : > { %19308 = vmatprep.subr.bf16.mxu1 %v24046_v42 }
0x1213   : > { %19310 = vmatpush3.bf16.msra.mxu1 %v20956_v3 }
0x1214   : > { %19311 = vmatprep.subr.bf16.mxu1 %v24046_v42 }
0x1217   : > { %19313 = vmatpush3.bf16.msra.mxu1 %v20966_v10 }
0x1218   : > { %19416 = vmatprep.subr.bf16.mxu1 %v24046_v42 }
0x121a   : > { %17465 = vmatmul.mubr.msk.f32.vlgmr.msra.gmra.mrb[42].mxu1 %vm674_vm4, %v21987_v47 }
0x121b   : > { %17659 = vmatprep.mubr.msk.f32.mxu1 %vm20352_vm0, %v24047_v48 }
0x126f   : > { %v6930_v50 = vpop.f32.mrb[42].mxu0 }
0x1270   : > { %v17485_v51 = vpop.f32.mrb[43].mxu0  ;;  %v6934_v57 = vsel %vm21567_vm6, %v6930_v50, -1e+30 }
0x1271   : > { %v6935_v60 = vmax.f32 %v21992_v37, %v6934_v57  ;;  %v2184_v37 = vmax.f32 %v2182_v26, %v2183_v1  ;;  %v15020_v26 = vld [vmem:[%s23991_s2 + $0x1f0] sm:$0xff] }
0x127f   : > { %v7002_v63 = vpop.f32.mrb[44].mxu0 }
0x1280   : > { %v7006_v5 = vsel %vm6166_vm7, %v7002_v63, -1e+30  ;;  %v17504_v8 = vpop.f32.mrb[45].mxu0  ;;  %v14999_v63 = vld [vmem:[%s23993_s4 + $0xc] sm:$0xf] }
0x1281   : > { %v7007_v11 = vmax.f32 %v6935_v60, %v7006_v5  ;;  %v15004_v5 = vld [vmem:[%s23991_s2 + $0x180] sm:$0xff]  ;;  %v15005_v8 = vld [vmem:[%s23991_s2 + $0x188] sm:$0xff] }
0x128f   : > { %v7074_v15 = vpop.f32.mrb[46].mxu0 }
0x1290   : > { %v7078_v19 = vsel %vm6173_vm8, %v7074_v15, -1e+30  ;;  %v17523_v23 = vpop.f32.mrb[47].mxu0  ;;  %v15006_v15 = vld [vmem:[%s23991_s2 + $0x190] sm:$0xff] }
0x1291   : > { %v7079_v28 = vmax.f32 %v7007_v11, %v7078_v19  ;;  %v22249_v11 = vpack.c.bf16 %v15005_v8, %v15004_v5  ;;  %v15007_v19 = vld [vmem:[%s23991_s2 + $0x198] sm:$0xff] }
0x1292   : > { %v22259_v23 = vpack.c.bf16 %v15007_v19, %v15006_v15  ;;  %v15055_v5 = vld [vmem:[%s23991_s2 + $0x318] sm:$0xff]  ;;  %v15056_v15 = vld [vmem:[%s23991_s2 + $0x320] sm:$0xff]  ;;  %v15057_v19 = vld [vmem:[%s23991_s2 + $0x328] sm:$0xff] }
0x1293   : > { %19418 = vmatpush3.bf16.msra.mxu1 %v22249_v11 }
0x1294   : > { %19419 = vmatprep.subr.bf16.mxu1 %v24046_v42 }
0x1297   : > { %19421 = vmatpush3.bf16.msra.mxu1 %v22259_v23 }
0x1298   : > { %19422 = vmatprep.subr.bf16.mxu1 %v24046_v42 }
0x129f   : > { %v7146_v31 = vpop.f32.mrb[48].mxu0 }
0x12a0   : > { %v7150_v34 = vsel %vm6180_vm9, %v7146_v31, -1e+30  ;;  %v17542_v12 = vpop.f32.mrb[49].mxu0  ;;  %v15009_v31 = vld [vmem:[%s23991_s2 + $0x1a8] sm:$0xff] }
0x12a1   : > { %v7151_v25 = vmax.f32 %v7079_v28, %v7150_v34  ;;  %v15008_v28 = vld [vmem:[%s23991_s2 + $0x1a0] sm:$0xff]  ;;  %v15010_v12 = vld [vmem:[%s23991_s2 + $0x1b0] sm:$0xff] }
0x12a2   : > { %v22269_v34 = vpack.c.bf16 %v15009_v31, %v15008_v28  ;;  %v22413_v28 = vpack.c.bf16 %v15057_v19, %v15056_v15  ;;  %v15058_v31 = vld [vmem:[%s23991_s2 + $0x330] sm:$0xff] }
0x12a4   : > { %19424 = vmatpush3.bf16.msra.mxu1 %v22269_v34  ;;  %24063 = vst [vmem:[#allocation14_spill] sm:$0xff] %v22413_v28 }
0x12a5   : > { %19425 = vmatprep.subr.bf16.mxu1 %v24046_v42 }
0x12af   : > { %v7218_v30 = vpop.f32.mrb[50].mxu0 }
0x12b0   : > { %v7222_v35 = vsel %vm6187_vm10, %v7218_v30, -1e+30  ;;  %v17561_v9 = vpop.f32.mrb[51].mxu0 }
0x12b1   : > { %v7223_v16 = vmax.f32 %v7151_v25, %v7222_v35  ;;  %v15011_v25 = vld [vmem:[%s23991_s2 + $0x1b8] sm:$0xff] }
0x12b2   : > { %v22279_v30 = vpack.c.bf16 %v15011_v25, %v15010_v12  ;;  %v15059_v12 = vld [vmem:[%s23991_s2 + $0x338] sm:$0xff] }
0x12b3   : > { %v22423_v25 = vpack.c.bf16 %v15059_v12, %v15058_v31  ;;  %v15003_v31 = vld [vmem:[%s23994_s5 + $0x1f8] sm:$0xf]  ;;  %v15040_v12 = vld [vmem:[%s23991_s2 + $0x2c0] sm:$0xff] }
0x12b4   : > { %19427 = vmatpush3.bf16.msra.mxu1 %v22279_v30 }
0x12b5   : > { %17681 = vmatprep.subr.mxu1 %v24047_v48  ;;  %24064 = vst [vmem:[#allocation10_spill] sm:$0xff] %v22423_v25 }
0x12bf   : > { %v7290_v22 = vpop.f32.mrb[52].mxu0 }
0x12c0   : > { %v7294_v58 = vsel %vm6194_vm11, %v7290_v22, -1e+30  ;;  %v17580_v61 = vpop.f32.mrb[53].mxu0 }
0x12c1   : > { %v7295_v3 = vmax.f32 %v7223_v16, %v7294_v58 }
0x12cf   : > { %v7362_v10 = vpop.f32.mrb[54].mxu0 }
0x12d0   : > { %v7366_v52 = vsel %vm6201_vm12, %v7362_v10, -1e+30  ;;  %v17599_v39 = vpop.f32.mrb[55].mxu0  ;;  %v15014_v10 = vld [vmem:[%s23991_s2 + $0x1c0] sm:$0xff] }
0x12d1   : > { %v7367_v17 = vmax.f32 %v7295_v3, %v7366_v52  ;;  %v15015_v52 = vld [vmem:[%s23991_s2 + $0x1c8] sm:$0xff] }
0x12df   : > { %v7434_v36 = vpop.f32.mrb[56].mxu0 }
0x12e0   : > { %v7438_v32 = vsel %vm21825_vm14, %v7434_v36, -1e+30  ;;  %v17618_v59 = vpop.f32.mrb[57].mxu0  ;;  %v22293_v36 = vpack.c.bf16 %v15015_v52, %v15014_v10  ;;  %v15069_v10 = vld [vmem:[%s23991_s2 + $0x368] sm:$0xff] }
0x12e1   : > { %v7439_v2 = vmax.f32 %v7367_v17, %v7438_v32  ;;  %v15016_v32 = vld [vmem:[%s23991_s2 + $0x1d0] sm:$0xff]  ;;  %v15017_v59 = vld [vmem:[%s23991_s2 + $0x1d8] sm:$0xff] }
0x12e2   : > { %v22306_v14 = vpack.c.bf16 %v15017_v59, %v15016_v32  ;;  %v15071_v32 = vld [vmem:[%s23991_s2 + $0x378] sm:$0xff] }
0x12e3   : > { %v7440_v55 = vmul.f32 0.2, %v7439_v2 }
0x12e5   : > { %v7441_v62 = vmax.f32 %v7439_v2, %v7440_v55  ;;  %v15018_v2 = vld [vmem:[%s23991_s2 + $0x1e0] sm:$0xff]  ;;  %v15019_v55 = vld [vmem:[%s23991_s2 + $0x1e8] sm:$0xff] }
0x12e7   : > { %v7442_v7 = vadd.f32 %v7441_v62, %v6214_v43 }
0x12e9   : > { %7446 = vst.msk [vmem:[#allocation2 + $0x8] sm:$0xf] %vm7443_vm15, %v7442_v7  ;;  %v22319_v7 = vpack.c.bf16 %v15019_v55, %v15018_v2  ;;  %v15088_v2 = vld [vmem:[%s23991_s2 + $0x440] sm:$0xff]  ;;  %v15089_v55 = vld [vmem:[%s23991_s2 + $0x448] sm:$0xff] }
0x12ed   : > { %v6852_v29 = vpop.f32.mrb[42].mxu1 }
0x12ee   : > { %v6857_v46 = vmul.f32 0.11111111, %v6852_v29  ;;  %v17466_v40 = vpop.f32.mrb[43].mxu1  ;;  %v15021_v29 = vld [vmem:[%s23991_s2 + $0x1f8] sm:$0xff] }
0x12ef   : > { %v22333_v1 = vpack.c.bf16 %v15021_v29, %v15020_v26  ;;  %v15029_v40 = vld [vmem:[%s23991_s2 + $0x208] sm:$0xff]  ;;  %v15091_v26 = vld [vmem:[%s23991_s2 + $0x458] sm:$0xff] }
0x12f0   : > { %v6858_v47 = vmul.f32 0.2, %v6857_v46 }
0x12f2   : > { %v6859_v21 = vmax.f32 %v6857_v46, %v6858_v47  ;;  %v15028_v46 = vld [vmem:[%s23991_s2 + $0x200] sm:$0xff] }
0x12f3   : > { %v22345_v47 = vpack.c.bf16 %v15029_v40, %v15028_v46  ;;  %v15092_v46 = vld [vmem:[%s23991_s2 + $0x460] sm:$0xff]  ;;  %v15093_v40 = vld [vmem:[%s23991_s2 + $0x468] sm:$0xff] }
0x12f4   : > { %v6860_v24 = vadd.f32 %v6859_v21, %v2184_v37  ;;  %v15030_v37 = vld [vmem:[%s23991_s2 + $0x210] sm:$0xff]  ;;  %v15031_v21 = vld [vmem:[%s23991_s2 + $0x218] sm:$0xff] }
0x12f6   : > { %7447 = vst.msk [vmem:[#allocation2 + $0xc] sm:$0xf] %vm7443_vm15, %v6860_v24  ;;  %v22357_v24 = vpack.c.bf16 %v15031_v21, %v15030_v37  ;;  %v22501_v37 = vpack.c.bf16 %v15093_v40, %v15092_v46  ;;  %v15094_v21 = vld [vmem:[%s23991_s2 + $0x470] sm:$0xff]  ;;  %v15047_v40 = vld [vmem:[%s23991_s2 + $0x2f8] sm:$0xff] }
0x12f7   : > { %v15046_v46 = vld [vmem:[%s23991_s2 + $0x2f0] sm:$0xff] }
0x12f8   : > { %24067 = vst [vmem:[#allocation13_spill] sm:$0xff] %v22501_v37 }
0x12fd   : > { %v7449_v27 = vld [vmem:[#allocation2 + $0x8] sm:$0xff] }
0x12fe   : > { %v19411_v38 = vpack.c.bf16 %v7449_v27, %v22017_v18  ;;  %14488 = vst.msk [vmem:[%s22022_s22 + $0x8] sm:$0xff] %vm674_vm4, %v7449_v27  ;;  %v24062_v18 = vld [vmem:[#allocation9_spill] sm:$0xff]  ;;  %v15032_v27 = vld [vmem:[%s23991_s2 + $0x220] sm:$0xff] }
0x1300   : > { %19412 = vmatpush3.bf16.msra.mxu0 %v19411_v38  ;;  %v15033_v38 = vld [vmem:[%s23991_s2 + $0x228] sm:$0xff] }
0x1301   : > { %17626 = vmatprep.subr.mxu0 %v24047_v48 }
0x1303   : > { %17624 = vmatmul.mubr.msk.f32.vlgmr.msra.gmra.mrb[58].mxu0 %vm342_vm1, %v14995_v41  ;;  %v22369_v41 = vpack.c.bf16 %v15033_v38, %v15032_v27  ;;  %v15095_v27 = vld [vmem:[%s23991_s2 + $0x478] sm:$0xff] }
0x1304   : > { %17628 = vmatprep.mubr.msk.f32.mxu0 %vm20352_vm0, %v24047_v48  ;;  %v22511_v38 = vpack.c.bf16 %v15095_v27, %v15094_v21  ;;  %v22581_v21 = vpack.c.bf16 %v15047_v40, %v15046_v46  ;;  %v15080_v40 = vld [vmem:[%s23991_s2 + $0x420] sm:$0xff] }
0x1306   : > { %24068 = vst [vmem:[#allocation16_spill] sm:$0xff] %v22511_v38 }
0x13d6   : > { %v7521_v45 = vpop.f32.mrb[58].mxu0 }
0x13d7   : > { %v7525_v50 = vmul.f32 0.2, %v7521_v45  ;;  %v17625_v51 = vpop.f32.mrb[59].mxu0 }
0x13d9   : > { %v7526_v57 = vmax.f32 %v7521_v45, %v7525_v50  ;;  %v15034_v45 = vld [vmem:[%s23991_s2 + $0x230] sm:$0xff]  ;;  %v15035_v50 = vld [vmem:[%s23991_s2 + $0x238] sm:$0xff] }
0x13da   : > { %v22379_v51 = vpack.c.bf16 %v15035_v50, %v15034_v45 }
0x13db   : > { %v7527_v60 = vmul.f32 %v7526_v57, %v7526_v57 }
0x13dd   : > { %17627 = vmatpush3.msk.msra.mxu0 %vm423_vm2, %v7527_v60  ;;  %v15053_v60 = vld [vmem:[%s23991_s2 + $0x308] sm:$0xff] }
0x13de   : > { %17629 = vmatmul.mubr.msk.f32.vlgmr.msra.gmra.mrb[60].mxu0 %vm419_vm3, %v24054_v0  ;;  %19413 = vmatprep.subr.bf16.mxu0 %v24046_v42 }
0x13df   : > { %19415 = vmatpush3.bf16.msra.mxu0 %v24062_v18  ;;  %17635 = vmatprep.mubr.msk.f32.mxu0 %vm20352_vm0, %v24047_v48 }
0x13e0   : > { %17638 = vmatprep.subr.mxu0 %v24047_v48 }
0x13e2   : > { %17636 = vmatmul.mubr.msk.f32.vlgmr.msra.gmra.mrb[62].mxu0 %vm342_vm1, %v14999_v63  ;;  %v15054_v63 = vld [vmem:[%s23991_s2 + $0x310] sm:$0xff] }
0x13e3   : > { %17640 = vmatprep.mubr.msk.f32.mxu0 %vm20352_vm0, %v24047_v48  ;;  %v22401_v8 = vpack.c.bf16 %v15055_v5, %v15054_v63  ;;  %v15013_v63 = vld [vmem:[%s23994_s5 + $0x1fc] sm:$0xf] }
0x14b1   : > { %v7597_v35 = vpop.f32.mrb[60].mxu0 }
0x14b2   : > { %v7601_v9 = vmul.f32 0.25, %v7597_v35  ;;  %v17630_v16 = vpop.f32.mrb[61].mxu0  ;;  %v15064_v35 = vld [vmem:[%s23991_s2 + $0x340] sm:$0xff] }
0x14b4   : > { %v7602_v22 = vadd.f32 1e-08, %v7601_v9  ;;  %v15065_v9 = vld [vmem:[%s23991_s2 + $0x348] sm:$0xff] }
0x14b5   : > { %v7680_v58 = vpop.f32.mrb[62].mxu0  ;;  %v22433_v16 = vpack.c.bf16 %v15065_v9, %v15064_v35  ;;  %v15041_v35 = vld [vmem:[%s23991_s2 + $0x2c8] sm:$0xff]  ;;  %v15027_v9 = vld [vmem:[%s23994_s5 + $0x200] sm:$0xf] }
0x14b6   : > { %20247 = vrsqrt.f32 %v7602_v22  ;;  %v7684_v61 = vmul.f32 0.2, %v7680_v58  ;;  %v17637_v3 = vpop.f32.mrb[63].mxu0  ;;  %v15066_v22 = vld [vmem:[%s23991_s2 + $0x350] sm:$0xff] }
0x14b7   : > { %v15068_v3 = vld [vmem:[%s23991_s2 + $0x360] sm:$0xff] }
0x14b8   : > { %v22289_v39 = vmax.f32 %v7680_v58, %v7684_v61  ;;  %v15067_v58 = vld [vmem:[%s23991_s2 + $0x358] sm:$0xff]  ;;  %v22457_v52 = vpack.c.bf16 %v15069_v10, %v15068_v3  ;;  %v15042_v3 = vld [vmem:[%s23991_s2 + $0x2d0] sm:$0xff] }
0x14b9   : > { %v22445_v61 = vpack.c.bf16 %v15067_v58, %v15066_v22  ;;  %v22547_v22 = vpack.c.bf16 %v15041_v35, %v15040_v12  ;;  %v15043_v10 = vld [vmem:[%s23991_s2 + $0x2d8] sm:$0xff] }
0x14ba   : > { %v7686_v17 = vmul.f32 %v22289_v39, %v22289_v39 }
0x14bc   : > { %17639 = vmatpush3.msk.msra.mxu0 %vm423_vm2, %v7686_v17  ;;  %v15070_v17 = vld [vmem:[%s23991_s2 + $0x370] sm:$0xff] }
0x14bd   : > { %17641 = vmatmul.mubr.msk.f32.vlgmr.msra.gmra.mrb[64].mxu0 %vm419_vm3, %v24054_v0  ;;  %19428 = vmatprep.subr.bf16.mxu0 %v24046_v42  ;;  %v22467_v59 = vpack.c.bf16 %v15071_v32, %v15070_v17 }
0x14be   : > { %19430 = vmatpush3.bf16.msra.mxu0 %v22293_v36  ;;  %17678 = vmatprep.mubr.msk.f32.mxu0 %vm20352_vm0, %v24047_v48 }
0x14bf   : > { %19431 = vmatprep.subr.bf16.mxu0 %v24046_v42 }
0x14c0   : > { %v20248_v43 = vpop.eup %20247 }
0x14c1   : > { %v7607_v62 = vrot.slane %v20248_v43, %v20556_v44  ;;  %v22477_v43 = vpack.c.bf16 %v15089_v55, %v15088_v2  ;;  %v22559_v2 = vpack.c.bf16 %v15043_v10, %v15042_v3  ;;  %v15044_v55 = vld [vmem:[%s23991_s2 + $0x2e0] sm:$0xff]  ;;  %v15077_v10 = vld [vmem:[%s23991_s2 + $0x408] sm:$0xff] }
0x14c2   : > { %19433 = vmatpush3.bf16.msra.mxu0 %v22306_v14  ;;  %v15076_v3 = vld [vmem:[%s23991_s2 + $0x400] sm:$0xff] }
0x14c3   : > { %v22321_v49 = vmul.f32 %v7607_v62, %v7526_v57  ;;  %19434 = vmatprep.subr.bf16.mxu0 %v24046_v42  ;;  %v15052_v57 = vld [vmem:[%s23991_s2 + $0x300] sm:$0xff]  ;;  %24065 = vst [vmem:[#allocation11_spill] sm:$0xff] %v22477_v43  ;;  %v15090_v62 = vld [vmem:[%s23991_s2 + $0x450] sm:$0xff] }
0x14c4   : > { %v22389_v18 = vpack.c.bf16 %v15053_v60, %v15052_v57  ;;  %v22489_v29 = vpack.c.bf16 %v15091_v26, %v15090_v62  ;;  %v15045_v62 = vld [vmem:[%s23991_s2 + $0x2e8] sm:$0xff] }
0x14c5   : > { %17660 = vmatmul.mubr.msk.f32.vlgmr.msra.gmra.mrb[44].mxu1 %vm674_vm4, %v22321_v49  ;;  %v22571_v26 = vpack.c.bf16 %v15045_v62, %v15044_v55  ;;  %v15078_v55 = vld [vmem:[%s23991_s2 + $0x410] sm:$0xff]  ;;  %v15079_v62 = vld [vmem:[%s23991_s2 + $0x418] sm:$0xff] }
0x14c6   : > { %19436 = vmatpush3.bf16.msra.mxu0 %v22319_v7  ;;  %17683 = vmatprep.mubr.msk.f32.mxu1 %vm20352_vm0, %v24047_v48  ;;  %24066 = vst [vmem:[#allocation12_spill] sm:$0xff] %v22489_v29  ;;  %v22627_v46 = vpack.c.bf16 %v15079_v62, %v15078_v55  ;;  %v15104_v62 = vld [vmem:[%s23991_s2 + $0x4a0] sm:$0xff] }
0x14c7   : > { %19437 = vmatprep.subr.bf16.mxu0 %v24046_v42 }
0x14c8   : > { %24070 = vst [vmem:[#allocation9_spill] sm:$0xff] %v22627_v46 }
0x14ca   : > { %19439 = vmatpush3.bf16.msra.mxu0 %v22333_v1 }
0x14cb   : > { %19440 = vmatprep.subr.bf16.mxu0 %v24046_v42 }
0x14cd   : > { %17679 = vmatmul.mubr.msk.f32.vlgmr.msra.gmra.mrb[66].mxu0 %vm674_vm4, %v22321_v49 }
0x14ce   : > { %19442 = vmatpush3.bf16.msra.mxu0 %v22345_v47  ;;  %17707 = vmatprep.mubr.msk.f32.mxu0 %vm20352_vm0, %v24047_v48 }
0x14cf   : > { %19443 = vmatprep.subr.bf16.mxu0 %v24046_v42 }
0x14d2   : > { %19445 = vmatpush3.bf16.msra.mxu0 %v22357_v24 }
0x14d3   : > { %19446 = vmatprep.subr.bf16.mxu0 %v24046_v42 }
0x14d6   : > { %19448 = vmatpush3.bf16.msra.mxu0 %v22369_v41 }
0x14d7   : > { %19449 = vmatprep.subr.bf16.mxu0 %v24046_v42 }
0x14da   : > { %19451 = vmatpush3.bf16.msra.mxu0 %v22379_v51 }
0x14db   : > { %19464 = vmatprep.subr.bf16.mxu0 %v24046_v42 }
0x14dd   : > { %17708 = vmatmul.mubr.msk.f32.vlgmr.msra.gmra.mrb[68].mxu0 %vm674_vm4, %v22321_v49 }
0x14de   : > { %19466 = vmatpush3.bf16.msra.mxu0 %v22389_v18  ;;  %17755 = vmatprep.mubr.msk.f32.mxu0 %vm20352_vm0, %v24047_v48 }
0x14df   : > { %19467 = vmatprep.subr.bf16.mxu0 %v24046_v42 }
0x14e2   : > { %19469 = vmatpush3.bf16.msra.mxu0 %v22401_v8 }
0x14e3   : > { %19470 = vmatprep.subr.bf16.mxu0 %v24046_v42 }
0x14e6   : > { %19472 = vmatpush3.bf16.msra.mxu0 %v22413_v28 }
0x14e7   : > { %19473 = vmatprep.subr.bf16.mxu0 %v24046_v42 }
0x14ea   : > { %19475 = vmatpush3.bf16.msra.mxu0 %v22423_v25 }
0x14eb   : > { %19476 = vmatprep.subr.bf16.mxu0 %v24046_v42 }
0x14ed   : > { %17756 = vmatmul.mubr.msk.f32.vlgmr.msra.gmra.mrb[70].mxu0 %vm674_vm4, %v22321_v49 }
0x14ee   : > { %19478 = vmatpush3.bf16.msra.mxu0 %v22433_v16  ;;  %17779 = vmatprep.mubr.msk.f32.mxu0 %vm20352_vm0, %v24047_v48 }
0x14ef   : > { %19479 = vmatprep.subr.bf16.mxu0 %v24046_v42 }
0x14f2   : > { %19481 = vmatpush3.bf16.msra.mxu0 %v22445_v61 }
0x14f3   : > { %19482 = vmatprep.subr.bf16.mxu0 %v24046_v42 }
0x14f6   : > { %19484 = vmatpush3.bf16.msra.mxu0 %v22457_v52 }
0x14f7   : > { %19485 = vmatprep.subr.bf16.mxu0 %v24046_v42 }
0x14fa   : > { %19487 = vmatpush3.bf16.msra.mxu0 %v22467_v59 }
0x14fb   : > { %19500 = vmatprep.subr.bf16.mxu0 %v24046_v42 }
0x14fd   : > { %17780 = vmatmul.mubr.msk.f32.vlgmr.msra.gmra.mrb[72].mxu0 %vm674_vm4, %v22321_v49 }
0x14fe   : > { %19502 = vmatpush3.bf16.msra.mxu0 %v22477_v43  ;;  %17827 = vmatprep.mubr.msk.f32.mxu0 %vm20352_vm0, %v24047_v48 }
0x14ff   : > { %19503 = vmatprep.subr.bf16.mxu0 %v24046_v42 }
0x1502   : > { %19505 = vmatpush3.bf16.msra.mxu0 %v22489_v29 }
0x1503   : > { %19506 = vmatprep.subr.bf16.mxu0 %v24046_v42 }
0x1506   : > { %19508 = vmatpush3.bf16.msra.mxu0 %v22501_v37 }
0x1507   : > { %19509 = vmatprep.subr.bf16.mxu0 %v24046_v42 }
0x150a   : > { %19511 = vmatpush3.bf16.msra.mxu0 %v22511_v38 }
0x150b   : > { %17859 = vmatprep.subr.mxu0 %v24047_v48 }
0x150d   : > { %17828 = vmatmul.mubr.msk.f32.vlgmr.msra.gmra.mrb[74].mxu0 %vm674_vm4, %v22321_v49 }
0x150e   : > { %17861 = vmatprep.mubr.msk.f32.mxu0 %vm20352_vm0, %v24047_v48 }
0x1590   : > { %v22520_v45 = vpop.f32.mrb[64].mxu0 }
0x1591   : > { %v17642_v50 = vpop.f32.mrb[65].mxu0 }
0x1598   : > { %v7847_v57 = vpop.f32.mrb[44].mxu1 }
0x1599   : > { %v17661_v60 = vpop.f32.mrb[45].mxu1 }
0x15a0   : > { %v7927_v5 = vpop.f32.mrb[66].mxu0 }
0x15a1   : > { %v9269_v15 = vadd.f32 %v7927_v5, %v7847_v57  ;;  %v17680_v19 = vpop.f32.mrb[67].mxu0  ;;  %17682 = vmatpush3.msk.msra.mxu1 %vm423_vm2, %v7927_v5 }
0x15a2   : > { %17686 = vmatprep.subr.mxu1 %v24047_v48  ;;  %17684 = vmatmul.mubr.msk.f32.vlgmr.msra.gmra.mrb[46].mxu1 %vm419_vm3, %v15013_v63 }
0x15a3   : > { %17687 = vmatpush3.msk.msra.mxu1 %vm423_vm2, %v7847_v57  ;;  %17688 = vmatprep.mubr.msk.f32.mxu1 %vm20352_vm0, %v24047_v48 }
0x15a4   : > { %17710 = vmatprep.subr.mxu1 %v24047_v48 }
0x15aa   : > { %17689 = vmatmul.mubr.msk.f32.vlgmr.msra.gmra.mrb[46].mxu1 %vm419_vm3, %v15003_v31 }
0x15ab   : > { %17712 = vmatprep.mubr.msk.f32.mxu1 %vm20352_vm0, %v24047_v48 }
0x15b0   : > { %v8159_v58 = vpop.f32.mrb[68].mxu0 }
0x15b1   : > { %v9270_v17 = vadd.f32 %v9269_v15, %v8159_v58  ;;  %v17709_v32 = vpop.f32.mrb[69].mxu0  ;;  %17711 = vmatpush3.msk.msra.mxu1 %vm423_vm2, %v8159_v58  ;;  %v15039_v15 = vld [vmem:[%s23994_s5 + $0x204] sm:$0xf]  ;;  %v15051_v58 = vld [vmem:[%s23994_s5 + $0x208] sm:$0xf] }
0x15b2   : > { %19452 = vmatprep.subr.bf16.mxu1 %v24046_v42  ;;  %17713 = vmatmul.mubr.msk.f32.vlgmr.msra.gmra.mrb[46].mxu1 %vm419_vm3, %v15027_v9  ;;  %v22617_v32 = vpack.c.bf16 %v15077_v10, %v15076_v3  ;;  %v15087_v3 = vld [vmem:[%s23994_s5 + $0x214] sm:$0xf] }
0x15b3   : > { %19454 = vmatpush3.bf16.msra.mxu1 %v22547_v22  ;;  %17731 = vmatprep.mubr.msk.f32.mxu1 %vm20352_vm0, %v24047_v48 }
0x15b4   : > { %19455 = vmatprep.subr.bf16.mxu1 %v24046_v42  ;;  %24069 = vst [vmem:[#allocation15_spill] sm:$0xff] %v22617_v32 }
0x15b7   : > { %19457 = vmatpush3.bf16.msra.mxu1 %v22559_v2 }
0x15b8   : > { %19458 = vmatprep.subr.bf16.mxu1 %v24046_v42 }
0x15bb   : > { %19460 = vmatpush3.bf16.msra.mxu1 %v22571_v26 }
0x15bc   : > { %19461 = vmatprep.subr.bf16.mxu1 %v24046_v42 }
0x15bf   : > { %19463 = vmatpush3.bf16.msra.mxu1 %v22581_v21 }
0x15c0   : > { %v8473_v27 = vpop.f32.mrb[70].mxu0  ;;  %17734 = vmatprep.subr.mxu1 %v24047_v48 }
0x15c1   : > { %v17757_v50 = vpop.f32.mrb[71].mxu0 }
0x15c2   : > { %17732 = vmatmul.mubr.msk.f32.vlgmr.msra.gmra.mrb[48].mxu1 %vm674_vm4, %v22321_v49 }
0x15c3   : > { %17736 = vmatprep.mubr.msk.f32.mxu1 %vm20352_vm0, %v24047_v48 }
0x15d0   : > { %v8630_v57 = vpop.f32.mrb[72].mxu0 }
0x15d1   : > { %v17781_v60 = vpop.f32.mrb[73].mxu0 }
0x15d2   : > { %v15083_v60 = vld [vmem:[%s23991_s2 + $0x438] sm:$0xff] }
0x15e0   : > { %v8944_v63 = vpop.f32.mrb[74].mxu0 }
0x15e1   : > { %v17829_v5 = vpop.f32.mrb[75].mxu0 }
0x1695   : > { %v8316_v19 = vpop.f32.mrb[48].mxu1 }
0x1696   : > { %v9271_v31 = vadd.f32 %v9270_v17, %v8316_v19  ;;  %v17733_v12 = vpop.f32.mrb[49].mxu1  ;;  %17735 = vmatpush3.msk.msra.mxu1 %vm423_vm2, %v8316_v19  ;;  %v15063_v17 = vld [vmem:[%s23994_s5 + $0x20c] sm:$0xf] }
0x1697   : > { %17737 = vmatmul.mubr.msk.f32.vlgmr.msra.gmra.mrb[46].mxu1 %vm419_vm3, %v15039_v15  ;;  %17758 = vmatprep.subr.mxu1 %v24047_v48  ;;  %v15075_v15 = vld [vmem:[%s23994_s5 + $0x210] sm:$0xf] }
0x1698   : > { %v9272_v35 = vadd.f32 %v9271_v31, %v8473_v27  ;;  %17759 = vmatpush3.msk.msra.mxu1 %vm423_vm2, %v8473_v27  ;;  %17760 = vmatprep.mubr.msk.f32.mxu1 %vm20352_vm0, %v24047_v48  ;;  %v15081_v27 = vld [vmem:[%s23991_s2 + $0x428] sm:$0xff] }
0x1699   : > { %17782 = vmatprep.subr.mxu1 %v24047_v48  ;;  %v22639_v50 = vpack.c.bf16 %v15081_v27, %v15080_v40  ;;  %v15105_v40 = vld [vmem:[%s23991_s2 + $0x4a8] sm:$0xff] }
0x169a   : > { %v9273_v9 = vadd.f32 %v9272_v35, %v8630_v57  ;;  %v22699_v27 = vpack.c.bf16 %v15105_v40, %v15104_v62 }
0x169b   : > { %24071 = vst [vmem:[#allocation17_spill] sm:$0xff] %v22639_v50 }
0x169f   : > { %17761 = vmatmul.mubr.msk.f32.vlgmr.msra.gmra.mrb[46].mxu1 %vm419_vm3, %v15051_v58  ;;  %v15100_v58 = vld [vmem:[%s23991_s2 + $0x480] sm:$0xff] }
0x16a0   : > { %17783 = vmatpush3.msk.msra.mxu1 %vm423_vm2, %v8630_v57  ;;  %17784 = vmatprep.mubr.msk.f32.mxu1 %vm20352_vm0, %v24047_v48  ;;  %v15082_v57 = vld [vmem:[%s23991_s2 + $0x430] sm:$0xff] }
0x16a1   : > { %19488 = vmatprep.subr.bf16.mxu1 %v24046_v42  ;;  %v22649_v5 = vpack.c.bf16 %v15083_v60, %v15082_v57  ;;  %v15106_v57 = vld [vmem:[%s23991_s2 + $0x4b0] sm:$0xff]  ;;  %v15107_v60 = vld [vmem:[%s23991_s2 + $0x4b8] sm:$0xff] }
0x16a3   : > { %24072 = vst [vmem:[#allocation18_spill] sm:$0xff] %v22649_v5 }
0x16a7   : > { %17785 = vmatmul.mubr.msk.f32.vlgmr.msra.gmra.mrb[46].mxu1 %vm419_vm3, %v15063_v17  ;;  %v15103_v17 = vld [vmem:[%s23991_s2 + $0x498] sm:$0xff] }
0x16a8   : > { %19490 = vmatpush3.bf16.msra.mxu1 %v22617_v32  ;;  %17803 = vmatprep.mubr.msk.f32.mxu1 %vm20352_vm0, %v24047_v48 }
0x16a9   : > { %19491 = vmatprep.subr.bf16.mxu1 %v24046_v42 }
0x16ac   : > { %19493 = vmatpush3.bf16.msra.mxu1 %v22627_v46 }
0x16ad   : > { %19494 = vmatprep.subr.bf16.mxu1 %v24046_v42 }
0x16b0   : > { %19496 = vmatpush3.bf16.msra.mxu1 %v22639_v50 }
0x16b1   : > { %19497 = vmatprep.subr.bf16.mxu1 %v24046_v42 }
0x16b4   : > { %19499 = vmatpush3.bf16.msra.mxu1 %v22649_v5 }
0x16b5   : > { %17806 = vmatprep.subr.mxu1 %v24047_v48 }
0x16b7   : > { %17804 = vmatmul.mubr.msk.f32.vlgmr.msra.gmra.mrb[50].mxu1 %vm674_vm4, %v22321_v49 }
0x16b8   : > { %17808 = vmatprep.mubr.msk.f32.mxu1 %vm20352_vm0, %v24047_v48 }
0x178a   : > { %v8787_v19 = vpop.f32.mrb[50].mxu1 }
0x178b   : > { %v9274_v31 = vadd.f32 %v9273_v9, %v8787_v19  ;;  %v17805_v12 = vpop.f32.mrb[51].mxu1  ;;  %17807 = vmatpush3.msk.msra.mxu1 %vm423_vm2, %v8787_v19  ;;  %v15101_v9 = vld [vmem:[%s23991_s2 + $0x488] sm:$0xff]  ;;  %v7760_v19 = vmul.f32 0.25, %v22520_v45  ;;  %v15118_v45 = vld [vmem:[%s23991_s2 + $0x50] sm:$0xff] }
0x178c   : > { %17809 = vmatmul.mubr.msk.f32.vlgmr.msra.gmra.mrb[46].mxu1 %vm419_vm3, %v15075_v15  ;;  %17830 = vmatprep.subr.mxu1 %v24047_v48  ;;  %v22677_v10 = vpack.c.bf16 %v15101_v9, %v15100_v58  ;;  %v22709_v15 = vpack.c.bf16 %v15107_v60, %v15106_v57  ;;  %v15116_v12 = vld [vmem:[%s23991_s2 + $0x40] sm:$0xff]  ;;  %v15117_v58 = vld [vmem:[%s23991_s2 + $0x48] sm:$0xff]  ;;  %v15099_v9 = vld [vmem:[%s23994_s5 + $0x218] sm:$0xf] }
0x178d   : > { %17831 = vmatpush3.msk.msra.mxu1 %vm423_vm2, %v8944_v63  ;;  %17832 = vmatprep.mubr.msk.f32.mxu1 %vm20352_vm0, %v24047_v48  ;;  %v9275_v35 = vadd.f32 %v9274_v31, %v8944_v63  ;;  %v15102_v63 = vld [vmem:[%s23991_s2 + $0x490] sm:$0xff]  ;;  %v7761_v31 = vadd.f32 1e-08, %v7760_v19  ;;  %v15120_v60 = vld [vmem:[%s23991_s2 + $0x60] sm:$0xff] }
0x178e   : > { %19512 = vmatprep.subr.bf16.mxu1 %v24046_v42  ;;  %v22687_v55 = vpack.c.bf16 %v15103_v17, %v15102_v63  ;;  %v15119_v17 = vld [vmem:[%s23991_s2 + $0x58] sm:$0xff] }
0x178f   : > { %20249 = vrsqrt.f32 %v7761_v31  ;;  %v19540_v57 = vpack.c.bf16 %v15119_v17, %v15118_v45  ;;  %v15122_v31 = vld [vmem:[%s23991_s2 + $0x70] sm:$0xff]  ;;  %v15143_v45 = vld [vmem:[%s23991_s2 + $0xc8] sm:$0xff] }
0x1794   : > { %17833 = vmatmul.mubr.msk.f32.vlgmr.msra.gmra.mrb[46].mxu1 %vm419_vm3, %v15087_v3  ;;  %v19537_v3 = vpack.c.bf16 %v15117_v58, %v15116_v12  ;;  %v15123_v12 = vld [vmem:[%s23991_s2 + $0x78] sm:$0xff] }
0x1795   : > { %19514 = vmatpush3.bf16.msra.mxu1 %v22677_v10  ;;  %17851 = vmatprep.mubr.msk.f32.mxu1 %vm20352_vm0, %v24047_v48 }
0x1796   : > { %19515 = vmatprep.subr.bf16.mxu1 %v24046_v42 }
0x1799   : > { %19517 = vmatpush3.bf16.msra.mxu1 %v22687_v55  ;;  %v20250_v58 = vpop.eup %20249 }
0x179a   : > { %19518 = vmatprep.subr.bf16.mxu1 %v24046_v42 }
0x179d   : > { %19520 = vmatpush3.bf16.msra.mxu1 %v22699_v27 }
0x179e   : > { %19521 = vmatprep.subr.bf16.mxu1 %v24046_v42 }
0x17a1   : > { %19523 = vmatpush3.bf16.msra.mxu1 %v22709_v15 }
0x17a2   : > { %17854 = vmatprep.subr.mxu1 %v24047_v48 }
0x17a4   : > { %17852 = vmatmul.mubr.msk.f32.vlgmr.msra.gmra.mrb[52].mxu1 %vm674_vm4, %v22321_v49 }
0x17a5   : > { %17856 = vmatprep.mubr.msk.f32.mxu1 %vm20352_vm0, %v24047_v48 }
0x1877   : > { %v9101_v63 = vpop.f32.mrb[52].mxu1 }
0x1878   : > { %v22734_v62 = vadd.f32 %v9275_v35, %v9101_v63  ;;  %v17853_v40 = vpop.f32.mrb[53].mxu1  ;;  %17855 = vmatpush3.msk.msra.mxu1 %vm423_vm2, %v9101_v63  ;;  %v15121_v35 = vld [vmem:[%s23991_s2 + $0x68] sm:$0xff]  ;;  %v15142_v63 = vld [vmem:[%s23991_s2 + $0xc0] sm:$0xff] }
0x1879   : > { %17857 = vmatmul.mubr.msk.f32.vlgmr.msra.gmra.mrb[46].mxu1 %vm419_vm3, %v15099_v9  ;;  %19536 = vmatprep.subr.bf16.mxu1 %v24046_v42  ;;  %v19543_v19 = vpack.c.bf16 %v15121_v35, %v15120_v60  ;;  %v19546_v9 = vpack.c.bf16 %v15123_v12, %v15122_v31  ;;  %v19561_v17 = vpack.c.bf16 %v15143_v45, %v15142_v63  ;;  %v15145_v60 = vld [vmem:[%s23991_s2 + $0xd8] sm:$0xff]  ;;  %v15148_v12 = vld [vmem:[%s23991_s2 + $0xf0] sm:$0xff]  ;;  %v15155_v63 = vld [vmem:[%s23991_s2 + $0x108] sm:$0xff] }
0x187a   : > { %24073 = vst [vmem:[#allocation19_spill] sm:$0xff] %v22734_v62  ;;  %19538 = vmatpush3.bf16.msra.mxu1 %v19537_v3  ;;  %17899 = vmatprep.mubr.msk.f32.mxu1 %vm20352_vm0, %v24047_v48  ;;  %v7766_v3 = vrot.slane %v20250_v58, %v20556_v44  ;;  %v15149_v58 = vld [vmem:[%s23991_s2 + $0xf8] sm:$0xff] }
0x187b   : > { %19539 = vmatprep.subr.bf16.mxu1 %v24046_v42 }
0x187c   : > { %v22764_v40 = vmul.f32 %v7766_v3, %v22289_v39  ;;  %v15146_v39 = vld [vmem:[%s23991_s2 + $0xe0] sm:$0xff] }
0x187d   : > { %v15154_v3 = vld [vmem:[%s23991_s2 + $0x100] sm:$0xff] }
0x187e   : > { %19541 = vmatpush3.bf16.msra.mxu1 %v19540_v57  ;;  %v15144_v57 = vld [vmem:[%s23991_s2 + $0xd0] sm:$0xff]  ;;  %v19573_v45 = vpack.c.bf16 %v15155_v63, %v15154_v3  ;;  %v15191_v3 = vld [vmem:[%s23991_s2 + $0x248] sm:$0xff] }
0x187f   : > { %19542 = vmatprep.subr.bf16.mxu1 %v24046_v42  ;;  %v19564_v35 = vpack.c.bf16 %v15145_v60, %v15144_v57  ;;  %v15157_v57 = vld [vmem:[%s23991_s2 + $0x118] sm:$0xff] }
0x1882   : > { %19544 = vmatpush3.bf16.msra.mxu1 %v19543_v19  ;;  %v15147_v19 = vld [vmem:[%s23991_s2 + $0xe8] sm:$0xff] }
0x1883   : > { %19545 = vmatprep.subr.bf16.mxu1 %v24046_v42  ;;  %v19567_v31 = vpack.c.bf16 %v15147_v19, %v15146_v39  ;;  %v15159_v39 = vld [vmem:[%s23991_s2 + $0x128] sm:$0xff] }
0x1886   : > { %19547 = vmatpush3.bf16.msra.mxu1 %v19546_v9  ;;  %v19570_v9 = vpack.c.bf16 %v15149_v58, %v15148_v12  ;;  %v15161_v12 = vld [vmem:[%s23991_s2 + $0x138] sm:$0xff] }
0x1887   : > { %19560 = vmatprep.subr.bf16.mxu1 %v24046_v42 }
0x1889   : > { %17900 = vmatmul.mubr.msk.f32.vlgmr.msra.gmra.mrb[54].mxu1 %vm674_vm4, %v22764_v40 }
0x188a   : > { %19562 = vmatpush3.bf16.msra.mxu1 %v19561_v17  ;;  %17952 = vmatprep.mubr.msk.f32.mxu1 %vm20352_vm0, %v24047_v48  ;;  %v15156_v17 = vld [vmem:[%s23991_s2 + $0x110] sm:$0xff] }
0x188b   : > { %19563 = vmatprep.subr.bf16.mxu1 %v24046_v42  ;;  %v19576_v60 = vpack.c.bf16 %v15157_v57, %v15156_v17  ;;  %v15193_v17 = vld [vmem:[%s23991_s2 + $0x258] sm:$0xff] }
0x188e   : > { %19565 = vmatpush3.bf16.msra.mxu1 %v19564_v35  ;;  %v15158_v35 = vld [vmem:[%s23991_s2 + $0x120] sm:$0xff] }
0x188f   : > { %19566 = vmatprep.subr.bf16.mxu1 %v24046_v42  ;;  %v19579_v19 = vpack.c.bf16 %v15159_v39, %v15158_v35  ;;  %v15195_v35 = vld [vmem:[%s23991_s2 + $0x268] sm:$0xff] }
0x1892   : > { %19568 = vmatpush3.bf16.msra.mxu1 %v19567_v31  ;;  %v15160_v31 = vld [vmem:[%s23991_s2 + $0x130] sm:$0xff] }
0x1893   : > { %19569 = vmatprep.subr.bf16.mxu1 %v24046_v42  ;;  %v19582_v58 = vpack.c.bf16 %v15161_v12, %v15160_v31  ;;  %v15197_v31 = vld [vmem:[%s23991_s2 + $0x278] sm:$0xff] }
0x1896   : > { %19571 = vmatpush3.bf16.msra.mxu1 %v19570_v9  ;;  %v15190_v9 = vld [vmem:[%s23991_s2 + $0x240] sm:$0xff] }
0x1897   : > { %19572 = vmatprep.subr.bf16.mxu1 %v24046_v42  ;;  %v19633_v63 = vpack.c.bf16 %v15191_v3, %v15190_v9  ;;  %v15227_v9 = vld [vmem:[%s23991_s2 + $0x388] sm:$0xff] }
0x1899   : > { %17953 = vmatmul.mubr.msk.f32.vlgmr.msra.gmra.mrb[56].mxu1 %vm674_vm4, %v22764_v40 }
0x189a   : > { %19574 = vmatpush3.bf16.msra.mxu1 %v19573_v45  ;;  %17976 = vmatprep.mubr.msk.f32.mxu1 %vm20352_vm0, %v24047_v48  ;;  %v15192_v45 = vld [vmem:[%s23991_s2 + $0x250] sm:$0xff] }
0x189b   : > { %19575 = vmatprep.subr.bf16.mxu1 %v24046_v42  ;;  %v19636_v57 = vpack.c.bf16 %v15193_v17, %v15192_v45  ;;  %v15229_v45 = vld [vmem:[%s23991_s2 + $0x398] sm:$0xff] }
0x189e   : > { %19577 = vmatpush3.bf16.msra.mxu1 %v19576_v60  ;;  %v15194_v60 = vld [vmem:[%s23991_s2 + $0x260] sm:$0xff] }
0x189f   : > { %19578 = vmatprep.subr.bf16.mxu1 %v24046_v42  ;;  %v19639_v39 = vpack.c.bf16 %v15195_v35, %v15194_v60  ;;  %v15231_v60 = vld [vmem:[%s23991_s2 + $0x3a8] sm:$0xff] }
0x18a2   : > { %19580 = vmatpush3.bf16.msra.mxu1 %v19579_v19  ;;  %v15196_v19 = vld [vmem:[%s23991_s2 + $0x270] sm:$0xff] }
0x18a3   : > { %19581 = vmatprep.subr.bf16.mxu1 %v24046_v42  ;;  %v19642_v12 = vpack.c.bf16 %v15197_v31, %v15196_v19  ;;  %v15233_v19 = vld [vmem:[%s23991_s2 + $0x3b8] sm:$0xff] }
0x18a6   : > { %19583 = vmatpush3.bf16.msra.mxu1 %v19582_v58  ;;  %v15226_v58 = vld [vmem:[%s23991_s2 + $0x380] sm:$0xff] }
0x18a7   : > { %19596 = vmatprep.subr.bf16.mxu1 %v24046_v42  ;;  %v19693_v3 = vpack.c.bf16 %v15227_v9, %v15226_v58  ;;  %v15263_v58 = vld [vmem:[%s23991_s2 + $0x4c8] sm:$0xff] }
0x18a9   : > { %17977 = vmatmul.mubr.msk.f32.vlgmr.msra.gmra.mrb[58].mxu1 %vm674_vm4, %v22764_v40 }
0x18aa   : > { %19598 = vmatpush3.bf16.msra.mxu1 %v22249_v11  ;;  %18024 = vmatprep.mubr.msk.f32.mxu1 %vm20352_vm0, %v24047_v48 }
0x18ab   : > { %19599 = vmatprep.subr.bf16.mxu1 %v24046_v42 }
0x18ae   : > { %19601 = vmatpush3.bf16.msra.mxu1 %v22259_v23 }
0x18af   : > { %19602 = vmatprep.subr.bf16.mxu1 %v24046_v42 }
0x18b2   : > { %19604 = vmatpush3.bf16.msra.mxu1 %v22269_v34 }
0x18b3   : > { %19605 = vmatprep.subr.bf16.mxu1 %v24046_v42 }
0x18b6   : > { %19607 = vmatpush3.bf16.msra.mxu1 %v22279_v30 }
0x18b7   : > { %19620 = vmatprep.subr.bf16.mxu1 %v24046_v42 }
0x18b9   : > { %18025 = vmatmul.mubr.msk.f32.vlgmr.msra.gmra.mrb[60].mxu1 %vm674_vm4, %v22764_v40 }
0x18ba   : > { %19622 = vmatpush3.bf16.msra.mxu1 %v22345_v47  ;;  %18072 = vmatprep.mubr.msk.f32.mxu1 %vm20352_vm0, %v24047_v48 }
0x18bb   : > { %19623 = vmatprep.subr.bf16.mxu1 %v24046_v42 }
0x18be   : > { %19625 = vmatpush3.bf16.msra.mxu1 %v22357_v24 }
0x18bf   : > { %19626 = vmatprep.subr.bf16.mxu1 %v24046_v42 }
0x18c2   : > { %19628 = vmatpush3.bf16.msra.mxu1 %v22369_v41 }
0x18c3   : > { %19629 = vmatprep.subr.bf16.mxu1 %v24046_v42 }
0x18c6   : > { %19631 = vmatpush3.bf16.msra.mxu1 %v22379_v51 }
0x18c7   : > { %19632 = vmatprep.subr.bf16.mxu1 %v24046_v42 }
0x18c9   : > { %18073 = vmatmul.mubr.msk.f32.vlgmr.msra.gmra.mrb[62].mxu1 %vm674_vm4, %v22764_v40 }
0x18ca   : > { %19634 = vmatpush3.bf16.msra.mxu1 %v19633_v63  ;;  %18096 = vmatprep.mubr.msk.f32.mxu1 %vm20352_vm0, %v24047_v48  ;;  %v15228_v63 = vld [vmem:[%s23991_s2 + $0x390] sm:$0xff] }
0x18cb   : > { %19635 = vmatprep.subr.bf16.mxu1 %v24046_v42  ;;  %v19696_v17 = vpack.c.bf16 %v15229_v45, %v15228_v63  ;;  %v15265_v63 = vld [vmem:[%s23991_s2 + $0x4d8] sm:$0xff] }
0x18ce   : > { %19637 = vmatpush3.bf16.msra.mxu1 %v19636_v57  ;;  %v15230_v57 = vld [vmem:[%s23991_s2 + $0x3a0] sm:$0xff] }
0x18cf   : > { %19638 = vmatprep.subr.bf16.mxu1 %v24046_v42  ;;  %v19699_v35 = vpack.c.bf16 %v15231_v60, %v15230_v57  ;;  %v15267_v57 = vld [vmem:[%s23991_s2 + $0x4e8] sm:$0xff] }
0x18d2   : > { %19640 = vmatpush3.bf16.msra.mxu1 %v19639_v39  ;;  %v15232_v39 = vld [vmem:[%s23991_s2 + $0x3b0] sm:$0xff] }
0x18d3   : > { %19641 = vmatprep.subr.bf16.mxu1 %v24046_v42  ;;  %v19702_v31 = vpack.c.bf16 %v15233_v19, %v15232_v39  ;;  %v15269_v39 = vld [vmem:[%s23991_s2 + $0x4f8] sm:$0xff] }
0x18d6   : > { %19643 = vmatpush3.bf16.msra.mxu1 %v19642_v12  ;;  %v15262_v12 = vld [vmem:[%s23991_s2 + $0x4c0] sm:$0xff] }
0x18d7   : > { %19656 = vmatprep.subr.bf16.mxu1 %v24046_v42  ;;  %v19753_v9 = vpack.c.bf16 %v15263_v58, %v15262_v12  ;;  %v15275_v12 = vld [vmem:[%s23991_s2 + $0x508] sm:$0xff] }
0x18d9   : > { %18097 = vmatmul.mubr.msk.f32.vlgmr.msra.gmra.mrb[64].mxu1 %vm674_vm4, %v22764_v40 }
0x18da   : > { %19658 = vmatpush3.bf16.msra.mxu1 %v22547_v22  ;;  %18144 = vmatprep.mubr.msk.f32.mxu1 %vm20352_vm0, %v24047_v48 }
0x18db   : > { %19659 = vmatprep.subr.bf16.mxu1 %v24046_v42 }
0x18de   : > { %19661 = vmatpush3.bf16.msra.mxu1 %v22559_v2 }
0x18df   : > { %19662 = vmatprep.subr.bf16.mxu1 %v24046_v42 }
0x18e2   : > { %19664 = vmatpush3.bf16.msra.mxu1 %v22571_v26 }
0x18e3   : > { %19665 = vmatprep.subr.bf16.mxu1 %v24046_v42 }
0x18e6   : > { %19667 = vmatpush3.bf16.msra.mxu1 %v22581_v21 }
0x18e7   : > { %19668 = vmatprep.subr.bf16.mxu1 %v24046_v42 }
0x18e9   : > { %18145 = vmatmul.mubr.msk.f32.vlgmr.msra.gmra.mrb[66].mxu1 %vm674_vm4, %v22764_v40 }
0x18ea   : > { %19670 = vmatpush3.bf16.msra.mxu1 %v22389_v18  ;;  %18168 = vmatprep.mubr.msk.f32.mxu1 %vm20352_vm0, %v24047_v48 }
0x18eb   : > { %19671 = vmatprep.subr.bf16.mxu1 %v24046_v42 }
0x18ee   : > { %19673 = vmatpush3.bf16.msra.mxu1 %v22401_v8 }
0x18ef   : > { %19674 = vmatprep.subr.bf16.mxu1 %v24046_v42 }
0x18f2   : > { %19676 = vmatpush3.bf16.msra.mxu1 %v22413_v28 }
0x18f3   : > { %19677 = vmatprep.subr.bf16.mxu1 %v24046_v42 }
0x18f6   : > { %19679 = vmatpush3.bf16.msra.mxu1 %v22423_v25 }
0x18f7   : > { %19692 = vmatprep.subr.bf16.mxu1 %v24046_v42 }
0x18f9   : > { %18169 = vmatmul.mubr.msk.f32.vlgmr.msra.gmra.mrb[68].mxu1 %vm674_vm4, %v22764_v40 }
0x18fa   : > { %19694 = vmatpush3.bf16.msra.mxu1 %v19693_v3  ;;  %18216 = vmatprep.mubr.msk.f32.mxu1 %vm20352_vm0, %v24047_v48  ;;  %v15264_v3 = vld [vmem:[%s23991_s2 + $0x4d0] sm:$0xff] }
0x18fb   : > { %19695 = vmatprep.subr.bf16.mxu1 %v24046_v42  ;;  %v19756_v45 = vpack.c.bf16 %v15265_v63, %v15264_v3  ;;  %v15277_v3 = vld [vmem:[%s23991_s2 + $0x518] sm:$0xff] }
0x18fe   : > { %19697 = vmatpush3.bf16.msra.mxu1 %v19696_v17  ;;  %v15266_v17 = vld [vmem:[%s23991_s2 + $0x4e0] sm:$0xff] }
0x18ff   : > { %19698 = vmatprep.subr.bf16.mxu1 %v24046_v42  ;;  %v19759_v60 = vpack.c.bf16 %v15267_v57, %v15266_v17  ;;  %v15279_v17 = vld [vmem:[%s23991_s2 + $0x528] sm:$0xff] }
0x1902   : > { %19700 = vmatpush3.bf16.msra.mxu1 %v19699_v35  ;;  %v15268_v35 = vld [vmem:[%s23991_s2 + $0x4f0] sm:$0xff] }
0x1903   : > { %19701 = vmatprep.subr.bf16.mxu1 %v24046_v42  ;;  %v19762_v19 = vpack.c.bf16 %v15269_v39, %v15268_v35  ;;  %v15281_v35 = vld [vmem:[%s23991_s2 + $0x538] sm:$0xff] }
0x1906   : > { %19703 = vmatpush3.bf16.msra.mxu1 %v19702_v31  ;;  %v15274_v31 = vld [vmem:[%s23991_s2 + $0x500] sm:$0xff] }
0x1907   : > { %19716 = vmatprep.subr.bf16.mxu1 %v24046_v42  ;;  %v19765_v58 = vpack.c.bf16 %v15275_v12, %v15274_v31  ;;  %v15299_v31 = vld [vmem:[%s23991_s2 + $0x588] sm:$0xff] }
0x1909   : > { %18217 = vmatmul.mubr.msk.f32.vlgmr.msra.gmra.mrb[70].mxu1 %vm674_vm4, %v22764_v40 }
0x190a   : > { %19718 = vmatpush3.bf16.msra.mxu1 %v22617_v32  ;;  %18264 = vmatprep.mubr.msk.f32.mxu1 %vm20352_vm0, %v24047_v48 }
0x190b   : > { %19719 = vmatprep.subr.bf16.mxu1 %v24046_v42 }
0x190e   : > { %19721 = vmatpush3.bf16.msra.mxu1 %v22627_v46 }
0x190f   : > { %19722 = vmatprep.subr.bf16.mxu1 %v24046_v42 }
0x1912   : > { %19724 = vmatpush3.bf16.msra.mxu1 %v22639_v50 }
0x1913   : > { %19725 = vmatprep.subr.bf16.mxu1 %v24046_v42 }
0x1916   : > { %19727 = vmatpush3.bf16.msra.mxu1 %v22649_v5 }
0x1917   : > { %19728 = vmatprep.subr.bf16.mxu1 %v24046_v42 }
0x1919   : > { %18265 = vmatmul.mubr.msk.f32.vlgmr.msra.gmra.mrb[72].mxu1 %vm674_vm4, %v22764_v40 }
0x191a   : > { %19730 = vmatpush3.bf16.msra.mxu1 %v22477_v43  ;;  %18288 = vmatprep.mubr.msk.f32.mxu1 %vm20352_vm0, %v24047_v48 }
0x191b   : > { %19731 = vmatprep.subr.bf16.mxu1 %v24046_v42 }
0x191e   : > { %19733 = vmatpush3.bf16.msra.mxu1 %v22489_v29 }
0x191f   : > { %19734 = vmatprep.subr.bf16.mxu1 %v24046_v42 }
0x1922   : > { %19736 = vmatpush3.bf16.msra.mxu1 %v22501_v37 }
0x1923   : > { %19737 = vmatprep.subr.bf16.mxu1 %v24046_v42 }
0x1926   : > { %19739 = vmatpush3.bf16.msra.mxu1 %v22511_v38 }
0x1927   : > { %19752 = vmatprep.subr.bf16.mxu1 %v24046_v42 }
0x1929   : > { %18289 = vmatmul.mubr.msk.f32.vlgmr.msra.gmra.mrb[74].mxu1 %vm674_vm4, %v22764_v40 }
0x192a   : > { %19754 = vmatpush3.bf16.msra.mxu1 %v19753_v9  ;;  %18336 = vmatprep.mubr.msk.f32.mxu1 %vm20352_vm0, %v24047_v48  ;;  %v15276_v9 = vld [vmem:[%s23991_s2 + $0x510] sm:$0xff] }
0x192b   : > { %19755 = vmatprep.subr.bf16.mxu1 %v24046_v42  ;;  %v19768_v63 = vpack.c.bf16 %v15277_v3, %v15276_v9  ;;  %v15301_v9 = vld [vmem:[%s23991_s2 + $0x598] sm:$0xff] }
0x192e   : > { %19757 = vmatpush3.bf16.msra.mxu1 %v19756_v45  ;;  %v15278_v45 = vld [vmem:[%s23991_s2 + $0x520] sm:$0xff] }
0x192f   : > { %19758 = vmatprep.subr.bf16.mxu1 %v24046_v42  ;;  %v19771_v57 = vpack.c.bf16 %v15279_v17, %v15278_v45  ;;  %v15303_v45 = vld [vmem:[%s23991_s2 + $0x5a8] sm:$0xff] }
0x1932   : > { %19760 = vmatpush3.bf16.msra.mxu1 %v19759_v60  ;;  %v15280_v60 = vld [vmem:[%s23991_s2 + $0x530] sm:$0xff] }
0x1933   : > { %19761 = vmatprep.subr.bf16.mxu1 %v24046_v42  ;;  %v19774_v39 = vpack.c.bf16 %v15281_v35, %v15280_v60 }
0x1936   : > { %19763 = vmatpush3.bf16.msra.mxu1 %v19762_v19  ;;  %v15298_v19 = vld [vmem:[%s23991_s2 + $0x580] sm:$0xff] }
0x1937   : > { %19764 = vmatprep.subr.bf16.mxu1 %v24046_v42  ;;  %v19789_v12 = vpack.c.bf16 %v15299_v31, %v15298_v19  ;;  %v9284_v19 = vld [vmem:[%s23991_s2 + $0x8] sm:$0xff] }
0x1939   : > { %18337 = vmatmul.mubr.msk.f32.vlgmr.msra.gmra.mrb[76].mxu1 %vm674_vm4, %v22764_v40 }
0x193a   : > { %19766 = vmatpush3.bf16.msra.mxu1 %v19765_v58  ;;  %18360 = vmatprep.mubr.msk.f32.mxu1 %vm20352_vm0, %v24047_v48  ;;  %v15300_v58 = vld [vmem:[%s23991_s2 + $0x590] sm:$0xff] }
0x193b   : > { %19767 = vmatprep.subr.bf16.mxu1 %v24046_v42  ;;  %v19792_v3 = vpack.c.bf16 %v15301_v9, %v15300_v58  ;;  %v15305_v58 = vld [vmem:[%s23991_s2 + $0x5b8] sm:$0xff] }
0x193e   : > { %19769 = vmatpush3.bf16.msra.mxu1 %v19768_v63  ;;  %v15302_v63 = vld [vmem:[%s23991_s2 + $0x5a0] sm:$0xff] }
0x193f   : > { %19770 = vmatprep.subr.bf16.mxu1 %v24046_v42  ;;  %v19795_v35 = vpack.c.bf16 %v15303_v45, %v15302_v63  ;;  %v9285_v45 = vld [vmem:[%s23991_s2 + $0x10] sm:$0xff] }
0x1942   : > { %19772 = vmatpush3.bf16.msra.mxu1 %v19771_v57 }
0x1943   : > { %19773 = vmatprep.subr.bf16.mxu1 %v24046_v42 }
0x1946   : > { %19775 = vmatpush3.bf16.msra.mxu1 %v19774_v39  ;;  %v9283_v39 = vld [vmem:[%s23991_s2] sm:$0xff] }
0x1947   : > { %19788 = vmatprep.subr.bf16.mxu1 %v24046_v42 }
0x1949   : > { %18361 = vmatmul.mubr.msk.f32.vlgmr.msra.gmra.mrb[78].mxu1 %vm674_vm4, %v22764_v40 }
0x194a   : > { %19790 = vmatpush3.bf16.msra.mxu1 %v19789_v12  ;;  %18408 = vmatprep.mubr.msk.f32.mxu1 %vm20352_vm0, %v24047_v48  ;;  %v15304_v12 = vld [vmem:[%s23991_s2 + $0x5b0] sm:$0xff] }
0x194b   : > { %19791 = vmatprep.subr.bf16.mxu1 %v24046_v42  ;;  %v19798_v63 = vpack.c.bf16 %v15305_v58, %v15304_v12  ;;  %v9288_v12 = vld [vmem:[%s23991_s2 + $0x28] sm:$0xff]  ;;  %v15324_v58 = vld [vmem:[%s23991_s2 + $0x610] sm:$0xff] }
0x194c   : > { %v9177_v17 = vpop.f32.mrb[46].mxu1 }
0x194d   : > { %v9182_v57 = vmul.f32 0.2, %v9177_v17  ;;  %v17858_v60 = vpop.f32.mrb[47].mxu1 }
0x194e   : > { %19793 = vmatpush3.bf16.msra.mxu1 %v19792_v3  ;;  %v19525_v3 = vpack.c.bf16 %v9284_v19, %v9283_v39  ;;  %v15323_v60 = vld [vmem:[%s23991_s2 + $0x608] sm:$0xff]  ;;  %v9287_v19 = vld [vmem:[%s23991_s2 + $0x20] sm:$0xff] }
0x194f   : > { %v23054_v31 = vmax.f32 %v9177_v17, %v9182_v57  ;;  %19794 = vmatprep.subr.bf16.mxu1 %v24046_v42  ;;  %v9286_v17 = vld [vmem:[%s23991_s2 + $0x18] sm:$0xff]  ;;  %v15322_v57 = vld [vmem:[%s23991_s2 + $0x600] sm:$0xff] }
0x1950   : > { %v19813_v39 = vpack.c.bf16 %v15323_v60, %v15322_v57  ;;  %v15326_v57 = vld [vmem:[%s23991_s2 + $0x620] sm:$0xff]  ;;  %v15327_v60 = vld [vmem:[%s23991_s2 + $0x628] sm:$0xff] }
0x1951   : > { %v9184_v9 = vmul.f32 %v23054_v31, %v23054_v31 }
0x1952   : > { %19796 = vmatpush3.bf16.msra.mxu1 %v19795_v35  ;;  %v19528_v35 = vpack.c.bf16 %v9286_v17, %v9285_v45  ;;  %v9289_v45 = vld [vmem:[%s23991_s2 + $0x30] sm:$0xff]  ;;  %v9290_v17 = vld [vmem:[%s23991_s2 + $0x38] sm:$0xff] }
0x1953   : > { %17860 = vmatpush3.msk.msra.mxu0 %vm423_vm2, %v9184_v9  ;;  %19797 = vmatprep.subr.bf16.mxu1 %v24046_v42  ;;  %v15325_v9 = vld [vmem:[%s23991_s2 + $0x618] sm:$0xff] }
0x1954   : > { %17862 = vmatmul.mubr.msk.f32.vlgmr.msra.gmra.mrb[76].mxu0 %vm419_vm3, %v24054_v0  ;;  %19524 = vmatprep.subr.bf16.mxu0 %v24046_v42 }
0x1955   : > { %19526 = vmatpush3.bf16.msra.mxu0 %v19525_v3  ;;  %17880 = vmatprep.mubr.msk.f32.mxu0 %vm20352_vm0, %v24047_v48  ;;  %v19531_v3 = vpack.c.bf16 %v9288_v12, %v9287_v19  ;;  %v19534_v19 = vpack.c.bf16 %v9290_v17, %v9289_v45  ;;  %v19819_v12 = vpack.c.bf16 %v15327_v60, %v15326_v57 }
0x1956   : > { %19799 = vmatpush3.bf16.msra.mxu1 %v19798_v63  ;;  %19527 = vmatprep.subr.bf16.mxu0 %v24046_v42  ;;  %v19816_v63 = vpack.c.bf16 %v15325_v9, %v15324_v58  ;;  %v15328_v58 = vld [vmem:[%s23991_s2 + $0x630] sm:$0xff]  ;;  %v15329_v9 = vld [vmem:[%s23991_s2 + $0x638] sm:$0xff] }
0x1957   : > { %19812 = vmatprep.subr.bf16.mxu1 %v24046_v42 }
0x1959   : > { %19529 = vmatpush3.bf16.msra.mxu0 %v19528_v35  ;;  %18409 = vmatmul.mubr.msk.f32.vlgmr.msra.gmra.mrb[80].mxu1 %vm674_vm4, %v22764_v40 }
0x195a   : > { %19814 = vmatpush3.bf16.msra.mxu1 %v19813_v39  ;;  %19530 = vmatprep.subr.bf16.mxu0 %v24046_v42 }
0x195b   : > { %19815 = vmatprep.subr.bf16.mxu1 %v24046_v42  ;;  %18456 = vmatprep.mubr.msk.f32.mxu1 %vm20352_vm0, %v24047_v48 }
0x195c   : > { %v9440_v35 = vpop.f32.mrb[54].mxu1 }
0x195d   : > { %19532 = vmatpush3.bf16.msra.mxu0 %v19531_v3  ;;  %v17901_v39 = vpop.f32.mrb[55].mxu1  ;;  %v19822_v3 = vpack.c.bf16 %v15329_v9, %v15328_v58  ;;  %v15115_v9 = vld [vmem:[%s23995_s6 + $0x70c] sm:$0xf] }
0x195e   : > { %19817 = vmatpush3.bf16.msra.mxu1 %v19816_v63  ;;  %19533 = vmatprep.subr.bf16.mxu0 %v24046_v42 }
0x195f   : > { %19818 = vmatprep.subr.bf16.mxu1 %v24046_v42 }
0x1961   : > { %19535 = vmatpush3.bf16.msra.mxu0 %v19534_v19 }
0x1962   : > { %19820 = vmatpush3.bf16.msra.mxu1 %v19819_v12  ;;  %17902 = vmatprep.subr.mxu0 %v24047_v48 }
0x1963   : > { %19821 = vmatprep.subr.bf16.mxu1 %v24046_v42 }
0x1964   : > { %17881 = vmatmul.mubr.msk.f32.vlgmr.msra.gmra.mrb[78].mxu0 %vm674_vm4, %v22764_v40 }
0x1965   : > { %17903 = vmatpush3.msk.msra.mxu0 %vm423_vm2, %v9440_v35  ;;  %17904 = vmatprep.mubr.msk.f32.mxu0 %vm20352_vm0, %v24047_v48 }
0x1966   : > { %19823 = vmatpush3.bf16.msra.mxu1 %v19822_v3  ;;  %17907 = vmatprep.subr.mxu0 %v24047_v48 }
0x1967   : > { %18464 = vmatprep.subr.mxu1 %v24047_v48 }
0x1968   : > { %17905 = vmatmul.mubr.msk.f32.vlgmr.msra.gmra.mrb[80].mxu0 %vm419_vm3, %v15115_v9 }
0x1969   : > { %18457 = vmatmul.mubr.msk.f32.vlgmr.msra.gmra.mrb[82].mxu1 %vm674_vm4, %v22764_v40  ;;  %17909 = vmatprep.mubr.msk.f32.mxu0 %vm20352_vm0, %v24047_v48 }
0x196a   : > { %18466 = vmatprep.mubr.msk.f32.mxu1 %vm20352_vm0, %v24047_v48 }
0x196c   : > { %v23137_v63 = vpop.f32.mrb[56].mxu1 }
0x196d   : > { %v17954_v45 = vpop.f32.mrb[57].mxu1 }
0x197c   : > { %v23139_v17 = vpop.f32.mrb[58].mxu1 }
0x197d   : > { %v17978_v57 = vpop.f32.mrb[59].mxu1 }
0x198c   : > { %v23141_v60 = vpop.f32.mrb[60].mxu1 }
0x198d   : > { %v18026_v35 = vpop.f32.mrb[61].mxu1 }
0x199c   : > { %v23143_v39 = vpop.f32.mrb[62].mxu1 }
0x199d   : > { %v18074_v19 = vpop.f32.mrb[63].mxu1 }
0x19ac   : > { %v23145_v12 = vpop.f32.mrb[64].mxu1 }
0x19ad   : > { %v18098_v58 = vpop.f32.mrb[65].mxu1 }
0x19bc   : > { %v23153_v3 = vpop.f32.mrb[66].mxu1 }
0x19bd   : > { %v18146_v45 = vpop.f32.mrb[67].mxu1 }
0x19cc   : > { %v23155_v57 = vpop.f32.mrb[68].mxu1 }
0x19cd   : > { %v18170_v35 = vpop.f32.mrb[69].mxu1 }
0x19dc   : > { %v23157_v62 = vpop.f32.mrb[70].mxu1 }
0x19dd   : > { %v18218_v19 = vpop.f32.mrb[71].mxu1 }
0x19de   : > { %v15130_v19 = vld [vmem:[%s23991_s2 + $0x80] sm:$0xff] }
0x19ec   : > { %v23159_v38 = vpop.f32.mrb[72].mxu1 }
0x19ed   : > { %v18266_v58 = vpop.f32.mrb[73].mxu1 }
0x19ee   : > { %v15113_v58 = vld [vmem:[%s23995_s6 + $0x708] sm:$0xf] }
0x19fc   : > { %v23161_v37 = vpop.f32.mrb[74].mxu1 }
0x19fd   : > { %v18290_v29 = vpop.f32.mrb[75].mxu1 }
0x19fe   : > { %v15131_v29 = vld [vmem:[%s23991_s2 + $0x88] sm:$0xff] }
0x1a0c   : > { %v23163_v43 = vpop.f32.mrb[76].mxu1 }
0x1a0d   : > { %v18338_v9 = vpop.f32.mrb[77].mxu1 }
0x1a0e   : > { %v19549_v9 = vpack.c.bf16 %v15131_v29, %v15130_v19  ;;  %v15134_v19 = vld [vmem:[%s23991_s2 + $0xa0] sm:$0xff] }
0x1a1c   : > { %v23165_v5 = vpop.f32.mrb[78].mxu1 }
0x1a1d   : > { %v18362_v50 = vpop.f32.mrb[79].mxu1 }
0x1a27   : > { %v23167_v46 = vpop.f32.mrb[76].mxu0 }
0x1a28   : > { %v17863_v45 = vpop.f32.mrb[77].mxu0 }
0x1a29   : > { %v15132_v45 = vld [vmem:[%s23991_s2 + $0x90] sm:$0xff] }
0x1a2c   : > { %v23169_v32 = vpop.f32.mrb[80].mxu1 }
0x1a2d   : > { %v18410_v35 = vpop.f32.mrb[81].mxu1 }
0x1a2e   : > { %v15133_v35 = vld [vmem:[%s23991_s2 + $0x98] sm:$0xff] }
0x1a2f   : > { %v19552_v28 = vpack.c.bf16 %v15133_v35, %v15132_v45  ;;  %v15137_v45 = vld [vmem:[%s23991_s2 + $0xb8] sm:$0xff] }
0x1a37   : > { %v9360_v50 = vpop.f32.mrb[78].mxu0 }
0x1a38   : > { %v17882_v25 = vpop.f32.mrb[79].mxu0  ;;  %17908 = vmatpush3.msk.msra.mxu0 %vm423_vm2, %v9360_v50 }
0x1a39   : > { %19548 = vmatprep.subr.bf16.mxu0 %v24046_v42  ;;  %17910 = vmatmul.mubr.msk.f32.vlgmr.msra.gmra.mrb[80].mxu0 %vm419_vm3, %v15113_v58  ;;  %v15135_v25 = vld [vmem:[%s23991_s2 + $0xa8] sm:$0xff] }
0x1a3a   : > { %19550 = vmatpush3.bf16.msra.mxu0 %v19549_v9  ;;  %17928 = vmatprep.mubr.msk.f32.mxu0 %vm20352_vm0, %v24047_v48  ;;  %v19555_v58 = vpack.c.bf16 %v15135_v25, %v15134_v19  ;;  %v15136_v9 = vld [vmem:[%s23991_s2 + $0xb0] sm:$0xff] }
0x1a3b   : > { %19551 = vmatprep.subr.bf16.mxu0 %v24046_v42  ;;  %v19558_v35 = vpack.c.bf16 %v15137_v45, %v15136_v9  ;;  %v15153_v9 = vld [vmem:[%s23995_s6 + $0x718] sm:$0xf] }
0x1a3c   : > { %v23198_v29 = vpop.f32.mrb[82].mxu1 }
0x1a3d   : > { %v18458_v50 = vpop.f32.mrb[83].mxu1 }
0x1a3e   : > { %19553 = vmatpush3.bf16.msra.mxu0 %v19552_v28  ;;  %v15129_v28 = vld [vmem:[%s23995_s6 + $0x710] sm:$0xf]  ;;  %v15141_v50 = vld [vmem:[%s23995_s6 + $0x714] sm:$0xf] }
0x1a3f   : > { %19554 = vmatprep.subr.bf16.mxu0 %v24046_v42 }
0x1a42   : > { %19556 = vmatpush3.bf16.msra.mxu0 %v19555_v58  ;;  %v15167_v58 = vld [vmem:[%s23991_s2 + $0x148] sm:$0xff] }
0x1a43   : > { %19557 = vmatprep.subr.bf16.mxu0 %v24046_v42 }
0x1a46   : > { %19559 = vmatpush3.bf16.msra.mxu0 %v19558_v35  ;;  %v15169_v35 = vld [vmem:[%s23991_s2 + $0x158] sm:$0xff] }
0x1a47   : > { %17931 = vmatprep.subr.mxu0 %v24047_v48 }
0x1a49   : > { %17929 = vmatmul.mubr.msk.f32.vlgmr.msra.gmra.mrb[82].mxu0 %vm674_vm4, %v22764_v40 }
0x1a4a   : > { %17933 = vmatprep.mubr.msk.f32.mxu0 %vm20352_vm0, %v24047_v48 }
0x1b1c   : > { %v9672_v19 = vpop.f32.mrb[82].mxu0 }
0x1b1d   : > { %v17930_v25 = vpop.f32.mrb[83].mxu0  ;;  %17932 = vmatpush3.msk.msra.mxu0 %vm423_vm2, %v9672_v19  ;;  %v15170_v19 = vld [vmem:[%s23991_s2 + $0x160] sm:$0xff] }
0x1b1e   : > { %17934 = vmatmul.mubr.msk.f32.vlgmr.msra.gmra.mrb[80].mxu0 %vm419_vm3, %v15129_v28  ;;  %17955 = vmatprep.subr.mxu0 %v24047_v48  ;;  %v15171_v25 = vld [vmem:[%s23991_s2 + $0x168] sm:$0xff] }
0x1b1f   : > { %17956 = vmatpush3.msk.msra.mxu0 %vm423_vm2, %v23137_v63  ;;  %17957 = vmatprep.mubr.msk.f32.mxu0 %vm20352_vm0, %v24047_v48  ;;  %v15166_v63 = vld [vmem:[%s23991_s2 + $0x140] sm:$0xff] }
0x1b20   : > { %17979 = vmatprep.subr.mxu0 %v24047_v48  ;;  %v19585_v45 = vpack.c.bf16 %v15167_v58, %v15166_v63  ;;  %v15172_v63 = vld [vmem:[%s23991_s2 + $0x170] sm:$0xff]  ;;  %v15173_v58 = vld [vmem:[%s23991_s2 + $0x178] sm:$0xff] }
0x1b26   : > { %17958 = vmatmul.mubr.msk.f32.vlgmr.msra.gmra.mrb[80].mxu0 %vm419_vm3, %v15141_v50  ;;  %v19591_v50 = vpack.c.bf16 %v15171_v25, %v15170_v19  ;;  %v13233_v19 = vsel %vm21567_vm6, %v23141_v60, -1e+30  ;;  %v15181_v25 = vld [vmem:[%s23995_s6 + $0x724] sm:$0xf] }
0x1b27   : > { %17980 = vmatpush3.msk.msra.mxu0 %vm423_vm2, %v23139_v17  ;;  %17981 = vmatprep.mubr.msk.f32.mxu0 %vm20352_vm0, %v24047_v48  ;;  %v15168_v17 = vld [vmem:[%s23991_s2 + $0x150] sm:$0xff] }
0x1b28   : > { %19584 = vmatprep.subr.bf16.mxu0 %v24046_v42  ;;  %v19588_v28 = vpack.c.bf16 %v15169_v35, %v15168_v17 }
0x1b2e   : > { %17982 = vmatmul.mubr.msk.f32.vlgmr.msra.gmra.mrb[80].mxu0 %vm419_vm3, %v15153_v9  ;;  %v19594_v9 = vpack.c.bf16 %v15173_v58, %v15172_v63 }
0x1b2f   : > { %19586 = vmatpush3.bf16.msra.mxu0 %v19585_v45  ;;  %18000 = vmatprep.mubr.msk.f32.mxu0 %vm20352_vm0, %v24047_v48  ;;  %v15165_v45 = vld [vmem:[%s23995_s6 + $0x71c] sm:$0xf] }
0x1b30   : > { %19587 = vmatprep.subr.bf16.mxu0 %v24046_v42 }
0x1b33   : > { %19589 = vmatpush3.bf16.msra.mxu0 %v19588_v28  ;;  %v15177_v28 = vld [vmem:[%s23995_s6 + $0x720] sm:$0xf] }
0x1b34   : > { %19590 = vmatprep.subr.bf16.mxu0 %v24046_v42 }
0x1b37   : > { %19592 = vmatpush3.bf16.msra.mxu0 %v19591_v50  ;;  %v13234_v50 = vmax.f32 %v22764_v40, %v13233_v19  ;;  %v23327_v19 = vsel %vm6180_vm9, %v23153_v3, -1e+30 }
0x1b38   : > { %19593 = vmatprep.subr.bf16.mxu0 %v24046_v42 }
0x1b3b   : > { %19595 = vmatpush3.bf16.msra.mxu0 %v19594_v9 }
0x1b3c   : > { %18003 = vmatprep.subr.mxu0 %v24047_v48 }
0x1b3e   : > { %18001 = vmatmul.mubr.msk.f32.vlgmr.msra.gmra.mrb[84].mxu0 %vm674_vm4, %v22764_v40 }
0x1b3f   : > { %18005 = vmatprep.mubr.msk.f32.mxu0 %vm20352_vm0, %v24047_v48 }
0x1c11   : > { %v10143_v17 = vpop.f32.mrb[84].mxu0 }
0x1c12   : > { %v18002_v35 = vpop.f32.mrb[85].mxu0  ;;  %18004 = vmatpush3.msk.msra.mxu0 %vm423_vm2, %v10143_v17 }
0x1c13   : > { %18006 = vmatmul.mubr.msk.f32.vlgmr.msra.gmra.mrb[80].mxu0 %vm419_vm3, %v15165_v45  ;;  %18027 = vmatprep.subr.mxu0 %v24047_v48  ;;  %v13237_v35 = vsel %vm6173_vm8, %v23143_v39, -1e+30 }
0x1c14   : > { %18028 = vmatpush3.msk.msra.mxu0 %vm423_vm2, %v23141_v60  ;;  %18029 = vmatprep.mubr.msk.f32.mxu0 %vm20352_vm0, %v24047_v48 }
0x1c15   : > { %19608 = vmatprep.subr.bf16.mxu0 %v24046_v42 }
0x1c1b   : > { %18030 = vmatmul.mubr.msk.f32.vlgmr.msra.gmra.mrb[80].mxu0 %vm419_vm3, %v15177_v28 }
0x1c1c   : > { %19610 = vmatpush3.bf16.msra.mxu0 %v22293_v36  ;;  %18048 = vmatprep.mubr.msk.f32.mxu0 %vm20352_vm0, %v24047_v48 }
0x1c1d   : > { %19611 = vmatprep.subr.bf16.mxu0 %v24046_v42 }
0x1c20   : > { %19613 = vmatpush3.bf16.msra.mxu0 %v22306_v14 }
0x1c21   : > { %19614 = vmatprep.subr.bf16.mxu0 %v24046_v42 }
0x1c24   : > { %19616 = vmatpush3.bf16.msra.mxu0 %v22319_v7 }
0x1c25   : > { %19617 = vmatprep.subr.bf16.mxu0 %v24046_v42 }
0x1c28   : > { %19619 = vmatpush3.bf16.msra.mxu0 %v22333_v1 }
0x1c29   : > { %18051 = vmatprep.subr.mxu0 %v24047_v48 }
0x1c2b   : > { %18049 = vmatmul.mubr.msk.f32.vlgmr.msra.gmra.mrb[86].mxu0 %vm674_vm4, %v22764_v40 }
0x1c2c   : > { %18053 = vmatprep.mubr.msk.f32.mxu0 %vm20352_vm0, %v24047_v48 }
0x1cfe   : > { %v10441_v63 = vpop.f32.mrb[86].mxu0 }
0x1cff   : > { %v13221_v58 = vadd.f32 %v10441_v63, %v23141_v60  ;;  %v13235_v9 = vsel %vm6166_vm7, %v10441_v63, -1e+30  ;;  %v18050_v45 = vpop.f32.mrb[87].mxu0  ;;  %18052 = vmatpush3.msk.msra.mxu0 %vm423_vm2, %v10441_v63 }
0x1d00   : > { %v13236_v17 = vmax.f32 %v13234_v50, %v13235_v9  ;;  %18054 = vmatmul.mubr.msk.f32.vlgmr.msra.gmra.mrb[80].mxu0 %vm419_vm3, %v15181_v25  ;;  %18075 = vmatprep.subr.mxu0 %v24047_v48  ;;  %v15203_v9 = vld [vmem:[%s23991_s2 + $0x288] sm:$0xff] }
0x1d01   : > { %v13222_v28 = vadd.f32 %v13221_v58, %v23143_v39  ;;  %18076 = vmatpush3.msk.msra.mxu0 %vm423_vm2, %v23143_v39  ;;  %18077 = vmatprep.mubr.msk.f32.mxu0 %vm20352_vm0, %v24047_v48  ;;  %v15185_v39 = vld [vmem:[%s23995_s6 + $0x728] sm:$0xf]  ;;  %v15202_v58 = vld [vmem:[%s23991_s2 + $0x280] sm:$0xff]  ;;  %v15189_v45 = vld [vmem:[%s23995_s6 + $0x72c] sm:$0xf] }
0x1d02   : > { %v23321_v60 = vmax.f32 %v13236_v17, %v13237_v35  ;;  %18099 = vmatprep.subr.mxu0 %v24047_v48  ;;  %v19645_v17 = vpack.c.bf16 %v15203_v9, %v15202_v58  ;;  %v15205_v35 = vld [vmem:[%s23991_s2 + $0x298] sm:$0xff]  ;;  %v15208_v9 = vld [vmem:[%s23991_s2 + $0x2b0] sm:$0xff] }
0x1d03   : > { %v13223_v25 = vadd.f32 %v13222_v28, %v23153_v3 }
0x1d04   : > { %v13240_v50 = vmax.f32 %v23321_v60, %v23327_v19  ;;  %v15238_v60 = vld [vmem:[%s23991_s2 + $0x3c0] sm:$0xff]  ;;  %v15239_v19 = vld [vmem:[%s23991_s2 + $0x3c8] sm:$0xff] }
0x1d05   : > { %v13224_v63 = vadd.f32 %v13223_v25, %v23155_v57  ;;  %v15206_v25 = vld [vmem:[%s23991_s2 + $0x2a0] sm:$0xff] }
0x1d08   : > { %18078 = vmatmul.mubr.msk.f32.vlgmr.msra.gmra.mrb[80].mxu0 %vm419_vm3, %v15185_v39  ;;  %v15207_v39 = vld [vmem:[%s23991_s2 + $0x2a8] sm:$0xff] }
0x1d09   : > { %18100 = vmatpush3.msk.msra.mxu0 %vm423_vm2, %v23145_v12  ;;  %18101 = vmatprep.mubr.msk.f32.mxu0 %vm20352_vm0, %v24047_v48  ;;  %v15204_v12 = vld [vmem:[%s23991_s2 + $0x290] sm:$0xff]  ;;  %v19651_v58 = vpack.c.bf16 %v15207_v39, %v15206_v25 }
0x1d0a   : > { %19644 = vmatprep.subr.bf16.mxu0 %v24046_v42  ;;  %v19648_v28 = vpack.c.bf16 %v15205_v35, %v15204_v12  ;;  %v15201_v12 = vld [vmem:[%s23995_s6 + $0x730] sm:$0xf]  ;;  %v15213_v25 = vld [vmem:[%s23995_s6 + $0x734] sm:$0xf] }
0x1d10   : > { %18102 = vmatmul.mubr.msk.f32.vlgmr.msra.gmra.mrb[80].mxu0 %vm419_vm3, %v15189_v45  ;;  %v15209_v45 = vld [vmem:[%s23991_s2 + $0x2b8] sm:$0xff] }
0x1d11   : > { %19646 = vmatpush3.bf16.msra.mxu0 %v19645_v17  ;;  %18120 = vmatprep.mubr.msk.f32.mxu0 %vm20352_vm0, %v24047_v48  ;;  %v19654_v17 = vpack.c.bf16 %v15209_v45, %v15208_v9 }
0x1d12   : > { %19647 = vmatprep.subr.bf16.mxu0 %v24046_v42 }
0x1d15   : > { %19649 = vmatpush3.bf16.msra.mxu0 %v19648_v28 }
0x1d16   : > { %19650 = vmatprep.subr.bf16.mxu0 %v24046_v42 }
0x1d19   : > { %19652 = vmatpush3.bf16.msra.mxu0 %v19651_v58 }
0x1d1a   : > { %19653 = vmatprep.subr.bf16.mxu0 %v24046_v42 }
0x1d1d   : > { %19655 = vmatpush3.bf16.msra.mxu0 %v19654_v17 }
0x1d1e   : > { %18123 = vmatprep.subr.mxu0 %v24047_v48 }
0x1d20   : > { %18121 = vmatmul.mubr.msk.f32.vlgmr.msra.gmra.mrb[88].mxu0 %vm674_vm4, %v22764_v40 }
0x1d21   : > { %18125 = vmatprep.mubr.msk.f32.mxu0 %vm20352_vm0, %v24047_v48 }
0x1df3   : > { %v10904_v35 = vpop.f32.mrb[88].mxu0 }
0x1df4   : > { %v18122_v28 = vpop.f32.mrb[89].mxu0  ;;  %18124 = vmatpush3.msk.msra.mxu0 %vm423_vm2, %v10904_v35 }
0x1df5   : > { %18126 = vmatmul.mubr.msk.f32.vlgmr.msra.gmra.mrb[80].mxu0 %vm419_vm3, %v15201_v12  ;;  %18147 = vmatprep.subr.mxu0 %v24047_v48  ;;  %v13243_v12 = vsel %vm6194_vm11, %v23159_v38, -1e+30 }
0x1df6   : > { %18148 = vmatpush3.msk.msra.mxu0 %vm423_vm2, %v23153_v3  ;;  %18149 = vmatprep.mubr.msk.f32.mxu0 %vm20352_vm0, %v24047_v48  ;;  %v15217_v3 = vld [vmem:[%s23995_s6 + $0x738] sm:$0xf] }
0x1df7   : > { %18171 = vmatprep.subr.mxu0 %v24047_v48 }
0x1dfd   : > { %18150 = vmatmul.mubr.msk.f32.vlgmr.msra.gmra.mrb[80].mxu0 %vm419_vm3, %v15213_v25  ;;  %v15225_v25 = vld [vmem:[%s23995_s6 + $0x740] sm:$0xf] }
0x1dfe   : > { %18172 = vmatpush3.msk.msra.mxu0 %vm423_vm2, %v23155_v57  ;;  %18173 = vmatprep.mubr.msk.f32.mxu0 %vm20352_vm0, %v24047_v48  ;;  %v15221_v57 = vld [vmem:[%s23995_s6 + $0x73c] sm:$0xf] }
0x1dff   : > { %19680 = vmatprep.subr.bf16.mxu0 %v24046_v42 }
0x1e05   : > { %18174 = vmatmul.mubr.msk.f32.vlgmr.msra.gmra.mrb[80].mxu0 %vm419_vm3, %v15217_v3  ;;  %v19705_v3 = vpack.c.bf16 %v15239_v19, %v15238_v60  ;;  %v15237_v60 = vld [vmem:[%s23995_s6 + $0x744] sm:$0xf] }
0x1e06   : > { %19682 = vmatpush3.bf16.msra.mxu0 %v22433_v16  ;;  %18192 = vmatprep.mubr.msk.f32.mxu0 %vm20352_vm0, %v24047_v48 }
0x1e07   : > { %19683 = vmatprep.subr.bf16.mxu0 %v24046_v42 }
0x1e0a   : > { %19685 = vmatpush3.bf16.msra.mxu0 %v22445_v61 }
0x1e0b   : > { %19686 = vmatprep.subr.bf16.mxu0 %v24046_v42 }
0x1e0e   : > { %19688 = vmatpush3.bf16.msra.mxu0 %v22457_v52 }
0x1e0f   : > { %19689 = vmatprep.subr.bf16.mxu0 %v24046_v42 }
0x1e12   : > { %19691 = vmatpush3.bf16.msra.mxu0 %v22467_v59 }
0x1e13   : > { %18195 = vmatprep.subr.mxu0 %v24047_v48 }
0x1e15   : > { %18193 = vmatmul.mubr.msk.f32.vlgmr.msra.gmra.mrb[90].mxu0 %vm674_vm4, %v22764_v40 }
0x1e16   : > { %18197 = vmatprep.mubr.msk.f32.mxu0 %vm20352_vm0, %v24047_v48 }
0x1ee8   : > { %v11351_v39 = vpop.f32.mrb[90].mxu0 }
0x1ee9   : > { %v13225_v58 = vadd.f32 %v13224_v63, %v11351_v39  ;;  %v13241_v9 = vsel %vm6187_vm10, %v11351_v39, -1e+30  ;;  %v18194_v45 = vpop.f32.mrb[91].mxu0  ;;  %18196 = vmatpush3.msk.msra.mxu0 %vm423_vm2, %v11351_v39  ;;  %v15241_v39 = vld [vmem:[%s23991_s2 + $0x3d8] sm:$0xff] }
0x1eea   : > { %v13242_v17 = vmax.f32 %v13240_v50, %v13241_v9  ;;  %18198 = vmatmul.mubr.msk.f32.vlgmr.msra.gmra.mrb[80].mxu0 %vm419_vm3, %v15221_v57  ;;  %18219 = vmatprep.subr.mxu0 %v24047_v48  ;;  %v13245_v50 = vsel %vm6201_vm12, %v23161_v37, -1e+30  ;;  %v15240_v57 = vld [vmem:[%s23991_s2 + $0x3d0] sm:$0xff]  ;;  %v15242_v9 = vld [vmem:[%s23991_s2 + $0x3e0] sm:$0xff]  ;;  %v15243_v45 = vld [vmem:[%s23991_s2 + $0x3e8] sm:$0xff] }
0x1eeb   : > { %v13226_v63 = vadd.f32 %v13225_v58, %v23159_v38  ;;  %18220 = vmatpush3.msk.msra.mxu0 %vm423_vm2, %v23157_v62  ;;  %18221 = vmatprep.mubr.msk.f32.mxu0 %vm20352_vm0, %v24047_v48  ;;  %v19708_v58 = vpack.c.bf16 %v15241_v39, %v15240_v57 }
0x1eec   : > { %v13244_v35 = vmax.f32 %v13242_v17, %v13243_v12  ;;  %19704 = vmatprep.subr.bf16.mxu0 %v24046_v42  ;;  %v19711_v17 = vpack.c.bf16 %v15243_v45, %v15242_v9  ;;  %v15244_v12 = vld [vmem:[%s23991_s2 + $0x3f0] sm:$0xff]  ;;  %v15273_v45 = vld [vmem:[%s23995_s6 + $0x758] sm:$0xf] }
0x1eed   : > { %v13227_v62 = vadd.f32 %v13226_v63, %v23161_v37  ;;  %v15245_v63 = vld [vmem:[%s23991_s2 + $0x3f8] sm:$0xff] }
0x1eee   : > { %v13246_v28 = vmax.f32 %v13244_v35, %v13245_v50  ;;  %v19714_v35 = vpack.c.bf16 %v15245_v63, %v15244_v12  ;;  %v15289_v12 = vld [vmem:[%s23991_s2 + $0x558] sm:$0xff] }
0x1ef2   : > { %18222 = vmatmul.mubr.msk.f32.vlgmr.msra.gmra.mrb[80].mxu0 %vm419_vm3, %v15225_v25  ;;  %v15249_v25 = vld [vmem:[%s23995_s6 + $0x748] sm:$0xf] }
0x1ef3   : > { %19706 = vmatpush3.bf16.msra.mxu0 %v19705_v3  ;;  %18240 = vmatprep.mubr.msk.f32.mxu0 %vm20352_vm0, %v24047_v48 }
0x1ef4   : > { %19707 = vmatprep.subr.bf16.mxu0 %v24046_v42 }
0x1ef7   : > { %19709 = vmatpush3.bf16.msra.mxu0 %v19708_v58 }
0x1ef8   : > { %19710 = vmatprep.subr.bf16.mxu0 %v24046_v42 }
0x1efb   : > { %19712 = vmatpush3.bf16.msra.mxu0 %v19711_v17 }
0x1efc   : > { %19713 = vmatprep.subr.bf16.mxu0 %v24046_v42 }
0x1eff   : > { %19715 = vmatpush3.bf16.msra.mxu0 %v19714_v35  ;;  %v15290_v35 = vld [vmem:[%s23991_s2 + $0x560] sm:$0xff] }
0x1f00   : > { %18243 = vmatprep.subr.mxu0 %v24047_v48 }
0x1f02   : > { %18241 = vmatmul.mubr.msk.f32.vlgmr.msra.gmra.mrb[92].mxu0 %vm674_vm4, %v22764_v40 }
0x1f03   : > { %18245 = vmatprep.mubr.msk.f32.mxu0 %vm20352_vm0, %v24047_v48 }
0x1fd5   : > { %v11665_v19 = vpop.f32.mrb[92].mxu0 }
0x1fd6   : > { %v18242_v50 = vpop.f32.mrb[93].mxu0  ;;  %18244 = vmatpush3.msk.msra.mxu0 %vm423_vm2, %v11665_v19 }
0x1fd7   : > { %18246 = vmatmul.mubr.msk.f32.vlgmr.msra.gmra.mrb[80].mxu0 %vm419_vm3, %v15237_v60  ;;  %18267 = vmatprep.subr.mxu0 %v24047_v48  ;;  %v15291_v60 = vld [vmem:[%s23991_s2 + $0x568] sm:$0xff]  ;;  %v15292_v50 = vld [vmem:[%s23991_s2 + $0x570] sm:$0xff] }
0x1fd8   : > { %18268 = vmatpush3.msk.msra.mxu0 %vm423_vm2, %v23159_v38  ;;  %18269 = vmatprep.mubr.msk.f32.mxu0 %vm20352_vm0, %v24047_v48  ;;  %v15253_v38 = vld [vmem:[%s23995_s6 + $0x74c] sm:$0xf]  ;;  %v19783_v19 = vpack.c.bf16 %v15291_v60, %v15290_v35  ;;  %v15316_v35 = vld [vmem:[%s23991_s2 + $0x5f0] sm:$0xff]  ;;  %v15317_v60 = vld [vmem:[%s23991_s2 + $0x5f8] sm:$0xff] }
0x1fd9   : > { %18291 = vmatprep.subr.mxu0 %v24047_v48 }
0x1fdf   : > { %18270 = vmatmul.mubr.msk.f32.vlgmr.msra.gmra.mrb[80].mxu0 %vm419_vm3, %v15249_v25  ;;  %v15293_v25 = vld [vmem:[%s23991_s2 + $0x578] sm:$0xff] }
0x1fe0   : > { %18292 = vmatpush3.msk.msra.mxu0 %vm423_vm2, %v23161_v37  ;;  %18293 = vmatprep.mubr.msk.f32.mxu0 %vm20352_vm0, %v24047_v48  ;;  %v15257_v37 = vld [vmem:[%s23995_s6 + $0x750] sm:$0xf] }
0x1fe1   : > { %19740 = vmatprep.subr.bf16.mxu0 %v24046_v42 }
0x1fe7   : > { %18294 = vmatmul.mubr.msk.f32.vlgmr.msra.gmra.mrb[80].mxu0 %vm419_vm3, %v15253_v38  ;;  %v19786_v38 = vpack.c.bf16 %v15293_v25, %v15292_v50  ;;  %v15309_v50 = vld [vmem:[%s23995_s6 + $0x764] sm:$0xf] }
0x1fe8   : > { %19742 = vmatpush3.bf16.msra.mxu0 %v22677_v10  ;;  %18312 = vmatprep.mubr.msk.f32.mxu0 %vm20352_vm0, %v24047_v48 }
0x1fe9   : > { %19743 = vmatprep.subr.bf16.mxu0 %v24046_v42 }
0x1fec   : > { %19745 = vmatpush3.bf16.msra.mxu0 %v22687_v55 }
0x1fed   : > { %19746 = vmatprep.subr.bf16.mxu0 %v24046_v42 }
0x1ff0   : > { %19748 = vmatpush3.bf16.msra.mxu0 %v22699_v27 }
0x1ff1   : > { %19749 = vmatprep.subr.bf16.mxu0 %v24046_v42 }
0x1ff4   : > { %19751 = vmatpush3.bf16.msra.mxu0 %v22709_v15 }
0x1ff5   : > { %18315 = vmatprep.subr.mxu0 %v24047_v48 }
0x1ff7   : > { %18313 = vmatmul.mubr.msk.f32.vlgmr.msra.gmra.mrb[94].mxu0 %vm674_vm4, %v22764_v40 }
0x1ff8   : > { %18317 = vmatprep.mubr.msk.f32.mxu0 %vm20352_vm0, %v24047_v48 }
0x20ca   : > { %v12112_v3 = vpop.f32.mrb[94].mxu0 }
0x20cb   : > { %v23521_v57 = vadd.f32 %v13227_v62, %v12112_v3  ;;  %v13247_v39 = vsel %vm21825_vm14, %v12112_v3, -1e+30  ;;  %v18314_v58 = vpop.f32.mrb[95].mxu0  ;;  %18316 = vmatpush3.msk.msra.mxu0 %vm423_vm2, %v12112_v3  ;;  %v15261_v62 = vld [vmem:[%s23995_s6 + $0x754] sm:$0xf] }
0x20cc   : > { %v23526_v9 = vmax.f32 %v13246_v28, %v13247_v39  ;;  %18318 = vmatmul.mubr.msk.f32.vlgmr.msra.gmra.mrb[80].mxu0 %vm419_vm3, %v15257_v37  ;;  %18339 = vmatprep.subr.mxu0 %v24047_v48  ;;  %v15287_v28 = vld [vmem:[%s23991_s2 + $0x548] sm:$0xff]  ;;  %v15285_v37 = vld [vmem:[%s23995_s6 + $0x75c] sm:$0xf]  ;;  %v15310_v58 = vld [vmem:[%s23991_s2 + $0x5c0] sm:$0xff] }
0x20cd   : > { %18340 = vmatpush3.msk.msra.mxu0 %vm423_vm2, %v23163_v43  ;;  %18341 = vmatprep.mubr.msk.f32.mxu0 %vm20352_vm0, %v24047_v48  ;;  %v15286_v43 = vld [vmem:[%s23991_s2 + $0x540] sm:$0xff] }
0x20ce   : > { %18363 = vmatprep.subr.mxu0 %v24047_v48  ;;  %v19777_v17 = vpack.c.bf16 %v15287_v28, %v15286_v43  ;;  %v15297_v43 = vld [vmem:[%s23995_s6 + $0x760] sm:$0xf] }
0x20d4   : > { %18342 = vmatmul.mubr.msk.f32.vlgmr.msra.gmra.mrb[80].mxu0 %vm419_vm3, %v15261_v62  ;;  %v15311_v62 = vld [vmem:[%s23991_s2 + $0x5c8] sm:$0xff] }
0x20d5   : > { %18364 = vmatpush3.msk.msra.mxu0 %vm423_vm2, %v23165_v5  ;;  %18365 = vmatprep.mubr.msk.f32.mxu0 %vm20352_vm0, %v24047_v48  ;;  %v15288_v5 = vld [vmem:[%s23991_s2 + $0x550] sm:$0xff]  ;;  %v19801_v28 = vpack.c.bf16 %v15311_v62, %v15310_v58 }
0x20d6   : > { %19776 = vmatprep.subr.bf16.mxu0 %v24046_v42  ;;  %v19780_v63 = vpack.c.bf16 %v15289_v12, %v15288_v5  ;;  %v15314_v5 = vld [vmem:[%s23991_s2 + $0x5e0] sm:$0xff]  ;;  %v15315_v12 = vld [vmem:[%s23991_s2 + $0x5e8] sm:$0xff] }
0x20dc   : > { %18366 = vmatmul.mubr.msk.f32.vlgmr.msra.gmra.mrb[80].mxu0 %vm419_vm3, %v15273_v45  ;;  %v15313_v45 = vld [vmem:[%s23991_s2 + $0x5d8] sm:$0xff] }
0x20dd   : > { %19778 = vmatpush3.bf16.msra.mxu0 %v19777_v17  ;;  %18384 = vmatprep.mubr.msk.f32.mxu0 %vm20352_vm0, %v24047_v48 }
0x20de   : > { %19779 = vmatprep.subr.bf16.mxu0 %v24046_v42 }
0x20e1   : > { %19781 = vmatpush3.bf16.msra.mxu0 %v19780_v63  ;;  %v19807_v63 = vpack.c.bf16 %v15315_v12, %v15314_v5 }
0x20e2   : > { %19782 = vmatprep.subr.bf16.mxu0 %v24046_v42 }
0x20e5   : > { %19784 = vmatpush3.bf16.msra.mxu0 %v19783_v19  ;;  %v19810_v19 = vpack.c.bf16 %v15317_v60, %v15316_v35 }
0x20e6   : > { %19785 = vmatprep.subr.bf16.mxu0 %v24046_v42 }
0x20e9   : > { %19787 = vmatpush3.bf16.msra.mxu0 %v19786_v38 }
0x20ea   : > { %18387 = vmatprep.subr.mxu0 %v24047_v48 }
0x20ec   : > { %18385 = vmatmul.mubr.msk.f32.vlgmr.msra.gmra.mrb[96].mxu0 %vm674_vm4, %v22764_v40 }
0x20ed   : > { %18389 = vmatprep.mubr.msk.f32.mxu0 %vm20352_vm0, %v24047_v48 }
0x21bf   : > { %v12583_v3 = vpop.f32.mrb[96].mxu0 }
0x21c0   : > { %v18386_v39 = vpop.f32.mrb[97].mxu0  ;;  %18388 = vmatpush3.msk.msra.mxu0 %vm423_vm2, %v12583_v3 }
0x21c1   : > { %18390 = vmatmul.mubr.msk.f32.vlgmr.msra.gmra.mrb[80].mxu0 %vm419_vm3, %v15285_v37  ;;  %18411 = vmatprep.subr.mxu0 %v24047_v48 }
0x21c2   : > { %18412 = vmatpush3.msk.msra.mxu0 %vm423_vm2, %v23169_v32  ;;  %18413 = vmatprep.mubr.msk.f32.mxu0 %vm20352_vm0, %v24047_v48  ;;  %v15312_v32 = vld [vmem:[%s23991_s2 + $0x5d0] sm:$0xff] }
0x21c3   : > { %19800 = vmatprep.subr.bf16.mxu0 %v24046_v42  ;;  %v19804_v17 = vpack.c.bf16 %v15313_v45, %v15312_v32 }
0x21c9   : > { %18414 = vmatmul.mubr.msk.f32.vlgmr.msra.gmra.mrb[80].mxu0 %vm419_vm3, %v15297_v43 }
0x21ca   : > { %19802 = vmatpush3.bf16.msra.mxu0 %v19801_v28  ;;  %18432 = vmatprep.mubr.msk.f32.mxu0 %vm20352_vm0, %v24047_v48 }
0x21cb   : > { %19803 = vmatprep.subr.bf16.mxu0 %v24046_v42 }
0x21ce   : > { %19805 = vmatpush3.bf16.msra.mxu0 %v19804_v17  ;;  %v13229_v17 = vmul.f32 0.11111111, %v23521_v57 }
0x21cf   : > { %19806 = vmatprep.subr.bf16.mxu0 %v24046_v42 }
0x21d0   : > { %v13230_v12 = vmul.f32 0.2, %v13229_v17 }
0x21d2   : > { %19808 = vmatpush3.bf16.msra.mxu0 %v19807_v63  ;;  %v13231_v60 = vmax.f32 %v13229_v17, %v13230_v12 }
0x21d3   : > { %19809 = vmatprep.subr.bf16.mxu0 %v24046_v42 }
0x21d6   : > { %19811 = vmatpush3.bf16.msra.mxu0 %v19810_v19 }
0x21d7   : > { %18435 = vmatprep.subr.mxu0 %v24047_v48 }
0x21d9   : > { %18433 = vmatmul.mubr.msk.f32.vlgmr.msra.gmra.mrb[98].mxu0 %vm674_vm4, %v22764_v40  ;;  %v15321_v40 = vld [vmem:[%s23995_s6 + $0x768] sm:$0xf] }
0x21da   : > { %18437 = vmatprep.mubr.msk.f32.mxu0 %vm20352_vm0, %v24047_v48 }
0x22ac   : > { %v12897_v25 = vpop.f32.mrb[98].mxu0 }
0x22ad   : > { %v18434_v38 = vpop.f32.mrb[99].mxu0  ;;  %18436 = vmatpush3.msk.msra.mxu0 %vm423_vm2, %v12897_v25  ;;  %v13232_v25 = vadd.f32 %v13231_v60, %v22321_v49  ;;  %v24081_v49 = vld [vmem:[#allocation12_spill] sm:$0xff] }
0x22ae   : > { %18438 = vmatmul.mubr.msk.f32.vlgmr.msra.gmra.mrb[80].mxu0 %vm419_vm3, %v15309_v50  ;;  %18459 = vmatprep.subr.mxu0 %v24047_v48 }
0x22af   : > { %18460 = vmatpush3.msk.msra.mxu0 %vm423_vm2, %v23198_v29  ;;  %18461 = vmatprep.mubr.msk.f32.mxu0 %vm20352_vm0, %v24047_v48 }
0x22b0   : > { %19932 = vmatprep.subr.bf16.mxu0 %v24046_v42 }
0x22b6   : > { %18462 = vmatmul.mubr.msk.f32.vlgmr.msra.gmra.mrb[80].mxu0 %vm419_vm3, %v15321_v40 }
0x22b7   : > { %19934 = vmatpush3.bf16.msra.mxu0 %v22249_v11  ;;  %18656 = vmatprep.mubr.msk.f32.mxu0 %vm20352_vm0, %v24047_v48 }
0x22b8   : > { %19935 = vmatprep.subr.bf16.mxu0 %v24046_v42 }
0x22bb   : > { %19937 = vmatpush3.bf16.msra.mxu0 %v22259_v23 }
0x22bc   : > { %19938 = vmatprep.subr.bf16.mxu0 %v24046_v42 }
0x22bf   : > { %19940 = vmatpush3.bf16.msra.mxu0 %v22269_v34 }
0x22c0   : > { %19941 = vmatprep.subr.bf16.mxu0 %v24046_v42 }
0x22c3   : > { %19943 = vmatpush3.bf16.msra.mxu0 %v22279_v30 }
0x22c4   : > { %19944 = vmatprep.subr.bf16.mxu0 %v24046_v42 }
0x2389   : > { %v13130_v29 = vpop.f32.mrb[80].mxu0 }
0x238a   : > { %v13135_v37 = vmul.f32 0.2, %v13130_v29  ;;  %v18463_v3 = vpop.f32.mrb[81].mxu0 }
0x238c   : > { %v13136_v39 = vmax.f32 %v13130_v29, %v13135_v37 }
0x238e   : > { %v13137_v58 = vmul.f32 %v13136_v39, %v13136_v39 }
0x2390   : > { %18465 = vmatpush3.msk.msra.mxu1 %vm423_vm2, %v13137_v58 }
0x2391   : > { %18467 = vmatmul.mubr.msk.f32.vlgmr.msra.gmra.mrb[84].mxu1 %vm419_vm3, %v24054_v0  ;;  %19824 = vmatprep.subr.bf16.mxu1 %v24046_v42  ;;  %v9258_v0 = vmul.f32 0.25, %v23167_v46 }
0x2392   : > { %19826 = vmatpush3.bf16.msra.mxu1 %v22293_v36  ;;  %18485 = vmatprep.mubr.msk.f32.mxu1 %vm20352_vm0, %v24047_v48 }
0x2393   : > { %19827 = vmatprep.subr.bf16.mxu1 %v24046_v42  ;;  %v9259_v62 = vadd.f32 1e-08, %v9258_v0 }
0x2395   : > { %20251 = vrsqrt.f32 %v9259_v62 }
0x2396   : > { %19829 = vmatpush3.bf16.msra.mxu1 %v22306_v14 }
0x2397   : > { %19830 = vmatprep.subr.bf16.mxu1 %v24046_v42 }
0x239a   : > { %19832 = vmatpush3.bf16.msra.mxu1 %v22319_v7 }
0x239b   : > { %19833 = vmatprep.subr.bf16.mxu1 %v24046_v42 }
0x239e   : > { %19835 = vmatpush3.bf16.msra.mxu1 %v22333_v1 }
0x239f   : > { %19836 = vmatprep.subr.bf16.mxu1 %v24046_v42  ;;  %v20252_v5 = vpop.eup %20251 }
0x23a0   : > { %v9264_v63 = vrot.slane %v20252_v5, %v20556_v44 }
0x23a2   : > { %v9265_v50 = vmul.f32 %v9264_v63, %v23054_v31 }
0x2464   : > { %v13207_v43 = vpop.f32.mrb[84].mxu1 }
0x2465   : > { %v13211_v28 = vmul.f32 0.25, %v13207_v43  ;;  %v18468_v32 = vpop.f32.mrb[85].mxu1 }
0x2467   : > { %v13212_v45 = vadd.f32 1e-08, %v13211_v28 }
0x2469   : > { %20253 = vrsqrt.f32 %v13212_v45 }
0x2473   : > { %v20254_v35 = vpop.eup %20253 }
0x2474   : > { %v13217_v19 = vrot.slane %v20254_v35, %v20556_v44 }
0x2476   : > { %v13218_v46 = vmul.f32 %v13217_v19, %v13136_v39 }
0x2478   : > { %v23676_v38 = vadd.f32 %v13218_v46, %v9265_v50 }
0x247a   : > { %14479 = vst.msk [vmem:[#allocation2] sm:$0xf] %vm7443_vm15, %v23676_v38  ;;  %18486 = vmatmul.mubr.msk.f32.vlgmr.msra.gmra.mrb[86].mxu1 %vm674_vm4, %v23676_v38  ;;  %v23683_v57 = vadd.f32 %v13232_v25, %v23676_v38 }
0x247b   : > { %19838 = vmatpush3.bf16.msra.mxu1 %v22249_v11  ;;  %18504 = vmatprep.mubr.msk.f32.mxu1 %vm20352_vm0, %v24047_v48  ;;  %v24074_v11 = vld [vmem:[#allocation14_spill] sm:$0xff] }
0x247c   : > { %18657 = vmatmul.mubr.msk.f32.vlgmr.msra.gmra.mrb[100].mxu0 %vm674_vm4, %v23683_v57  ;;  %14480 = vst.msk [vmem:[#allocation2 + $0x4] sm:$0xf] %vm7443_vm15, %v23683_v57  ;;  %19839 = vmatprep.subr.bf16.mxu1 %v24046_v42 }
0x247d   : > { %19946 = vmatpush3.bf16.msra.mxu0 %v22293_v36  ;;  %18675 = vmatprep.mubr.msk.f32.mxu0 %vm20352_vm0, %v24047_v48  ;;  %v24078_v36 = vld [vmem:[#allocation17_spill] sm:$0xff] }
0x247e   : > { %19947 = vmatprep.subr.bf16.mxu0 %v24046_v42 }
0x247f   : > { %19841 = vmatpush3.bf16.msra.mxu1 %v22259_v23  ;;  %v24075_v23 = vld [vmem:[#allocation10_spill] sm:$0xff] }
0x2480   : > { %19842 = vmatprep.subr.bf16.mxu1 %v24046_v42 }
0x2481   : > { %19949 = vmatpush3.bf16.msra.mxu0 %v22306_v14  ;;  %v24079_v14 = vld [vmem:[#allocation18_spill] sm:$0xff] }
0x2482   : > { %19950 = vmatprep.subr.bf16.mxu0 %v24046_v42 }
0x2483   : > { %19844 = vmatpush3.bf16.msra.mxu1 %v22269_v34  ;;  %v14483_v44 = vld [vmem:[#allocation2] sm:$0xff] }
0x2484   : > { %19845 = vmatprep.subr.bf16.mxu1 %v24046_v42  ;;  %14485 = vst.msk [vmem:[%s23705_s25] sm:$0xff] %vm674_vm4, %v14483_v44  ;;  %v24076_v34 = vld [vmem:[#allocation15_spill] sm:$0xff] }
0x2485   : > { %19952 = vmatpush3.bf16.msra.mxu0 %v22319_v7  ;;  %v24080_v7 = vld [vmem:[#allocation11_spill] sm:$0xff] }
0x2486   : > { %19953 = vmatprep.subr.bf16.mxu0 %v24046_v42 }
0x2487   : > { %19847 = vmatpush3.bf16.msra.mxu1 %v22279_v30  ;;  %v24077_v30 = vld [vmem:[#allocation9_spill] sm:$0xff] }
0x2488   : > { %19848 = vmatprep.subr.bf16.mxu1 %v24046_v42 }
0x2489   : > { %19955 = vmatpush3.bf16.msra.mxu0 %v22333_v1  ;;  %v24082_v1 = vld [vmem:[#allocation13_spill] sm:$0xff] }
0x248a   : > { %18505 = vmatmul.mubr.msk.f32.vlgmr.msra.gmra.mrb[86].mxu1 %vm674_vm4, %v23676_v38  ;;  %19956 = vmatprep.subr.bf16.mxu0 %v24046_v42 }
0x248b   : > { %19850 = vmatpush3.bf16.msra.mxu1 %v22345_v47  ;;  %18523 = vmatprep.mubr.msk.f32.mxu1 %vm20352_vm0, %v24047_v48 }
0x248c   : > { %18676 = vmatmul.mubr.msk.f32.vlgmr.msra.gmra.mrb[102].mxu0 %vm674_vm4, %v23683_v57  ;;  %19851 = vmatprep.subr.bf16.mxu1 %v24046_v42 }
0x248d   : > { %19958 = vmatpush3.bf16.msra.mxu0 %v22345_v47  ;;  %18694 = vmatprep.mubr.msk.f32.mxu0 %vm20352_vm0, %v24047_v48  ;;  %v24083_v47 = vld [vmem:[#allocation16_spill] sm:$0xff] }
0x248e   : > { %19959 = vmatprep.subr.bf16.mxu0 %v24046_v42 }
0x248f   : > { %19853 = vmatpush3.bf16.msra.mxu1 %v22357_v24 }
0x2490   : > { %19854 = vmatprep.subr.bf16.mxu1 %v24046_v42 }
0x2491   : > { %19961 = vmatpush3.bf16.msra.mxu0 %v22357_v24 }
0x2492   : > { %19962 = vmatprep.subr.bf16.mxu0 %v24046_v42 }
0x2493   : > { %19856 = vmatpush3.bf16.msra.mxu1 %v22369_v41 }
0x2494   : > { %19857 = vmatprep.subr.bf16.mxu1 %v24046_v42 }
0x2495   : > { %19964 = vmatpush3.bf16.msra.mxu0 %v22369_v41 }
0x2496   : > { %19965 = vmatprep.subr.bf16.mxu0 %v24046_v42 }
0x2497   : > { %19859 = vmatpush3.bf16.msra.mxu1 %v22379_v51 }
0x2498   : > { %19860 = vmatprep.subr.bf16.mxu1 %v24046_v42 }
0x2499   : > { %19967 = vmatpush3.bf16.msra.mxu0 %v22379_v51 }
0x249a   : > { %18524 = vmatmul.mubr.msk.f32.vlgmr.msra.gmra.mrb[86].mxu1 %vm674_vm4, %v23676_v38  ;;  %19968 = vmatprep.subr.bf16.mxu0 %v24046_v42 }
0x249b   : > { %19862 = vmatpush3.bf16.msra.mxu1 %v22547_v22  ;;  %18542 = vmatprep.mubr.msk.f32.mxu1 %vm20352_vm0, %v24047_v48 }
0x249c   : > { %18695 = vmatmul.mubr.msk.f32.vlgmr.msra.gmra.mrb[104].mxu0 %vm674_vm4, %v23683_v57  ;;  %19863 = vmatprep.subr.bf16.mxu1 %v24046_v42 }
0x249d   : > { %19970 = vmatpush3.bf16.msra.mxu0 %v22547_v22  ;;  %18713 = vmatprep.mubr.msk.f32.mxu0 %vm20352_vm0, %v24047_v48 }
0x249e   : > { %19971 = vmatprep.subr.bf16.mxu0 %v24046_v42 }
0x249f   : > { %19865 = vmatpush3.bf16.msra.mxu1 %v22559_v2 }
0x24a0   : > { %19866 = vmatprep.subr.bf16.mxu1 %v24046_v42 }
0x24a1   : > { %19973 = vmatpush3.bf16.msra.mxu0 %v22559_v2 }
0x24a2   : > { %19974 = vmatprep.subr.bf16.mxu0 %v24046_v42 }
0x24a3   : > { %19868 = vmatpush3.bf16.msra.mxu1 %v22571_v26 }
0x24a4   : > { %19869 = vmatprep.subr.bf16.mxu1 %v24046_v42 }
0x24a5   : > { %19976 = vmatpush3.bf16.msra.mxu0 %v22571_v26 }
0x24a6   : > { %19977 = vmatprep.subr.bf16.mxu0 %v24046_v42 }
0x24a7   : > { %19871 = vmatpush3.bf16.msra.mxu1 %v22581_v21 }
0x24a8   : > { %19872 = vmatprep.subr.bf16.mxu1 %v24046_v42 }
0x24a9   : > { %19979 = vmatpush3.bf16.msra.mxu0 %v22581_v21 }
0x24aa   : > { %18543 = vmatmul.mubr.msk.f32.vlgmr.msra.gmra.mrb[86].mxu1 %vm674_vm4, %v23676_v38  ;;  %19980 = vmatprep.subr.bf16.mxu0 %v24046_v42 }
0x24ab   : > { %19874 = vmatpush3.bf16.msra.mxu1 %v22389_v18  ;;  %18561 = vmatprep.mubr.msk.f32.mxu1 %vm20352_vm0, %v24047_v48 }
0x24ac   : > { %18714 = vmatmul.mubr.msk.f32.vlgmr.msra.gmra.mrb[106].mxu0 %vm674_vm4, %v23683_v57  ;;  %19875 = vmatprep.subr.bf16.mxu1 %v24046_v42 }
0x24ad   : > { %19982 = vmatpush3.bf16.msra.mxu0 %v22433_v16  ;;  %18732 = vmatprep.mubr.msk.f32.mxu0 %vm20352_vm0, %v24047_v48 }
0x24ae   : > { %19983 = vmatprep.subr.bf16.mxu0 %v24046_v42 }
0x24af   : > { %19877 = vmatpush3.bf16.msra.mxu1 %v22401_v8 }
0x24b0   : > { %19878 = vmatprep.subr.bf16.mxu1 %v24046_v42 }
0x24b1   : > { %19985 = vmatpush3.bf16.msra.mxu0 %v22445_v61 }
0x24b2   : > { %19986 = vmatprep.subr.bf16.mxu0 %v24046_v42 }
0x24b3   : > { %19880 = vmatpush3.bf16.msra.mxu1 %v24074_v11 }
0x24b4   : > { %19881 = vmatprep.subr.bf16.mxu1 %v24046_v42 }
0x24b5   : > { %19988 = vmatpush3.bf16.msra.mxu0 %v22457_v52 }
0x24b6   : > { %19989 = vmatprep.subr.bf16.mxu0 %v24046_v42 }
0x24b7   : > { %19883 = vmatpush3.bf16.msra.mxu1 %v24075_v23 }
0x24b8   : > { %19884 = vmatprep.subr.bf16.mxu1 %v24046_v42 }
0x24b9   : > { %19991 = vmatpush3.bf16.msra.mxu0 %v22467_v59 }
0x24ba   : > { %18562 = vmatmul.mubr.msk.f32.vlgmr.msra.gmra.mrb[86].mxu1 %vm674_vm4, %v23676_v38  ;;  %19992 = vmatprep.subr.bf16.mxu0 %v24046_v42 }
0x24bb   : > { %19886 = vmatpush3.bf16.msra.mxu1 %v22433_v16  ;;  %18580 = vmatprep.mubr.msk.f32.mxu1 %vm20352_vm0, %v24047_v48 }
0x24bc   : > { %18733 = vmatmul.mubr.msk.f32.vlgmr.msra.gmra.mrb[108].mxu0 %vm674_vm4, %v23683_v57  ;;  %19887 = vmatprep.subr.bf16.mxu1 %v24046_v42 }
0x24bd   : > { %19994 = vmatpush3.bf16.msra.mxu0 %v24076_v34  ;;  %18751 = vmatprep.mubr.msk.f32.mxu0 %vm20352_vm0, %v24047_v48 }
0x24be   : > { %19995 = vmatprep.subr.bf16.mxu0 %v24046_v42 }
0x24bf   : > { %19889 = vmatpush3.bf16.msra.mxu1 %v22445_v61 }
0x24c0   : > { %19890 = vmatprep.subr.bf16.mxu1 %v24046_v42 }
0x24c1   : > { %19997 = vmatpush3.bf16.msra.mxu0 %v24077_v30 }
0x24c2   : > { %19998 = vmatprep.subr.bf16.mxu0 %v24046_v42 }
0x24c3   : > { %19892 = vmatpush3.bf16.msra.mxu1 %v22457_v52 }
0x24c4   : > { %19893 = vmatprep.subr.bf16.mxu1 %v24046_v42 }
0x24c5   : > { %20000 = vmatpush3.bf16.msra.mxu0 %v24078_v36 }
0x24c6   : > { %20001 = vmatprep.subr.bf16.mxu0 %v24046_v42 }
0x24c7   : > { %19895 = vmatpush3.bf16.msra.mxu1 %v22467_v59 }
0x24c8   : > { %19896 = vmatprep.subr.bf16.mxu1 %v24046_v42 }
0x24c9   : > { %20003 = vmatpush3.bf16.msra.mxu0 %v24079_v14 }
0x24ca   : > { %18581 = vmatmul.mubr.msk.f32.vlgmr.msra.gmra.mrb[86].mxu1 %vm674_vm4, %v23676_v38  ;;  %20004 = vmatprep.subr.bf16.mxu0 %v24046_v42 }
0x24cb   : > { %19898 = vmatpush3.bf16.msra.mxu1 %v24076_v34  ;;  %18599 = vmatprep.mubr.msk.f32.mxu1 %vm20352_vm0, %v24047_v48 }
0x24cc   : > { %18752 = vmatmul.mubr.msk.f32.vlgmr.msra.gmra.mrb[110].mxu0 %vm674_vm4, %v23683_v57  ;;  %19899 = vmatprep.subr.bf16.mxu1 %v24046_v42 }
0x24cd   : > { %20006 = vmatpush3.bf16.msra.mxu0 %v24080_v7  ;;  %18770 = vmatprep.mubr.msk.f32.mxu0 %vm20352_vm0, %v24047_v48 }
0x24ce   : > { %20007 = vmatprep.subr.bf16.mxu0 %v24046_v42 }
0x24cf   : > { %19901 = vmatpush3.bf16.msra.mxu1 %v24077_v30 }
0x24d0   : > { %19902 = vmatprep.subr.bf16.mxu1 %v24046_v42 }
0x24d1   : > { %20009 = vmatpush3.bf16.msra.mxu0 %v24081_v49 }
0x24d2   : > { %20010 = vmatprep.subr.bf16.mxu0 %v24046_v42 }
0x24d3   : > { %19904 = vmatpush3.bf16.msra.mxu1 %v24078_v36 }
0x24d4   : > { %19905 = vmatprep.subr.bf16.mxu1 %v24046_v42 }
0x24d5   : > { %20012 = vmatpush3.bf16.msra.mxu0 %v24082_v1 }
0x24d6   : > { %20013 = vmatprep.subr.bf16.mxu0 %v24046_v42 }
0x24d7   : > { %19907 = vmatpush3.bf16.msra.mxu1 %v24079_v14 }
0x24d8   : > { %19908 = vmatprep.subr.bf16.mxu1 %v24046_v42 }
0x24d9   : > { %20015 = vmatpush3.bf16.msra.mxu0 %v24083_v47 }
0x24da   : > { %18600 = vmatmul.mubr.msk.f32.vlgmr.msra.gmra.mrb[86].mxu1 %vm674_vm4, %v23676_v38  ;;  %20016 = vmatprep.subr.bf16.mxu0 %v24046_v42 }
0x24db   : > { %19910 = vmatpush3.bf16.msra.mxu1 %v24080_v7  ;;  %18618 = vmatprep.mubr.msk.f32.mxu1 %vm20352_vm0, %v24047_v48 }
0x24dc   : > { %18771 = vmatmul.mubr.msk.f32.vlgmr.msra.gmra.mrb[112].mxu0 %vm674_vm4, %v23683_v57  ;;  %19911 = vmatprep.subr.bf16.mxu1 %v24046_v42 }
0x24dd   : > { %20018 = vmatpush3.bf16.msra.mxu0 %v22677_v10  ;;  %18789 = vmatprep.mubr.msk.f32.mxu0 %vm20352_vm0, %v24047_v48 }
0x24de   : > { %20019 = vmatprep.subr.bf16.mxu0 %v24046_v42 }
0x24df   : > { %19913 = vmatpush3.bf16.msra.mxu1 %v24081_v49 }
0x24e0   : > { %19914 = vmatprep.subr.bf16.mxu1 %v24046_v42 }
0x24e1   : > { %20021 = vmatpush3.bf16.msra.mxu0 %v22687_v55 }
0x24e2   : > { %20022 = vmatprep.subr.bf16.mxu0 %v24046_v42 }
0x24e3   : > { %19916 = vmatpush3.bf16.msra.mxu1 %v24082_v1 }
0x24e4   : > { %19917 = vmatprep.subr.bf16.mxu1 %v24046_v42 }
0x24e5   : > { %20024 = vmatpush3.bf16.msra.mxu0 %v22699_v27 }
0x24e6   : > { %20025 = vmatprep.subr.bf16.mxu0 %v24046_v42 }
0x24e7   : > { %19919 = vmatpush3.bf16.msra.mxu1 %v24083_v47 }
0x24e8   : > { %19920 = vmatprep.subr.bf16.mxu1 %v24046_v42 }
0x24e9   : > { %20027 = vmatpush3.bf16.msra.mxu0 %v22709_v15 }
0x24ea   : > { %18619 = vmatmul.mubr.msk.f32.vlgmr.msra.gmra.mrb[86].mxu1 %vm674_vm4, %v23676_v38 }
0x24eb   : > { %19922 = vmatpush3.bf16.msra.mxu1 %v22677_v10  ;;  %18637 = vmatprep.mubr.msk.f32.mxu1 %vm20352_vm0, %v24047_v48 }
0x24ec   : > { %18790 = vmatmul.mubr.msk.f32.vlgmr.msra.gmra.mrb[114].mxu0 %vm674_vm4, %v23683_v57  ;;  %19923 = vmatprep.subr.bf16.mxu1 %v24046_v42 }
0x24ef   : > { %19925 = vmatpush3.bf16.msra.mxu1 %v22687_v55 }
0x24f0   : > { %19926 = vmatprep.subr.bf16.mxu1 %v24046_v42 }
0x24f3   : > { %19928 = vmatpush3.bf16.msra.mxu1 %v22699_v27 }
0x24f4   : > { %19929 = vmatprep.subr.bf16.mxu1 %v24046_v42 }
0x24f7   : > { %19931 = vmatpush3.bf16.msra.mxu1 %v22709_v15 }
0x24fa   : > { %18638 = vmatmul.mubr.msk.f32.vlgmr.msra.gmra.mrb[86].mxu1 %vm674_vm4, %v23676_v38 }
0x254f   : > { %v13966_v48 = vpop.f32.mrb[100].mxu0 }
0x2550   : > { %v18658_v24 = vpop.f32.mrb[101].mxu0  ;;  %v13970_v41 = vsel %vm21567_vm6, %v13966_v48, -1e+30 }
0x2551   : > { %v13971_v51 = vmax.f32 %v23683_v57, %v13970_v41 }
0x255f   : > { %v14038_v18 = vpop.f32.mrb[102].mxu0 }
0x2560   : > { %v14042_v8 = vsel %vm6166_vm7, %v14038_v18, -1e+30  ;;  %v18677_v16 = vpop.f32.mrb[103].mxu0 }
0x2561   : > { %v14043_v42 = vmax.f32 %v13971_v51, %v14042_v8 }
0x2562   : > { %20268 = shalt.err (!%p20265_p3)
}
0x2563   : > { %s20269_s22 = scalar_lea.hbm %s23884_s12, 256  ;;  %s20273_s19 = scalar_lea.hbm %s23997_s8, 512 }
0x2564   : > { %p20270_p4 = scmp.ne.s32.totalorder %s23884_s12, %s20269_s22  ;;  %p20274_p9 = scmp.lt.u32.totalorder %s23884_s12, %s23997_s8 }
0x2565   : > { %p20275_p10 = scmp.lt.u32.totalorder %s20273_s19, %s20269_s22  ;;  %p20277_p12 = scmp.lt.u32.totalorder %s20269_s22, %s23884_s12 }
0x2566   : > { %p20271_p7 = pnand %p20270_p4, %p20443_p5 }
0x2567   : > { %p20276_p11 = por %p20275_p10, %p20274_p9 }
0x2568   : > { %p20272_p8 = pneg %p20271_p7 }
0x2569   : > { %p20278_p13 = por %p20277_p12, %p20276_p11 }
0x256b   : > { %p20279_p0 = pnand %p20278_p13, %p20272_p8 }
0x256d   : > { %20282 = shalt.err (!%p20279_p0)
}
0x256e   : > { %s20357_s18 = smov 128   ;;  %s20358_s24 = smov 8   ;;  %v13249_v0 = vmul.f32 0.2, %v23526_v9  ;;  %v24084_v13 = vld [vmem:[#allocation19_spill] sm:$0xff] }
0x256f   : > { %20189 = dma.vmem_to_hbm [thread:$0]  (%p20443_p5), %s23887_s13, 256, %s23884_s12, %s14495_s17, %s20357_s18, %s20357_s18, %s20358_s24   ;;  %v14110_v6 = vpop.f32.mrb[104].mxu0  ;;  %v9277_v45 = vmul.f32 0.11111111, %v24084_v13 }
0x2570   : > { %v14114_v54 = vsel %vm6173_vm8, %v14110_v6, -1e+30  ;;  %v18696_v61 = vpop.f32.mrb[105].mxu0  ;;  %v13250_v56 = vmax.f32 %v23526_v9, %v13249_v0  ;;  %s14508_s21 = sshll.u32 %s23705_s25, 4  ;;  %s24085_s12 = sshll.u32 %s20426_s9, 8  ;;  %s23941_s21 = int_to_ptr.vmem [resolvable:$true] %s14508_s21 }
0x2571   : > { %v14115_v52 = vmax.f32 %v14043_v42, %v14114_v54  ;;  %v9278_v20 = vmul.f32 0.2, %v9277_v45  ;;  %s23939_s22 = scalar_lea.hbm %s23996_s7, %s24085_s12  ;;  %s14490_s26 = scalar_lea.sflag [#allocation4], %s22000_s20 }
0x2572   : > { %s20283_s10 = scalar_lea.vmem %s23941_s21, 256  ;;  %s20359_s9 = smov [#allocation3]  }
0x2573   : > { %v9279_v35 = vmax.f32 %v9277_v45, %v9278_v20  ;;  %p20284_p1 = scmp.ne.s32.totalorder %s23941_s21, %s20283_s10  ;;  %s20287_s19 = sshll.u32 %s20359_s9, 4  ;;  %s20288_s19 = int_to_ptr.vmem [resolvable:$false] %s20287_s19 }
0x2574   : > { %s20289_s23 = scalar_lea.vmem %s20288_s19, 512  ;;  %p20290_p4 = scmp.lt.s32.totalorder %s23941_s21, %s20288_s19 }
0x2575   : > { %p20285_p2 = pnand %p20284_p1, %p20443_p5  ;;  %p20291_p7 = scmp.lt.s32.totalorder %s20289_s23, %s20283_s10 }
0x2577   : > { %p20286_p3 = pneg %p20285_p2  ;;  %p20292_p8 = por %p20291_p7, %p20290_p4 }
0x2579   : > { %p20293_p9 = pnand %p20292_p8, %p20286_p3 }
0x257f   : > { %v14182_v59 = vpop.f32.mrb[106].mxu0 }
0x2580   : > { %v14186_v22 = vsel %vm6180_vm9, %v14182_v59, -1e+30  ;;  %v18715_v2 = vpop.f32.mrb[107].mxu0 }
0x2581   : > { %v14187_v26 = vmax.f32 %v14115_v52, %v14186_v22 }
0x258f   : > { %v14254_v21 = vpop.f32.mrb[108].mxu0 }
0x2590   : > { %v14258_v10 = vsel %vm6187_vm10, %v14254_v21, -1e+30  ;;  %v18734_v55 = vpop.f32.mrb[109].mxu0 }
0x2591   : > { %v14259_v27 = vmax.f32 %v14187_v26, %v14258_v10 }
0x259f   : > { %v14326_v15 = vpop.f32.mrb[110].mxu0 }
0x25a0   : > { %v14330_v31 = vsel %vm6194_vm11, %v14326_v15, -1e+30  ;;  %v18753_v53 = vpop.f32.mrb[111].mxu0 }
0x25a1   : > { %v14331_v40 = vmax.f32 %v14259_v27, %v14330_v31 }
0x25af   : > { %v14398_v29 = vpop.f32.mrb[112].mxu0 }
0x25b0   : > { %v14402_v37 = vsel %vm6201_vm12, %v14398_v29, -1e+30  ;;  %v18772_v4 = vpop.f32.mrb[113].mxu0 }
0x25b1   : > { %v14403_v3 = vmax.f32 %v14331_v40, %v14402_v37 }
0x25bf   : > { %v14470_v39 = vpop.f32.mrb[114].mxu0 }
0x25c0   : > { %v14474_v58 = vsel %vm21825_vm14, %v14470_v39, -1e+30  ;;  %v18791_v33 = vpop.f32.mrb[115].mxu0 }
0x25c1   : > { %v14475_v62 = vmax.f32 %v14403_v3, %v14474_v58 }
0x25c3   : > { %v14476_v43 = vmul.f32 0.2, %v14475_v62 }
0x25c5   : > { %v14477_v28 = vmax.f32 %v14475_v62, %v14476_v43 }
0x25c7   : > { %v14478_v32 = vadd.f32 %v14477_v28, %v13250_v56 }
0x25c9   : > { %14481 = vst.msk [vmem:[#allocation2 + $0x8] sm:$0xf] %vm7443_vm15, %v14478_v32 }
0x25cd   : > { %v13888_v17 = vpop.f32.mrb[86].mxu1 }
0x25ce   : > { %v13893_v5 = vmul.f32 0.11111111, %v13888_v17  ;;  %v18639_v12 = vpop.f32.mrb[87].mxu1 }
0x25d0   : > { %v13894_v63 = vmul.f32 0.2, %v13893_v5 }
0x25d2   : > { %v13895_v60 = vmax.f32 %v13893_v5, %v13894_v63 }
0x25d4   : > { %v13896_v19 = vadd.f32 %v13895_v60, %v9279_v35 }
0x25d6   : > { %14482 = vst.msk [vmem:[#allocation2 + $0xc] sm:$0xf] %vm7443_vm15, %v13896_v19 }
0x25dd   : > { %v14484_v9 = vld [vmem:[#allocation2 + $0x8] sm:$0xff] }
0x25de   : > { %14486 = vst.msk [vmem:[%s23705_s25 + $0x8] sm:$0xff] %vm674_vm4, %v14484_v9 }
0x25df   : > { %20296 = shalt.err (!%p20293_p9)
}
0x25e0   : > { %s20297_s25 = scalar_lea.hbm %s23939_s22, 256  ;;  %s20301_s17 = scalar_lea.hbm %s23996_s7, 512 }
0x25e1   : > { %p20298_p10 = scmp.ne.s32.totalorder %s23939_s22, %s20297_s25  ;;  %p20302_p13 = scmp.lt.u32.totalorder %s23939_s22, %s23996_s7 }
0x25e2   : > { %p20303_p0 = scmp.lt.u32.totalorder %s20301_s17, %s20297_s25  ;;  %p20305_p2 = scmp.lt.u32.totalorder %s20297_s25, %s23939_s22 }
0x25e3   : > { %p20299_p11 = pnand %p20298_p10, %p20443_p5 }
0x25e4   : > { %p20304_p1 = por %p20303_p0, %p20302_p13 }
0x25e5   : > { %p20300_p12 = pneg %p20299_p11 }
0x25e6   : > { %p20306_p3 = por %p20305_p2, %p20304_p1 }
0x25e8   : > { %p20307_p4 = pnand %p20306_p3, %p20300_p12 }
0x25ea   : > { %20310 = shalt.err (!%p20307_p4)
}
0x25eb   : > { %20188 = dma.vmem_to_hbm [thread:$0]  (%p20443_p5), %s23941_s21, 256, %s23939_s22, %s14490_s26, %s20357_s18, %s20357_s18, %s20358_s24  }
0x25ec PF: > { %p20199_p7 = scmp.ge.s32.totalorder %s20349_s30, 2  ;;  %s14539_s10 = sand.u32 1, %s20337_s27  }
0x25ed   : > { %s14540_s23 = scalar_lea.sflag [#allocation4], %s14539_s10 }
0x25ee   : > { %p20193_p8 = pnand %p20199_p7, %p20447_p6 }
0x25f0   : > { %20328 = dma.done.wait (!%p20193_p8), %s14540_s23, 256  }
0x25f1   : > { %20330 = vsyncadd (!%p20193_p8), %s14540_s23, 4294967040  ;;  %s14549_s15 = scalar_lea.sflag [#allocation6], %s14539_s10 }
0x25f2   : > { %20332 = dma.done.wait (!%p20193_p8), %s14549_s15, 256  }
0x25f3   : > { %20334 = vsyncadd (!%p20193_p8), %s14549_s15, 4294967040  ;;  %p22_p5 = scmp.ge.s32.totalorder %s20430_s11, 4   ;;  %s24086_s27 = smov %s20341_s28 }
0x25f4   : > { %s24087_s28 = smov %s20345_s29  ;;  %s24088_s29 = smov %s20441_s14 }
0x25f5   : > { %s24089_s30 = smov %s20430_s11  ;;  %24 = sbr.rel (!%p22_p5) target bundleno = 5 (0x5), region = 197 }
0x25fc   :  { %14554 = vsyncpa [#allocation4], 1 }
0x25fd   :  { %14556 = vsyncpa [#allocation4 + $0x1], 1 }
0x25fe   :  { %14557 = vsyncpa [#allocation6], 1 }
0x25ff   :  { %14559 = vsyncpa [#allocation6 + $0x1], 1 }

</bundles_post_ra>
